<compile_context>
chip_gen: v6e
topology: v6e:2x2x1
jax: 0.10.0
libtpu: 0.0.40
codegen_flags: <defaults>
</compile_context>

<pallas_src>
import functools
import math

import jax
import jax.numpy as jnp
from jax import lax
from jax.experimental import pallas as pl
from jax.experimental.pallas import tpu as pltpu


# ----------------------------------------------------------------------------
# Planning: chunk size / padding / unroll / VMEM limit.
# ----------------------------------------------------------------------------
def _plan(T, B, d_worst, H, stream_dtype,
          budget_bytes=24 * 1024 * 1024, max_chunk=256):
    sb = jnp.dtype(stream_dtype).itemsize
    # Bytes that scale with the chunk length Tc (streamed blocks double-buffered
    # by the BlockSpec pipeline, gx scratch single-buffered f32).
    per_t = B * (2 * d_worst * sb * 2          # fwd+bwd input chunks
                 + 2 * H * sb * 2              # fwd+bwd output chunks
                 + 2 * 4 * H * 4)              # gx scratch (f32)
    fixed = ((2 * d_worst * 4 * H + 2 * H * 4 * H) * sb * 2   # W_ih, W_hh
             + 8 * 4 * H * 4                                  # biases
             + 6 * B * H * 4 * 4)                             # h/c scratch, hn/cn
    tc = (budget_bytes - fixed) // max(per_t, 1)
    tc = max(1, min(int(tc), max_chunk, T))
    # (8,128) constraint: Tc*B (second-minor dim of streamed blocks) must be a
    # multiple of 8 -> round Tc up to a multiple of 8/gcd(B,8).
    m = 8 // math.gcd(B, 8)
    tc = ((tc + m - 1) // m) * m
    nc = -(-T // tc)                      # ceil
    t_pad = nc * tc
    unroll = next(u for u in (8, 4, 2, 1) if tc % u == 0)
    footprint = per_t * tc + fixed
    # Default scoped VMEM (16/32 MiB) is too small for large chunks; stay well
    # under v7x's 64 MiB physical VMEM.
    vmem_limit = int(min(max(2 * footprint, 24 * 1024 * 1024), 56 * 1024 * 1024))
    return tc, t_pad, unroll, vmem_limit


# ----------------------------------------------------------------------------
# Fused bidirectional LSTM layer kernel.
# ----------------------------------------------------------------------------
def _bidir_lstm_kernel(*refs, n_parts, tc, B, H, t_true, t_pad, unroll):
    """One T-chunk of a bidirectional LSTM layer.

    Ref layout (inputs, outputs, scratch):
      xf_parts[n], xb_parts[n]        (tc*B, D_p)  streamed input chunks
                                       (fwd chunk i, bwd chunk nc-1-i)
      wf_parts[n], wb_parts[n]        (D_p, 4H)    input-projection weights
      bias_f, bias_b                  (1, 4H)      f32 (b_ih + b_hh)
      whh_f, whh_b                    (H, 4H)      recurrent weights
      of, ob                          (tc*B, H)    per-direction outputs
      hn, cn                          (2, B, H)    final states (last step only)
      gxf_sc, gxb_sc                  (tc*B, 4H)   f32 gate scratch
      hf_sc, cf_sc, hb_sc, cb_sc      (B, H)       f32 carried state
    Gate order matches PyTorch: [i, f, g, o].
    """
    n = n_parts
    G = 4 * H
    xf = refs[0:n]
    xb = refs[n:2 * n]
    wf = refs[2 * n:3 * n]
    wb = refs[3 * n:4 * n]
    bias_f_ref, bias_b_ref, whf_ref, whb_ref = refs[4 * n:4 * n + 4]
    of_ref, ob_ref, hn_ref, cn_ref = refs[4 * n + 4:4 * n + 8]
    gxf_sc, gxb_sc, hf_sc, cf_sc, hb_sc, cb_sc = refs[4 * n + 8:4 * n + 14]

    chunk = pl.program_id(0)

    @pl.when(chunk == 0)
    def _init():
        z = jnp.zeros((B, H), jnp.float32)
        hf_sc[...] = z
        cf_sc[...] = z
        hb_sc[...] = z
        cb_sc[...] = z

    # ---- Chunk-level input projection: big-M matmul per direction (MXU). ----
    gf = bias_f_ref[...]                     # (1, G) f32, broadcasts
    for p in range(n):
        gf = gf + jnp.dot(xf[p][...], wf[p][...],
                          preferred_element_type=jnp.float32)
    gxf_sc[...] = gf
    gb = bias_b_ref[...]
    for p in range(n):
        gb = gb + jnp.dot(xb[p][...], wb[p][...],
                          preferred_element_type=jnp.float32)
    gxb_sc[...] = gb

    # Hoisted recurrent weights (loaded once per chunk, not per time step).
    whf = whf_ref[...]
    whb = whb_ref[...]
    wdt = whf.dtype

    # Whole-vreg activation select: tanh on the 'g' slab, sigmoid elsewhere.
    lane = lax.broadcasted_iota(jnp.int32, (B, G), 1)
    g_slab = (lane >= 2 * H) & (lane < 3 * H)

    def cell(gates, c_prev):
        act = jnp.where(g_slab, jnp.tanh(gates), jax.nn.sigmoid(gates))
        i_t = act[:, 0:H]
        f_t = act[:, H:2 * H]
        g_t = act[:, 2 * H:3 * H]
        o_t = act[:, 3 * H:4 * H]
        c_new = f_t * c_prev + i_t * g_t
        h_new = o_t * jnp.tanh(c_new)
        return h_new, c_new

    pad = t_pad - t_true   # number of zero-padded trailing time steps (static)

    def step(t, carry):
        hf, cf, hb, cb = carry
        rowf = t * B                    # local fwd time index t
        rowb = (tc - 1 - t) * B         # local bwd time index tc-1-t
        gate_f = gxf_sc[pl.ds(rowf, B), :] + jnp.dot(
            hf.astype(wdt), whf, preferred_element_type=jnp.float32)
        gate_b = gxb_sc[pl.ds(rowb, B), :] + jnp.dot(
            hb.astype(wdt), whb, preferred_element_type=jnp.float32)
        hf_n, cf_n = cell(gate_f, cf)
        hb_n, cb_n = cell(gate_b, cb)
        if pad:
            # Branch-free masking of padded time steps (keeps state frozen).
            gidx = chunk * tc + t
            mf = (gidx < t_true).astype(jnp.float32)        # fwd valid
            mb = (gidx >= pad).astype(jnp.float32)          # bwd valid
            hf_n = mf * hf_n + (1.0 - mf) * hf
            cf_n = mf * cf_n + (1.0 - mf) * cf
            hb_n = mb * hb_n + (1.0 - mb) * hb
            cb_n = mb * cb_n + (1.0 - mb) * cb
        of_ref[pl.ds(rowf, B), :] = hf_n.astype(of_ref.dtype)
        ob_ref[pl.ds(rowb, B), :] = hb_n.astype(ob_ref.dtype)
        return hf_n, cf_n, hb_n, cb_n

    carry0 = (hf_sc[...], cf_sc[...], hb_sc[...], cb_sc[...])
    hf, cf, hb, cb = lax.fori_loop(0, tc, step, carry0, unroll=unroll)

    # Persist state across grid steps (single store per chunk).
    hf_sc[...] = hf
    cf_sc[...] = cf
    hb_sc[...] = hb
    cb_sc[...] = cb

    # hn/cn blocks use a constant index_map + "arbitrary" semantics, so they are
    # VMEM-resident; only the last grid step's content reaches HBM.
    @pl.when(chunk == pl.num_programs(0) - 1)
    def _finalize():
        hn_ref[0] = hf
        hn_ref[1] = hb
        cn_ref[0] = cf
        cn_ref[1] = cb


def _bidir_layer(parts, wf_parts, wb_parts, bias_f, bias_b, whh_f, whh_b,
                 *, t_true, t_pad, tc, B, H, unroll, vmem_limit):
    """parts: tuple of (t_pad*B, D_p) flattened time-major inputs."""
    n_parts = len(parts)
    nc = t_pad // tc
    G = 4 * H
    stream_dtype = parts[0].dtype

    kernel = functools.partial(
        _bidir_lstm_kernel, n_parts=n_parts, tc=tc, B=B, H=H,
        t_true=t_true, t_pad=t_pad, unroll=unroll)

    in_specs = []
    for p in parts:                                           # fwd chunks
        in_specs.append(pl.BlockSpec((tc * B, p.shape[1]), lambda i: (i, 0)))
    for p in parts:                                           # bwd chunks
        in_specs.append(pl.BlockSpec((tc * B, p.shape[1]),
                                     lambda i: (nc - 1 - i, 0)))
    for w in (*wf_parts, *wb_parts):                          # W_ih slices
        in_specs.append(pl.BlockSpec(w.shape, lambda i: (0, 0)))
    in_specs.append(pl.BlockSpec(bias_f.shape, lambda i: (0, 0)))
    in_specs.append(pl.BlockSpec(bias_b.shape, lambda i: (0, 0)))
    in_specs.append(pl.BlockSpec(whh_f.shape, lambda i: (0, 0)))
    in_specs.append(pl.BlockSpec(whh_b.shape, lambda i: (0, 0)))

    out_specs = (
        pl.BlockSpec((tc * B, H), lambda i: (i, 0)),              # out fwd
        pl.BlockSpec((tc * B, H), lambda i: (nc - 1 - i, 0)),     # out bwd
        pl.BlockSpec((2, B, H), lambda i: (0, 0, 0)),             # h_n
        pl.BlockSpec((2, B, H), lambda i: (0, 0, 0)),             # c_n
    )
    out_shape = (
        jax.ShapeDtypeStruct((t_pad * B, H), stream_dtype),
        jax.ShapeDtypeStruct((t_pad * B, H), stream_dtype),
        jax.ShapeDtypeStruct((2, B, H), jnp.float32),
        jax.ShapeDtypeStruct((2, B, H), jnp.float32),
    )
    scratch_shapes = [
        pltpu.VMEM((tc * B, G), jnp.float32),   # gx fwd
        pltpu.VMEM((tc * B, G), jnp.float32),   # gx bwd
        pltpu.VMEM((B, H), jnp.float32),        # h fwd
        pltpu.VMEM((B, H), jnp.float32),        # c fwd
        pltpu.VMEM((B, H), jnp.float32),        # h bwd
        pltpu.VMEM((B, H), jnp.float32),        # c bwd
    ]

    grid_spec = pltpu.PrefetchScalarGridSpec(
        num_scalar_prefetch=0, grid=(nc,),
        in_specs=in_specs, out_specs=out_specs,
        scratch_shapes=scratch_shapes)

    return pl.pallas_call(
        kernel,
        out_shape=out_shape,
        grid_spec=grid_spec,
        compiler_params=pltpu.CompilerParams(
            dimension_semantics=("arbitrary",),
            vmem_limit_bytes=vmem_limit),
    )(*parts, *parts, *wf_parts, *wb_parts, bias_f, bias_b, whh_f, whh_b)


# ----------------------------------------------------------------------------
# Parameters & forward pass.
# ----------------------------------------------------------------------------
def init_lstm_params(key, input_size, hidden_size, num_layers=4):
    """PyTorch nn.LSTM raw parameter shapes, deterministically initialized."""
    stdv = 1.0 / (hidden_size ** 0.5)
    params = []
    for layer in range(num_layers):
        d_in = input_size if layer == 0 else 2 * hidden_size
        layer_dirs = []
        for _direction in range(2):
            key, k1, k2, k3, k4 = jax.random.split(key, 5)
            w_ih = jax.random.uniform(k1, (4 * hidden_size, d_in), jnp.float32, -stdv, stdv)
            w_hh = jax.random.uniform(k2, (4 * hidden_size, hidden_size), jnp.float32, -stdv, stdv)
            b_ih = jax.random.uniform(k3, (4 * hidden_size,), jnp.float32, -stdv, stdv)
            b_hh = jax.random.uniform(k4, (4 * hidden_size,), jnp.float32, -stdv, stdv)
            layer_dirs.append((w_ih, w_hh, b_ih, b_hh))
        params.append(layer_dirs)
    return params


def prepare_params(params, stream_dtype=jnp.bfloat16):
    """One-time prep: transpose weights, split W_ih per input part, sum biases."""
    prepared = []
    for layer_idx, layer_dirs in enumerate(params):
        layer_prep = []
        for (w_ih, w_hh, b_ih, b_hh) in layer_dirs:
            H = w_hh.shape[1]
            w_ih_t = jnp.transpose(w_ih).astype(stream_dtype)       # (D_in, 4H)
            if layer_idx == 0:
                w_parts = (w_ih_t,)
            else:                                                    # split fwd/bwd input halves
                w_parts = (w_ih_t[:H], w_ih_t[H:])
            layer_prep.append((
                w_parts,
                jnp.transpose(w_hh).astype(stream_dtype),            # (H, 4H)
                (b_ih + b_hh).reshape(1, -1).astype(jnp.float32),    # (1, 4H)
            ))
        prepared.append(tuple(layer_prep))
    return prepared


def lstm_layer_forward(x, prepared_params, *, stream_dtype=jnp.bfloat16):
    """x: (B, input_size, T) as given to the PyTorch module (which transposes
    dims 1,2 before the LSTM). Returns (output (B,T,2H), (h_n, c_n))."""
    B, d_in, T = x.shape
    H = prepared_params[0][0][1].shape[0]
    d_worst = max(d_in, 2 * H)
    tc, t_pad, unroll, vmem_limit = _plan(T, B, d_worst, H, stream_dtype)

    # Single transpose: module's (B,D,T)->(B,T,D) and time-major (T,B,D) fused;
    # then flatten to (T*B, D) so the kernel's gx matmul is a clean 2-D dot.
    x_tbd = jnp.transpose(x, (2, 0, 1)).astype(stream_dtype)
    if t_pad != T:
        x_tbd = jnp.pad(x_tbd, ((0, t_pad - T), (0, 0), (0, 0)))
    parts = (x_tbd.reshape(t_pad * B, d_in),)

    h_n, c_n = [], []
    for layer_prep in prepared_params:
        (wf_parts, whh_f, bias_f), (wb_parts, whh_b, bias_b) = layer_prep
        out_f, out_b, hn, cn = _bidir_layer(
            parts, wf_parts, wb_parts, bias_f, bias_b, whh_f, whh_b,
            t_true=T, t_pad=t_pad, tc=tc, B=B, H=H,
            unroll=unroll, vmem_limit=vmem_limit)
        h_n.append(hn[0]); h_n.append(hn[1])
        c_n.append(cn[0]); c_n.append(cn[1])
        parts = (out_f, out_b)
        # TODO(synk): nn.LSTM inter-layer dropout (p=0.5) applies only in
        # training mode; inference forward is identity, so it is omitted here.

    out = jnp.concatenate(
        [parts[0].reshape(t_pad, B, H)[:T], parts[1].reshape(t_pad, B, H)[:T]],
        axis=-1)
    out = jnp.transpose(out, (1, 0, 2)).astype(jnp.float32)   # (B, T, 2H)
    h_n = jnp.stack(h_n, axis=0)                              # (num_layers*2, B, H)
    c_n = jnp.stack(c_n, axis=0)
    return out, (h_n, c_n)


# ----------------------------------------------------------------------------
# Pure-JAX reference (operates on raw PyTorch-shaped params) for correctness.
# ----------------------------------------------------------------------------
def _lstm_dir_ref(x_tbd, w_ih, w_hh, b_ih, b_hh):
    _, B, _ = x_tbd.shape
    H = w_hh.shape[1]
    w_ih_t, w_hh_t = w_ih.T, w_hh.T
    bias = (b_ih + b_hh)[None, :]

    def step(carry, x_t):
        h, c = carry
        gates = x_t @ w_ih_t + h @ w_hh_t + bias
        i = jax.nn.sigmoid(gates[:, 0 * H:1 * H])
        f = jax.nn.sigmoid(gates[:, 1 * H:2 * H])
        g = jnp.tanh(gates[:, 2 * H:3 * H])
        o = jax.nn.sigmoid(gates[:, 3 * H:4 * H])
        c = f * c + i * g
        h = o * jnp.tanh(c)
        return (h, c), h

    init = (jnp.zeros((B, H), jnp.float32), jnp.zeros((B, H), jnp.float32))
    (h_T, c_T), h_seq = lax.scan(step, init, x_tbd)
    return h_seq, h_T, c_T


def lstm_layer_forward_ref(x, params):
    layer_in = jnp.transpose(x, (2, 0, 1))
    h_n, c_n = [], []
    for layer_dirs in params:
        dir_outs = []
        for direction, (w_ih, w_hh, b_ih, b_hh) in enumerate(layer_dirs):
            inp = layer_in if direction == 0 else jnp.flip(layer_in, axis=0)
            h_seq, h_T, c_T = _lstm_dir_ref(inp, w_ih, w_hh, b_ih, b_hh)
            if direction == 1:
                h_seq = jnp.flip(h_seq, axis=0)
            dir_outs.append(h_seq)
            h_n.append(h_T)
            c_n.append(c_T)
        layer_in = jnp.concatenate(dir_outs, axis=-1)
    output = jnp.transpose(layer_in, (1, 0, 2))
    return output, (jnp.stack(h_n, axis=0), jnp.stack(c_n, axis=0))


if __name__ == "__main__":
    B, input_size, hidden_size, T, num_layers = 2, 16, 32, 8, 4

    key = jax.random.PRNGKey(0)
    key, kx, kp = jax.random.split(key, 3)
    # Module input is (B, input_size, T); forward transposes to (B, T, input_size).
    x = jax.random.normal(kx, (B, input_size, T), jnp.float32)
    params = init_lstm_params(kp, input_size, hidden_size, num_layers=num_layers)
    ref_out, (ref_h, ref_c) = lstm_layer_forward_ref(x, params)

    # ---- f32-streaming path: strict correctness vs. the reference ----
    prep_f32 = prepare_params(params, stream_dtype=jnp.float32)
    fwd_f32 = jax.jit(functools.partial(lstm_layer_forward, stream_dtype=jnp.float32))
    out32, (h32, c32) = fwd_f32(x, prep_f32)
    jax.block_until_ready((out32, h32, c32))

    assert out32.shape == (B, T, 2 * hidden_size)
    assert h32.shape == (num_layers * 2, B, hidden_size)
    assert c32.shape == (num_layers * 2, B, hidden_size)
    assert jnp.allclose(out32, ref_out, atol=1e-4, rtol=1e-4)
    assert jnp.allclose(h32, ref_h, atol=1e-4, rtol=1e-4)
    assert jnp.allclose(c32, ref_c, atol=1e-4, rtol=1e-4)

    # ---- ragged T (exercises the padded-chunk masking path), still f32 ----
    T2 = 6
    x2 = jax.random.normal(jax.random.PRNGKey(1), (B, input_size, T2), jnp.float32)
    ref2_out, (ref2_h, ref2_c) = lstm_layer_forward_ref(x2, params)
    out2, (h2, c2) = fwd_f32(x2, prep_f32)
    jax.block_until_ready((out2, h2, c2))
    assert out2.shape == (B, T2, 2 * hidden_size)
    assert jnp.allclose(out2, ref2_out, atol=1e-4, rtol=1e-4)
    assert jnp.allclose(h2, ref2_h, atol=1e-4, rtol=1e-4)
    assert jnp.allclose(c2, ref2_c, atol=1e-4, rtol=1e-4)

    # ---- bf16-streaming path (perf mode): loose numerical sanity check ----
    prep_bf16 = prepare_params(params, stream_dtype=jnp.bfloat16)
    fwd_bf16 = jax.jit(functools.partial(lstm_layer_forward, stream_dtype=jnp.bfloat16))
    out16, (h16, c16) = fwd_bf16(x, prep_bf16)
    jax.block_until_ready((out16, h16, c16))
    assert out16.shape == (B, T, 2 * hidden_size)
    assert bool(jnp.all(jnp.isfinite(out16)))
    assert float(jnp.max(jnp.abs(out16 - ref_out))) < 0.2

    print("KERNEL_OK")
</pallas_src>

<mosaic_0001>
module attributes {stable_mosaic.version = 11 : i64} {
  func.func @_bidir_lstm_kernel(%arg0: i32, %arg1: memref<16x32xf32, #tpu.memory_space<vmem>>, %arg2: memref<16x32xf32, #tpu.memory_space<vmem>>, %arg3: memref<16x32xf32, #tpu.memory_space<vmem>>, %arg4: memref<16x32xf32, #tpu.memory_space<vmem>>, %arg5: memref<32x128xf32, #tpu.memory_space<vmem>>, %arg6: memref<32x128xf32, #tpu.memory_space<vmem>>, %arg7: memref<32x128xf32, #tpu.memory_space<vmem>>, %arg8: memref<32x128xf32, #tpu.memory_space<vmem>>, %arg9: memref<1x128xf32, #tpu.memory_space<vmem>>, %arg10: memref<1x128xf32, #tpu.memory_space<vmem>>, %arg11: memref<32x128xf32, #tpu.memory_space<vmem>>, %arg12: memref<32x128xf32, #tpu.memory_space<vmem>>, %arg13: memref<16x32xf32, #tpu.memory_space<vmem>>, %arg14: memref<16x32xf32, #tpu.memory_space<vmem>>, %arg15: memref<2x2x32xf32, #tpu.memory_space<vmem>>, %arg16: memref<2x2x32xf32, #tpu.memory_space<vmem>>, %arg17: memref<16x128xf32, #tpu.memory_space<vmem>>, %arg18: memref<16x128xf32, #tpu.memory_space<vmem>>, %arg19: memref<2x32xf32, #tpu.memory_space<vmem>>, %arg20: memref<2x32xf32, #tpu.memory_space<vmem>>, %arg21: memref<2x32xf32, #tpu.memory_space<vmem>>, %arg22: memref<2x32xf32, #tpu.memory_space<vmem>>) attributes {dimension_semantics = [#tpu.dimension_semantics<arbitrary>], iteration_bounds = array<i64: 1>, scalar_prefetch = 0 : i64, scratch_operands = 6 : i64, tpu.core_type = #tpu.core_type<tc>, window_params = [{transform_indices = @transform_0, window_bounds = array<i64: 16, 32>}, {transform_indices = @transform_1, window_bounds = array<i64: 16, 32>}, {transform_indices = @transform_2, window_bounds = array<i64: 16, 32>}, {transform_indices = @transform_3, window_bounds = array<i64: 16, 32>}, {pipeline_mode = #tpu.pipeline_mode<synchronous>, transform_indices = @transform_4, window_bounds = array<i64: 32, 128>}, {pipeline_mode = #tpu.pipeline_mode<synchronous>, transform_indices = @transform_5, window_bounds = array<i64: 32, 128>}, {pipeline_mode = #tpu.pipeline_mode<synchronous>, transform_indices = @transform_6, window_bounds = array<i64: 32, 128>}, {pipeline_mode = #tpu.pipeline_mode<synchronous>, transform_indices = @transform_7, window_bounds = array<i64: 32, 128>}, {pipeline_mode = #tpu.pipeline_mode<synchronous>, transform_indices = @transform_8, window_bounds = array<i64: 1, 128>}, {pipeline_mode = #tpu.pipeline_mode<synchronous>, transform_indices = @transform_9, window_bounds = array<i64: 1, 128>}, {pipeline_mode = #tpu.pipeline_mode<synchronous>, transform_indices = @transform_10, window_bounds = array<i64: 32, 128>}, {pipeline_mode = #tpu.pipeline_mode<synchronous>, transform_indices = @transform_11, window_bounds = array<i64: 32, 128>}, {transform_indices = @transform_12, window_bounds = array<i64: 16, 32>}, {transform_indices = @transform_13, window_bounds = array<i64: 16, 32>}, {pipeline_mode = #tpu.pipeline_mode<synchronous>, transform_indices = @transform_14, window_bounds = array<i64: 2, 2, 32>}, {pipeline_mode = #tpu.pipeline_mode<synchronous>, transform_indices = @transform_15, window_bounds = array<i64: 2, 2, 32>}]} {
    %c0_i32 = arith.constant 0 : i32
    %0 = arith.cmpi eq, %arg0, %c0_i32 : i32
    %1 = arith.extui %0 : i1 to i32
    %c0_i32_0 = arith.constant 0 : i32
    %2 = arith.cmpi ne, %1, %c0_i32_0 : i32
    scf.if %2 {
      %cst_138 = arith.constant 0.000000e+00 : f32
      %420 = vector.broadcast %cst_138 : f32 to vector<2x32xf32>
      %c0_139 = arith.constant 0 : index
      %c0_140 = arith.constant 0 : index
      %421 = vector.load %arg19[%c0_139, %c0_140] : memref<2x32xf32, #tpu.memory_space<vmem>>, vector<2x32xf32>
      tpu.vector_store %arg19[%c0_139, %c0_140], %420 {strides = array<i32>} : memref<2x32xf32, #tpu.memory_space<vmem>>, vector<2x32xf32>,
      %c0_141 = arith.constant 0 : index
      %c0_142 = arith.constant 0 : index
      %422 = vector.load %arg20[%c0_141, %c0_142] : memref<2x32xf32, #tpu.memory_space<vmem>>, vector<2x32xf32>
      tpu.vector_store %arg20[%c0_141, %c0_142], %420 {strides = array<i32>} : memref<2x32xf32, #tpu.memory_space<vmem>>, vector<2x32xf32>,
      %c0_143 = arith.constant 0 : index
      %c0_144 = arith.constant 0 : index
      %423 = vector.load %arg21[%c0_143, %c0_144] : memref<2x32xf32, #tpu.memory_space<vmem>>, vector<2x32xf32>
      tpu.vector_store %arg21[%c0_143, %c0_144], %420 {strides = array<i32>} : memref<2x32xf32, #tpu.memory_space<vmem>>, vector<2x32xf32>,
      %c0_145 = arith.constant 0 : index
      %c0_146 = arith.constant 0 : index
      %424 = vector.load %arg22[%c0_145, %c0_146] : memref<2x32xf32, #tpu.memory_space<vmem>>, vector<2x32xf32>
      tpu.vector_store %arg22[%c0_145, %c0_146], %420 {strides = array<i32>} : memref<2x32xf32, #tpu.memory_space<vmem>>, vector<2x32xf32>,
    } else {
    }
    %c0 = arith.constant 0 : index
    %c0_1 = arith.constant 0 : index
    %3 = vector.load %arg9[%c0, %c0_1] : memref<1x128xf32, #tpu.memory_space<vmem>>, vector<1x128xf32>
    %c0_2 = arith.constant 0 : index
    %c0_3 = arith.constant 0 : index
    %4 = vector.load %arg1[%c0_2, %c0_3] : memref<16x32xf32, #tpu.memory_space<vmem>>, vector<16x32xf32>
    %c0_4 = arith.constant 0 : index
    %c0_5 = arith.constant 0 : index
    %5 = vector.load %arg5[%c0_4, %c0_5] : memref<32x128xf32, #tpu.memory_space<vmem>>, vector<32x128xf32>
    %cst = arith.constant dense<0.000000e+00> : vector<16x128xf32>
    %6 = tpu.matmul %4, %5, %cst {dimension_numbers = #tpu.dot_dimension_numbers<[1], [0], [0], [1], [0, 0, 1, 1], [], []>} : vector<16x32xf32>, vector<32x128xf32>, vector<16x128xf32> -> vector<16x128xf32>
    %7 = vector.broadcast %3 : vector<1x128xf32> to vector<16x128xf32>
    %8 = arith.addf %7, %6 : vector<16x128xf32>
    %c0_6 = arith.constant 0 : index
    %c0_7 = arith.constant 0 : index
    %9 = vector.load %arg2[%c0_6, %c0_7] : memref<16x32xf32, #tpu.memory_space<vmem>>, vector<16x32xf32>
    %c0_8 = arith.constant 0 : index
    %c0_9 = arith.constant 0 : index
    %10 = vector.load %arg6[%c0_8, %c0_9] : memref<32x128xf32, #tpu.memory_space<vmem>>, vector<32x128xf32>
    %cst_10 = arith.constant dense<0.000000e+00> : vector<16x128xf32>
    %11 = tpu.matmul %9, %10, %cst_10 {dimension_numbers = #tpu.dot_dimension_numbers<[1], [0], [0], [1], [0, 0, 1, 1], [], []>} : vector<16x32xf32>, vector<32x128xf32>, vector<16x128xf32> -> vector<16x128xf32>
    %12 = arith.addf %8, %11 : vector<16x128xf32>
    %c0_11 = arith.constant 0 : index
    %c0_12 = arith.constant 0 : index
    %13 = vector.load %arg17[%c0_11, %c0_12] : memref<16x128xf32, #tpu.memory_space<vmem>>, vector<16x128xf32>
    tpu.vector_store %arg17[%c0_11, %c0_12], %12 {strides = array<i32>} : memref<16x128xf32, #tpu.memory_space<vmem>>, vector<16x128xf32>,
    %c0_13 = arith.constant 0 : index
    %c0_14 = arith.constant 0 : index
    %14 = vector.load %arg10[%c0_13, %c0_14] : memref<1x128xf32, #tpu.memory_space<vmem>>, vector<1x128xf32>
    %c0_15 = arith.constant 0 : index
    %c0_16 = arith.constant 0 : index
    %15 = vector.load %arg3[%c0_15, %c0_16] : memref<16x32xf32, #tpu.memory_space<vmem>>, vector<16x32xf32>
    %c0_17 = arith.constant 0 : index
    %c0_18 = arith.constant 0 : index
    %16 = vector.load %arg7[%c0_17, %c0_18] : memref<32x128xf32, #tpu.memory_space<vmem>>, vector<32x128xf32>
    %cst_19 = arith.constant dense<0.000000e+00> : vector<16x128xf32>
    %17 = tpu.matmul %15, %16, %cst_19 {dimension_numbers = #tpu.dot_dimension_numbers<[1], [0], [0], [1], [0, 0, 1, 1], [], []>} : vector<16x32xf32>, vector<32x128xf32>, vector<16x128xf32> -> vector<16x128xf32>
    %18 = vector.broadcast %14 : vector<1x128xf32> to vector<16x128xf32>
    %19 = arith.addf %18, %17 : vector<16x128xf32>
    %c0_20 = arith.constant 0 : index
    %c0_21 = arith.constant 0 : index
    %20 = vector.load %arg4[%c0_20, %c0_21] : memref<16x32xf32, #tpu.memory_space<vmem>>, vector<16x32xf32>
    %c0_22 = arith.constant 0 : index
    %c0_23 = arith.constant 0 : index
    %21 = vector.load %arg8[%c0_22, %c0_23] : memref<32x128xf32, #tpu.memory_space<vmem>>, vector<32x128xf32>
    %cst_24 = arith.constant dense<0.000000e+00> : vector<16x128xf32>
    %22 = tpu.matmul %20, %21, %cst_24 {dimension_numbers = #tpu.dot_dimension_numbers<[1], [0], [0], [1], [0, 0, 1, 1], [], []>} : vector<16x32xf32>, vector<32x128xf32>, vector<16x128xf32> -> vector<16x128xf32>
    %23 = arith.addf %19, %22 : vector<16x128xf32>
    %c0_25 = arith.constant 0 : index
    %c0_26 = arith.constant 0 : index
    %24 = vector.load %arg18[%c0_25, %c0_26] : memref<16x128xf32, #tpu.memory_space<vmem>>, vector<16x128xf32>
    tpu.vector_store %arg18[%c0_25, %c0_26], %23 {strides = array<i32>} : memref<16x128xf32, #tpu.memory_space<vmem>>, vector<16x128xf32>,
    %c0_27 = arith.constant 0 : index
    %c0_28 = arith.constant 0 : index
    %25 = vector.load %arg11[%c0_27, %c0_28] : memref<32x128xf32, #tpu.memory_space<vmem>>, vector<32x128xf32>
    %c0_29 = arith.constant 0 : index
    %c0_30 = arith.constant 0 : index
    %26 = vector.load %arg12[%c0_29, %c0_30] : memref<32x128xf32, #tpu.memory_space<vmem>>, vector<32x128xf32>
    %27 = tpu.iota {dimensions = array<i32: 1>} : vector<2x128xi32>
    %c64_i32 = arith.constant 64 : i32
    %28 = vector.broadcast %c64_i32 : i32 to vector<2x128xi32>
    %29 = arith.cmpi sge, %27, %28 : vector<2x128xi32>
    %c96_i32 = arith.constant 96 : i32
    %30 = vector.broadcast %c96_i32 : i32 to vector<2x128xi32>
    %31 = arith.cmpi slt, %27, %30 : vector<2x128xi32>
    %32 = arith.andi %29, %31 : vector<2x128xi1>
    %c0_31 = arith.constant 0 : index
    %c0_32 = arith.constant 0 : index
    %33 = vector.load %arg19[%c0_31, %c0_32] : memref<2x32xf32, #tpu.memory_space<vmem>>, vector<2x32xf32>
    %c0_33 = arith.constant 0 : index
    %c0_34 = arith.constant 0 : index
    %34 = vector.load %arg20[%c0_33, %c0_34] : memref<2x32xf32, #tpu.memory_space<vmem>>, vector<2x32xf32>
    %c0_35 = arith.constant 0 : index
    %c0_36 = arith.constant 0 : index
    %35 = vector.load %arg21[%c0_35, %c0_36] : memref<2x32xf32, #tpu.memory_space<vmem>>, vector<2x32xf32>
    %c0_37 = arith.constant 0 : index
    %c0_38 = arith.constant 0 : index
    %36 = vector.load %arg22[%c0_37, %c0_38] : memref<2x32xf32, #tpu.memory_space<vmem>>, vector<2x32xf32>
    %c0_i32_39 = arith.constant 0 : i32
    %c2_i32 = arith.constant 2 : i32
    %37 = arith.muli %c0_i32_39, %c2_i32 : i32
    %c7_i32 = arith.constant 7 : i32
    %38 = arith.subi %c7_i32, %c0_i32_39 : i32
    %c2_i32_40 = arith.constant 2 : i32
    %39 = arith.muli %38, %c2_i32_40 : i32
    %40 = arith.index_cast %37 : i32 to index
    %c0_41 = arith.constant 0 : index
    %41 = vector.load %arg17[%40, %c0_41] : memref<16x128xf32, #tpu.memory_space<vmem>>, vector<2x128xf32>
    %cst_42 = arith.constant dense<0.000000e+00> : vector<2x128xf32>
    %42 = tpu.matmul %33, %25, %cst_42 {dimension_numbers = #tpu.dot_dimension_numbers<[1], [0], [0], [1], [0, 0, 1, 1], [], []>} : vector<2x32xf32>, vector<32x128xf32>, vector<2x128xf32> -> vector<2x128xf32>
    %43 = arith.addf %41, %42 : vector<2x128xf32>
    %44 = arith.index_cast %39 : i32 to index
    %c0_43 = arith.constant 0 : index
    %45 = vector.load %arg18[%44, %c0_43] : memref<16x128xf32, #tpu.memory_space<vmem>>, vector<2x128xf32>
    %cst_44 = arith.constant dense<0.000000e+00> : vector<2x128xf32>
    %46 = tpu.matmul %35, %26, %cst_44 {dimension_numbers = #tpu.dot_dimension_numbers<[1], [0], [0], [1], [0, 0, 1, 1], [], []>} : vector<2x32xf32>, vector<32x128xf32>, vector<2x128xf32> -> vector<2x128xf32>
    %47 = arith.addf %45, %46 : vector<2x128xf32>
    %48 = math.tanh %43 : vector<2x128xf32>
    %49 = arith.negf %43 : vector<2x128xf32>
    %50 = math.exp %49 : vector<2x128xf32>
    %cst_45 = arith.constant 1.000000e+00 : f32
    %51 = vector.broadcast %cst_45 : f32 to vector<2x128xf32>
    %52 = arith.addf %51, %50 : vector<2x128xf32>
    %53 = arith.divf %51, %52 : vector<2x128xf32>
    %54 = arith.select %32, %48, %53 : vector<2x128xi1>, vector<2x128xf32>
    %55 = vector.extract_strided_slice %54 {offsets = [0, 0], sizes = [2, 32], strides = [1, 1]} : vector<2x128xf32> to vector<2x32xf32>
    %56 = vector.extract_strided_slice %54 {offsets = [0, 32], sizes = [2, 32], strides = [1, 1]} : vector<2x128xf32> to vector<2x32xf32>
    %57 = vector.extract_strided_slice %54 {offsets = [0, 64], sizes = [2, 32], strides = [1, 1]} : vector<2x128xf32> to vector<2x32xf32>
    %58 = vector.extract_strided_slice %54 {offsets = [0, 96], sizes = [2, 32], strides = [1, 1]} : vector<2x128xf32> to vector<2x32xf32>
    %59 = arith.mulf %56, %34 : vector<2x32xf32>
    %60 = arith.mulf %55, %57 : vector<2x32xf32>
    %61 = arith.addf %59, %60 : vector<2x32xf32>
    %62 = math.tanh %61 : vector<2x32xf32>
    %63 = arith.mulf %58, %62 : vector<2x32xf32>
    %64 = math.tanh %47 : vector<2x128xf32>
    %65 = arith.negf %47 : vector<2x128xf32>
    %66 = math.exp %65 : vector<2x128xf32>
    %cst_46 = arith.constant 1.000000e+00 : f32
    %67 = vector.broadcast %cst_46 : f32 to vector<2x128xf32>
    %68 = arith.addf %67, %66 : vector<2x128xf32>
    %69 = arith.divf %67, %68 : vector<2x128xf32>
    %70 = arith.select %32, %64, %69 : vector<2x128xi1>, vector<2x128xf32>
    %71 = vector.extract_strided_slice %70 {offsets = [0, 0], sizes = [2, 32], strides = [1, 1]} : vector<2x128xf32> to vector<2x32xf32>
    %72 = vector.extract_strided_slice %70 {offsets = [0, 32], sizes = [2, 32], strides = [1, 1]} : vector<2x128xf32> to vector<2x32xf32>
    %73 = vector.extract_strided_slice %70 {offsets = [0, 64], sizes = [2, 32], strides = [1, 1]} : vector<2x128xf32> to vector<2x32xf32>
    %74 = vector.extract_strided_slice %70 {offsets = [0, 96], sizes = [2, 32], strides = [1, 1]} : vector<2x128xf32> to vector<2x32xf32>
    %75 = arith.mulf %72, %36 : vector<2x32xf32>
    %76 = arith.mulf %71, %73 : vector<2x32xf32>
    %77 = arith.addf %75, %76 : vector<2x32xf32>
    %78 = math.tanh %77 : vector<2x32xf32>
    %79 = arith.mulf %74, %78 : vector<2x32xf32>
    %80 = arith.index_cast %37 : i32 to index
    %c0_47 = arith.constant 0 : index
    %81 = vector.load %arg13[%80, %c0_47] : memref<16x32xf32, #tpu.memory_space<vmem>>, vector<2x32xf32>
    tpu.vector_store %arg13[%80, %c0_47], %63 {strides = array<i32>} : memref<16x32xf32, #tpu.memory_space<vmem>>, vector<2x32xf32>,
    %82 = arith.index_cast %39 : i32 to index
    %c0_48 = arith.constant 0 : index
    %83 = vector.load %arg14[%82, %c0_48] : memref<16x32xf32, #tpu.memory_space<vmem>>, vector<2x32xf32>
    tpu.vector_store %arg14[%82, %c0_48], %79 {strides = array<i32>} : memref<16x32xf32, #tpu.memory_space<vmem>>, vector<2x32xf32>,
    %c1_i32 = arith.constant 1 : i32
    %c2_i32_49 = arith.constant 2 : i32
    %84 = arith.muli %c1_i32, %c2_i32_49 : i32
    %c7_i32_50 = arith.constant 7 : i32
    %85 = arith.subi %c7_i32_50, %c1_i32 : i32
    %c2_i32_51 = arith.constant 2 : i32
    %86 = arith.muli %85, %c2_i32_51 : i32
    %87 = arith.index_cast %84 : i32 to index
    %c0_52 = arith.constant 0 : index
    %88 = vector.load %arg17[%87, %c0_52] : memref<16x128xf32, #tpu.memory_space<vmem>>, vector<2x128xf32>
    %cst_53 = arith.constant dense<0.000000e+00> : vector<2x128xf32>
    %89 = tpu.matmul %63, %25, %cst_53 {dimension_numbers = #tpu.dot_dimension_numbers<[1], [0], [0], [1], [0, 0, 1, 1], [], []>} : vector<2x32xf32>, vector<32x128xf32>, vector<2x128xf32> -> vector<2x128xf32>
    %90 = arith.addf %88, %89 : vector<2x128xf32>
    %91 = arith.index_cast %86 : i32 to index
    %c0_54 = arith.constant 0 : index
    %92 = vector.load %arg18[%91, %c0_54] : memref<16x128xf32, #tpu.memory_space<vmem>>, vector<2x128xf32>
    %cst_55 = arith.constant dense<0.000000e+00> : vector<2x128xf32>
    %93 = tpu.matmul %79, %26, %cst_55 {dimension_numbers = #tpu.dot_dimension_numbers<[1], [0], [0], [1], [0, 0, 1, 1], [], []>} : vector<2x32xf32>, vector<32x128xf32>, vector<2x128xf32> -> vector<2x128xf32>
    %94 = arith.addf %92, %93 : vector<2x128xf32>
    %95 = math.tanh %90 : vector<2x128xf32>
    %96 = arith.negf %90 : vector<2x128xf32>
    %97 = math.exp %96 : vector<2x128xf32>
    %cst_56 = arith.constant 1.000000e+00 : f32
    %98 = vector.broadcast %cst_56 : f32 to vector<2x128xf32>
    %99 = arith.addf %98, %97 : vector<2x128xf32>
    %100 = arith.divf %98, %99 : vector<2x128xf32>
    %101 = arith.select %32, %95, %100 : vector<2x128xi1>, vector<2x128xf32>
    %102 = vector.extract_strided_slice %101 {offsets = [0, 0], sizes = [2, 32], strides = [1, 1]} : vector<2x128xf32> to vector<2x32xf32>
    %103 = vector.extract_strided_slice %101 {offsets = [0, 32], sizes = [2, 32], strides = [1, 1]} : vector<2x128xf32> to vector<2x32xf32>
    %104 = vector.extract_strided_slice %101 {offsets = [0, 64], sizes = [2, 32], strides = [1, 1]} : vector<2x128xf32> to vector<2x32xf32>
    %105 = vector.extract_strided_slice %101 {offsets = [0, 96], sizes = [2, 32], strides = [1, 1]} : vector<2x128xf32> to vector<2x32xf32>
    %106 = arith.mulf %103, %61 : vector<2x32xf32>
    %107 = arith.mulf %102, %104 : vector<2x32xf32>
    %108 = arith.addf %106, %107 : vector<2x32xf32>
    %109 = math.tanh %108 : vector<2x32xf32>
    %110 = arith.mulf %105, %109 : vector<2x32xf32>
    %111 = math.tanh %94 : vector<2x128xf32>
    %112 = arith.negf %94 : vector<2x128xf32>
    %113 = math.exp %112 : vector<2x128xf32>
    %cst_57 = arith.constant 1.000000e+00 : f32
    %114 = vector.broadcast %cst_57 : f32 to vector<2x128xf32>
    %115 = arith.addf %114, %113 : vector<2x128xf32>
    %116 = arith.divf %114, %115 : vector<2x128xf32>
    %117 = arith.select %32, %111, %116 : vector<2x128xi1>, vector<2x128xf32>
    %118 = vector.extract_strided_slice %117 {offsets = [0, 0], sizes = [2, 32], strides = [1, 1]} : vector<2x128xf32> to vector<2x32xf32>
    %119 = vector.extract_strided_slice %117 {offsets = [0, 32], sizes = [2, 32], strides = [1, 1]} : vector<2x128xf32> to vector<2x32xf32>
    %120 = vector.extract_strided_slice %117 {offsets = [0, 64], sizes = [2, 32], strides = [1, 1]} : vector<2x128xf32> to vector<2x32xf32>
    %121 = vector.extract_strided_slice %117 {offsets = [0, 96], sizes = [2, 32], strides = [1, 1]} : vector<2x128xf32> to vector<2x32xf32>
    %122 = arith.mulf %119, %77 : vector<2x32xf32>
    %123 = arith.mulf %118, %120 : vector<2x32xf32>
    %124 = arith.addf %122, %123 : vector<2x32xf32>
    %125 = math.tanh %124 : vector<2x32xf32>
    %126 = arith.mulf %121, %125 : vector<2x32xf32>
    %127 = arith.index_cast %84 : i32 to index
    %c0_58 = arith.constant 0 : index
    %128 = vector.load %arg13[%127, %c0_58] : memref<16x32xf32, #tpu.memory_space<vmem>>, vector<2x32xf32>
    tpu.vector_store %arg13[%127, %c0_58], %110 {strides = array<i32>} : memref<16x32xf32, #tpu.memory_space<vmem>>, vector<2x32xf32>,
    %129 = arith.index_cast %86 : i32 to index
    %c0_59 = arith.constant 0 : index
    %130 = vector.load %arg14[%129, %c0_59] : memref<16x32xf32, #tpu.memory_space<vmem>>, vector<2x32xf32>
    tpu.vector_store %arg14[%129, %c0_59], %126 {strides = array<i32>} : memref<16x32xf32, #tpu.memory_space<vmem>>, vector<2x32xf32>,
    %c2_i32_60 = arith.constant 2 : i32
    %c2_i32_61 = arith.constant 2 : i32
    %131 = arith.muli %c2_i32_60, %c2_i32_61 : i32
    %c7_i32_62 = arith.constant 7 : i32
    %132 = arith.subi %c7_i32_62, %c2_i32_60 : i32
    %c2_i32_63 = arith.constant 2 : i32
    %133 = arith.muli %132, %c2_i32_63 : i32
    %134 = arith.index_cast %131 : i32 to index
    %c0_64 = arith.constant 0 : index
    %135 = vector.load %arg17[%134, %c0_64] : memref<16x128xf32, #tpu.memory_space<vmem>>, vector<2x128xf32>
    %cst_65 = arith.constant dense<0.000000e+00> : vector<2x128xf32>
    %136 = tpu.matmul %110, %25, %cst_65 {dimension_numbers = #tpu.dot_dimension_numbers<[1], [0], [0], [1], [0, 0, 1, 1], [], []>} : vector<2x32xf32>, vector<32x128xf32>, vector<2x128xf32> -> vector<2x128xf32>
    %137 = arith.addf %135, %136 : vector<2x128xf32>
    %138 = arith.index_cast %133 : i32 to index
    %c0_66 = arith.constant 0 : index
    %139 = vector.load %arg18[%138, %c0_66] : memref<16x128xf32, #tpu.memory_space<vmem>>, vector<2x128xf32>
    %cst_67 = arith.constant dense<0.000000e+00> : vector<2x128xf32>
    %140 = tpu.matmul %126, %26, %cst_67 {dimension_numbers = #tpu.dot_dimension_numbers<[1], [0], [0], [1], [0, 0, 1, 1], [], []>} : vector<2x32xf32>, vector<32x128xf32>, vector<2x128xf32> -> vector<2x128xf32>
    %141 = arith.addf %139, %140 : vector<2x128xf32>
    %142 = math.tanh %137 : vector<2x128xf32>
    %143 = arith.negf %137 : vector<2x128xf32>
    %144 = math.exp %143 : vector<2x128xf32>
    %cst_68 = arith.constant 1.000000e+00 : f32
    %145 = vector.broadcast %cst_68 : f32 to vector<2x128xf32>
    %146 = arith.addf %145, %144 : vector<2x128xf32>
    %147 = arith.divf %145, %146 : vector<2x128xf32>
    %148 = arith.select %32, %142, %147 : vector<2x128xi1>, vector<2x128xf32>
    %149 = vector.extract_strided_slice %148 {offsets = [0, 0], sizes = [2, 32], strides = [1, 1]} : vector<2x128xf32> to vector<2x32xf32>
    %150 = vector.extract_strided_slice %148 {offsets = [0, 32], sizes = [2, 32], strides = [1, 1]} : vector<2x128xf32> to vector<2x32xf32>
    %151 = vector.extract_strided_slice %148 {offsets = [0, 64], sizes = [2, 32], strides = [1, 1]} : vector<2x128xf32> to vector<2x32xf32>
    %152 = vector.extract_strided_slice %148 {offsets = [0, 96], sizes = [2, 32], strides = [1, 1]} : vector<2x128xf32> to vector<2x32xf32>
    %153 = arith.mulf %150, %108 : vector<2x32xf32>
    %154 = arith.mulf %149, %151 : vector<2x32xf32>
    %155 = arith.addf %153, %154 : vector<2x32xf32>
    %156 = math.tanh %155 : vector<2x32xf32>
    %157 = arith.mulf %152, %156 : vector<2x32xf32>
    %158 = math.tanh %141 : vector<2x128xf32>
    %159 = arith.negf %141 : vector<2x128xf32>
    %160 = math.exp %159 : vector<2x128xf32>
    %cst_69 = arith.constant 1.000000e+00 : f32
    %161 = vector.broadcast %cst_69 : f32 to vector<2x128xf32>
    %162 = arith.addf %161, %160 : vector<2x128xf32>
    %163 = arith.divf %161, %162 : vector<2x128xf32>
    %164 = arith.select %32, %158, %163 : vector<2x128xi1>, vector<2x128xf32>
    %165 = vector.extract_strided_slice %164 {offsets = [0, 0], sizes = [2, 32], strides = [1, 1]} : vector<2x128xf32> to vector<2x32xf32>
    %166 = vector.extract_strided_slice %164 {offsets = [0, 32], sizes = [2, 32], strides = [1, 1]} : vector<2x128xf32> to vector<2x32xf32>
    %167 = vector.extract_strided_slice %164 {offsets = [0, 64], sizes = [2, 32], strides = [1, 1]} : vector<2x128xf32> to vector<2x32xf32>
    %168 = vector.extract_strided_slice %164 {offsets = [0, 96], sizes = [2, 32], strides = [1, 1]} : vector<2x128xf32> to vector<2x32xf32>
    %169 = arith.mulf %166, %124 : vector<2x32xf32>
    %170 = arith.mulf %165, %167 : vector<2x32xf32>
    %171 = arith.addf %169, %170 : vector<2x32xf32>
    %172 = math.tanh %171 : vector<2x32xf32>
    %173 = arith.mulf %168, %172 : vector<2x32xf32>
    %174 = arith.index_cast %131 : i32 to index
    %c0_70 = arith.constant 0 : index
    %175 = vector.load %arg13[%174, %c0_70] : memref<16x32xf32, #tpu.memory_space<vmem>>, vector<2x32xf32>
    tpu.vector_store %arg13[%174, %c0_70], %157 {strides = array<i32>} : memref<16x32xf32, #tpu.memory_space<vmem>>, vector<2x32xf32>,
    %176 = arith.index_cast %133 : i32 to index
    %c0_71 = arith.constant 0 : index
    %177 = vector.load %arg14[%176, %c0_71] : memref<16x32xf32, #tpu.memory_space<vmem>>, vector<2x32xf32>
    tpu.vector_store %arg14[%176, %c0_71], %173 {strides = array<i32>} : memref<16x32xf32, #tpu.memory_space<vmem>>, vector<2x32xf32>,
    %c3_i32 = arith.constant 3 : i32
    %c2_i32_72 = arith.constant 2 : i32
    %178 = arith.muli %c3_i32, %c2_i32_72 : i32
    %c7_i32_73 = arith.constant 7 : i32
    %179 = arith.subi %c7_i32_73, %c3_i32 : i32
    %c2_i32_74 = arith.constant 2 : i32
    %180 = arith.muli %179, %c2_i32_74 : i32
    %181 = arith.index_cast %178 : i32 to index
    %c0_75 = arith.constant 0 : index
    %182 = vector.load %arg17[%181, %c0_75] : memref<16x128xf32, #tpu.memory_space<vmem>>, vector<2x128xf32>
    %cst_76 = arith.constant dense<0.000000e+00> : vector<2x128xf32>
    %183 = tpu.matmul %157, %25, %cst_76 {dimension_numbers = #tpu.dot_dimension_numbers<[1], [0], [0], [1], [0, 0, 1, 1], [], []>} : vector<2x32xf32>, vector<32x128xf32>, vector<2x128xf32> -> vector<2x128xf32>
    %184 = arith.addf %182, %183 : vector<2x128xf32>
    %185 = arith.index_cast %180 : i32 to index
    %c0_77 = arith.constant 0 : index
    %186 = vector.load %arg18[%185, %c0_77] : memref<16x128xf32, #tpu.memory_space<vmem>>, vector<2x128xf32>
    %cst_78 = arith.constant dense<0.000000e+00> : vector<2x128xf32>
    %187 = tpu.matmul %173, %26, %cst_78 {dimension_numbers = #tpu.dot_dimension_numbers<[1], [0], [0], [1], [0, 0, 1, 1], [], []>} : vector<2x32xf32>, vector<32x128xf32>, vector<2x128xf32> -> vector<2x128xf32>
    %188 = arith.addf %186, %187 : vector<2x128xf32>
    %189 = math.tanh %184 : vector<2x128xf32>
    %190 = arith.negf %184 : vector<2x128xf32>
    %191 = math.exp %190 : vector<2x128xf32>
    %cst_79 = arith.constant 1.000000e+00 : f32
    %192 = vector.broadcast %cst_79 : f32 to vector<2x128xf32>
    %193 = arith.addf %192, %191 : vector<2x128xf32>
    %194 = arith.divf %192, %193 : vector<2x128xf32>
    %195 = arith.select %32, %189, %194 : vector<2x128xi1>, vector<2x128xf32>
    %196 = vector.extract_strided_slice %195 {offsets = [0, 0], sizes = [2, 32], strides = [1, 1]} : vector<2x128xf32> to vector<2x32xf32>
    %197 = vector.extract_strided_slice %195 {offsets = [0, 32], sizes = [2, 32], strides = [1, 1]} : vector<2x128xf32> to vector<2x32xf32>
    %198 = vector.extract_strided_slice %195 {offsets = [0, 64], sizes = [2, 32], strides = [1, 1]} : vector<2x128xf32> to vector<2x32xf32>
    %199 = vector.extract_strided_slice %195 {offsets = [0, 96], sizes = [2, 32], strides = [1, 1]} : vector<2x128xf32> to vector<2x32xf32>
    %200 = arith.mulf %197, %155 : vector<2x32xf32>
    %201 = arith.mulf %196, %198 : vector<2x32xf32>
    %202 = arith.addf %200, %201 : vector<2x32xf32>
    %203 = math.tanh %202 : vector<2x32xf32>
    %204 = arith.mulf %199, %203 : vector<2x32xf32>
    %205 = math.tanh %188 : vector<2x128xf32>
    %206 = arith.negf %188 : vector<2x128xf32>
    %207 = math.exp %206 : vector<2x128xf32>
    %cst_80 = arith.constant 1.000000e+00 : f32
    %208 = vector.broadcast %cst_80 : f32 to vector<2x128xf32>
    %209 = arith.addf %208, %207 : vector<2x128xf32>
    %210 = arith.divf %208, %209 : vector<2x128xf32>
    %211 = arith.select %32, %205, %210 : vector<2x128xi1>, vector<2x128xf32>
    %212 = vector.extract_strided_slice %211 {offsets = [0, 0], sizes = [2, 32], strides = [1, 1]} : vector<2x128xf32> to vector<2x32xf32>
    %213 = vector.extract_strided_slice %211 {offsets = [0, 32], sizes = [2, 32], strides = [1, 1]} : vector<2x128xf32> to vector<2x32xf32>
    %214 = vector.extract_strided_slice %211 {offsets = [0, 64], sizes = [2, 32], strides = [1, 1]} : vector<2x128xf32> to vector<2x32xf32>
    %215 = vector.extract_strided_slice %211 {offsets = [0, 96], sizes = [2, 32], strides = [1, 1]} : vector<2x128xf32> to vector<2x32xf32>
    %216 = arith.mulf %213, %171 : vector<2x32xf32>
    %217 = arith.mulf %212, %214 : vector<2x32xf32>
    %218 = arith.addf %216, %217 : vector<2x32xf32>
    %219 = math.tanh %218 : vector<2x32xf32>
    %220 = arith.mulf %215, %219 : vector<2x32xf32>
    %221 = arith.index_cast %178 : i32 to index
    %c0_81 = arith.constant 0 : index
    %222 = vector.load %arg13[%221, %c0_81] : memref<16x32xf32, #tpu.memory_space<vmem>>, vector<2x32xf32>
    tpu.vector_store %arg13[%221, %c0_81], %204 {strides = array<i32>} : memref<16x32xf32, #tpu.memory_space<vmem>>, vector<2x32xf32>,
    %223 = arith.index_cast %180 : i32 to index
    %c0_82 = arith.constant 0 : index
    %224 = vector.load %arg14[%223, %c0_82] : memref<16x32xf32, #tpu.memory_space<vmem>>, vector<2x32xf32>
    tpu.vector_store %arg14[%223, %c0_82], %220 {strides = array<i32>} : memref<16x32xf32, #tpu.memory_space<vmem>>, vector<2x32xf32>,
    %c4_i32 = arith.constant 4 : i32
    %c2_i32_83 = arith.constant 2 : i32
    %225 = arith.muli %c4_i32, %c2_i32_83 : i32
    %c7_i32_84 = arith.constant 7 : i32
    %226 = arith.subi %c7_i32_84, %c4_i32 : i32
    %c2_i32_85 = arith.constant 2 : i32
    %227 = arith.muli %226, %c2_i32_85 : i32
    %228 = arith.index_cast %225 : i32 to index
    %c0_86 = arith.constant 0 : index
    %229 = vector.load %arg17[%228, %c0_86] : memref<16x128xf32, #tpu.memory_space<vmem>>, vector<2x128xf32>
    %cst_87 = arith.constant dense<0.000000e+00> : vector<2x128xf32>
    %230 = tpu.matmul %204, %25, %cst_87 {dimension_numbers = #tpu.dot_dimension_numbers<[1], [0], [0], [1], [0, 0, 1, 1], [], []>} : vector<2x32xf32>, vector<32x128xf32>, vector<2x128xf32> -> vector<2x128xf32>
    %231 = arith.addf %229, %230 : vector<2x128xf32>
    %232 = arith.index_cast %227 : i32 to index
    %c0_88 = arith.constant 0 : index
    %233 = vector.load %arg18[%232, %c0_88] : memref<16x128xf32, #tpu.memory_space<vmem>>, vector<2x128xf32>
    %cst_89 = arith.constant dense<0.000000e+00> : vector<2x128xf32>
    %234 = tpu.matmul %220, %26, %cst_89 {dimension_numbers = #tpu.dot_dimension_numbers<[1], [0], [0], [1], [0, 0, 1, 1], [], []>} : vector<2x32xf32>, vector<32x128xf32>, vector<2x128xf32> -> vector<2x128xf32>
    %235 = arith.addf %233, %234 : vector<2x128xf32>
    %236 = math.tanh %231 : vector<2x128xf32>
    %237 = arith.negf %231 : vector<2x128xf32>
    %238 = math.exp %237 : vector<2x128xf32>
    %cst_90 = arith.constant 1.000000e+00 : f32
    %239 = vector.broadcast %cst_90 : f32 to vector<2x128xf32>
    %240 = arith.addf %239, %238 : vector<2x128xf32>
    %241 = arith.divf %239, %240 : vector<2x128xf32>
    %242 = arith.select %32, %236, %241 : vector<2x128xi1>, vector<2x128xf32>
    %243 = vector.extract_strided_slice %242 {offsets = [0, 0], sizes = [2, 32], strides = [1, 1]} : vector<2x128xf32> to vector<2x32xf32>
    %244 = vector.extract_strided_slice %242 {offsets = [0, 32], sizes = [2, 32], strides = [1, 1]} : vector<2x128xf32> to vector<2x32xf32>
    %245 = vector.extract_strided_slice %242 {offsets = [0, 64], sizes = [2, 32], strides = [1, 1]} : vector<2x128xf32> to vector<2x32xf32>
    %246 = vector.extract_strided_slice %242 {offsets = [0, 96], sizes = [2, 32], strides = [1, 1]} : vector<2x128xf32> to vector<2x32xf32>
    %247 = arith.mulf %244, %202 : vector<2x32xf32>
    %248 = arith.mulf %243, %245 : vector<2x32xf32>
    %249 = arith.addf %247, %248 : vector<2x32xf32>
    %250 = math.tanh %249 : vector<2x32xf32>
    %251 = arith.mulf %246, %250 : vector<2x32xf32>
    %252 = math.tanh %235 : vector<2x128xf32>
    %253 = arith.negf %235 : vector<2x128xf32>
    %254 = math.exp %253 : vector<2x128xf32>
    %cst_91 = arith.constant 1.000000e+00 : f32
    %255 = vector.broadcast %cst_91 : f32 to vector<2x128xf32>
    %256 = arith.addf %255, %254 : vector<2x128xf32>
    %257 = arith.divf %255, %256 : vector<2x128xf32>
    %258 = arith.select %32, %252, %257 : vector<2x128xi1>, vector<2x128xf32>
    %259 = vector.extract_strided_slice %258 {offsets = [0, 0], sizes = [2, 32], strides = [1, 1]} : vector<2x128xf32> to vector<2x32xf32>
    %260 = vector.extract_strided_slice %258 {offsets = [0, 32], sizes = [2, 32], strides = [1, 1]} : vector<2x128xf32> to vector<2x32xf32>
    %261 = vector.extract_strided_slice %258 {offsets = [0, 64], sizes = [2, 32], strides = [1, 1]} : vector<2x128xf32> to vector<2x32xf32>
    %262 = vector.extract_strided_slice %258 {offsets = [0, 96], sizes = [2, 32], strides = [1, 1]} : vector<2x128xf32> to vector<2x32xf32>
    %263 = arith.mulf %260, %218 : vector<2x32xf32>
    %264 = arith.mulf %259, %261 : vector<2x32xf32>
    %265 = arith.addf %263, %264 : vector<2x32xf32>
    %266 = math.tanh %265 : vector<2x32xf32>
    %267 = arith.mulf %262, %266 : vector<2x32xf32>
    %268 = arith.index_cast %225 : i32 to index
    %c0_92 = arith.constant 0 : index
    %269 = vector.load %arg13[%268, %c0_92] : memref<16x32xf32, #tpu.memory_space<vmem>>, vector<2x32xf32>
    tpu.vector_store %arg13[%268, %c0_92], %251 {strides = array<i32>} : memref<16x32xf32, #tpu.memory_space<vmem>>, vector<2x32xf32>,
    %270 = arith.index_cast %227 : i32 to index
    %c0_93 = arith.constant 0 : index
    %271 = vector.load %arg14[%270, %c0_93] : memref<16x32xf32, #tpu.memory_space<vmem>>, vector<2x32xf32>
    tpu.vector_store %arg14[%270, %c0_93], %267 {strides = array<i32>} : memref<16x32xf32, #tpu.memory_space<vmem>>, vector<2x32xf32>,
    %c5_i32 = arith.constant 5 : i32
    %c2_i32_94 = arith.constant 2 : i32
    %272 = arith.muli %c5_i32, %c2_i32_94 : i32
    %c7_i32_95 = arith.constant 7 : i32
    %273 = arith.subi %c7_i32_95, %c5_i32 : i32
    %c2_i32_96 = arith.constant 2 : i32
    %274 = arith.muli %273, %c2_i32_96 : i32
    %275 = arith.index_cast %272 : i32 to index
    %c0_97 = arith.constant 0 : index
    %276 = vector.load %arg17[%275, %c0_97] : memref<16x128xf32, #tpu.memory_space<vmem>>, vector<2x128xf32>
    %cst_98 = arith.constant dense<0.000000e+00> : vector<2x128xf32>
    %277 = tpu.matmul %251, %25, %cst_98 {dimension_numbers = #tpu.dot_dimension_numbers<[1], [0], [0], [1], [0, 0, 1, 1], [], []>} : vector<2x32xf32>, vector<32x128xf32>, vector<2x128xf32> -> vector<2x128xf32>
    %278 = arith.addf %276, %277 : vector<2x128xf32>
    %279 = arith.index_cast %274 : i32 to index
    %c0_99 = arith.constant 0 : index
    %280 = vector.load %arg18[%279, %c0_99] : memref<16x128xf32, #tpu.memory_space<vmem>>, vector<2x128xf32>
    %cst_100 = arith.constant dense<0.000000e+00> : vector<2x128xf32>
    %281 = tpu.matmul %267, %26, %cst_100 {dimension_numbers = #tpu.dot_dimension_numbers<[1], [0], [0], [1], [0, 0, 1, 1], [], []>} : vector<2x32xf32>, vector<32x128xf32>, vector<2x128xf32> -> vector<2x128xf32>
    %282 = arith.addf %280, %281 : vector<2x128xf32>
    %283 = math.tanh %278 : vector<2x128xf32>
    %284 = arith.negf %278 : vector<2x128xf32>
    %285 = math.exp %284 : vector<2x128xf32>
    %cst_101 = arith.constant 1.000000e+00 : f32
    %286 = vector.broadcast %cst_101 : f32 to vector<2x128xf32>
    %287 = arith.addf %286, %285 : vector<2x128xf32>
    %288 = arith.divf %286, %287 : vector<2x128xf32>
    %289 = arith.select %32, %283, %288 : vector<2x128xi1>, vector<2x128xf32>
    %290 = vector.extract_strided_slice %289 {offsets = [0, 0], sizes = [2, 32], strides = [1, 1]} : vector<2x128xf32> to vector<2x32xf32>
    %291 = vector.extract_strided_slice %289 {offsets = [0, 32], sizes = [2, 32], strides = [1, 1]} : vector<2x128xf32> to vector<2x32xf32>
    %292 = vector.extract_strided_slice %289 {offsets = [0, 64], sizes = [2, 32], strides = [1, 1]} : vector<2x128xf32> to vector<2x32xf32>
    %293 = vector.extract_strided_slice %289 {offsets = [0, 96], sizes = [2, 32], strides = [1, 1]} : vector<2x128xf32> to vector<2x32xf32>
    %294 = arith.mulf %291, %249 : vector<2x32xf32>
    %295 = arith.mulf %290, %292 : vector<2x32xf32>
    %296 = arith.addf %294, %295 : vector<2x32xf32>
    %297 = math.tanh %296 : vector<2x32xf32>
    %298 = arith.mulf %293, %297 : vector<2x32xf32>
    %299 = math.tanh %282 : vector<2x128xf32>
    %300 = arith.negf %282 : vector<2x128xf32>
    %301 = math.exp %300 : vector<2x128xf32>
    %cst_102 = arith.constant 1.000000e+00 : f32
    %302 = vector.broadcast %cst_102 : f32 to vector<2x128xf32>
    %303 = arith.addf %302, %301 : vector<2x128xf32>
    %304 = arith.divf %302, %303 : vector<2x128xf32>
    %305 = arith.select %32, %299, %304 : vector<2x128xi1>, vector<2x128xf32>
    %306 = vector.extract_strided_slice %305 {offsets = [0, 0], sizes = [2, 32], strides = [1, 1]} : vector<2x128xf32> to vector<2x32xf32>
    %307 = vector.extract_strided_slice %305 {offsets = [0, 32], sizes = [2, 32], strides = [1, 1]} : vector<2x128xf32> to vector<2x32xf32>
    %308 = vector.extract_strided_slice %305 {offsets = [0, 64], sizes = [2, 32], strides = [1, 1]} : vector<2x128xf32> to vector<2x32xf32>
    %309 = vector.extract_strided_slice %305 {offsets = [0, 96], sizes = [2, 32], strides = [1, 1]} : vector<2x128xf32> to vector<2x32xf32>
    %310 = arith.mulf %307, %265 : vector<2x32xf32>
    %311 = arith.mulf %306, %308 : vector<2x32xf32>
    %312 = arith.addf %310, %311 : vector<2x32xf32>
    %313 = math.tanh %312 : vector<2x32xf32>
    %314 = arith.mulf %309, %313 : vector<2x32xf32>
    %315 = arith.index_cast %272 : i32 to index
    %c0_103 = arith.constant 0 : index
    %316 = vector.load %arg13[%315, %c0_103] : memref<16x32xf32, #tpu.memory_space<vmem>>, vector<2x32xf32>
    tpu.vector_store %arg13[%315, %c0_103], %298 {strides = array<i32>} : memref<16x32xf32, #tpu.memory_space<vmem>>, vector<2x32xf32>,
    %317 = arith.index_cast %274 : i32 to index
    %c0_104 = arith.constant 0 : index
    %318 = vector.load %arg14[%317, %c0_104] : memref<16x32xf32, #tpu.memory_space<vmem>>, vector<2x32xf32>
    tpu.vector_store %arg14[%317, %c0_104], %314 {strides = array<i32>} : memref<16x32xf32, #tpu.memory_space<vmem>>, vector<2x32xf32>,
    %c6_i32 = arith.constant 6 : i32
    %c2_i32_105 = arith.constant 2 : i32
    %319 = arith.muli %c6_i32, %c2_i32_105 : i32
    %c7_i32_106 = arith.constant 7 : i32
    %320 = arith.subi %c7_i32_106, %c6_i32 : i32
    %c2_i32_107 = arith.constant 2 : i32
    %321 = arith.muli %320, %c2_i32_107 : i32
    %322 = arith.index_cast %319 : i32 to index
    %c0_108 = arith.constant 0 : index
    %323 = vector.load %arg17[%322, %c0_108] : memref<16x128xf32, #tpu.memory_space<vmem>>, vector<2x128xf32>
    %cst_109 = arith.constant dense<0.000000e+00> : vector<2x128xf32>
    %324 = tpu.matmul %298, %25, %cst_109 {dimension_numbers = #tpu.dot_dimension_numbers<[1], [0], [0], [1], [0, 0, 1, 1], [], []>} : vector<2x32xf32>, vector<32x128xf32>, vector<2x128xf32> -> vector<2x128xf32>
    %325 = arith.addf %323, %324 : vector<2x128xf32>
    %326 = arith.index_cast %321 : i32 to index
    %c0_110 = arith.constant 0 : index
    %327 = vector.load %arg18[%326, %c0_110] : memref<16x128xf32, #tpu.memory_space<vmem>>, vector<2x128xf32>
    %cst_111 = arith.constant dense<0.000000e+00> : vector<2x128xf32>
    %328 = tpu.matmul %314, %26, %cst_111 {dimension_numbers = #tpu.dot_dimension_numbers<[1], [0], [0], [1], [0, 0, 1, 1], [], []>} : vector<2x32xf32>, vector<32x128xf32>, vector<2x128xf32> -> vector<2x128xf32>
    %329 = arith.addf %327, %328 : vector<2x128xf32>
    %330 = math.tanh %325 : vector<2x128xf32>
    %331 = arith.negf %325 : vector<2x128xf32>
    %332 = math.exp %331 : vector<2x128xf32>
    %cst_112 = arith.constant 1.000000e+00 : f32
    %333 = vector.broadcast %cst_112 : f32 to vector<2x128xf32>
    %334 = arith.addf %333, %332 : vector<2x128xf32>
    %335 = arith.divf %333, %334 : vector<2x128xf32>
    %336 = arith.select %32, %330, %335 : vector<2x128xi1>, vector<2x128xf32>
    %337 = vector.extract_strided_slice %336 {offsets = [0, 0], sizes = [2, 32], strides = [1, 1]} : vector<2x128xf32> to vector<2x32xf32>
    %338 = vector.extract_strided_slice %336 {offsets = [0, 32], sizes = [2, 32], strides = [1, 1]} : vector<2x128xf32> to vector<2x32xf32>
    %339 = vector.extract_strided_slice %336 {offsets = [0, 64], sizes = [2, 32], strides = [1, 1]} : vector<2x128xf32> to vector<2x32xf32>
    %340 = vector.extract_strided_slice %336 {offsets = [0, 96], sizes = [2, 32], strides = [1, 1]} : vector<2x128xf32> to vector<2x32xf32>
    %341 = arith.mulf %338, %296 : vector<2x32xf32>
    %342 = arith.mulf %337, %339 : vector<2x32xf32>
    %343 = arith.addf %341, %342 : vector<2x32xf32>
    %344 = math.tanh %343 : vector<2x32xf32>
    %345 = arith.mulf %340, %344 : vector<2x32xf32>
    %346 = math.tanh %329 : vector<2x128xf32>
    %347 = arith.negf %329 : vector<2x128xf32>
    %348 = math.exp %347 : vector<2x128xf32>
    %cst_113 = arith.constant 1.000000e+00 : f32
    %349 = vector.broadcast %cst_113 : f32 to vector<2x128xf32>
    %350 = arith.addf %349, %348 : vector<2x128xf32>
    %351 = arith.divf %349, %350 : vector<2x128xf32>
    %352 = arith.select %32, %346, %351 : vector<2x128xi1>, vector<2x128xf32>
    %353 = vector.extract_strided_slice %352 {offsets = [0, 0], sizes = [2, 32], strides = [1, 1]} : vector<2x128xf32> to vector<2x32xf32>
    %354 = vector.extract_strided_slice %352 {offsets = [0, 32], sizes = [2, 32], strides = [1, 1]} : vector<2x128xf32> to vector<2x32xf32>
    %355 = vector.extract_strided_slice %352 {offsets = [0, 64], sizes = [2, 32], strides = [1, 1]} : vector<2x128xf32> to vector<2x32xf32>
    %356 = vector.extract_strided_slice %352 {offsets = [0, 96], sizes = [2, 32], strides = [1, 1]} : vector<2x128xf32> to vector<2x32xf32>
    %357 = arith.mulf %354, %312 : vector<2x32xf32>
    %358 = arith.mulf %353, %355 : vector<2x32xf32>
    %359 = arith.addf %357, %358 : vector<2x32xf32>
    %360 = math.tanh %359 : vector<2x32xf32>
    %361 = arith.mulf %356, %360 : vector<2x32xf32>
    %362 = arith.index_cast %319 : i32 to index
    %c0_114 = arith.constant 0 : index
    %363 = vector.load %arg13[%362, %c0_114] : memref<16x32xf32, #tpu.memory_space<vmem>>, vector<2x32xf32>
    tpu.vector_store %arg13[%362, %c0_114], %345 {strides = array<i32>} : memref<16x32xf32, #tpu.memory_space<vmem>>, vector<2x32xf32>,
    %364 = arith.index_cast %321 : i32 to index
    %c0_115 = arith.constant 0 : index
    %365 = vector.load %arg14[%364, %c0_115] : memref<16x32xf32, #tpu.memory_space<vmem>>, vector<2x32xf32>
    tpu.vector_store %arg14[%364, %c0_115], %361 {strides = array<i32>} : memref<16x32xf32, #tpu.memory_space<vmem>>, vector<2x32xf32>,
    %c7_i32_116 = arith.constant 7 : i32
    %c2_i32_117 = arith.constant 2 : i32
    %366 = arith.muli %c7_i32_116, %c2_i32_117 : i32
    %c7_i32_118 = arith.constant 7 : i32
    %367 = arith.subi %c7_i32_118, %c7_i32_116 : i32
    %c2_i32_119 = arith.constant 2 : i32
    %368 = arith.muli %367, %c2_i32_119 : i32
    %369 = arith.index_cast %366 : i32 to index
    %c0_120 = arith.constant 0 : index
    %370 = vector.load %arg17[%369, %c0_120] : memref<16x128xf32, #tpu.memory_space<vmem>>, vector<2x128xf32>
    %cst_121 = arith.constant dense<0.000000e+00> : vector<2x128xf32>
    %371 = tpu.matmul %345, %25, %cst_121 {dimension_numbers = #tpu.dot_dimension_numbers<[1], [0], [0], [1], [0, 0, 1, 1], [], []>} : vector<2x32xf32>, vector<32x128xf32>, vector<2x128xf32> -> vector<2x128xf32>
    %372 = arith.addf %370, %371 : vector<2x128xf32>
    %373 = arith.index_cast %368 : i32 to index
    %c0_122 = arith.constant 0 : index
    %374 = vector.load %arg18[%373, %c0_122] : memref<16x128xf32, #tpu.memory_space<vmem>>, vector<2x128xf32>
    %cst_123 = arith.constant dense<0.000000e+00> : vector<2x128xf32>
    %375 = tpu.matmul %361, %26, %cst_123 {dimension_numbers = #tpu.dot_dimension_numbers<[1], [0], [0], [1], [0, 0, 1, 1], [], []>} : vector<2x32xf32>, vector<32x128xf32>, vector<2x128xf32> -> vector<2x128xf32>
    %376 = arith.addf %374, %375 : vector<2x128xf32>
    %377 = math.tanh %372 : vector<2x128xf32>
    %378 = arith.negf %372 : vector<2x128xf32>
    %379 = math.exp %378 : vector<2x128xf32>
    %cst_124 = arith.constant 1.000000e+00 : f32
    %380 = vector.broadcast %cst_124 : f32 to vector<2x128xf32>
    %381 = arith.addf %380, %379 : vector<2x128xf32>
    %382 = arith.divf %380, %381 : vector<2x128xf32>
    %383 = arith.select %32, %377, %382 : vector<2x128xi1>, vector<2x128xf32>
    %384 = vector.extract_strided_slice %383 {offsets = [0, 0], sizes = [2, 32], strides = [1, 1]} : vector<2x128xf32> to vector<2x32xf32>
    %385 = vector.extract_strided_slice %383 {offsets = [0, 32], sizes = [2, 32], strides = [1, 1]} : vector<2x128xf32> to vector<2x32xf32>
    %386 = vector.extract_strided_slice %383 {offsets = [0, 64], sizes = [2, 32], strides = [1, 1]} : vector<2x128xf32> to vector<2x32xf32>
    %387 = vector.extract_strided_slice %383 {offsets = [0, 96], sizes = [2, 32], strides = [1, 1]} : vector<2x128xf32> to vector<2x32xf32>
    %388 = arith.mulf %385, %343 : vector<2x32xf32>
    %389 = arith.mulf %384, %386 : vector<2x32xf32>
    %390 = arith.addf %388, %389 : vector<2x32xf32>
    %391 = math.tanh %390 : vector<2x32xf32>
    %392 = arith.mulf %387, %391 : vector<2x32xf32>
    %393 = math.tanh %376 : vector<2x128xf32>
    %394 = arith.negf %376 : vector<2x128xf32>
    %395 = math.exp %394 : vector<2x128xf32>
    %cst_125 = arith.constant 1.000000e+00 : f32
    %396 = vector.broadcast %cst_125 : f32 to vector<2x128xf32>
    %397 = arith.addf %396, %395 : vector<2x128xf32>
    %398 = arith.divf %396, %397 : vector<2x128xf32>
    %399 = arith.select %32, %393, %398 : vector<2x128xi1>, vector<2x128xf32>
    %400 = vector.extract_strided_slice %399 {offsets = [0, 0], sizes = [2, 32], strides = [1, 1]} : vector<2x128xf32> to vector<2x32xf32>
    %401 = vector.extract_strided_slice %399 {offsets = [0, 32], sizes = [2, 32], strides = [1, 1]} : vector<2x128xf32> to vector<2x32xf32>
    %402 = vector.extract_strided_slice %399 {offsets = [0, 64], sizes = [2, 32], strides = [1, 1]} : vector<2x128xf32> to vector<2x32xf32>
    %403 = vector.extract_strided_slice %399 {offsets = [0, 96], sizes = [2, 32], strides = [1, 1]} : vector<2x128xf32> to vector<2x32xf32>
    %404 = arith.mulf %401, %359 : vector<2x32xf32>
    %405 = arith.mulf %400, %402 : vector<2x32xf32>
    %406 = arith.addf %404, %405 : vector<2x32xf32>
    %407 = math.tanh %406 : vector<2x32xf32>
    %408 = arith.mulf %403, %407 : vector<2x32xf32>
    %409 = arith.index_cast %366 : i32 to index
    %c0_126 = arith.constant 0 : index
    %410 = vector.load %arg13[%409, %c0_126] : memref<16x32xf32, #tpu.memory_space<vmem>>, vector<2x32xf32>
    tpu.vector_store %arg13[%409, %c0_126], %392 {strides = array<i32>} : memref<16x32xf32, #tpu.memory_space<vmem>>, vector<2x32xf32>,
    %411 = arith.index_cast %368 : i32 to index
    %c0_127 = arith.constant 0 : index
    %412 = vector.load %arg14[%411, %c0_127] : memref<16x32xf32, #tpu.memory_space<vmem>>, vector<2x32xf32>
    tpu.vector_store %arg14[%411, %c0_127], %408 {strides = array<i32>} : memref<16x32xf32, #tpu.memory_space<vmem>>, vector<2x32xf32>,
    %c8_i32 = arith.constant 8 : i32
    %c0_128 = arith.constant 0 : index
    %c0_129 = arith.constant 0 : index
    %413 = vector.load %arg19[%c0_128, %c0_129] : memref<2x32xf32, #tpu.memory_space<vmem>>, vector<2x32xf32>
    tpu.vector_store %arg19[%c0_128, %c0_129], %392 {strides = array<i32>} : memref<2x32xf32, #tpu.memory_space<vmem>>, vector<2x32xf32>,
    %c0_130 = arith.constant 0 : index
    %c0_131 = arith.constant 0 : index
    %414 = vector.load %arg20[%c0_130, %c0_131] : memref<2x32xf32, #tpu.memory_space<vmem>>, vector<2x32xf32>
    tpu.vector_store %arg20[%c0_130, %c0_131], %390 {strides = array<i32>} : memref<2x32xf32, #tpu.memory_space<vmem>>, vector<2x32xf32>,
    %c0_132 = arith.constant 0 : index
    %c0_133 = arith.constant 0 : index
    %415 = vector.load %arg21[%c0_132, %c0_133] : memref<2x32xf32, #tpu.memory_space<vmem>>, vector<2x32xf32>
    tpu.vector_store %arg21[%c0_132, %c0_133], %408 {strides = array<i32>} : memref<2x32xf32, #tpu.memory_space<vmem>>, vector<2x32xf32>,
    %c0_134 = arith.constant 0 : index
    %c0_135 = arith.constant 0 : index
    %416 = vector.load %arg22[%c0_134, %c0_135] : memref<2x32xf32, #tpu.memory_space<vmem>>, vector<2x32xf32>
    tpu.vector_store %arg22[%c0_134, %c0_135], %406 {strides = array<i32>} : memref<2x32xf32, #tpu.memory_space<vmem>>, vector<2x32xf32>,
    %c0_i32_136 = arith.constant 0 : i32
    %417 = arith.cmpi eq, %arg0, %c0_i32_136 : i32
    %418 = arith.extui %417 : i1 to i32
    %c0_i32_137 = arith.constant 0 : i32
    %419 = arith.cmpi ne, %418, %c0_i32_137 : i32
    scf.if %419 {
      %c0_138 = arith.constant 0 : index
      %c0_139 = arith.constant 0 : index
      %c0_140 = arith.constant 0 : index
      %420 = vector.load %arg15[%c0_138, %c0_139, %c0_140] : memref<2x2x32xf32, #tpu.memory_space<vmem>>, vector<1x2x32xf32>
      %421 = vector.shape_cast %420 : vector<1x2x32xf32> to vector<2x32xf32>
      %422 = vector.shape_cast %392 : vector<2x32xf32> to vector<1x2x32xf32>
      tpu.vector_store %arg15[%c0_138, %c0_139, %c0_140], %422 {strides = array<i32>} : memref<2x2x32xf32, #tpu.memory_space<vmem>>, vector<1x2x32xf32>,
      %c1 = arith.constant 1 : index
      %c0_141 = arith.constant 0 : index
      %c0_142 = arith.constant 0 : index
      %423 = vector.load %arg15[%c1, %c0_141, %c0_142] : memref<2x2x32xf32, #tpu.memory_space<vmem>>, vector<1x2x32xf32>
      %424 = vector.shape_cast %423 : vector<1x2x32xf32> to vector<2x32xf32>
      %425 = vector.shape_cast %408 : vector<2x32xf32> to vector<1x2x32xf32>
      tpu.vector_store %arg15[%c1, %c0_141, %c0_142], %425 {strides = array<i32>} : memref<2x2x32xf32, #tpu.memory_space<vmem>>, vector<1x2x32xf32>,
      %c0_143 = arith.constant 0 : index
      %c0_144 = arith.constant 0 : index
      %c0_145 = arith.constant 0 : index
      %426 = vector.load %arg16[%c0_143, %c0_144, %c0_145] : memref<2x2x32xf32, #tpu.memory_space<vmem>>, vector<1x2x32xf32>
      %427 = vector.shape_cast %426 : vector<1x2x32xf32> to vector<2x32xf32>
      %428 = vector.shape_cast %390 : vector<2x32xf32> to vector<1x2x32xf32>
      tpu.vector_store %arg16[%c0_143, %c0_144, %c0_145], %428 {strides = array<i32>} : memref<2x2x32xf32, #tpu.memory_space<vmem>>, vector<1x2x32xf32>,
      %c1_146 = arith.constant 1 : index
      %c0_147 = arith.constant 0 : index
      %c0_148 = arith.constant 0 : index
      %429 = vector.load %arg16[%c1_146, %c0_147, %c0_148] : memref<2x2x32xf32, #tpu.memory_space<vmem>>, vector<1x2x32xf32>
      %430 = vector.shape_cast %429 : vector<1x2x32xf32> to vector<2x32xf32>
      %431 = vector.shape_cast %406 : vector<2x32xf32> to vector<1x2x32xf32>
      tpu.vector_store %arg16[%c1_146, %c0_147, %c0_148], %431 {strides = array<i32>} : memref<2x2x32xf32, #tpu.memory_space<vmem>>, vector<1x2x32xf32>,
    } else {
    }
    return
  }
  func.func @transform_0(%arg0: i32) -> (i32, i32) {
    %c0_i32 = arith.constant 0 : i32
    %c0_i32_0 = arith.constant 0 : i32
    return %arg0, %c0_i32 : i32, i32
  }
  func.func @transform_1(%arg0: i32) -> (i32, i32) {
    %c0_i32 = arith.constant 0 : i32
    %c0_i32_0 = arith.constant 0 : i32
    return %arg0, %c0_i32 : i32, i32
  }
  func.func @transform_2(%arg0: i32) -> (i32, i32) {
    %c0_i32 = arith.constant 0 : i32
    %0 = arith.subi %c0_i32, %arg0 : i32
    %c0_i32_0 = arith.constant 0 : i32
    %c0_i32_1 = arith.constant 0 : i32
    return %0, %c0_i32_0 : i32, i32
  }
  func.func @transform_3(%arg0: i32) -> (i32, i32) {
    %c0_i32 = arith.constant 0 : i32
    %0 = arith.subi %c0_i32, %arg0 : i32
    %c0_i32_0 = arith.constant 0 : i32
    %c0_i32_1 = arith.constant 0 : i32
    return %0, %c0_i32_0 : i32, i32
  }
  func.func @transform_4(%arg0: i32) -> (i32, i32) {
    %c0_i32 = arith.constant 0 : i32
    %c0_i32_0 = arith.constant 0 : i32
    %c0_i32_1 = arith.constant 0 : i32
    return %c0_i32, %c0_i32_0 : i32, i32
  }
  func.func @transform_5(%arg0: i32) -> (i32, i32) {
    %c0_i32 = arith.constant 0 : i32
    %c0_i32_0 = arith.constant 0 : i32
    %c0_i32_1 = arith.constant 0 : i32
    return %c0_i32, %c0_i32_0 : i32, i32
  }
  func.func @transform_6(%arg0: i32) -> (i32, i32) {
    %c0_i32 = arith.constant 0 : i32
    %c0_i32_0 = arith.constant 0 : i32
    %c0_i32_1 = arith.constant 0 : i32
    return %c0_i32, %c0_i32_0 : i32, i32
  }
  func.func @transform_7(%arg0: i32) -> (i32, i32) {
    %c0_i32 = arith.constant 0 : i32
    %c0_i32_0 = arith.constant 0 : i32
    %c0_i32_1 = arith.constant 0 : i32
    return %c0_i32, %c0_i32_0 : i32, i32
  }
  func.func @transform_8(%arg0: i32) -> (i32, i32) {
    %c0_i32 = arith.constant 0 : i32
    %c0_i32_0 = arith.constant 0 : i32
    %c0_i32_1 = arith.constant 0 : i32
    return %c0_i32, %c0_i32_0 : i32, i32
  }
  func.func @transform_9(%arg0: i32) -> (i32, i32) {
    %c0_i32 = arith.constant 0 : i32
    %c0_i32_0 = arith.constant 0 : i32
    %c0_i32_1 = arith.constant 0 : i32
    return %c0_i32, %c0_i32_0 : i32, i32
  }
  func.func @transform_10(%arg0: i32) -> (i32, i32) {
    %c0_i32 = arith.constant 0 : i32
    %c0_i32_0 = arith.constant 0 : i32
    %c0_i32_1 = arith.constant 0 : i32
    return %c0_i32, %c0_i32_0 : i32, i32
  }
  func.func @transform_11(%arg0: i32) -> (i32, i32) {
    %c0_i32 = arith.constant 0 : i32
    %c0_i32_0 = arith.constant 0 : i32
    %c0_i32_1 = arith.constant 0 : i32
    return %c0_i32, %c0_i32_0 : i32, i32
  }
  func.func @transform_12(%arg0: i32) -> (i32, i32) {
    %c0_i32 = arith.constant 0 : i32
    %c0_i32_0 = arith.constant 0 : i32
    return %arg0, %c0_i32 : i32, i32
  }
  func.func @transform_13(%arg0: i32) -> (i32, i32) {
    %c0_i32 = arith.constant 0 : i32
    %0 = arith.subi %c0_i32, %arg0 : i32
    %c0_i32_0 = arith.constant 0 : i32
    %c0_i32_1 = arith.constant 0 : i32
    return %0, %c0_i32_0 : i32, i32
  }
  func.func @transform_14(%arg0: i32) -> (i32, i32, i32) {
    %c0_i32 = arith.constant 0 : i32
    %c0_i32_0 = arith.constant 0 : i32
    %c0_i32_1 = arith.constant 0 : i32
    %c0_i32_2 = arith.constant 0 : i32
    return %c0_i32, %c0_i32_0, %c0_i32_1 : i32, i32, i32
  }
  func.func @transform_15(%arg0: i32) -> (i32, i32, i32) {
    %c0_i32 = arith.constant 0 : i32
    %c0_i32_0 = arith.constant 0 : i32
    %c0_i32_1 = arith.constant 0 : i32
    %c0_i32_2 = arith.constant 0 : i32
    return %c0_i32, %c0_i32_0, %c0_i32_1 : i32, i32, i32
  }
}

module attributes {stable_mosaic.version = 11 : i64} {
  func.func @_bidir_lstm_kernel(%arg0: i32, %arg1: memref<16x32xf32, #tpu.memory_space<vmem>>, %arg2: memref<16x32xf32, #tpu.memory_space<vmem>>, %arg3: memref<16x32xf32, #tpu.memory_space<vmem>>, %arg4: memref<16x32xf32, #tpu.memory_space<vmem>>, %arg5: memref<32x128xf32, #tpu.memory_space<vmem>>, %arg6: memref<32x128xf32, #tpu.memory_space<vmem>>, %arg7: memref<32x128xf32, #tpu.memory_space<vmem>>, %arg8: memref<32x128xf32, #tpu.memory_space<vmem>>, %arg9: memref<1x128xf32, #tpu.memory_space<vmem>>, %arg10: memref<1x128xf32, #tpu.memory_space<vmem>>, %arg11: memref<32x128xf32, #tpu.memory_space<vmem>>, %arg12: memref<32x128xf32, #tpu.memory_space<vmem>>, %arg13: memref<16x32xf32, #tpu.memory_space<vmem>>, %arg14: memref<16x32xf32, #tpu.memory_space<vmem>>, %arg15: memref<2x2x32xf32, #tpu.memory_space<vmem>>, %arg16: memref<2x2x32xf32, #tpu.memory_space<vmem>>, %arg17: memref<16x128xf32, #tpu.memory_space<vmem>>, %arg18: memref<16x128xf32, #tpu.memory_space<vmem>>, %arg19: memref<2x32xf32, #tpu.memory_space<vmem>>, %arg20: memref<2x32xf32, #tpu.memory_space<vmem>>, %arg21: memref<2x32xf32, #tpu.memory_space<vmem>>, %arg22: memref<2x32xf32, #tpu.memory_space<vmem>>) attributes {dimension_semantics = [#tpu.dimension_semantics<arbitrary>], iteration_bounds = array<i64: 1>, scalar_prefetch = 0 : i64, scratch_operands = 6 : i64, tpu.core_type = #tpu.core_type<tc>, window_params = [{transform_indices = @transform_0, window_bounds = array<i64: 16, 32>}, {transform_indices = @transform_1, window_bounds = array<i64: 16, 32>}, {transform_indices = @transform_2, window_bounds = array<i64: 16, 32>}, {transform_indices = @transform_3, window_bounds = array<i64: 16, 32>}, {pipeline_mode = #tpu.pipeline_mode<synchronous>, transform_indices = @transform_4, window_bounds = array<i64: 32, 128>}, {pipeline_mode = #tpu.pipeline_mode<synchronous>, transform_indices = @transform_5, window_bounds = array<i64: 32, 128>}, {pipeline_mode = #tpu.pipeline_mode<synchronous>, transform_indices = @transform_6, window_bounds = array<i64: 32, 128>}, {pipeline_mode = #tpu.pipeline_mode<synchronous>, transform_indices = @transform_7, window_bounds = array<i64: 32, 128>}, {pipeline_mode = #tpu.pipeline_mode<synchronous>, transform_indices = @transform_8, window_bounds = array<i64: 1, 128>}, {pipeline_mode = #tpu.pipeline_mode<synchronous>, transform_indices = @transform_9, window_bounds = array<i64: 1, 128>}, {pipeline_mode = #tpu.pipeline_mode<synchronous>, transform_indices = @transform_10, window_bounds = array<i64: 32, 128>}, {pipeline_mode = #tpu.pipeline_mode<synchronous>, transform_indices = @transform_11, window_bounds = array<i64: 32, 128>}, {transform_indices = @transform_12, window_bounds = array<i64: 16, 32>}, {transform_indices = @transform_13, window_bounds = array<i64: 16, 32>}, {pipeline_mode = #tpu.pipeline_mode<synchronous>, transform_indices = @transform_14, window_bounds = array<i64: 2, 2, 32>}, {pipeline_mode = #tpu.pipeline_mode<synchronous>, transform_indices = @transform_15, window_bounds = array<i64: 2, 2, 32>}]} {
    %c0_i32 = arith.constant 0 : i32
    %0 = arith.cmpi eq, %arg0, %c0_i32 : i32
    %1 = arith.extui %0 : i1 to i32
    %c0_i32_0 = arith.constant 0 : i32
    %2 = arith.cmpi ne, %1, %c0_i32_0 : i32
    scf.if %2 {
      %cst_138 = arith.constant 0.000000e+00 : f32
      %420 = vector.broadcast %cst_138 : f32 to vector<2x32xf32>
      %c0_139 = arith.constant 0 : index
      %c0_140 = arith.constant 0 : index
      %421 = vector.load %arg19[%c0_139, %c0_140] : memref<2x32xf32, #tpu.memory_space<vmem>>, vector<2x32xf32>
      tpu.vector_store %arg19[%c0_139, %c0_140], %420 {strides = array<i32>} : memref<2x32xf32, #tpu.memory_space<vmem>>, vector<2x32xf32>,
      %c0_141 = arith.constant 0 : index
      %c0_142 = arith.constant 0 : index
      %422 = vector.load %arg20[%c0_141, %c0_142] : memref<2x32xf32, #tpu.memory_space<vmem>>, vector<2x32xf32>
      tpu.vector_store %arg20[%c0_141, %c0_142], %420 {strides = array<i32>} : memref<2x32xf32, #tpu.memory_space<vmem>>, vector<2x32xf32>,
      %c0_143 = arith.constant 0 : index
      %c0_144 = arith.constant 0 : index
      %423 = vector.load %arg21[%c0_143, %c0_144] : memref<2x32xf32, #tpu.memory_space<vmem>>, vector<2x32xf32>
      tpu.vector_store %arg21[%c0_143, %c0_144], %420 {strides = array<i32>} : memref<2x32xf32, #tpu.memory_space<vmem>>, vector<2x32xf32>,
      %c0_145 = arith.constant 0 : index
      %c0_146 = arith.constant 0 : index
      %424 = vector.load %arg22[%c0_145, %c0_146] : memref<2x32xf32, #tpu.memory_space<vmem>>, vector<2x32xf32>
      tpu.vector_store %arg22[%c0_145, %c0_146], %420 {strides = array<i32>} : memref<2x32xf32, #tpu.memory_space<vmem>>, vector<2x32xf32>,
    } else {
    }
    %c0 = arith.constant 0 : index
    %c0_1 = arith.constant 0 : index
    %3 = vector.load %arg9[%c0, %c0_1] : memref<1x128xf32, #tpu.memory_space<vmem>>, vector<1x128xf32>
    %c0_2 = arith.constant 0 : index
    %c0_3 = arith.constant 0 : index
    %4 = vector.load %arg1[%c0_2, %c0_3] : memref<16x32xf32, #tpu.memory_space<vmem>>, vector<16x32xf32>
    %c0_4 = arith.constant 0 : index
    %c0_5 = arith.constant 0 : index
    %5 = vector.load %arg5[%c0_4, %c0_5] : memref<32x128xf32, #tpu.memory_space<vmem>>, vector<32x128xf32>
    %cst = arith.constant dense<0.000000e+00> : vector<16x128xf32>
    %6 = tpu.matmul %4, %5, %cst {dimension_numbers = #tpu.dot_dimension_numbers<[1], [0], [0], [1], [0, 0, 1, 1], [], []>} : vector<16x32xf32>, vector<32x128xf32>, vector<16x128xf32> -> vector<16x128xf32>
    %7 = vector.broadcast %3 : vector<1x128xf32> to vector<16x128xf32>
    %8 = arith.addf %7, %6 : vector<16x128xf32>
    %c0_6 = arith.constant 0 : index
    %c0_7 = arith.constant 0 : index
    %9 = vector.load %arg2[%c0_6, %c0_7] : memref<16x32xf32, #tpu.memory_space<vmem>>, vector<16x32xf32>
    %c0_8 = arith.constant 0 : index
    %c0_9 = arith.constant 0 : index
    %10 = vector.load %arg6[%c0_8, %c0_9] : memref<32x128xf32, #tpu.memory_space<vmem>>, vector<32x128xf32>
    %cst_10 = arith.constant dense<0.000000e+00> : vector<16x128xf32>
    %11 = tpu.matmul %9, %10, %cst_10 {dimension_numbers = #tpu.dot_dimension_numbers<[1], [0], [0], [1], [0, 0, 1, 1], [], []>} : vector<16x32xf32>, vector<32x128xf32>, vector<16x128xf32> -> vector<16x128xf32>
    %12 = arith.addf %8, %11 : vector<16x128xf32>
    %c0_11 = arith.constant 0 : index
    %c0_12 = arith.constant 0 : index
    %13 = vector.load %arg17[%c0_11, %c0_12] : memref<16x128xf32, #tpu.memory_space<vmem>>, vector<16x128xf32>
    tpu.vector_store %arg17[%c0_11, %c0_12], %12 {strides = array<i32>} : memref<16x128xf32, #tpu.memory_space<vmem>>, vector<16x128xf32>,
    %c0_13 = arith.constant 0 : index
    %c0_14 = arith.constant 0 : index
    %14 = vector.load %arg10[%c0_13, %c0_14] : memref<1x128xf32, #tpu.memory_space<vmem>>, vector<1x128xf32>
    %c0_15 = arith.constant 0 : index
    %c0_16 = arith.constant 0 : index
    %15 = vector.load %arg3[%c0_15, %c0_16] : memref<16x32xf32, #tpu.memory_space<vmem>>, vector<16x32xf32>
    %c0_17 = arith.constant 0 : index
    %c0_18 = arith.constant 0 : index
    %16 = vector.load %arg7[%c0_17, %c0_18] : memref<32x128xf32, #tpu.memory_space<vmem>>, vector<32x128xf32>
    %cst_19 = arith.constant dense<0.000000e+00> : vector<16x128xf32>
    %17 = tpu.matmul %15, %16, %cst_19 {dimension_numbers = #tpu.dot_dimension_numbers<[1], [0], [0], [1], [0, 0, 1, 1], [], []>} : vector<16x32xf32>, vector<32x128xf32>, vector<16x128xf32> -> vector<16x128xf32>
    %18 = vector.broadcast %14 : vector<1x128xf32> to vector<16x128xf32>
    %19 = arith.addf %18, %17 : vector<16x128xf32>
    %c0_20 = arith.constant 0 : index
    %c0_21 = arith.constant 0 : index
    %20 = vector.load %arg4[%c0_20, %c0_21] : memref<16x32xf32, #tpu.memory_space<vmem>>, vector<16x32xf32>
    %c0_22 = arith.constant 0 : index
    %c0_23 = arith.constant 0 : index
    %21 = vector.load %arg8[%c0_22, %c0_23] : memref<32x128xf32, #tpu.memory_space<vmem>>, vector<32x128xf32>
    %cst_24 = arith.constant dense<0.000000e+00> : vector<16x128xf32>
    %22 = tpu.matmul %20, %21, %cst_24 {dimension_numbers = #tpu.dot_dimension_numbers<[1], [0], [0], [1], [0, 0, 1, 1], [], []>} : vector<16x32xf32>, vector<32x128xf32>, vector<16x128xf32> -> vector<16x128xf32>
    %23 = arith.addf %19, %22 : vector<16x128xf32>
    %c0_25 = arith.constant 0 : index
    %c0_26 = arith.constant 0 : index
    %24 = vector.load %arg18[%c0_25, %c0_26] : memref<16x128xf32, #tpu.memory_space<vmem>>, vector<16x128xf32>
    tpu.vector_store %arg18[%c0_25, %c0_26], %23 {strides = array<i32>} : memref<16x128xf32, #tpu.memory_space<vmem>>, vector<16x128xf32>,
    %c0_27 = arith.constant 0 : index
    %c0_28 = arith.constant 0 : index
    %25 = vector.load %arg11[%c0_27, %c0_28] : memref<32x128xf32, #tpu.memory_space<vmem>>, vector<32x128xf32>
    %c0_29 = arith.constant 0 : index
    %c0_30 = arith.constant 0 : index
    %26 = vector.load %arg12[%c0_29, %c0_30] : memref<32x128xf32, #tpu.memory_space<vmem>>, vector<32x128xf32>
    %27 = tpu.iota {dimensions = array<i32: 1>} : vector<2x128xi32>
    %c64_i32 = arith.constant 64 : i32
    %28 = vector.broadcast %c64_i32 : i32 to vector<2x128xi32>
    %29 = arith.cmpi sge, %27, %28 : vector<2x128xi32>
    %c96_i32 = arith.constant 96 : i32
    %30 = vector.broadcast %c96_i32 : i32 to vector<2x128xi32>
    %31 = arith.cmpi slt, %27, %30 : vector<2x128xi32>
    %32 = arith.andi %29, %31 : vector<2x128xi1>
    %c0_31 = arith.constant 0 : index
    %c0_32 = arith.constant 0 : index
    %33 = vector.load %arg19[%c0_31, %c0_32] : memref<2x32xf32, #tpu.memory_space<vmem>>, vector<2x32xf32>
    %c0_33 = arith.constant 0 : index
    %c0_34 = arith.constant 0 : index
    %34 = vector.load %arg20[%c0_33, %c0_34] : memref<2x32xf32, #tpu.memory_space<vmem>>, vector<2x32xf32>
    %c0_35 = arith.constant 0 : index
    %c0_36 = arith.constant 0 : index
    %35 = vector.load %arg21[%c0_35, %c0_36] : memref<2x32xf32, #tpu.memory_space<vmem>>, vector<2x32xf32>
    %c0_37 = arith.constant 0 : index
    %c0_38 = arith.constant 0 : index
    %36 = vector.load %arg22[%c0_37, %c0_38] : memref<2x32xf32, #tpu.memory_space<vmem>>, vector<2x32xf32>
    %c0_i32_39 = arith.constant 0 : i32
    %c2_i32 = arith.constant 2 : i32
    %37 = arith.muli %c0_i32_39, %c2_i32 : i32
    %c7_i32 = arith.constant 7 : i32
    %38 = arith.subi %c7_i32, %c0_i32_39 : i32
    %c2_i32_40 = arith.constant 2 : i32
    %39 = arith.muli %38, %c2_i32_40 : i32
    %40 = arith.index_cast %37 : i32 to index
    %c0_41 = arith.constant 0 : index
    %41 = vector.load %arg17[%40, %c0_41] : memref<16x128xf32, #tpu.memory_space<vmem>>, vector<2x128xf32>
    %cst_42 = arith.constant dense<0.000000e+00> : vector<2x128xf32>
    %42 = tpu.matmul %33, %25, %cst_42 {dimension_numbers = #tpu.dot_dimension_numbers<[1], [0], [0], [1], [0, 0, 1, 1], [], []>} : vector<2x32xf32>, vector<32x128xf32>, vector<2x128xf32> -> vector<2x128xf32>
    %43 = arith.addf %41, %42 : vector<2x128xf32>
    %44 = arith.index_cast %39 : i32 to index
    %c0_43 = arith.constant 0 : index
    %45 = vector.load %arg18[%44, %c0_43] : memref<16x128xf32, #tpu.memory_space<vmem>>, vector<2x128xf32>
    %cst_44 = arith.constant dense<0.000000e+00> : vector<2x128xf32>
    %46 = tpu.matmul %35, %26, %cst_44 {dimension_numbers = #tpu.dot_dimension_numbers<[1], [0], [0], [1], [0, 0, 1, 1], [], []>} : vector<2x32xf32>, vector<32x128xf32>, vector<2x128xf32> -> vector<2x128xf32>
    %47 = arith.addf %45, %46 : vector<2x128xf32>
    %48 = math.tanh %43 : vector<2x128xf32>
    %49 = arith.negf %43 : vector<2x128xf32>
    %50 = math.exp %49 : vector<2x128xf32>
    %cst_45 = arith.constant 1.000000e+00 : f32
    %51 = vector.broadcast %cst_45 : f32 to vector<2x128xf32>
    %52 = arith.addf %51, %50 : vector<2x128xf32>
    %53 = arith.divf %51, %52 : vector<2x128xf32>
    %54 = arith.select %32, %48, %53 : vector<2x128xi1>, vector<2x128xf32>
    %55 = vector.extract_strided_slice %54 {offsets = [0, 0], sizes = [2, 32], strides = [1, 1]} : vector<2x128xf32> to vector<2x32xf32>
    %56 = vector.extract_strided_slice %54 {offsets = [0, 32], sizes = [2, 32], strides = [1, 1]} : vector<2x128xf32> to vector<2x32xf32>
    %57 = vector.extract_strided_slice %54 {offsets = [0, 64], sizes = [2, 32], strides = [1, 1]} : vector<2x128xf32> to vector<2x32xf32>
    %58 = vector.extract_strided_slice %54 {offsets = [0, 96], sizes = [2, 32], strides = [1, 1]} : vector<2x128xf32> to vector<2x32xf32>
    %59 = arith.mulf %56, %34 : vector<2x32xf32>
    %60 = arith.mulf %55, %57 : vector<2x32xf32>
    %61 = arith.addf %59, %60 : vector<2x32xf32>
    %62 = math.tanh %61 : vector<2x32xf32>
    %63 = arith.mulf %58, %62 : vector<2x32xf32>
    %64 = math.tanh %47 : vector<2x128xf32>
    %65 = arith.negf %47 : vector<2x128xf32>
    %66 = math.exp %65 : vector<2x128xf32>
    %cst_46 = arith.constant 1.000000e+00 : f32
    %67 = vector.broadcast %cst_46 : f32 to vector<2x128xf32>
    %68 = arith.addf %67, %66 : vector<2x128xf32>
    %69 = arith.divf %67, %68 : vector<2x128xf32>
    %70 = arith.select %32, %64, %69 : vector<2x128xi1>, vector<2x128xf32>
    %71 = vector.extract_strided_slice %70 {offsets = [0, 0], sizes = [2, 32], strides = [1, 1]} : vector<2x128xf32> to vector<2x32xf32>
    %72 = vector.extract_strided_slice %70 {offsets = [0, 32], sizes = [2, 32], strides = [1, 1]} : vector<2x128xf32> to vector<2x32xf32>
    %73 = vector.extract_strided_slice %70 {offsets = [0, 64], sizes = [2, 32], strides = [1, 1]} : vector<2x128xf32> to vector<2x32xf32>
    %74 = vector.extract_strided_slice %70 {offsets = [0, 96], sizes = [2, 32], strides = [1, 1]} : vector<2x128xf32> to vector<2x32xf32>
    %75 = arith.mulf %72, %36 : vector<2x32xf32>
    %76 = arith.mulf %71, %73 : vector<2x32xf32>
    %77 = arith.addf %75, %76 : vector<2x32xf32>
    %78 = math.tanh %77 : vector<2x32xf32>
    %79 = arith.mulf %74, %78 : vector<2x32xf32>
    %80 = arith.index_cast %37 : i32 to index
    %c0_47 = arith.constant 0 : index
    %81 = vector.load %arg13[%80, %c0_47] : memref<16x32xf32, #tpu.memory_space<vmem>>, vector<2x32xf32>
    tpu.vector_store %arg13[%80, %c0_47], %63 {strides = array<i32>} : memref<16x32xf32, #tpu.memory_space<vmem>>, vector<2x32xf32>,
    %82 = arith.index_cast %39 : i32 to index
    %c0_48 = arith.constant 0 : index
    %83 = vector.load %arg14[%82, %c0_48] : memref<16x32xf32, #tpu.memory_space<vmem>>, vector<2x32xf32>
    tpu.vector_store %arg14[%82, %c0_48], %79 {strides = array<i32>} : memref<16x32xf32, #tpu.memory_space<vmem>>, vector<2x32xf32>,
    %c1_i32 = arith.constant 1 : i32
    %c2_i32_49 = arith.constant 2 : i32
    %84 = arith.muli %c1_i32, %c2_i32_49 : i32
    %c7_i32_50 = arith.constant 7 : i32
    %85 = arith.subi %c7_i32_50, %c1_i32 : i32
    %c2_i32_51 = arith.constant 2 : i32
    %86 = arith.muli %85, %c2_i32_51 : i32
    %87 = arith.index_cast %84 : i32 to index
    %c0_52 = arith.constant 0 : index
    %88 = vector.load %arg17[%87, %c0_52] : memref<16x128xf32, #tpu.memory_space<vmem>>, vector<2x128xf32>
    %cst_53 = arith.constant dense<0.000000e+00> : vector<2x128xf32>
    %89 = tpu.matmul %63, %25, %cst_53 {dimension_numbers = #tpu.dot_dimension_numbers<[1], [0], [0], [1], [0, 0, 1, 1], [], []>} : vector<2x32xf32>, vector<32x128xf32>, vector<2x128xf32> -> vector<2x128xf32>
    %90 = arith.addf %88, %89 : vector<2x128xf32>
    %91 = arith.index_cast %86 : i32 to index
    %c0_54 = arith.constant 0 : index
    %92 = vector.load %arg18[%91, %c0_54] : memref<16x128xf32, #tpu.memory_space<vmem>>, vector<2x128xf32>
    %cst_55 = arith.constant dense<0.000000e+00> : vector<2x128xf32>
    %93 = tpu.matmul %79, %26, %cst_55 {dimension_numbers = #tpu.dot_dimension_numbers<[1], [0], [0], [1], [0, 0, 1, 1], [], []>} : vector<2x32xf32>, vector<32x128xf32>, vector<2x128xf32> -> vector<2x128xf32>
    %94 = arith.addf %92, %93 : vector<2x128xf32>
    %95 = math.tanh %90 : vector<2x128xf32>
    %96 = arith.negf %90 : vector<2x128xf32>
    %97 = math.exp %96 : vector<2x128xf32>
    %cst_56 = arith.constant 1.000000e+00 : f32
    %98 = vector.broadcast %cst_56 : f32 to vector<2x128xf32>
    %99 = arith.addf %98, %97 : vector<2x128xf32>
    %100 = arith.divf %98, %99 : vector<2x128xf32>
    %101 = arith.select %32, %95, %100 : vector<2x128xi1>, vector<2x128xf32>
    %102 = vector.extract_strided_slice %101 {offsets = [0, 0], sizes = [2, 32], strides = [1, 1]} : vector<2x128xf32> to vector<2x32xf32>
    %103 = vector.extract_strided_slice %101 {offsets = [0, 32], sizes = [2, 32], strides = [1, 1]} : vector<2x128xf32> to vector<2x32xf32>
    %104 = vector.extract_strided_slice %101 {offsets = [0, 64], sizes = [2, 32], strides = [1, 1]} : vector<2x128xf32> to vector<2x32xf32>
    %105 = vector.extract_strided_slice %101 {offsets = [0, 96], sizes = [2, 32], strides = [1, 1]} : vector<2x128xf32> to vector<2x32xf32>
    %106 = arith.mulf %103, %61 : vector<2x32xf32>
    %107 = arith.mulf %102, %104 : vector<2x32xf32>
    %108 = arith.addf %106, %107 : vector<2x32xf32>
    %109 = math.tanh %108 : vector<2x32xf32>
    %110 = arith.mulf %105, %109 : vector<2x32xf32>
    %111 = math.tanh %94 : vector<2x128xf32>
    %112 = arith.negf %94 : vector<2x128xf32>
    %113 = math.exp %112 : vector<2x128xf32>
    %cst_57 = arith.constant 1.000000e+00 : f32
    %114 = vector.broadcast %cst_57 : f32 to vector<2x128xf32>
    %115 = arith.addf %114, %113 : vector<2x128xf32>
    %116 = arith.divf %114, %115 : vector<2x128xf32>
    %117 = arith.select %32, %111, %116 : vector<2x128xi1>, vector<2x128xf32>
    %118 = vector.extract_strided_slice %117 {offsets = [0, 0], sizes = [2, 32], strides = [1, 1]} : vector<2x128xf32> to vector<2x32xf32>
    %119 = vector.extract_strided_slice %117 {offsets = [0, 32], sizes = [2, 32], strides = [1, 1]} : vector<2x128xf32> to vector<2x32xf32>
    %120 = vector.extract_strided_slice %117 {offsets = [0, 64], sizes = [2, 32], strides = [1, 1]} : vector<2x128xf32> to vector<2x32xf32>
    %121 = vector.extract_strided_slice %117 {offsets = [0, 96], sizes = [2, 32], strides = [1, 1]} : vector<2x128xf32> to vector<2x32xf32>
    %122 = arith.mulf %119, %77 : vector<2x32xf32>
    %123 = arith.mulf %118, %120 : vector<2x32xf32>
    %124 = arith.addf %122, %123 : vector<2x32xf32>
    %125 = math.tanh %124 : vector<2x32xf32>
    %126 = arith.mulf %121, %125 : vector<2x32xf32>
    %127 = arith.index_cast %84 : i32 to index
    %c0_58 = arith.constant 0 : index
    %128 = vector.load %arg13[%127, %c0_58] : memref<16x32xf32, #tpu.memory_space<vmem>>, vector<2x32xf32>
    tpu.vector_store %arg13[%127, %c0_58], %110 {strides = array<i32>} : memref<16x32xf32, #tpu.memory_space<vmem>>, vector<2x32xf32>,
    %129 = arith.index_cast %86 : i32 to index
    %c0_59 = arith.constant 0 : index
    %130 = vector.load %arg14[%129, %c0_59] : memref<16x32xf32, #tpu.memory_space<vmem>>, vector<2x32xf32>
    tpu.vector_store %arg14[%129, %c0_59], %126 {strides = array<i32>} : memref<16x32xf32, #tpu.memory_space<vmem>>, vector<2x32xf32>,
    %c2_i32_60 = arith.constant 2 : i32
    %c2_i32_61 = arith.constant 2 : i32
    %131 = arith.muli %c2_i32_60, %c2_i32_61 : i32
    %c7_i32_62 = arith.constant 7 : i32
    %132 = arith.subi %c7_i32_62, %c2_i32_60 : i32
    %c2_i32_63 = arith.constant 2 : i32
    %133 = arith.muli %132, %c2_i32_63 : i32
    %134 = arith.index_cast %131 : i32 to index
    %c0_64 = arith.constant 0 : index
    %135 = vector.load %arg17[%134, %c0_64] : memref<16x128xf32, #tpu.memory_space<vmem>>, vector<2x128xf32>
    %cst_65 = arith.constant dense<0.000000e+00> : vector<2x128xf32>
    %136 = tpu.matmul %110, %25, %cst_65 {dimension_numbers = #tpu.dot_dimension_numbers<[1], [0], [0], [1], [0, 0, 1, 1], [], []>} : vector<2x32xf32>, vector<32x128xf32>, vector<2x128xf32> -> vector<2x128xf32>
    %137 = arith.addf %135, %136 : vector<2x128xf32>
    %138 = arith.index_cast %133 : i32 to index
    %c0_66 = arith.constant 0 : index
    %139 = vector.load %arg18[%138, %c0_66] : memref<16x128xf32, #tpu.memory_space<vmem>>, vector<2x128xf32>
    %cst_67 = arith.constant dense<0.000000e+00> : vector<2x128xf32>
    %140 = tpu.matmul %126, %26, %cst_67 {dimension_numbers = #tpu.dot_dimension_numbers<[1], [0], [0], [1], [0, 0, 1, 1], [], []>} : vector<2x32xf32>, vector<32x128xf32>, vector<2x128xf32> -> vector<2x128xf32>
    %141 = arith.addf %139, %140 : vector<2x128xf32>
    %142 = math.tanh %137 : vector<2x128xf32>
    %143 = arith.negf %137 : vector<2x128xf32>
    %144 = math.exp %143 : vector<2x128xf32>
    %cst_68 = arith.constant 1.000000e+00 : f32
    %145 = vector.broadcast %cst_68 : f32 to vector<2x128xf32>
    %146 = arith.addf %145, %144 : vector<2x128xf32>
    %147 = arith.divf %145, %146 : vector<2x128xf32>
    %148 = arith.select %32, %142, %147 : vector<2x128xi1>, vector<2x128xf32>
    %149 = vector.extract_strided_slice %148 {offsets = [0, 0], sizes = [2, 32], strides = [1, 1]} : vector<2x128xf32> to vector<2x32xf32>
    %150 = vector.extract_strided_slice %148 {offsets = [0, 32], sizes = [2, 32], strides = [1, 1]} : vector<2x128xf32> to vector<2x32xf32>
    %151 = vector.extract_strided_slice %148 {offsets = [0, 64], sizes = [2, 32], strides = [1, 1]} : vector<2x128xf32> to vector<2x32xf32>
    %152 = vector.extract_strided_slice %148 {offsets = [0, 96], sizes = [2, 32], strides = [1, 1]} : vector<2x128xf32> to vector<2x32xf32>
    %153 = arith.mulf %150, %108 : vector<2x32xf32>
    %154 = arith.mulf %149, %151 : vector<2x32xf32>
    %155 = arith.addf %153, %154 : vector<2x32xf32>
    %156 = math.tanh %155 : vector<2x32xf32>
    %157 = arith.mulf %152, %156 : vector<2x32xf32>
    %158 = math.tanh %141 : vector<2x128xf32>
    %159 = arith.negf %141 : vector<2x128xf32>
    %160 = math.exp %159 : vector<2x128xf32>
    %cst_69 = arith.constant 1.000000e+00 : f32
    %161 = vector.broadcast %cst_69 : f32 to vector<2x128xf32>
    %162 = arith.addf %161, %160 : vector<2x128xf32>
    %163 = arith.divf %161, %162 : vector<2x128xf32>
    %164 = arith.select %32, %158, %163 : vector<2x128xi1>, vector<2x128xf32>
    %165 = vector.extract_strided_slice %164 {offsets = [0, 0], sizes = [2, 32], strides = [1, 1]} : vector<2x128xf32> to vector<2x32xf32>
    %166 = vector.extract_strided_slice %164 {offsets = [0, 32], sizes = [2, 32], strides = [1, 1]} : vector<2x128xf32> to vector<2x32xf32>
    %167 = vector.extract_strided_slice %164 {offsets = [0, 64], sizes = [2, 32], strides = [1, 1]} : vector<2x128xf32> to vector<2x32xf32>
    %168 = vector.extract_strided_slice %164 {offsets = [0, 96], sizes = [2, 32], strides = [1, 1]} : vector<2x128xf32> to vector<2x32xf32>
    %169 = arith.mulf %166, %124 : vector<2x32xf32>
    %170 = arith.mulf %165, %167 : vector<2x32xf32>
    %171 = arith.addf %169, %170 : vector<2x32xf32>
    %172 = math.tanh %171 : vector<2x32xf32>
    %173 = arith.mulf %168, %172 : vector<2x32xf32>
    %174 = arith.index_cast %131 : i32 to index
    %c0_70 = arith.constant 0 : index
    %175 = vector.load %arg13[%174, %c0_70] : memref<16x32xf32, #tpu.memory_space<vmem>>, vector<2x32xf32>
    tpu.vector_store %arg13[%174, %c0_70], %157 {strides = array<i32>} : memref<16x32xf32, #tpu.memory_space<vmem>>, vector<2x32xf32>,
    %176 = arith.index_cast %133 : i32 to index
    %c0_71 = arith.constant 0 : index
    %177 = vector.load %arg14[%176, %c0_71] : memref<16x32xf32, #tpu.memory_space<vmem>>, vector<2x32xf32>
    tpu.vector_store %arg14[%176, %c0_71], %173 {strides = array<i32>} : memref<16x32xf32, #tpu.memory_space<vmem>>, vector<2x32xf32>,
    %c3_i32 = arith.constant 3 : i32
    %c2_i32_72 = arith.constant 2 : i32
    %178 = arith.muli %c3_i32, %c2_i32_72 : i32
    %c7_i32_73 = arith.constant 7 : i32
    %179 = arith.subi %c7_i32_73, %c3_i32 : i32
    %c2_i32_74 = arith.constant 2 : i32
    %180 = arith.muli %179, %c2_i32_74 : i32
    %181 = arith.index_cast %178 : i32 to index
    %c0_75 = arith.constant 0 : index
    %182 = vector.load %arg17[%181, %c0_75] : memref<16x128xf32, #tpu.memory_space<vmem>>, vector<2x128xf32>
    %cst_76 = arith.constant dense<0.000000e+00> : vector<2x128xf32>
    %183 = tpu.matmul %157, %25, %cst_76 {dimension_numbers = #tpu.dot_dimension_numbers<[1], [0], [0], [1], [0, 0, 1, 1], [], []>} : vector<2x32xf32>, vector<32x128xf32>, vector<2x128xf32> -> vector<2x128xf32>
    %184 = arith.addf %182, %183 : vector<2x128xf32>
    %185 = arith.index_cast %180 : i32 to index
    %c0_77 = arith.constant 0 : index
    %186 = vector.load %arg18[%185, %c0_77] : memref<16x128xf32, #tpu.memory_space<vmem>>, vector<2x128xf32>
    %cst_78 = arith.constant dense<0.000000e+00> : vector<2x128xf32>
    %187 = tpu.matmul %173, %26, %cst_78 {dimension_numbers = #tpu.dot_dimension_numbers<[1], [0], [0], [1], [0, 0, 1, 1], [], []>} : vector<2x32xf32>, vector<32x128xf32>, vector<2x128xf32> -> vector<2x128xf32>
    %188 = arith.addf %186, %187 : vector<2x128xf32>
    %189 = math.tanh %184 : vector<2x128xf32>
    %190 = arith.negf %184 : vector<2x128xf32>
    %191 = math.exp %190 : vector<2x128xf32>
    %cst_79 = arith.constant 1.000000e+00 : f32
    %192 = vector.broadcast %cst_79 : f32 to vector<2x128xf32>
    %193 = arith.addf %192, %191 : vector<2x128xf32>
    %194 = arith.divf %192, %193 : vector<2x128xf32>
    %195 = arith.select %32, %189, %194 : vector<2x128xi1>, vector<2x128xf32>
    %196 = vector.extract_strided_slice %195 {offsets = [0, 0], sizes = [2, 32], strides = [1, 1]} : vector<2x128xf32> to vector<2x32xf32>
    %197 = vector.extract_strided_slice %195 {offsets = [0, 32], sizes = [2, 32], strides = [1, 1]} : vector<2x128xf32> to vector<2x32xf32>
    %198 = vector.extract_strided_slice %195 {offsets = [0, 64], sizes = [2, 32], strides = [1, 1]} : vector<2x128xf32> to vector<2x32xf32>
    %199 = vector.extract_strided_slice %195 {offsets = [0, 96], sizes = [2, 32], strides = [1, 1]} : vector<2x128xf32> to vector<2x32xf32>
    %200 = arith.mulf %197, %155 : vector<2x32xf32>
    %201 = arith.mulf %196, %198 : vector<2x32xf32>
    %202 = arith.addf %200, %201 : vector<2x32xf32>
    %203 = math.tanh %202 : vector<2x32xf32>
    %204 = arith.mulf %199, %203 : vector<2x32xf32>
    %205 = math.tanh %188 : vector<2x128xf32>
    %206 = arith.negf %188 : vector<2x128xf32>
    %207 = math.exp %206 : vector<2x128xf32>
    %cst_80 = arith.constant 1.000000e+00 : f32
    %208 = vector.broadcast %cst_80 : f32 to vector<2x128xf32>
    %209 = arith.addf %208, %207 : vector<2x128xf32>
    %210 = arith.divf %208, %209 : vector<2x128xf32>
    %211 = arith.select %32, %205, %210 : vector<2x128xi1>, vector<2x128xf32>
    %212 = vector.extract_strided_slice %211 {offsets = [0, 0], sizes = [2, 32], strides = [1, 1]} : vector<2x128xf32> to vector<2x32xf32>
    %213 = vector.extract_strided_slice %211 {offsets = [0, 32], sizes = [2, 32], strides = [1, 1]} : vector<2x128xf32> to vector<2x32xf32>
    %214 = vector.extract_strided_slice %211 {offsets = [0, 64], sizes = [2, 32], strides = [1, 1]} : vector<2x128xf32> to vector<2x32xf32>
    %215 = vector.extract_strided_slice %211 {offsets = [0, 96], sizes = [2, 32], strides = [1, 1]} : vector<2x128xf32> to vector<2x32xf32>
    %216 = arith.mulf %213, %171 : vector<2x32xf32>
    %217 = arith.mulf %212, %214 : vector<2x32xf32>
    %218 = arith.addf %216, %217 : vector<2x32xf32>
    %219 = math.tanh %218 : vector<2x32xf32>
    %220 = arith.mulf %215, %219 : vector<2x32xf32>
    %221 = arith.index_cast %178 : i32 to index
    %c0_81 = arith.constant 0 : index
    %222 = vector.load %arg13[%221, %c0_81] : memref<16x32xf32, #tpu.memory_space<vmem>>, vector<2x32xf32>
    tpu.vector_store %arg13[%221, %c0_81], %204 {strides = array<i32>} : memref<16x32xf32, #tpu.memory_space<vmem>>, vector<2x32xf32>,
    %223 = arith.index_cast %180 : i32 to index
    %c0_82 = arith.constant 0 : index
    %224 = vector.load %arg14[%223, %c0_82] : memref<16x32xf32, #tpu.memory_space<vmem>>, vector<2x32xf32>
    tpu.vector_store %arg14[%223, %c0_82], %220 {strides = array<i32>} : memref<16x32xf32, #tpu.memory_space<vmem>>, vector<2x32xf32>,
    %c4_i32 = arith.constant 4 : i32
    %c2_i32_83 = arith.constant 2 : i32
    %225 = arith.muli %c4_i32, %c2_i32_83 : i32
    %c7_i32_84 = arith.constant 7 : i32
    %226 = arith.subi %c7_i32_84, %c4_i32 : i32
    %c2_i32_85 = arith.constant 2 : i32
    %227 = arith.muli %226, %c2_i32_85 : i32
    %228 = arith.index_cast %225 : i32 to index
    %c0_86 = arith.constant 0 : index
    %229 = vector.load %arg17[%228, %c0_86] : memref<16x128xf32, #tpu.memory_space<vmem>>, vector<2x128xf32>
    %cst_87 = arith.constant dense<0.000000e+00> : vector<2x128xf32>
    %230 = tpu.matmul %204, %25, %cst_87 {dimension_numbers = #tpu.dot_dimension_numbers<[1], [0], [0], [1], [0, 0, 1, 1], [], []>} : vector<2x32xf32>, vector<32x128xf32>, vector<2x128xf32> -> vector<2x128xf32>
    %231 = arith.addf %229, %230 : vector<2x128xf32>
    %232 = arith.index_cast %227 : i32 to index
    %c0_88 = arith.constant 0 : index
    %233 = vector.load %arg18[%232, %c0_88] : memref<16x128xf32, #tpu.memory_space<vmem>>, vector<2x128xf32>
    %cst_89 = arith.constant dense<0.000000e+00> : vector<2x128xf32>
    %234 = tpu.matmul %220, %26, %cst_89 {dimension_numbers = #tpu.dot_dimension_numbers<[1], [0], [0], [1], [0, 0, 1, 1], [], []>} : vector<2x32xf32>, vector<32x128xf32>, vector<2x128xf32> -> vector<2x128xf32>
    %235 = arith.addf %233, %234 : vector<2x128xf32>
    %236 = math.tanh %231 : vector<2x128xf32>
    %237 = arith.negf %231 : vector<2x128xf32>
    %238 = math.exp %237 : vector<2x128xf32>
    %cst_90 = arith.constant 1.000000e+00 : f32
    %239 = vector.broadcast %cst_90 : f32 to vector<2x128xf32>
    %240 = arith.addf %239, %238 : vector<2x128xf32>
    %241 = arith.divf %239, %240 : vector<2x128xf32>
    %242 = arith.select %32, %236, %241 : vector<2x128xi1>, vector<2x128xf32>
    %243 = vector.extract_strided_slice %242 {offsets = [0, 0], sizes = [2, 32], strides = [1, 1]} : vector<2x128xf32> to vector<2x32xf32>
    %244 = vector.extract_strided_slice %242 {offsets = [0, 32], sizes = [2, 32], strides = [1, 1]} : vector<2x128xf32> to vector<2x32xf32>
    %245 = vector.extract_strided_slice %242 {offsets = [0, 64], sizes = [2, 32], strides = [1, 1]} : vector<2x128xf32> to vector<2x32xf32>
    %246 = vector.extract_strided_slice %242 {offsets = [0, 96], sizes = [2, 32], strides = [1, 1]} : vector<2x128xf32> to vector<2x32xf32>
    %247 = arith.mulf %244, %202 : vector<2x32xf32>
    %248 = arith.mulf %243, %245 : vector<2x32xf32>
    %249 = arith.addf %247, %248 : vector<2x32xf32>
    %250 = math.tanh %249 : vector<2x32xf32>
    %251 = arith.mulf %246, %250 : vector<2x32xf32>
    %252 = math.tanh %235 : vector<2x128xf32>
    %253 = arith.negf %235 : vector<2x128xf32>
    %254 = math.exp %253 : vector<2x128xf32>
    %cst_91 = arith.constant 1.000000e+00 : f32
    %255 = vector.broadcast %cst_91 : f32 to vector<2x128xf32>
    %256 = arith.addf %255, %254 : vector<2x128xf32>
    %257 = arith.divf %255, %256 : vector<2x128xf32>
    %258 = arith.select %32, %252, %257 : vector<2x128xi1>, vector<2x128xf32>
    %259 = vector.extract_strided_slice %258 {offsets = [0, 0], sizes = [2, 32], strides = [1, 1]} : vector<2x128xf32> to vector<2x32xf32>
    %260 = vector.extract_strided_slice %258 {offsets = [0, 32], sizes = [2, 32], strides = [1, 1]} : vector<2x128xf32> to vector<2x32xf32>
    %261 = vector.extract_strided_slice %258 {offsets = [0, 64], sizes = [2, 32], strides = [1, 1]} : vector<2x128xf32> to vector<2x32xf32>
    %262 = vector.extract_strided_slice %258 {offsets = [0, 96], sizes = [2, 32], strides = [1, 1]} : vector<2x128xf32> to vector<2x32xf32>
    %263 = arith.mulf %260, %218 : vector<2x32xf32>
    %264 = arith.mulf %259, %261 : vector<2x32xf32>
    %265 = arith.addf %263, %264 : vector<2x32xf32>
    %266 = math.tanh %265 : vector<2x32xf32>
    %267 = arith.mulf %262, %266 : vector<2x32xf32>
    %268 = arith.index_cast %225 : i32 to index
    %c0_92 = arith.constant 0 : index
    %269 = vector.load %arg13[%268, %c0_92] : memref<16x32xf32, #tpu.memory_space<vmem>>, vector<2x32xf32>
    tpu.vector_store %arg13[%268, %c0_92], %251 {strides = array<i32>} : memref<16x32xf32, #tpu.memory_space<vmem>>, vector<2x32xf32>,
    %270 = arith.index_cast %227 : i32 to index
    %c0_93 = arith.constant 0 : index
    %271 = vector.load %arg14[%270, %c0_93] : memref<16x32xf32, #tpu.memory_space<vmem>>, vector<2x32xf32>
    tpu.vector_store %arg14[%270, %c0_93], %267 {strides = array<i32>} : memref<16x32xf32, #tpu.memory_space<vmem>>, vector<2x32xf32>,
    %c5_i32 = arith.constant 5 : i32
    %c2_i32_94 = arith.constant 2 : i32
    %272 = arith.muli %c5_i32, %c2_i32_94 : i32
    %c7_i32_95 = arith.constant 7 : i32
    %273 = arith.subi %c7_i32_95, %c5_i32 : i32
    %c2_i32_96 = arith.constant 2 : i32
    %274 = arith.muli %273, %c2_i32_96 : i32
    %275 = arith.index_cast %272 : i32 to index
    %c0_97 = arith.constant 0 : index
    %276 = vector.load %arg17[%275, %c0_97] : memref<16x128xf32, #tpu.memory_space<vmem>>, vector<2x128xf32>
    %cst_98 = arith.constant dense<0.000000e+00> : vector<2x128xf32>
    %277 = tpu.matmul %251, %25, %cst_98 {dimension_numbers = #tpu.dot_dimension_numbers<[1], [0], [0], [1], [0, 0, 1, 1], [], []>} : vector<2x32xf32>, vector<32x128xf32>, vector<2x128xf32> -> vector<2x128xf32>
    %278 = arith.addf %276, %277 : vector<2x128xf32>
    %279 = arith.index_cast %274 : i32 to index
    %c0_99 = arith.constant 0 : index
    %280 = vector.load %arg18[%279, %c0_99] : memref<16x128xf32, #tpu.memory_space<vmem>>, vector<2x128xf32>
    %cst_100 = arith.constant dense<0.000000e+00> : vector<2x128xf32>
    %281 = tpu.matmul %267, %26, %cst_100 {dimension_numbers = #tpu.dot_dimension_numbers<[1], [0], [0], [1], [0, 0, 1, 1], [], []>} : vector<2x32xf32>, vector<32x128xf32>, vector<2x128xf32> -> vector<2x128xf32>
    %282 = arith.addf %280, %281 : vector<2x128xf32>
    %283 = math.tanh %278 : vector<2x128xf32>
    %284 = arith.negf %278 : vector<2x128xf32>
    %285 = math.exp %284 : vector<2x128xf32>
    %cst_101 = arith.constant 1.000000e+00 : f32
    %286 = vector.broadcast %cst_101 : f32 to vector<2x128xf32>
    %287 = arith.addf %286, %285 : vector<2x128xf32>
    %288 = arith.divf %286, %287 : vector<2x128xf32>
    %289 = arith.select %32, %283, %288 : vector<2x128xi1>, vector<2x128xf32>
    %290 = vector.extract_strided_slice %289 {offsets = [0, 0], sizes = [2, 32], strides = [1, 1]} : vector<2x128xf32> to vector<2x32xf32>
    %291 = vector.extract_strided_slice %289 {offsets = [0, 32], sizes = [2, 32], strides = [1, 1]} : vector<2x128xf32> to vector<2x32xf32>
    %292 = vector.extract_strided_slice %289 {offsets = [0, 64], sizes = [2, 32], strides = [1, 1]} : vector<2x128xf32> to vector<2x32xf32>
    %293 = vector.extract_strided_slice %289 {offsets = [0, 96], sizes = [2, 32], strides = [1, 1]} : vector<2x128xf32> to vector<2x32xf32>
    %294 = arith.mulf %291, %249 : vector<2x32xf32>
    %295 = arith.mulf %290, %292 : vector<2x32xf32>
    %296 = arith.addf %294, %295 : vector<2x32xf32>
    %297 = math.tanh %296 : vector<2x32xf32>
    %298 = arith.mulf %293, %297 : vector<2x32xf32>
    %299 = math.tanh %282 : vector<2x128xf32>
    %300 = arith.negf %282 : vector<2x128xf32>
    %301 = math.exp %300 : vector<2x128xf32>
    %cst_102 = arith.constant 1.000000e+00 : f32
    %302 = vector.broadcast %cst_102 : f32 to vector<2x128xf32>
    %303 = arith.addf %302, %301 : vector<2x128xf32>
    %304 = arith.divf %302, %303 : vector<2x128xf32>
    %305 = arith.select %32, %299, %304 : vector<2x128xi1>, vector<2x128xf32>
    %306 = vector.extract_strided_slice %305 {offsets = [0, 0], sizes = [2, 32], strides = [1, 1]} : vector<2x128xf32> to vector<2x32xf32>
    %307 = vector.extract_strided_slice %305 {offsets = [0, 32], sizes = [2, 32], strides = [1, 1]} : vector<2x128xf32> to vector<2x32xf32>
    %308 = vector.extract_strided_slice %305 {offsets = [0, 64], sizes = [2, 32], strides = [1, 1]} : vector<2x128xf32> to vector<2x32xf32>
    %309 = vector.extract_strided_slice %305 {offsets = [0, 96], sizes = [2, 32], strides = [1, 1]} : vector<2x128xf32> to vector<2x32xf32>
    %310 = arith.mulf %307, %265 : vector<2x32xf32>
    %311 = arith.mulf %306, %308 : vector<2x32xf32>
    %312 = arith.addf %310, %311 : vector<2x32xf32>
    %313 = math.tanh %312 : vector<2x32xf32>
    %314 = arith.mulf %309, %313 : vector<2x32xf32>
    %315 = arith.index_cast %272 : i32 to index
    %c0_103 = arith.constant 0 : index
    %316 = vector.load %arg13[%315, %c0_103] : memref<16x32xf32, #tpu.memory_space<vmem>>, vector<2x32xf32>
    tpu.vector_store %arg13[%315, %c0_103], %298 {strides = array<i32>} : memref<16x32xf32, #tpu.memory_space<vmem>>, vector<2x32xf32>,
    %317 = arith.index_cast %274 : i32 to index
    %c0_104 = arith.constant 0 : index
    %318 = vector.load %arg14[%317, %c0_104] : memref<16x32xf32, #tpu.memory_space<vmem>>, vector<2x32xf32>
    tpu.vector_store %arg14[%317, %c0_104], %314 {strides = array<i32>} : memref<16x32xf32, #tpu.memory_space<vmem>>, vector<2x32xf32>,
    %c6_i32 = arith.constant 6 : i32
    %c2_i32_105 = arith.constant 2 : i32
    %319 = arith.muli %c6_i32, %c2_i32_105 : i32
    %c7_i32_106 = arith.constant 7 : i32
    %320 = arith.subi %c7_i32_106, %c6_i32 : i32
    %c2_i32_107 = arith.constant 2 : i32
    %321 = arith.muli %320, %c2_i32_107 : i32
    %322 = arith.index_cast %319 : i32 to index
    %c0_108 = arith.constant 0 : index
    %323 = vector.load %arg17[%322, %c0_108] : memref<16x128xf32, #tpu.memory_space<vmem>>, vector<2x128xf32>
    %cst_109 = arith.constant dense<0.000000e+00> : vector<2x128xf32>
    %324 = tpu.matmul %298, %25, %cst_109 {dimension_numbers = #tpu.dot_dimension_numbers<[1], [0], [0], [1], [0, 0, 1, 1], [], []>} : vector<2x32xf32>, vector<32x128xf32>, vector<2x128xf32> -> vector<2x128xf32>
    %325 = arith.addf %323, %324 : vector<2x128xf32>
    %326 = arith.index_cast %321 : i32 to index
    %c0_110 = arith.constant 0 : index
    %327 = vector.load %arg18[%326, %c0_110] : memref<16x128xf32, #tpu.memory_space<vmem>>, vector<2x128xf32>
    %cst_111 = arith.constant dense<0.000000e+00> : vector<2x128xf32>
    %328 = tpu.matmul %314, %26, %cst_111 {dimension_numbers = #tpu.dot_dimension_numbers<[1], [0], [0], [1], [0, 0, 1, 1], [], []>} : vector<2x32xf32>, vector<32x128xf32>, vector<2x128xf32> -> vector<2x128xf32>
    %329 = arith.addf %327, %328 : vector<2x128xf32>
    %330 = math.tanh %325 : vector<2x128xf32>
    %331 = arith.negf %325 : vector<2x128xf32>
    %332 = math.exp %331 : vector<2x128xf32>
    %cst_112 = arith.constant 1.000000e+00 : f32
    %333 = vector.broadcast %cst_112 : f32 to vector<2x128xf32>
    %334 = arith.addf %333, %332 : vector<2x128xf32>
    %335 = arith.divf %333, %334 : vector<2x128xf32>
    %336 = arith.select %32, %330, %335 : vector<2x128xi1>, vector<2x128xf32>
    %337 = vector.extract_strided_slice %336 {offsets = [0, 0], sizes = [2, 32], strides = [1, 1]} : vector<2x128xf32> to vector<2x32xf32>
    %338 = vector.extract_strided_slice %336 {offsets = [0, 32], sizes = [2, 32], strides = [1, 1]} : vector<2x128xf32> to vector<2x32xf32>
    %339 = vector.extract_strided_slice %336 {offsets = [0, 64], sizes = [2, 32], strides = [1, 1]} : vector<2x128xf32> to vector<2x32xf32>
    %340 = vector.extract_strided_slice %336 {offsets = [0, 96], sizes = [2, 32], strides = [1, 1]} : vector<2x128xf32> to vector<2x32xf32>
    %341 = arith.mulf %338, %296 : vector<2x32xf32>
    %342 = arith.mulf %337, %339 : vector<2x32xf32>
    %343 = arith.addf %341, %342 : vector<2x32xf32>
    %344 = math.tanh %343 : vector<2x32xf32>
    %345 = arith.mulf %340, %344 : vector<2x32xf32>
    %346 = math.tanh %329 : vector<2x128xf32>
    %347 = arith.negf %329 : vector<2x128xf32>
    %348 = math.exp %347 : vector<2x128xf32>
    %cst_113 = arith.constant 1.000000e+00 : f32
    %349 = vector.broadcast %cst_113 : f32 to vector<2x128xf32>
    %350 = arith.addf %349, %348 : vector<2x128xf32>
    %351 = arith.divf %349, %350 : vector<2x128xf32>
    %352 = arith.select %32, %346, %351 : vector<2x128xi1>, vector<2x128xf32>
    %353 = vector.extract_strided_slice %352 {offsets = [0, 0], sizes = [2, 32], strides = [1, 1]} : vector<2x128xf32> to vector<2x32xf32>
    %354 = vector.extract_strided_slice %352 {offsets = [0, 32], sizes = [2, 32], strides = [1, 1]} : vector<2x128xf32> to vector<2x32xf32>
    %355 = vector.extract_strided_slice %352 {offsets = [0, 64], sizes = [2, 32], strides = [1, 1]} : vector<2x128xf32> to vector<2x32xf32>
    %356 = vector.extract_strided_slice %352 {offsets = [0, 96], sizes = [2, 32], strides = [1, 1]} : vector<2x128xf32> to vector<2x32xf32>
    %357 = arith.mulf %354, %312 : vector<2x32xf32>
    %358 = arith.mulf %353, %355 : vector<2x32xf32>
    %359 = arith.addf %357, %358 : vector<2x32xf32>
    %360 = math.tanh %359 : vector<2x32xf32>
    %361 = arith.mulf %356, %360 : vector<2x32xf32>
    %362 = arith.index_cast %319 : i32 to index
    %c0_114 = arith.constant 0 : index
    %363 = vector.load %arg13[%362, %c0_114] : memref<16x32xf32, #tpu.memory_space<vmem>>, vector<2x32xf32>
    tpu.vector_store %arg13[%362, %c0_114], %345 {strides = array<i32>} : memref<16x32xf32, #tpu.memory_space<vmem>>, vector<2x32xf32>,
    %364 = arith.index_cast %321 : i32 to index
    %c0_115 = arith.constant 0 : index
    %365 = vector.load %arg14[%364, %c0_115] : memref<16x32xf32, #tpu.memory_space<vmem>>, vector<2x32xf32>
    tpu.vector_store %arg14[%364, %c0_115], %361 {strides = array<i32>} : memref<16x32xf32, #tpu.memory_space<vmem>>, vector<2x32xf32>,
    %c7_i32_116 = arith.constant 7 : i32
    %c2_i32_117 = arith.constant 2 : i32
    %366 = arith.muli %c7_i32_116, %c2_i32_117 : i32
    %c7_i32_118 = arith.constant 7 : i32
    %367 = arith.subi %c7_i32_118, %c7_i32_116 : i32
    %c2_i32_119 = arith.constant 2 : i32
    %368 = arith.muli %367, %c2_i32_119 : i32
    %369 = arith.index_cast %366 : i32 to index
    %c0_120 = arith.constant 0 : index
    %370 = vector.load %arg17[%369, %c0_120] : memref<16x128xf32, #tpu.memory_space<vmem>>, vector<2x128xf32>
    %cst_121 = arith.constant dense<0.000000e+00> : vector<2x128xf32>
    %371 = tpu.matmul %345, %25, %cst_121 {dimension_numbers = #tpu.dot_dimension_numbers<[1], [0], [0], [1], [0, 0, 1, 1], [], []>} : vector<2x32xf32>, vector<32x128xf32>, vector<2x128xf32> -> vector<2x128xf32>
    %372 = arith.addf %370, %371 : vector<2x128xf32>
    %373 = arith.index_cast %368 : i32 to index
    %c0_122 = arith.constant 0 : index
    %374 = vector.load %arg18[%373, %c0_122] : memref<16x128xf32, #tpu.memory_space<vmem>>, vector<2x128xf32>
    %cst_123 = arith.constant dense<0.000000e+00> : vector<2x128xf32>
    %375 = tpu.matmul %361, %26, %cst_123 {dimension_numbers = #tpu.dot_dimension_numbers<[1], [0], [0], [1], [0, 0, 1, 1], [], []>} : vector<2x32xf32>, vector<32x128xf32>, vector<2x128xf32> -> vector<2x128xf32>
    %376 = arith.addf %374, %375 : vector<2x128xf32>
    %377 = math.tanh %372 : vector<2x128xf32>
    %378 = arith.negf %372 : vector<2x128xf32>
    %379 = math.exp %378 : vector<2x128xf32>
    %cst_124 = arith.constant 1.000000e+00 : f32
    %380 = vector.broadcast %cst_124 : f32 to vector<2x128xf32>
    %381 = arith.addf %380, %379 : vector<2x128xf32>
    %382 = arith.divf %380, %381 : vector<2x128xf32>
    %383 = arith.select %32, %377, %382 : vector<2x128xi1>, vector<2x128xf32>
    %384 = vector.extract_strided_slice %383 {offsets = [0, 0], sizes = [2, 32], strides = [1, 1]} : vector<2x128xf32> to vector<2x32xf32>
    %385 = vector.extract_strided_slice %383 {offsets = [0, 32], sizes = [2, 32], strides = [1, 1]} : vector<2x128xf32> to vector<2x32xf32>
    %386 = vector.extract_strided_slice %383 {offsets = [0, 64], sizes = [2, 32], strides = [1, 1]} : vector<2x128xf32> to vector<2x32xf32>
    %387 = vector.extract_strided_slice %383 {offsets = [0, 96], sizes = [2, 32], strides = [1, 1]} : vector<2x128xf32> to vector<2x32xf32>
    %388 = arith.mulf %385, %343 : vector<2x32xf32>
    %389 = arith.mulf %384, %386 : vector<2x32xf32>
    %390 = arith.addf %388, %389 : vector<2x32xf32>
    %391 = math.tanh %390 : vector<2x32xf32>
    %392 = arith.mulf %387, %391 : vector<2x32xf32>
    %393 = math.tanh %376 : vector<2x128xf32>
    %394 = arith.negf %376 : vector<2x128xf32>
    %395 = math.exp %394 : vector<2x128xf32>
    %cst_125 = arith.constant 1.000000e+00 : f32
    %396 = vector.broadcast %cst_125 : f32 to vector<2x128xf32>
    %397 = arith.addf %396, %395 : vector<2x128xf32>
    %398 = arith.divf %396, %397 : vector<2x128xf32>
    %399 = arith.select %32, %393, %398 : vector<2x128xi1>, vector<2x128xf32>
    %400 = vector.extract_strided_slice %399 {offsets = [0, 0], sizes = [2, 32], strides = [1, 1]} : vector<2x128xf32> to vector<2x32xf32>
    %401 = vector.extract_strided_slice %399 {offsets = [0, 32], sizes = [2, 32], strides = [1, 1]} : vector<2x128xf32> to vector<2x32xf32>
    %402 = vector.extract_strided_slice %399 {offsets = [0, 64], sizes = [2, 32], strides = [1, 1]} : vector<2x128xf32> to vector<2x32xf32>
    %403 = vector.extract_strided_slice %399 {offsets = [0, 96], sizes = [2, 32], strides = [1, 1]} : vector<2x128xf32> to vector<2x32xf32>
    %404 = arith.mulf %401, %359 : vector<2x32xf32>
    %405 = arith.mulf %400, %402 : vector<2x32xf32>
    %406 = arith.addf %404, %405 : vector<2x32xf32>
    %407 = math.tanh %406 : vector<2x32xf32>
    %408 = arith.mulf %403, %407 : vector<2x32xf32>
    %409 = arith.index_cast %366 : i32 to index
    %c0_126 = arith.constant 0 : index
    %410 = vector.load %arg13[%409, %c0_126] : memref<16x32xf32, #tpu.memory_space<vmem>>, vector<2x32xf32>
    tpu.vector_store %arg13[%409, %c0_126], %392 {strides = array<i32>} : memref<16x32xf32, #tpu.memory_space<vmem>>, vector<2x32xf32>,
    %411 = arith.index_cast %368 : i32 to index
    %c0_127 = arith.constant 0 : index
    %412 = vector.load %arg14[%411, %c0_127] : memref<16x32xf32, #tpu.memory_space<vmem>>, vector<2x32xf32>
    tpu.vector_store %arg14[%411, %c0_127], %408 {strides = array<i32>} : memref<16x32xf32, #tpu.memory_space<vmem>>, vector<2x32xf32>,
    %c8_i32 = arith.constant 8 : i32
    %c0_128 = arith.constant 0 : index
    %c0_129 = arith.constant 0 : index
    %413 = vector.load %arg19[%c0_128, %c0_129] : memref<2x32xf32, #tpu.memory_space<vmem>>, vector<2x32xf32>
    tpu.vector_store %arg19[%c0_128, %c0_129], %392 {strides = array<i32>} : memref<2x32xf32, #tpu.memory_space<vmem>>, vector<2x32xf32>,
    %c0_130 = arith.constant 0 : index
    %c0_131 = arith.constant 0 : index
    %414 = vector.load %arg20[%c0_130, %c0_131] : memref<2x32xf32, #tpu.memory_space<vmem>>, vector<2x32xf32>
    tpu.vector_store %arg20[%c0_130, %c0_131], %390 {strides = array<i32>} : memref<2x32xf32, #tpu.memory_space<vmem>>, vector<2x32xf32>,
    %c0_132 = arith.constant 0 : index
    %c0_133 = arith.constant 0 : index
    %415 = vector.load %arg21[%c0_132, %c0_133] : memref<2x32xf32, #tpu.memory_space<vmem>>, vector<2x32xf32>
    tpu.vector_store %arg21[%c0_132, %c0_133], %408 {strides = array<i32>} : memref<2x32xf32, #tpu.memory_space<vmem>>, vector<2x32xf32>,
    %c0_134 = arith.constant 0 : index
    %c0_135 = arith.constant 0 : index
    %416 = vector.load %arg22[%c0_134, %c0_135] : memref<2x32xf32, #tpu.memory_space<vmem>>, vector<2x32xf32>
    tpu.vector_store %arg22[%c0_134, %c0_135], %406 {strides = array<i32>} : memref<2x32xf32, #tpu.memory_space<vmem>>, vector<2x32xf32>,
    %c0_i32_136 = arith.constant 0 : i32
    %417 = arith.cmpi eq, %arg0, %c0_i32_136 : i32
    %418 = arith.extui %417 : i1 to i32
    %c0_i32_137 = arith.constant 0 : i32
    %419 = arith.cmpi ne, %418, %c0_i32_137 : i32
    scf.if %419 {
      %c0_138 = arith.constant 0 : index
      %c0_139 = arith.constant 0 : index
      %c0_140 = arith.constant 0 : index
      %420 = vector.load %arg15[%c0_138, %c0_139, %c0_140] : memref<2x2x32xf32, #tpu.memory_space<vmem>>, vector<1x2x32xf32>
      %421 = vector.shape_cast %420 : vector<1x2x32xf32> to vector<2x32xf32>
      %422 = vector.shape_cast %392 : vector<2x32xf32> to vector<1x2x32xf32>
      tpu.vector_store %arg15[%c0_138, %c0_139, %c0_140], %422 {strides = array<i32>} : memref<2x2x32xf32, #tpu.memory_space<vmem>>, vector<1x2x32xf32>,
      %c1 = arith.constant 1 : index
      %c0_141 = arith.constant 0 : index
      %c0_142 = arith.constant 0 : index
      %423 = vector.load %arg15[%c1, %c0_141, %c0_142] : memref<2x2x32xf32, #tpu.memory_space<vmem>>, vector<1x2x32xf32>
      %424 = vector.shape_cast %423 : vector<1x2x32xf32> to vector<2x32xf32>
      %425 = vector.shape_cast %408 : vector<2x32xf32> to vector<1x2x32xf32>
      tpu.vector_store %arg15[%c1, %c0_141, %c0_142], %425 {strides = array<i32>} : memref<2x2x32xf32, #tpu.memory_space<vmem>>, vector<1x2x32xf32>,
      %c0_143 = arith.constant 0 : index
      %c0_144 = arith.constant 0 : index
      %c0_145 = arith.constant 0 : index
      %426 = vector.load %arg16[%c0_143, %c0_144, %c0_145] : memref<2x2x32xf32, #tpu.memory_space<vmem>>, vector<1x2x32xf32>
      %427 = vector.shape_cast %426 : vector<1x2x32xf32> to vector<2x32xf32>
      %428 = vector.shape_cast %390 : vector<2x32xf32> to vector<1x2x32xf32>
      tpu.vector_store %arg16[%c0_143, %c0_144, %c0_145], %428 {strides = array<i32>} : memref<2x2x32xf32, #tpu.memory_space<vmem>>, vector<1x2x32xf32>,
      %c1_146 = arith.constant 1 : index
      %c0_147 = arith.constant 0 : index
      %c0_148 = arith.constant 0 : index
      %429 = vector.load %arg16[%c1_146, %c0_147, %c0_148] : memref<2x2x32xf32, #tpu.memory_space<vmem>>, vector<1x2x32xf32>
      %430 = vector.shape_cast %429 : vector<1x2x32xf32> to vector<2x32xf32>
      %431 = vector.shape_cast %406 : vector<2x32xf32> to vector<1x2x32xf32>
      tpu.vector_store %arg16[%c1_146, %c0_147, %c0_148], %431 {strides = array<i32>} : memref<2x2x32xf32, #tpu.memory_space<vmem>>, vector<1x2x32xf32>,
    } else {
    }
    return
  }
  func.func @transform_0(%arg0: i32) -> (i32, i32) {
    %c0_i32 = arith.constant 0 : i32
    %c0_i32_0 = arith.constant 0 : i32
    return %arg0, %c0_i32 : i32, i32
  }
  func.func @transform_1(%arg0: i32) -> (i32, i32) {
    %c0_i32 = arith.constant 0 : i32
    %c0_i32_0 = arith.constant 0 : i32
    return %arg0, %c0_i32 : i32, i32
  }
  func.func @transform_2(%arg0: i32) -> (i32, i32) {
    %c0_i32 = arith.constant 0 : i32
    %0 = arith.subi %c0_i32, %arg0 : i32
    %c0_i32_0 = arith.constant 0 : i32
    %c0_i32_1 = arith.constant 0 : i32
    return %0, %c0_i32_0 : i32, i32
  }
  func.func @transform_3(%arg0: i32) -> (i32, i32) {
    %c0_i32 = arith.constant 0 : i32
    %0 = arith.subi %c0_i32, %arg0 : i32
    %c0_i32_0 = arith.constant 0 : i32
    %c0_i32_1 = arith.constant 0 : i32
    return %0, %c0_i32_0 : i32, i32
  }
  func.func @transform_4(%arg0: i32) -> (i32, i32) {
    %c0_i32 = arith.constant 0 : i32
    %c0_i32_0 = arith.constant 0 : i32
    %c0_i32_1 = arith.constant 0 : i32
    return %c0_i32, %c0_i32_0 : i32, i32
  }
  func.func @transform_5(%arg0: i32) -> (i32, i32) {
    %c0_i32 = arith.constant 0 : i32
    %c0_i32_0 = arith.constant 0 : i32
    %c0_i32_1 = arith.constant 0 : i32
    return %c0_i32, %c0_i32_0 : i32, i32
  }
  func.func @transform_6(%arg0: i32) -> (i32, i32) {
    %c0_i32 = arith.constant 0 : i32
    %c0_i32_0 = arith.constant 0 : i32
    %c0_i32_1 = arith.constant 0 : i32
    return %c0_i32, %c0_i32_0 : i32, i32
  }
  func.func @transform_7(%arg0: i32) -> (i32, i32) {
    %c0_i32 = arith.constant 0 : i32
    %c0_i32_0 = arith.constant 0 : i32
    %c0_i32_1 = arith.constant 0 : i32
    return %c0_i32, %c0_i32_0 : i32, i32
  }
  func.func @transform_8(%arg0: i32) -> (i32, i32) {
    %c0_i32 = arith.constant 0 : i32
    %c0_i32_0 = arith.constant 0 : i32
    %c0_i32_1 = arith.constant 0 : i32
    return %c0_i32, %c0_i32_0 : i32, i32
  }
  func.func @transform_9(%arg0: i32) -> (i32, i32) {
    %c0_i32 = arith.constant 0 : i32
    %c0_i32_0 = arith.constant 0 : i32
    %c0_i32_1 = arith.constant 0 : i32
    return %c0_i32, %c0_i32_0 : i32, i32
  }
  func.func @transform_10(%arg0: i32) -> (i32, i32) {
    %c0_i32 = arith.constant 0 : i32
    %c0_i32_0 = arith.constant 0 : i32
    %c0_i32_1 = arith.constant 0 : i32
    return %c0_i32, %c0_i32_0 : i32, i32
  }
  func.func @transform_11(%arg0: i32) -> (i32, i32) {
    %c0_i32 = arith.constant 0 : i32
    %c0_i32_0 = arith.constant 0 : i32
    %c0_i32_1 = arith.constant 0 : i32
    return %c0_i32, %c0_i32_0 : i32, i32
  }
  func.func @transform_12(%arg0: i32) -> (i32, i32) {
    %c0_i32 = arith.constant 0 : i32
    %c0_i32_0 = arith.constant 0 : i32
    return %arg0, %c0_i32 : i32, i32
  }
  func.func @transform_13(%arg0: i32) -> (i32, i32) {
    %c0_i32 = arith.constant 0 : i32
    %0 = arith.subi %c0_i32, %arg0 : i32
    %c0_i32_0 = arith.constant 0 : i32
    %c0_i32_1 = arith.constant 0 : i32
    return %0, %c0_i32_0 : i32, i32
  }
  func.func @transform_14(%arg0: i32) -> (i32, i32, i32) {
    %c0_i32 = arith.constant 0 : i32
    %c0_i32_0 = arith.constant 0 : i32
    %c0_i32_1 = arith.constant 0 : i32
    %c0_i32_2 = arith.constant 0 : i32
    return %c0_i32, %c0_i32_0, %c0_i32_1 : i32, i32, i32
  }
  func.func @transform_15(%arg0: i32) -> (i32, i32, i32) {
    %c0_i32 = arith.constant 0 : i32
    %c0_i32_0 = arith.constant 0 : i32
    %c0_i32_1 = arith.constant 0 : i32
    %c0_i32_2 = arith.constant 0 : i32
    return %c0_i32, %c0_i32_0, %c0_i32_1 : i32, i32, i32
  }
}

module attributes {stable_mosaic.version = 11 : i64} {
  func.func @_bidir_lstm_kernel(%arg0: i32, %arg1: memref<16x16xf32, #tpu.memory_space<vmem>>, %arg2: memref<16x16xf32, #tpu.memory_space<vmem>>, %arg3: memref<16x128xf32, #tpu.memory_space<vmem>>, %arg4: memref<16x128xf32, #tpu.memory_space<vmem>>, %arg5: memref<1x128xf32, #tpu.memory_space<vmem>>, %arg6: memref<1x128xf32, #tpu.memory_space<vmem>>, %arg7: memref<32x128xf32, #tpu.memory_space<vmem>>, %arg8: memref<32x128xf32, #tpu.memory_space<vmem>>, %arg9: memref<16x32xf32, #tpu.memory_space<vmem>>, %arg10: memref<16x32xf32, #tpu.memory_space<vmem>>, %arg11: memref<2x2x32xf32, #tpu.memory_space<vmem>>, %arg12: memref<2x2x32xf32, #tpu.memory_space<vmem>>, %arg13: memref<16x128xf32, #tpu.memory_space<vmem>>, %arg14: memref<16x128xf32, #tpu.memory_space<vmem>>, %arg15: memref<2x32xf32, #tpu.memory_space<vmem>>, %arg16: memref<2x32xf32, #tpu.memory_space<vmem>>, %arg17: memref<2x32xf32, #tpu.memory_space<vmem>>, %arg18: memref<2x32xf32, #tpu.memory_space<vmem>>) attributes {dimension_semantics = [#tpu.dimension_semantics<arbitrary>], iteration_bounds = array<i64: 1>, scalar_prefetch = 0 : i64, scratch_operands = 6 : i64, tpu.core_type = #tpu.core_type<tc>, window_params = [{transform_indices = @transform_0, window_bounds = array<i64: 16, 16>}, {transform_indices = @transform_1, window_bounds = array<i64: 16, 16>}, {pipeline_mode = #tpu.pipeline_mode<synchronous>, transform_indices = @transform_2, window_bounds = array<i64: 16, 128>}, {pipeline_mode = #tpu.pipeline_mode<synchronous>, transform_indices = @transform_3, window_bounds = array<i64: 16, 128>}, {pipeline_mode = #tpu.pipeline_mode<synchronous>, transform_indices = @transform_4, window_bounds = array<i64: 1, 128>}, {pipeline_mode = #tpu.pipeline_mode<synchronous>, transform_indices = @transform_5, window_bounds = array<i64: 1, 128>}, {pipeline_mode = #tpu.pipeline_mode<synchronous>, transform_indices = @transform_6, window_bounds = array<i64: 32, 128>}, {pipeline_mode = #tpu.pipeline_mode<synchronous>, transform_indices = @transform_7, window_bounds = array<i64: 32, 128>}, {transform_indices = @transform_8, window_bounds = array<i64: 16, 32>}, {transform_indices = @transform_9, window_bounds = array<i64: 16, 32>}, {pipeline_mode = #tpu.pipeline_mode<synchronous>, transform_indices = @transform_10, window_bounds = array<i64: 2, 2, 32>}, {pipeline_mode = #tpu.pipeline_mode<synchronous>, transform_indices = @transform_11, window_bounds = array<i64: 2, 2, 32>}]} {
    %c0_i32 = arith.constant 0 : i32
    %0 = arith.cmpi eq, %arg0, %c0_i32 : i32
    %1 = arith.extui %0 : i1 to i32
    %c0_i32_0 = arith.constant 0 : i32
    %2 = arith.cmpi ne, %1, %c0_i32_0 : i32
    scf.if %2 {
      %cst_128 = arith.constant 0.000000e+00 : f32
      %412 = vector.broadcast %cst_128 : f32 to vector<2x32xf32>
      %c0_129 = arith.constant 0 : index
      %c0_130 = arith.constant 0 : index
      %413 = vector.load %arg15[%c0_129, %c0_130] : memref<2x32xf32, #tpu.memory_space<vmem>>, vector<2x32xf32>
      tpu.vector_store %arg15[%c0_129, %c0_130], %412 {strides = array<i32>} : memref<2x32xf32, #tpu.memory_space<vmem>>, vector<2x32xf32>,
      %c0_131 = arith.constant 0 : index
      %c0_132 = arith.constant 0 : index
      %414 = vector.load %arg16[%c0_131, %c0_132] : memref<2x32xf32, #tpu.memory_space<vmem>>, vector<2x32xf32>
      tpu.vector_store %arg16[%c0_131, %c0_132], %412 {strides = array<i32>} : memref<2x32xf32, #tpu.memory_space<vmem>>, vector<2x32xf32>,
      %c0_133 = arith.constant 0 : index
      %c0_134 = arith.constant 0 : index
      %415 = vector.load %arg17[%c0_133, %c0_134] : memref<2x32xf32, #tpu.memory_space<vmem>>, vector<2x32xf32>
      tpu.vector_store %arg17[%c0_133, %c0_134], %412 {strides = array<i32>} : memref<2x32xf32, #tpu.memory_space<vmem>>, vector<2x32xf32>,
      %c0_135 = arith.constant 0 : index
      %c0_136 = arith.constant 0 : index
      %416 = vector.load %arg18[%c0_135, %c0_136] : memref<2x32xf32, #tpu.memory_space<vmem>>, vector<2x32xf32>
      tpu.vector_store %arg18[%c0_135, %c0_136], %412 {strides = array<i32>} : memref<2x32xf32, #tpu.memory_space<vmem>>, vector<2x32xf32>,
    } else {
    }
    %c0 = arith.constant 0 : index
    %c0_1 = arith.constant 0 : index
    %3 = vector.load %arg5[%c0, %c0_1] : memref<1x128xf32, #tpu.memory_space<vmem>>, vector<1x128xf32>
    %c0_2 = arith.constant 0 : index
    %c0_3 = arith.constant 0 : index
    %4 = vector.load %arg1[%c0_2, %c0_3] : memref<16x16xf32, #tpu.memory_space<vmem>>, vector<16x16xf32>
    %c0_4 = arith.constant 0 : index
    %c0_5 = arith.constant 0 : index
    %5 = vector.load %arg3[%c0_4, %c0_5] : memref<16x128xf32, #tpu.memory_space<vmem>>, vector<16x128xf32>
    %cst = arith.constant dense<0.000000e+00> : vector<16x128xf32>
    %6 = tpu.matmul %4, %5, %cst {dimension_numbers = #tpu.dot_dimension_numbers<[1], [0], [0], [1], [0, 0, 1, 1], [], []>} : vector<16x16xf32>, vector<16x128xf32>, vector<16x128xf32> -> vector<16x128xf32>
    %7 = vector.broadcast %3 : vector<1x128xf32> to vector<16x128xf32>
    %8 = arith.addf %7, %6 : vector<16x128xf32>
    %c0_6 = arith.constant 0 : index
    %c0_7 = arith.constant 0 : index
    %9 = vector.load %arg13[%c0_6, %c0_7] : memref<16x128xf32, #tpu.memory_space<vmem>>, vector<16x128xf32>
    tpu.vector_store %arg13[%c0_6, %c0_7], %8 {strides = array<i32>} : memref<16x128xf32, #tpu.memory_space<vmem>>, vector<16x128xf32>,
    %c0_8 = arith.constant 0 : index
    %c0_9 = arith.constant 0 : index
    %10 = vector.load %arg6[%c0_8, %c0_9] : memref<1x128xf32, #tpu.memory_space<vmem>>, vector<1x128xf32>
    %c0_10 = arith.constant 0 : index
    %c0_11 = arith.constant 0 : index
    %11 = vector.load %arg2[%c0_10, %c0_11] : memref<16x16xf32, #tpu.memory_space<vmem>>, vector<16x16xf32>
    %c0_12 = arith.constant 0 : index
    %c0_13 = arith.constant 0 : index
    %12 = vector.load %arg4[%c0_12, %c0_13] : memref<16x128xf32, #tpu.memory_space<vmem>>, vector<16x128xf32>
    %cst_14 = arith.constant dense<0.000000e+00> : vector<16x128xf32>
    %13 = tpu.matmul %11, %12, %cst_14 {dimension_numbers = #tpu.dot_dimension_numbers<[1], [0], [0], [1], [0, 0, 1, 1], [], []>} : vector<16x16xf32>, vector<16x128xf32>, vector<16x128xf32> -> vector<16x128xf32>
    %14 = vector.broadcast %10 : vector<1x128xf32> to vector<16x128xf32>
    %15 = arith.addf %14, %13 : vector<16x128xf32>
    %c0_15 = arith.constant 0 : index
    %c0_16 = arith.constant 0 : index
    %16 = vector.load %arg14[%c0_15, %c0_16] : memref<16x128xf32, #tpu.memory_space<vmem>>, vector<16x128xf32>
    tpu.vector_store %arg14[%c0_15, %c0_16], %15 {strides = array<i32>} : memref<16x128xf32, #tpu.memory_space<vmem>>, vector<16x128xf32>,
    %c0_17 = arith.constant 0 : index
    %c0_18 = arith.constant 0 : index
    %17 = vector.load %arg7[%c0_17, %c0_18] : memref<32x128xf32, #tpu.memory_space<vmem>>, vector<32x128xf32>
    %c0_19 = arith.constant 0 : index
    %c0_20 = arith.constant 0 : index
    %18 = vector.load %arg8[%c0_19, %c0_20] : memref<32x128xf32, #tpu.memory_space<vmem>>, vector<32x128xf32>
    %19 = tpu.iota {dimensions = array<i32: 1>} : vector<2x128xi32>
    %c64_i32 = arith.constant 64 : i32
    %20 = vector.broadcast %c64_i32 : i32 to vector<2x128xi32>
    %21 = arith.cmpi sge, %19, %20 : vector<2x128xi32>
    %c96_i32 = arith.constant 96 : i32
    %22 = vector.broadcast %c96_i32 : i32 to vector<2x128xi32>
    %23 = arith.cmpi slt, %19, %22 : vector<2x128xi32>
    %24 = arith.andi %21, %23 : vector<2x128xi1>
    %c0_21 = arith.constant 0 : index
    %c0_22 = arith.constant 0 : index
    %25 = vector.load %arg15[%c0_21, %c0_22] : memref<2x32xf32, #tpu.memory_space<vmem>>, vector<2x32xf32>
    %c0_23 = arith.constant 0 : index
    %c0_24 = arith.constant 0 : index
    %26 = vector.load %arg16[%c0_23, %c0_24] : memref<2x32xf32, #tpu.memory_space<vmem>>, vector<2x32xf32>
    %c0_25 = arith.constant 0 : index
    %c0_26 = arith.constant 0 : index
    %27 = vector.load %arg17[%c0_25, %c0_26] : memref<2x32xf32, #tpu.memory_space<vmem>>, vector<2x32xf32>
    %c0_27 = arith.constant 0 : index
    %c0_28 = arith.constant 0 : index
    %28 = vector.load %arg18[%c0_27, %c0_28] : memref<2x32xf32, #tpu.memory_space<vmem>>, vector<2x32xf32>
    %c0_i32_29 = arith.constant 0 : i32
    %c2_i32 = arith.constant 2 : i32
    %29 = arith.muli %c0_i32_29, %c2_i32 : i32
    %c7_i32 = arith.constant 7 : i32
    %30 = arith.subi %c7_i32, %c0_i32_29 : i32
    %c2_i32_30 = arith.constant 2 : i32
    %31 = arith.muli %30, %c2_i32_30 : i32
    %32 = arith.index_cast %29 : i32 to index
    %c0_31 = arith.constant 0 : index
    %33 = vector.load %arg13[%32, %c0_31] : memref<16x128xf32, #tpu.memory_space<vmem>>, vector<2x128xf32>
    %cst_32 = arith.constant dense<0.000000e+00> : vector<2x128xf32>
    %34 = tpu.matmul %25, %17, %cst_32 {dimension_numbers = #tpu.dot_dimension_numbers<[1], [0], [0], [1], [0, 0, 1, 1], [], []>} : vector<2x32xf32>, vector<32x128xf32>, vector<2x128xf32> -> vector<2x128xf32>
    %35 = arith.addf %33, %34 : vector<2x128xf32>
    %36 = arith.index_cast %31 : i32 to index
    %c0_33 = arith.constant 0 : index
    %37 = vector.load %arg14[%36, %c0_33] : memref<16x128xf32, #tpu.memory_space<vmem>>, vector<2x128xf32>
    %cst_34 = arith.constant dense<0.000000e+00> : vector<2x128xf32>
    %38 = tpu.matmul %27, %18, %cst_34 {dimension_numbers = #tpu.dot_dimension_numbers<[1], [0], [0], [1], [0, 0, 1, 1], [], []>} : vector<2x32xf32>, vector<32x128xf32>, vector<2x128xf32> -> vector<2x128xf32>
    %39 = arith.addf %37, %38 : vector<2x128xf32>
    %40 = math.tanh %35 : vector<2x128xf32>
    %41 = arith.negf %35 : vector<2x128xf32>
    %42 = math.exp %41 : vector<2x128xf32>
    %cst_35 = arith.constant 1.000000e+00 : f32
    %43 = vector.broadcast %cst_35 : f32 to vector<2x128xf32>
    %44 = arith.addf %43, %42 : vector<2x128xf32>
    %45 = arith.divf %43, %44 : vector<2x128xf32>
    %46 = arith.select %24, %40, %45 : vector<2x128xi1>, vector<2x128xf32>
    %47 = vector.extract_strided_slice %46 {offsets = [0, 0], sizes = [2, 32], strides = [1, 1]} : vector<2x128xf32> to vector<2x32xf32>
    %48 = vector.extract_strided_slice %46 {offsets = [0, 32], sizes = [2, 32], strides = [1, 1]} : vector<2x128xf32> to vector<2x32xf32>
    %49 = vector.extract_strided_slice %46 {offsets = [0, 64], sizes = [2, 32], strides = [1, 1]} : vector<2x128xf32> to vector<2x32xf32>
    %50 = vector.extract_strided_slice %46 {offsets = [0, 96], sizes = [2, 32], strides = [1, 1]} : vector<2x128xf32> to vector<2x32xf32>
    %51 = arith.mulf %48, %26 : vector<2x32xf32>
    %52 = arith.mulf %47, %49 : vector<2x32xf32>
    %53 = arith.addf %51, %52 : vector<2x32xf32>
    %54 = math.tanh %53 : vector<2x32xf32>
    %55 = arith.mulf %50, %54 : vector<2x32xf32>
    %56 = math.tanh %39 : vector<2x128xf32>
    %57 = arith.negf %39 : vector<2x128xf32>
    %58 = math.exp %57 : vector<2x128xf32>
    %cst_36 = arith.constant 1.000000e+00 : f32
    %59 = vector.broadcast %cst_36 : f32 to vector<2x128xf32>
    %60 = arith.addf %59, %58 : vector<2x128xf32>
    %61 = arith.divf %59, %60 : vector<2x128xf32>
    %62 = arith.select %24, %56, %61 : vector<2x128xi1>, vector<2x128xf32>
    %63 = vector.extract_strided_slice %62 {offsets = [0, 0], sizes = [2, 32], strides = [1, 1]} : vector<2x128xf32> to vector<2x32xf32>
    %64 = vector.extract_strided_slice %62 {offsets = [0, 32], sizes = [2, 32], strides = [1, 1]} : vector<2x128xf32> to vector<2x32xf32>
    %65 = vector.extract_strided_slice %62 {offsets = [0, 64], sizes = [2, 32], strides = [1, 1]} : vector<2x128xf32> to vector<2x32xf32>
    %66 = vector.extract_strided_slice %62 {offsets = [0, 96], sizes = [2, 32], strides = [1, 1]} : vector<2x128xf32> to vector<2x32xf32>
    %67 = arith.mulf %64, %28 : vector<2x32xf32>
    %68 = arith.mulf %63, %65 : vector<2x32xf32>
    %69 = arith.addf %67, %68 : vector<2x32xf32>
    %70 = math.tanh %69 : vector<2x32xf32>
    %71 = arith.mulf %66, %70 : vector<2x32xf32>
    %72 = arith.index_cast %29 : i32 to index
    %c0_37 = arith.constant 0 : index
    %73 = vector.load %arg9[%72, %c0_37] : memref<16x32xf32, #tpu.memory_space<vmem>>, vector<2x32xf32>
    tpu.vector_store %arg9[%72, %c0_37], %55 {strides = array<i32>} : memref<16x32xf32, #tpu.memory_space<vmem>>, vector<2x32xf32>,
    %74 = arith.index_cast %31 : i32 to index
    %c0_38 = arith.constant 0 : index
    %75 = vector.load %arg10[%74, %c0_38] : memref<16x32xf32, #tpu.memory_space<vmem>>, vector<2x32xf32>
    tpu.vector_store %arg10[%74, %c0_38], %71 {strides = array<i32>} : memref<16x32xf32, #tpu.memory_space<vmem>>, vector<2x32xf32>,
    %c1_i32 = arith.constant 1 : i32
    %c2_i32_39 = arith.constant 2 : i32
    %76 = arith.muli %c1_i32, %c2_i32_39 : i32
    %c7_i32_40 = arith.constant 7 : i32
    %77 = arith.subi %c7_i32_40, %c1_i32 : i32
    %c2_i32_41 = arith.constant 2 : i32
    %78 = arith.muli %77, %c2_i32_41 : i32
    %79 = arith.index_cast %76 : i32 to index
    %c0_42 = arith.constant 0 : index
    %80 = vector.load %arg13[%79, %c0_42] : memref<16x128xf32, #tpu.memory_space<vmem>>, vector<2x128xf32>
    %cst_43 = arith.constant dense<0.000000e+00> : vector<2x128xf32>
    %81 = tpu.matmul %55, %17, %cst_43 {dimension_numbers = #tpu.dot_dimension_numbers<[1], [0], [0], [1], [0, 0, 1, 1], [], []>} : vector<2x32xf32>, vector<32x128xf32>, vector<2x128xf32> -> vector<2x128xf32>
    %82 = arith.addf %80, %81 : vector<2x128xf32>
    %83 = arith.index_cast %78 : i32 to index
    %c0_44 = arith.constant 0 : index
    %84 = vector.load %arg14[%83, %c0_44] : memref<16x128xf32, #tpu.memory_space<vmem>>, vector<2x128xf32>
    %cst_45 = arith.constant dense<0.000000e+00> : vector<2x128xf32>
    %85 = tpu.matmul %71, %18, %cst_45 {dimension_numbers = #tpu.dot_dimension_numbers<[1], [0], [0], [1], [0, 0, 1, 1], [], []>} : vector<2x32xf32>, vector<32x128xf32>, vector<2x128xf32> -> vector<2x128xf32>
    %86 = arith.addf %84, %85 : vector<2x128xf32>
    %87 = math.tanh %82 : vector<2x128xf32>
    %88 = arith.negf %82 : vector<2x128xf32>
    %89 = math.exp %88 : vector<2x128xf32>
    %cst_46 = arith.constant 1.000000e+00 : f32
    %90 = vector.broadcast %cst_46 : f32 to vector<2x128xf32>
    %91 = arith.addf %90, %89 : vector<2x128xf32>
    %92 = arith.divf %90, %91 : vector<2x128xf32>
    %93 = arith.select %24, %87, %92 : vector<2x128xi1>, vector<2x128xf32>
    %94 = vector.extract_strided_slice %93 {offsets = [0, 0], sizes = [2, 32], strides = [1, 1]} : vector<2x128xf32> to vector<2x32xf32>
    %95 = vector.extract_strided_slice %93 {offsets = [0, 32], sizes = [2, 32], strides = [1, 1]} : vector<2x128xf32> to vector<2x32xf32>
    %96 = vector.extract_strided_slice %93 {offsets = [0, 64], sizes = [2, 32], strides = [1, 1]} : vector<2x128xf32> to vector<2x32xf32>
    %97 = vector.extract_strided_slice %93 {offsets = [0, 96], sizes = [2, 32], strides = [1, 1]} : vector<2x128xf32> to vector<2x32xf32>
    %98 = arith.mulf %95, %53 : vector<2x32xf32>
    %99 = arith.mulf %94, %96 : vector<2x32xf32>
    %100 = arith.addf %98, %99 : vector<2x32xf32>
    %101 = math.tanh %100 : vector<2x32xf32>
    %102 = arith.mulf %97, %101 : vector<2x32xf32>
    %103 = math.tanh %86 : vector<2x128xf32>
    %104 = arith.negf %86 : vector<2x128xf32>
    %105 = math.exp %104 : vector<2x128xf32>
    %cst_47 = arith.constant 1.000000e+00 : f32
    %106 = vector.broadcast %cst_47 : f32 to vector<2x128xf32>
    %107 = arith.addf %106, %105 : vector<2x128xf32>
    %108 = arith.divf %106, %107 : vector<2x128xf32>
    %109 = arith.select %24, %103, %108 : vector<2x128xi1>, vector<2x128xf32>
    %110 = vector.extract_strided_slice %109 {offsets = [0, 0], sizes = [2, 32], strides = [1, 1]} : vector<2x128xf32> to vector<2x32xf32>
    %111 = vector.extract_strided_slice %109 {offsets = [0, 32], sizes = [2, 32], strides = [1, 1]} : vector<2x128xf32> to vector<2x32xf32>
    %112 = vector.extract_strided_slice %109 {offsets = [0, 64], sizes = [2, 32], strides = [1, 1]} : vector<2x128xf32> to vector<2x32xf32>
    %113 = vector.extract_strided_slice %109 {offsets = [0, 96], sizes = [2, 32], strides = [1, 1]} : vector<2x128xf32> to vector<2x32xf32>
    %114 = arith.mulf %111, %69 : vector<2x32xf32>
    %115 = arith.mulf %110, %112 : vector<2x32xf32>
    %116 = arith.addf %114, %115 : vector<2x32xf32>
    %117 = math.tanh %116 : vector<2x32xf32>
    %118 = arith.mulf %113, %117 : vector<2x32xf32>
    %119 = arith.index_cast %76 : i32 to index
    %c0_48 = arith.constant 0 : index
    %120 = vector.load %arg9[%119, %c0_48] : memref<16x32xf32, #tpu.memory_space<vmem>>, vector<2x32xf32>
    tpu.vector_store %arg9[%119, %c0_48], %102 {strides = array<i32>} : memref<16x32xf32, #tpu.memory_space<vmem>>, vector<2x32xf32>,
    %121 = arith.index_cast %78 : i32 to index
    %c0_49 = arith.constant 0 : index
    %122 = vector.load %arg10[%121, %c0_49] : memref<16x32xf32, #tpu.memory_space<vmem>>, vector<2x32xf32>
    tpu.vector_store %arg10[%121, %c0_49], %118 {strides = array<i32>} : memref<16x32xf32, #tpu.memory_space<vmem>>, vector<2x32xf32>,
    %c2_i32_50 = arith.constant 2 : i32
    %c2_i32_51 = arith.constant 2 : i32
    %123 = arith.muli %c2_i32_50, %c2_i32_51 : i32
    %c7_i32_52 = arith.constant 7 : i32
    %124 = arith.subi %c7_i32_52, %c2_i32_50 : i32
    %c2_i32_53 = arith.constant 2 : i32
    %125 = arith.muli %124, %c2_i32_53 : i32
    %126 = arith.index_cast %123 : i32 to index
    %c0_54 = arith.constant 0 : index
    %127 = vector.load %arg13[%126, %c0_54] : memref<16x128xf32, #tpu.memory_space<vmem>>, vector<2x128xf32>
    %cst_55 = arith.constant dense<0.000000e+00> : vector<2x128xf32>
    %128 = tpu.matmul %102, %17, %cst_55 {dimension_numbers = #tpu.dot_dimension_numbers<[1], [0], [0], [1], [0, 0, 1, 1], [], []>} : vector<2x32xf32>, vector<32x128xf32>, vector<2x128xf32> -> vector<2x128xf32>
    %129 = arith.addf %127, %128 : vector<2x128xf32>
    %130 = arith.index_cast %125 : i32 to index
    %c0_56 = arith.constant 0 : index
    %131 = vector.load %arg14[%130, %c0_56] : memref<16x128xf32, #tpu.memory_space<vmem>>, vector<2x128xf32>
    %cst_57 = arith.constant dense<0.000000e+00> : vector<2x128xf32>
    %132 = tpu.matmul %118, %18, %cst_57 {dimension_numbers = #tpu.dot_dimension_numbers<[1], [0], [0], [1], [0, 0, 1, 1], [], []>} : vector<2x32xf32>, vector<32x128xf32>, vector<2x128xf32> -> vector<2x128xf32>
    %133 = arith.addf %131, %132 : vector<2x128xf32>
    %134 = math.tanh %129 : vector<2x128xf32>
    %135 = arith.negf %129 : vector<2x128xf32>
    %136 = math.exp %135 : vector<2x128xf32>
    %cst_58 = arith.constant 1.000000e+00 : f32
    %137 = vector.broadcast %cst_58 : f32 to vector<2x128xf32>
    %138 = arith.addf %137, %136 : vector<2x128xf32>
    %139 = arith.divf %137, %138 : vector<2x128xf32>
    %140 = arith.select %24, %134, %139 : vector<2x128xi1>, vector<2x128xf32>
    %141 = vector.extract_strided_slice %140 {offsets = [0, 0], sizes = [2, 32], strides = [1, 1]} : vector<2x128xf32> to vector<2x32xf32>
    %142 = vector.extract_strided_slice %140 {offsets = [0, 32], sizes = [2, 32], strides = [1, 1]} : vector<2x128xf32> to vector<2x32xf32>
    %143 = vector.extract_strided_slice %140 {offsets = [0, 64], sizes = [2, 32], strides = [1, 1]} : vector<2x128xf32> to vector<2x32xf32>
    %144 = vector.extract_strided_slice %140 {offsets = [0, 96], sizes = [2, 32], strides = [1, 1]} : vector<2x128xf32> to vector<2x32xf32>
    %145 = arith.mulf %142, %100 : vector<2x32xf32>
    %146 = arith.mulf %141, %143 : vector<2x32xf32>
    %147 = arith.addf %145, %146 : vector<2x32xf32>
    %148 = math.tanh %147 : vector<2x32xf32>
    %149 = arith.mulf %144, %148 : vector<2x32xf32>
    %150 = math.tanh %133 : vector<2x128xf32>
    %151 = arith.negf %133 : vector<2x128xf32>
    %152 = math.exp %151 : vector<2x128xf32>
    %cst_59 = arith.constant 1.000000e+00 : f32
    %153 = vector.broadcast %cst_59 : f32 to vector<2x128xf32>
    %154 = arith.addf %153, %152 : vector<2x128xf32>
    %155 = arith.divf %153, %154 : vector<2x128xf32>
    %156 = arith.select %24, %150, %155 : vector<2x128xi1>, vector<2x128xf32>
    %157 = vector.extract_strided_slice %156 {offsets = [0, 0], sizes = [2, 32], strides = [1, 1]} : vector<2x128xf32> to vector<2x32xf32>
    %158 = vector.extract_strided_slice %156 {offsets = [0, 32], sizes = [2, 32], strides = [1, 1]} : vector<2x128xf32> to vector<2x32xf32>
    %159 = vector.extract_strided_slice %156 {offsets = [0, 64], sizes = [2, 32], strides = [1, 1]} : vector<2x128xf32> to vector<2x32xf32>
    %160 = vector.extract_strided_slice %156 {offsets = [0, 96], sizes = [2, 32], strides = [1, 1]} : vector<2x128xf32> to vector<2x32xf32>
    %161 = arith.mulf %158, %116 : vector<2x32xf32>
    %162 = arith.mulf %157, %159 : vector<2x32xf32>
    %163 = arith.addf %161, %162 : vector<2x32xf32>
    %164 = math.tanh %163 : vector<2x32xf32>
    %165 = arith.mulf %160, %164 : vector<2x32xf32>
    %166 = arith.index_cast %123 : i32 to index
    %c0_60 = arith.constant 0 : index
    %167 = vector.load %arg9[%166, %c0_60] : memref<16x32xf32, #tpu.memory_space<vmem>>, vector<2x32xf32>
    tpu.vector_store %arg9[%166, %c0_60], %149 {strides = array<i32>} : memref<16x32xf32, #tpu.memory_space<vmem>>, vector<2x32xf32>,
    %168 = arith.index_cast %125 : i32 to index
    %c0_61 = arith.constant 0 : index
    %169 = vector.load %arg10[%168, %c0_61] : memref<16x32xf32, #tpu.memory_space<vmem>>, vector<2x32xf32>
    tpu.vector_store %arg10[%168, %c0_61], %165 {strides = array<i32>} : memref<16x32xf32, #tpu.memory_space<vmem>>, vector<2x32xf32>,
    %c3_i32 = arith.constant 3 : i32
    %c2_i32_62 = arith.constant 2 : i32
    %170 = arith.muli %c3_i32, %c2_i32_62 : i32
    %c7_i32_63 = arith.constant 7 : i32
    %171 = arith.subi %c7_i32_63, %c3_i32 : i32
    %c2_i32_64 = arith.constant 2 : i32
    %172 = arith.muli %171, %c2_i32_64 : i32
    %173 = arith.index_cast %170 : i32 to index
    %c0_65 = arith.constant 0 : index
    %174 = vector.load %arg13[%173, %c0_65] : memref<16x128xf32, #tpu.memory_space<vmem>>, vector<2x128xf32>
    %cst_66 = arith.constant dense<0.000000e+00> : vector<2x128xf32>
    %175 = tpu.matmul %149, %17, %cst_66 {dimension_numbers = #tpu.dot_dimension_numbers<[1], [0], [0], [1], [0, 0, 1, 1], [], []>} : vector<2x32xf32>, vector<32x128xf32>, vector<2x128xf32> -> vector<2x128xf32>
    %176 = arith.addf %174, %175 : vector<2x128xf32>
    %177 = arith.index_cast %172 : i32 to index
    %c0_67 = arith.constant 0 : index
    %178 = vector.load %arg14[%177, %c0_67] : memref<16x128xf32, #tpu.memory_space<vmem>>, vector<2x128xf32>
    %cst_68 = arith.constant dense<0.000000e+00> : vector<2x128xf32>
    %179 = tpu.matmul %165, %18, %cst_68 {dimension_numbers = #tpu.dot_dimension_numbers<[1], [0], [0], [1], [0, 0, 1, 1], [], []>} : vector<2x32xf32>, vector<32x128xf32>, vector<2x128xf32> -> vector<2x128xf32>
    %180 = arith.addf %178, %179 : vector<2x128xf32>
    %181 = math.tanh %176 : vector<2x128xf32>
    %182 = arith.negf %176 : vector<2x128xf32>
    %183 = math.exp %182 : vector<2x128xf32>
    %cst_69 = arith.constant 1.000000e+00 : f32
    %184 = vector.broadcast %cst_69 : f32 to vector<2x128xf32>
    %185 = arith.addf %184, %183 : vector<2x128xf32>
    %186 = arith.divf %184, %185 : vector<2x128xf32>
    %187 = arith.select %24, %181, %186 : vector<2x128xi1>, vector<2x128xf32>
    %188 = vector.extract_strided_slice %187 {offsets = [0, 0], sizes = [2, 32], strides = [1, 1]} : vector<2x128xf32> to vector<2x32xf32>
    %189 = vector.extract_strided_slice %187 {offsets = [0, 32], sizes = [2, 32], strides = [1, 1]} : vector<2x128xf32> to vector<2x32xf32>
    %190 = vector.extract_strided_slice %187 {offsets = [0, 64], sizes = [2, 32], strides = [1, 1]} : vector<2x128xf32> to vector<2x32xf32>
    %191 = vector.extract_strided_slice %187 {offsets = [0, 96], sizes = [2, 32], strides = [1, 1]} : vector<2x128xf32> to vector<2x32xf32>
    %192 = arith.mulf %189, %147 : vector<2x32xf32>
    %193 = arith.mulf %188, %190 : vector<2x32xf32>
    %194 = arith.addf %192, %193 : vector<2x32xf32>
    %195 = math.tanh %194 : vector<2x32xf32>
    %196 = arith.mulf %191, %195 : vector<2x32xf32>
    %197 = math.tanh %180 : vector<2x128xf32>
    %198 = arith.negf %180 : vector<2x128xf32>
    %199 = math.exp %198 : vector<2x128xf32>
    %cst_70 = arith.constant 1.000000e+00 : f32
    %200 = vector.broadcast %cst_70 : f32 to vector<2x128xf32>
    %201 = arith.addf %200, %199 : vector<2x128xf32>
    %202 = arith.divf %200, %201 : vector<2x128xf32>
    %203 = arith.select %24, %197, %202 : vector<2x128xi1>, vector<2x128xf32>
    %204 = vector.extract_strided_slice %203 {offsets = [0, 0], sizes = [2, 32], strides = [1, 1]} : vector<2x128xf32> to vector<2x32xf32>
    %205 = vector.extract_strided_slice %203 {offsets = [0, 32], sizes = [2, 32], strides = [1, 1]} : vector<2x128xf32> to vector<2x32xf32>
    %206 = vector.extract_strided_slice %203 {offsets = [0, 64], sizes = [2, 32], strides = [1, 1]} : vector<2x128xf32> to vector<2x32xf32>
    %207 = vector.extract_strided_slice %203 {offsets = [0, 96], sizes = [2, 32], strides = [1, 1]} : vector<2x128xf32> to vector<2x32xf32>
    %208 = arith.mulf %205, %163 : vector<2x32xf32>
    %209 = arith.mulf %204, %206 : vector<2x32xf32>
    %210 = arith.addf %208, %209 : vector<2x32xf32>
    %211 = math.tanh %210 : vector<2x32xf32>
    %212 = arith.mulf %207, %211 : vector<2x32xf32>
    %213 = arith.index_cast %170 : i32 to index
    %c0_71 = arith.constant 0 : index
    %214 = vector.load %arg9[%213, %c0_71] : memref<16x32xf32, #tpu.memory_space<vmem>>, vector<2x32xf32>
    tpu.vector_store %arg9[%213, %c0_71], %196 {strides = array<i32>} : memref<16x32xf32, #tpu.memory_space<vmem>>, vector<2x32xf32>,
    %215 = arith.index_cast %172 : i32 to index
    %c0_72 = arith.constant 0 : index
    %216 = vector.load %arg10[%215, %c0_72] : memref<16x32xf32, #tpu.memory_space<vmem>>, vector<2x32xf32>
    tpu.vector_store %arg10[%215, %c0_72], %212 {strides = array<i32>} : memref<16x32xf32, #tpu.memory_space<vmem>>, vector<2x32xf32>,
    %c4_i32 = arith.constant 4 : i32
    %c2_i32_73 = arith.constant 2 : i32
    %217 = arith.muli %c4_i32, %c2_i32_73 : i32
    %c7_i32_74 = arith.constant 7 : i32
    %218 = arith.subi %c7_i32_74, %c4_i32 : i32
    %c2_i32_75 = arith.constant 2 : i32
    %219 = arith.muli %218, %c2_i32_75 : i32
    %220 = arith.index_cast %217 : i32 to index
    %c0_76 = arith.constant 0 : index
    %221 = vector.load %arg13[%220, %c0_76] : memref<16x128xf32, #tpu.memory_space<vmem>>, vector<2x128xf32>
    %cst_77 = arith.constant dense<0.000000e+00> : vector<2x128xf32>
    %222 = tpu.matmul %196, %17, %cst_77 {dimension_numbers = #tpu.dot_dimension_numbers<[1], [0], [0], [1], [0, 0, 1, 1], [], []>} : vector<2x32xf32>, vector<32x128xf32>, vector<2x128xf32> -> vector<2x128xf32>
    %223 = arith.addf %221, %222 : vector<2x128xf32>
    %224 = arith.index_cast %219 : i32 to index
    %c0_78 = arith.constant 0 : index
    %225 = vector.load %arg14[%224, %c0_78] : memref<16x128xf32, #tpu.memory_space<vmem>>, vector<2x128xf32>
    %cst_79 = arith.constant dense<0.000000e+00> : vector<2x128xf32>
    %226 = tpu.matmul %212, %18, %cst_79 {dimension_numbers = #tpu.dot_dimension_numbers<[1], [0], [0], [1], [0, 0, 1, 1], [], []>} : vector<2x32xf32>, vector<32x128xf32>, vector<2x128xf32> -> vector<2x128xf32>
    %227 = arith.addf %225, %226 : vector<2x128xf32>
    %228 = math.tanh %223 : vector<2x128xf32>
    %229 = arith.negf %223 : vector<2x128xf32>
    %230 = math.exp %229 : vector<2x128xf32>
    %cst_80 = arith.constant 1.000000e+00 : f32
    %231 = vector.broadcast %cst_80 : f32 to vector<2x128xf32>
    %232 = arith.addf %231, %230 : vector<2x128xf32>
    %233 = arith.divf %231, %232 : vector<2x128xf32>
    %234 = arith.select %24, %228, %233 : vector<2x128xi1>, vector<2x128xf32>
    %235 = vector.extract_strided_slice %234 {offsets = [0, 0], sizes = [2, 32], strides = [1, 1]} : vector<2x128xf32> to vector<2x32xf32>
    %236 = vector.extract_strided_slice %234 {offsets = [0, 32], sizes = [2, 32], strides = [1, 1]} : vector<2x128xf32> to vector<2x32xf32>
    %237 = vector.extract_strided_slice %234 {offsets = [0, 64], sizes = [2, 32], strides = [1, 1]} : vector<2x128xf32> to vector<2x32xf32>
    %238 = vector.extract_strided_slice %234 {offsets = [0, 96], sizes = [2, 32], strides = [1, 1]} : vector<2x128xf32> to vector<2x32xf32>
    %239 = arith.mulf %236, %194 : vector<2x32xf32>
    %240 = arith.mulf %235, %237 : vector<2x32xf32>
    %241 = arith.addf %239, %240 : vector<2x32xf32>
    %242 = math.tanh %241 : vector<2x32xf32>
    %243 = arith.mulf %238, %242 : vector<2x32xf32>
    %244 = math.tanh %227 : vector<2x128xf32>
    %245 = arith.negf %227 : vector<2x128xf32>
    %246 = math.exp %245 : vector<2x128xf32>
    %cst_81 = arith.constant 1.000000e+00 : f32
    %247 = vector.broadcast %cst_81 : f32 to vector<2x128xf32>
    %248 = arith.addf %247, %246 : vector<2x128xf32>
    %249 = arith.divf %247, %248 : vector<2x128xf32>
    %250 = arith.select %24, %244, %249 : vector<2x128xi1>, vector<2x128xf32>
    %251 = vector.extract_strided_slice %250 {offsets = [0, 0], sizes = [2, 32], strides = [1, 1]} : vector<2x128xf32> to vector<2x32xf32>
    %252 = vector.extract_strided_slice %250 {offsets = [0, 32], sizes = [2, 32], strides = [1, 1]} : vector<2x128xf32> to vector<2x32xf32>
    %253 = vector.extract_strided_slice %250 {offsets = [0, 64], sizes = [2, 32], strides = [1, 1]} : vector<2x128xf32> to vector<2x32xf32>
    %254 = vector.extract_strided_slice %250 {offsets = [0, 96], sizes = [2, 32], strides = [1, 1]} : vector<2x128xf32> to vector<2x32xf32>
    %255 = arith.mulf %252, %210 : vector<2x32xf32>
    %256 = arith.mulf %251, %253 : vector<2x32xf32>
    %257 = arith.addf %255, %256 : vector<2x32xf32>
    %258 = math.tanh %257 : vector<2x32xf32>
    %259 = arith.mulf %254, %258 : vector<2x32xf32>
    %260 = arith.index_cast %217 : i32 to index
    %c0_82 = arith.constant 0 : index
    %261 = vector.load %arg9[%260, %c0_82] : memref<16x32xf32, #tpu.memory_space<vmem>>, vector<2x32xf32>
    tpu.vector_store %arg9[%260, %c0_82], %243 {strides = array<i32>} : memref<16x32xf32, #tpu.memory_space<vmem>>, vector<2x32xf32>,
    %262 = arith.index_cast %219 : i32 to index
    %c0_83 = arith.constant 0 : index
    %263 = vector.load %arg10[%262, %c0_83] : memref<16x32xf32, #tpu.memory_space<vmem>>, vector<2x32xf32>
    tpu.vector_store %arg10[%262, %c0_83], %259 {strides = array<i32>} : memref<16x32xf32, #tpu.memory_space<vmem>>, vector<2x32xf32>,
    %c5_i32 = arith.constant 5 : i32
    %c2_i32_84 = arith.constant 2 : i32
    %264 = arith.muli %c5_i32, %c2_i32_84 : i32
    %c7_i32_85 = arith.constant 7 : i32
    %265 = arith.subi %c7_i32_85, %c5_i32 : i32
    %c2_i32_86 = arith.constant 2 : i32
    %266 = arith.muli %265, %c2_i32_86 : i32
    %267 = arith.index_cast %264 : i32 to index
    %c0_87 = arith.constant 0 : index
    %268 = vector.load %arg13[%267, %c0_87] : memref<16x128xf32, #tpu.memory_space<vmem>>, vector<2x128xf32>
    %cst_88 = arith.constant dense<0.000000e+00> : vector<2x128xf32>
    %269 = tpu.matmul %243, %17, %cst_88 {dimension_numbers = #tpu.dot_dimension_numbers<[1], [0], [0], [1], [0, 0, 1, 1], [], []>} : vector<2x32xf32>, vector<32x128xf32>, vector<2x128xf32> -> vector<2x128xf32>
    %270 = arith.addf %268, %269 : vector<2x128xf32>
    %271 = arith.index_cast %266 : i32 to index
    %c0_89 = arith.constant 0 : index
    %272 = vector.load %arg14[%271, %c0_89] : memref<16x128xf32, #tpu.memory_space<vmem>>, vector<2x128xf32>
    %cst_90 = arith.constant dense<0.000000e+00> : vector<2x128xf32>
    %273 = tpu.matmul %259, %18, %cst_90 {dimension_numbers = #tpu.dot_dimension_numbers<[1], [0], [0], [1], [0, 0, 1, 1], [], []>} : vector<2x32xf32>, vector<32x128xf32>, vector<2x128xf32> -> vector<2x128xf32>
    %274 = arith.addf %272, %273 : vector<2x128xf32>
    %275 = math.tanh %270 : vector<2x128xf32>
    %276 = arith.negf %270 : vector<2x128xf32>
    %277 = math.exp %276 : vector<2x128xf32>
    %cst_91 = arith.constant 1.000000e+00 : f32
    %278 = vector.broadcast %cst_91 : f32 to vector<2x128xf32>
    %279 = arith.addf %278, %277 : vector<2x128xf32>
    %280 = arith.divf %278, %279 : vector<2x128xf32>
    %281 = arith.select %24, %275, %280 : vector<2x128xi1>, vector<2x128xf32>
    %282 = vector.extract_strided_slice %281 {offsets = [0, 0], sizes = [2, 32], strides = [1, 1]} : vector<2x128xf32> to vector<2x32xf32>
    %283 = vector.extract_strided_slice %281 {offsets = [0, 32], sizes = [2, 32], strides = [1, 1]} : vector<2x128xf32> to vector<2x32xf32>
    %284 = vector.extract_strided_slice %281 {offsets = [0, 64], sizes = [2, 32], strides = [1, 1]} : vector<2x128xf32> to vector<2x32xf32>
    %285 = vector.extract_strided_slice %281 {offsets = [0, 96], sizes = [2, 32], strides = [1, 1]} : vector<2x128xf32> to vector<2x32xf32>
    %286 = arith.mulf %283, %241 : vector<2x32xf32>
    %287 = arith.mulf %282, %284 : vector<2x32xf32>
    %288 = arith.addf %286, %287 : vector<2x32xf32>
    %289 = math.tanh %288 : vector<2x32xf32>
    %290 = arith.mulf %285, %289 : vector<2x32xf32>
    %291 = math.tanh %274 : vector<2x128xf32>
    %292 = arith.negf %274 : vector<2x128xf32>
    %293 = math.exp %292 : vector<2x128xf32>
    %cst_92 = arith.constant 1.000000e+00 : f32
    %294 = vector.broadcast %cst_92 : f32 to vector<2x128xf32>
    %295 = arith.addf %294, %293 : vector<2x128xf32>
    %296 = arith.divf %294, %295 : vector<2x128xf32>
    %297 = arith.select %24, %291, %296 : vector<2x128xi1>, vector<2x128xf32>
    %298 = vector.extract_strided_slice %297 {offsets = [0, 0], sizes = [2, 32], strides = [1, 1]} : vector<2x128xf32> to vector<2x32xf32>
    %299 = vector.extract_strided_slice %297 {offsets = [0, 32], sizes = [2, 32], strides = [1, 1]} : vector<2x128xf32> to vector<2x32xf32>
    %300 = vector.extract_strided_slice %297 {offsets = [0, 64], sizes = [2, 32], strides = [1, 1]} : vector<2x128xf32> to vector<2x32xf32>
    %301 = vector.extract_strided_slice %297 {offsets = [0, 96], sizes = [2, 32], strides = [1, 1]} : vector<2x128xf32> to vector<2x32xf32>
    %302 = arith.mulf %299, %257 : vector<2x32xf32>
    %303 = arith.mulf %298, %300 : vector<2x32xf32>
    %304 = arith.addf %302, %303 : vector<2x32xf32>
    %305 = math.tanh %304 : vector<2x32xf32>
    %306 = arith.mulf %301, %305 : vector<2x32xf32>
    %307 = arith.index_cast %264 : i32 to index
    %c0_93 = arith.constant 0 : index
    %308 = vector.load %arg9[%307, %c0_93] : memref<16x32xf32, #tpu.memory_space<vmem>>, vector<2x32xf32>
    tpu.vector_store %arg9[%307, %c0_93], %290 {strides = array<i32>} : memref<16x32xf32, #tpu.memory_space<vmem>>, vector<2x32xf32>,
    %309 = arith.index_cast %266 : i32 to index
    %c0_94 = arith.constant 0 : index
    %310 = vector.load %arg10[%309, %c0_94] : memref<16x32xf32, #tpu.memory_space<vmem>>, vector<2x32xf32>
    tpu.vector_store %arg10[%309, %c0_94], %306 {strides = array<i32>} : memref<16x32xf32, #tpu.memory_space<vmem>>, vector<2x32xf32>,
    %c6_i32 = arith.constant 6 : i32
    %c2_i32_95 = arith.constant 2 : i32
    %311 = arith.muli %c6_i32, %c2_i32_95 : i32
    %c7_i32_96 = arith.constant 7 : i32
    %312 = arith.subi %c7_i32_96, %c6_i32 : i32
    %c2_i32_97 = arith.constant 2 : i32
    %313 = arith.muli %312, %c2_i32_97 : i32
    %314 = arith.index_cast %311 : i32 to index
    %c0_98 = arith.constant 0 : index
    %315 = vector.load %arg13[%314, %c0_98] : memref<16x128xf32, #tpu.memory_space<vmem>>, vector<2x128xf32>
    %cst_99 = arith.constant dense<0.000000e+00> : vector<2x128xf32>
    %316 = tpu.matmul %290, %17, %cst_99 {dimension_numbers = #tpu.dot_dimension_numbers<[1], [0], [0], [1], [0, 0, 1, 1], [], []>} : vector<2x32xf32>, vector<32x128xf32>, vector<2x128xf32> -> vector<2x128xf32>
    %317 = arith.addf %315, %316 : vector<2x128xf32>
    %318 = arith.index_cast %313 : i32 to index
    %c0_100 = arith.constant 0 : index
    %319 = vector.load %arg14[%318, %c0_100] : memref<16x128xf32, #tpu.memory_space<vmem>>, vector<2x128xf32>
    %cst_101 = arith.constant dense<0.000000e+00> : vector<2x128xf32>
    %320 = tpu.matmul %306, %18, %cst_101 {dimension_numbers = #tpu.dot_dimension_numbers<[1], [0], [0], [1], [0, 0, 1, 1], [], []>} : vector<2x32xf32>, vector<32x128xf32>, vector<2x128xf32> -> vector<2x128xf32>
    %321 = arith.addf %319, %320 : vector<2x128xf32>
    %322 = math.tanh %317 : vector<2x128xf32>
    %323 = arith.negf %317 : vector<2x128xf32>
    %324 = math.exp %323 : vector<2x128xf32>
    %cst_102 = arith.constant 1.000000e+00 : f32
    %325 = vector.broadcast %cst_102 : f32 to vector<2x128xf32>
    %326 = arith.addf %325, %324 : vector<2x128xf32>
    %327 = arith.divf %325, %326 : vector<2x128xf32>
    %328 = arith.select %24, %322, %327 : vector<2x128xi1>, vector<2x128xf32>
    %329 = vector.extract_strided_slice %328 {offsets = [0, 0], sizes = [2, 32], strides = [1, 1]} : vector<2x128xf32> to vector<2x32xf32>
    %330 = vector.extract_strided_slice %328 {offsets = [0, 32], sizes = [2, 32], strides = [1, 1]} : vector<2x128xf32> to vector<2x32xf32>
    %331 = vector.extract_strided_slice %328 {offsets = [0, 64], sizes = [2, 32], strides = [1, 1]} : vector<2x128xf32> to vector<2x32xf32>
    %332 = vector.extract_strided_slice %328 {offsets = [0, 96], sizes = [2, 32], strides = [1, 1]} : vector<2x128xf32> to vector<2x32xf32>
    %333 = arith.mulf %330, %288 : vector<2x32xf32>
    %334 = arith.mulf %329, %331 : vector<2x32xf32>
    %335 = arith.addf %333, %334 : vector<2x32xf32>
    %336 = math.tanh %335 : vector<2x32xf32>
    %337 = arith.mulf %332, %336 : vector<2x32xf32>
    %338 = math.tanh %321 : vector<2x128xf32>
    %339 = arith.negf %321 : vector<2x128xf32>
    %340 = math.exp %339 : vector<2x128xf32>
    %cst_103 = arith.constant 1.000000e+00 : f32
    %341 = vector.broadcast %cst_103 : f32 to vector<2x128xf32>
    %342 = arith.addf %341, %340 : vector<2x128xf32>
    %343 = arith.divf %341, %342 : vector<2x128xf32>
    %344 = arith.select %24, %338, %343 : vector<2x128xi1>, vector<2x128xf32>
    %345 = vector.extract_strided_slice %344 {offsets = [0, 0], sizes = [2, 32], strides = [1, 1]} : vector<2x128xf32> to vector<2x32xf32>
    %346 = vector.extract_strided_slice %344 {offsets = [0, 32], sizes = [2, 32], strides = [1, 1]} : vector<2x128xf32> to vector<2x32xf32>
    %347 = vector.extract_strided_slice %344 {offsets = [0, 64], sizes = [2, 32], strides = [1, 1]} : vector<2x128xf32> to vector<2x32xf32>
    %348 = vector.extract_strided_slice %344 {offsets = [0, 96], sizes = [2, 32], strides = [1, 1]} : vector<2x128xf32> to vector<2x32xf32>
    %349 = arith.mulf %346, %304 : vector<2x32xf32>
    %350 = arith.mulf %345, %347 : vector<2x32xf32>
    %351 = arith.addf %349, %350 : vector<2x32xf32>
    %352 = math.tanh %351 : vector<2x32xf32>
    %353 = arith.mulf %348, %352 : vector<2x32xf32>
    %354 = arith.index_cast %311 : i32 to index
    %c0_104 = arith.constant 0 : index
    %355 = vector.load %arg9[%354, %c0_104] : memref<16x32xf32, #tpu.memory_space<vmem>>, vector<2x32xf32>
    tpu.vector_store %arg9[%354, %c0_104], %337 {strides = array<i32>} : memref<16x32xf32, #tpu.memory_space<vmem>>, vector<2x32xf32>,
    %356 = arith.index_cast %313 : i32 to index
    %c0_105 = arith.constant 0 : index
    %357 = vector.load %arg10[%356, %c0_105] : memref<16x32xf32, #tpu.memory_space<vmem>>, vector<2x32xf32>
    tpu.vector_store %arg10[%356, %c0_105], %353 {strides = array<i32>} : memref<16x32xf32, #tpu.memory_space<vmem>>, vector<2x32xf32>,
    %c7_i32_106 = arith.constant 7 : i32
    %c2_i32_107 = arith.constant 2 : i32
    %358 = arith.muli %c7_i32_106, %c2_i32_107 : i32
    %c7_i32_108 = arith.constant 7 : i32
    %359 = arith.subi %c7_i32_108, %c7_i32_106 : i32
    %c2_i32_109 = arith.constant 2 : i32
    %360 = arith.muli %359, %c2_i32_109 : i32
    %361 = arith.index_cast %358 : i32 to index
    %c0_110 = arith.constant 0 : index
    %362 = vector.load %arg13[%361, %c0_110] : memref<16x128xf32, #tpu.memory_space<vmem>>, vector<2x128xf32>
    %cst_111 = arith.constant dense<0.000000e+00> : vector<2x128xf32>
    %363 = tpu.matmul %337, %17, %cst_111 {dimension_numbers = #tpu.dot_dimension_numbers<[1], [0], [0], [1], [0, 0, 1, 1], [], []>} : vector<2x32xf32>, vector<32x128xf32>, vector<2x128xf32> -> vector<2x128xf32>
    %364 = arith.addf %362, %363 : vector<2x128xf32>
    %365 = arith.index_cast %360 : i32 to index
    %c0_112 = arith.constant 0 : index
    %366 = vector.load %arg14[%365, %c0_112] : memref<16x128xf32, #tpu.memory_space<vmem>>, vector<2x128xf32>
    %cst_113 = arith.constant dense<0.000000e+00> : vector<2x128xf32>
    %367 = tpu.matmul %353, %18, %cst_113 {dimension_numbers = #tpu.dot_dimension_numbers<[1], [0], [0], [1], [0, 0, 1, 1], [], []>} : vector<2x32xf32>, vector<32x128xf32>, vector<2x128xf32> -> vector<2x128xf32>
    %368 = arith.addf %366, %367 : vector<2x128xf32>
    %369 = math.tanh %364 : vector<2x128xf32>
    %370 = arith.negf %364 : vector<2x128xf32>
    %371 = math.exp %370 : vector<2x128xf32>
    %cst_114 = arith.constant 1.000000e+00 : f32
    %372 = vector.broadcast %cst_114 : f32 to vector<2x128xf32>
    %373 = arith.addf %372, %371 : vector<2x128xf32>
    %374 = arith.divf %372, %373 : vector<2x128xf32>
    %375 = arith.select %24, %369, %374 : vector<2x128xi1>, vector<2x128xf32>
    %376 = vector.extract_strided_slice %375 {offsets = [0, 0], sizes = [2, 32], strides = [1, 1]} : vector<2x128xf32> to vector<2x32xf32>
    %377 = vector.extract_strided_slice %375 {offsets = [0, 32], sizes = [2, 32], strides = [1, 1]} : vector<2x128xf32> to vector<2x32xf32>
    %378 = vector.extract_strided_slice %375 {offsets = [0, 64], sizes = [2, 32], strides = [1, 1]} : vector<2x128xf32> to vector<2x32xf32>
    %379 = vector.extract_strided_slice %375 {offsets = [0, 96], sizes = [2, 32], strides = [1, 1]} : vector<2x128xf32> to vector<2x32xf32>
    %380 = arith.mulf %377, %335 : vector<2x32xf32>
    %381 = arith.mulf %376, %378 : vector<2x32xf32>
    %382 = arith.addf %380, %381 : vector<2x32xf32>
    %383 = math.tanh %382 : vector<2x32xf32>
    %384 = arith.mulf %379, %383 : vector<2x32xf32>
    %385 = math.tanh %368 : vector<2x128xf32>
    %386 = arith.negf %368 : vector<2x128xf32>
    %387 = math.exp %386 : vector<2x128xf32>
    %cst_115 = arith.constant 1.000000e+00 : f32
    %388 = vector.broadcast %cst_115 : f32 to vector<2x128xf32>
    %389 = arith.addf %388, %387 : vector<2x128xf32>
    %390 = arith.divf %388, %389 : vector<2x128xf32>
    %391 = arith.select %24, %385, %390 : vector<2x128xi1>, vector<2x128xf32>
    %392 = vector.extract_strided_slice %391 {offsets = [0, 0], sizes = [2, 32], strides = [1, 1]} : vector<2x128xf32> to vector<2x32xf32>
    %393 = vector.extract_strided_slice %391 {offsets = [0, 32], sizes = [2, 32], strides = [1, 1]} : vector<2x128xf32> to vector<2x32xf32>
    %394 = vector.extract_strided_slice %391 {offsets = [0, 64], sizes = [2, 32], strides = [1, 1]} : vector<2x128xf32> to vector<2x32xf32>
    %395 = vector.extract_strided_slice %391 {offsets = [0, 96], sizes = [2, 32], strides = [1, 1]} : vector<2x128xf32> to vector<2x32xf32>
    %396 = arith.mulf %393, %351 : vector<2x32xf32>
    %397 = arith.mulf %392, %394 : vector<2x32xf32>
    %398 = arith.addf %396, %397 : vector<2x32xf32>
    %399 = math.tanh %398 : vector<2x32xf32>
    %400 = arith.mulf %395, %399 : vector<2x32xf32>
    %401 = arith.index_cast %358 : i32 to index
    %c0_116 = arith.constant 0 : index
    %402 = vector.load %arg9[%401, %c0_116] : memref<16x32xf32, #tpu.memory_space<vmem>>, vector<2x32xf32>
    tpu.vector_store %arg9[%401, %c0_116], %384 {strides = array<i32>} : memref<16x32xf32, #tpu.memory_space<vmem>>, vector<2x32xf32>,
    %403 = arith.index_cast %360 : i32 to index
    %c0_117 = arith.constant 0 : index
    %404 = vector.load %arg10[%403, %c0_117] : memref<16x32xf32, #tpu.memory_space<vmem>>, vector<2x32xf32>
    tpu.vector_store %arg10[%403, %c0_117], %400 {strides = array<i32>} : memref<16x32xf32, #tpu.memory_space<vmem>>, vector<2x32xf32>,
    %c8_i32 = arith.constant 8 : i32
    %c0_118 = arith.constant 0 : index
    %c0_119 = arith.constant 0 : index
    %405 = vector.load %arg15[%c0_118, %c0_119] : memref<2x32xf32, #tpu.memory_space<vmem>>, vector<2x32xf32>
    tpu.vector_store %arg15[%c0_118, %c0_119], %384 {strides = array<i32>} : memref<2x32xf32, #tpu.memory_space<vmem>>, vector<2x32xf32>,
    %c0_120 = arith.constant 0 : index
    %c0_121 = arith.constant 0 : index
    %406 = vector.load %arg16[%c0_120, %c0_121] : memref<2x32xf32, #tpu.memory_space<vmem>>, vector<2x32xf32>
    tpu.vector_store %arg16[%c0_120, %c0_121], %382 {strides = array<i32>} : memref<2x32xf32, #tpu.memory_space<vmem>>, vector<2x32xf32>,
    %c0_122 = arith.constant 0 : index
    %c0_123 = arith.constant 0 : index
    %407 = vector.load %arg17[%c0_122, %c0_123] : memref<2x32xf32, #tpu.memory_space<vmem>>, vector<2x32xf32>
    tpu.vector_store %arg17[%c0_122, %c0_123], %400 {strides = array<i32>} : memref<2x32xf32, #tpu.memory_space<vmem>>, vector<2x32xf32>,
    %c0_124 = arith.constant 0 : index
    %c0_125 = arith.constant 0 : index
    %408 = vector.load %arg18[%c0_124, %c0_125] : memref<2x32xf32, #tpu.memory_space<vmem>>, vector<2x32xf32>
    tpu.vector_store %arg18[%c0_124, %c0_125], %398 {strides = array<i32>} : memref<2x32xf32, #tpu.memory_space<vmem>>, vector<2x32xf32>,
    %c0_i32_126 = arith.constant 0 : i32
    %409 = arith.cmpi eq, %arg0, %c0_i32_126 : i32
    %410 = arith.extui %409 : i1 to i32
    %c0_i32_127 = arith.constant 0 : i32
    %411 = arith.cmpi ne, %410, %c0_i32_127 : i32
    scf.if %411 {
      %c0_128 = arith.constant 0 : index
      %c0_129 = arith.constant 0 : index
      %c0_130 = arith.constant 0 : index
      %412 = vector.load %arg11[%c0_128, %c0_129, %c0_130] : memref<2x2x32xf32, #tpu.memory_space<vmem>>, vector<1x2x32xf32>
      %413 = vector.shape_cast %412 : vector<1x2x32xf32> to vector<2x32xf32>
      %414 = vector.shape_cast %384 : vector<2x32xf32> to vector<1x2x32xf32>
      tpu.vector_store %arg11[%c0_128, %c0_129, %c0_130], %414 {strides = array<i32>} : memref<2x2x32xf32, #tpu.memory_space<vmem>>, vector<1x2x32xf32>,
      %c1 = arith.constant 1 : index
      %c0_131 = arith.constant 0 : index
      %c0_132 = arith.constant 0 : index
      %415 = vector.load %arg11[%c1, %c0_131, %c0_132] : memref<2x2x32xf32, #tpu.memory_space<vmem>>, vector<1x2x32xf32>
      %416 = vector.shape_cast %415 : vector<1x2x32xf32> to vector<2x32xf32>
      %417 = vector.shape_cast %400 : vector<2x32xf32> to vector<1x2x32xf32>
      tpu.vector_store %arg11[%c1, %c0_131, %c0_132], %417 {strides = array<i32>} : memref<2x2x32xf32, #tpu.memory_space<vmem>>, vector<1x2x32xf32>,
      %c0_133 = arith.constant 0 : index
      %c0_134 = arith.constant 0 : index
      %c0_135 = arith.constant 0 : index
      %418 = vector.load %arg12[%c0_133, %c0_134, %c0_135] : memref<2x2x32xf32, #tpu.memory_space<vmem>>, vector<1x2x32xf32>
      %419 = vector.shape_cast %418 : vector<1x2x32xf32> to vector<2x32xf32>
      %420 = vector.shape_cast %382 : vector<2x32xf32> to vector<1x2x32xf32>
      tpu.vector_store %arg12[%c0_133, %c0_134, %c0_135], %420 {strides = array<i32>} : memref<2x2x32xf32, #tpu.memory_space<vmem>>, vector<1x2x32xf32>,
      %c1_136 = arith.constant 1 : index
      %c0_137 = arith.constant 0 : index
      %c0_138 = arith.constant 0 : index
      %421 = vector.load %arg12[%c1_136, %c0_137, %c0_138] : memref<2x2x32xf32, #tpu.memory_space<vmem>>, vector<1x2x32xf32>
      %422 = vector.shape_cast %421 : vector<1x2x32xf32> to vector<2x32xf32>
      %423 = vector.shape_cast %398 : vector<2x32xf32> to vector<1x2x32xf32>
      tpu.vector_store %arg12[%c1_136, %c0_137, %c0_138], %423 {strides = array<i32>} : memref<2x2x32xf32, #tpu.memory_space<vmem>>, vector<1x2x32xf32>,
    } else {
    }
    return
  }
  func.func @transform_0(%arg0: i32) -> (i32, i32) {
    %c0_i32 = arith.constant 0 : i32
    %c0_i32_0 = arith.constant 0 : i32
    return %arg0, %c0_i32 : i32, i32
  }
  func.func @transform_1(%arg0: i32) -> (i32, i32) {
    %c0_i32 = arith.constant 0 : i32
    %0 = arith.subi %c0_i32, %arg0 : i32
    %c0_i32_0 = arith.constant 0 : i32
    %c0_i32_1 = arith.constant 0 : i32
    return %0, %c0_i32_0 : i32, i32
  }
  func.func @transform_2(%arg0: i32) -> (i32, i32) {
    %c0_i32 = arith.constant 0 : i32
    %c0_i32_0 = arith.constant 0 : i32
    %c0_i32_1 = arith.constant 0 : i32
    return %c0_i32, %c0_i32_0 : i32, i32
  }
  func.func @transform_3(%arg0: i32) -> (i32, i32) {
    %c0_i32 = arith.constant 0 : i32
    %c0_i32_0 = arith.constant 0 : i32
    %c0_i32_1 = arith.constant 0 : i32
    return %c0_i32, %c0_i32_0 : i32, i32
  }
  func.func @transform_4(%arg0: i32) -> (i32, i32) {
    %c0_i32 = arith.constant 0 : i32
    %c0_i32_0 = arith.constant 0 : i32
    %c0_i32_1 = arith.constant 0 : i32
    return %c0_i32, %c0_i32_0 : i32, i32
  }
  func.func @transform_5(%arg0: i32) -> (i32, i32) {
    %c0_i32 = arith.constant 0 : i32
    %c0_i32_0 = arith.constant 0 : i32
    %c0_i32_1 = arith.constant 0 : i32
    return %c0_i32, %c0_i32_0 : i32, i32
  }
  func.func @transform_6(%arg0: i32) -> (i32, i32) {
    %c0_i32 = arith.constant 0 : i32
    %c0_i32_0 = arith.constant 0 : i32
    %c0_i32_1 = arith.constant 0 : i32
    return %c0_i32, %c0_i32_0 : i32, i32
  }
  func.func @transform_7(%arg0: i32) -> (i32, i32) {
    %c0_i32 = arith.constant 0 : i32
    %c0_i32_0 = arith.constant 0 : i32
    %c0_i32_1 = arith.constant 0 : i32
    return %c0_i32, %c0_i32_0 : i32, i32
  }
  func.func @transform_8(%arg0: i32) -> (i32, i32) {
    %c0_i32 = arith.constant 0 : i32
    %c0_i32_0 = arith.constant 0 : i32
    return %arg0, %c0_i32 : i32, i32
  }
  func.func @transform_9(%arg0: i32) -> (i32, i32) {
    %c0_i32 = arith.constant 0 : i32
    %0 = arith.subi %c0_i32, %arg0 : i32
    %c0_i32_0 = arith.constant 0 : i32
    %c0_i32_1 = arith.constant 0 : i32
    return %0, %c0_i32_0 : i32, i32
  }
  func.func @transform_10(%arg0: i32) -> (i32, i32, i32) {
    %c0_i32 = arith.constant 0 : i32
    %c0_i32_0 = arith.constant 0 : i32
    %c0_i32_1 = arith.constant 0 : i32
    %c0_i32_2 = arith.constant 0 : i32
    return %c0_i32, %c0_i32_0, %c0_i32_1 : i32, i32, i32
  }
  func.func @transform_11(%arg0: i32) -> (i32, i32, i32) {
    %c0_i32 = arith.constant 0 : i32
    %c0_i32_0 = arith.constant 0 : i32
    %c0_i32_1 = arith.constant 0 : i32
    %c0_i32_2 = arith.constant 0 : i32
    return %c0_i32, %c0_i32_0, %c0_i32_1 : i32, i32, i32
  }
}

</mosaic_0001>

<bundles_post_ra>
// kernel: lstm_layer_forward.4
= control target key start
LH: loop header
LB: loop body
LE: loop exit
PB: predicated region body
PF: predicated region fallthrough
CT: control target
= control target key end

     0   :  { %17 = vsyncpa [#allocation9], 0  ;;  %s3210_s0 = inlined_call_operand.vmem [shape: f32[16,16], index: 0, kind: input, shape index: {}, may-alias: {0,1}]   ;;  %s3211_s1 = inlined_call_operand.vmem [shape: f32[16,16], index: 1, kind: input, shape index: {}, may-alias: {0,1}]   ;;  %s3212_s2 = inlined_call_operand.hbm [shape: f32[16,128], index: 2, kind: input, shape index: {}]   ;;  %s3213_s3 = inlined_call_operand.hbm [shape: f32[16,128], index: 3, kind: input, shape index: {}]   ;;  %s3214_s4 = inlined_call_operand.vmem [shape: f32[1,128], index: 4, kind: input, shape index: {}]   ;;  %s3215_s5 = inlined_call_operand.hbm [shape: f32[1,128], index: 5, kind: input, shape index: {}]   ;;  %s3216_s6 = inlined_call_operand.hbm [shape: f32[32,128], index: 6, kind: input, shape index: {}]   ;;  %s3217_s7 = inlined_call_operand.hbm [shape: f32[32,128], index: 7, kind: input, shape index: {}]   ;;  %s3218_s8 = inlined_call_operand.vmem [shape: f32[16,32], index: 8, kind: output, shape index: {0}]   ;;  %s3219_s9 = inlined_call_operand.vmem [shape: f32[16,32], index: 9, kind: output, shape index: {1}]   ;;  %s3220_s10 = inlined_call_operand.vmem [shape: f32[2,2,32], index: 10, kind: output, shape index: {2}]   ;;  %s3221_s11 = inlined_call_operand.vmem [shape: f32[2,2,32], index: 11, kind: output, shape index: {3}]  }
   0x1   :  { %18 = vsyncpa [#allocation11], 0 }
   0x2   :  { %19 = vsyncpa [#allocation14], 0  ;;  %s2669_s17 = smov [#allocation10]   ;;  %s2670_s19 = smov [#allocation13]  }
   0x3   :  { %s49_s18 = sshll.u32 %s2669_s17, 4  ;;  %s73_s20 = sshll.u32 %s2670_s19, 4  ;;  %s50_s18 = int_to_ptr.vmem [resolvable:$true] %s49_s18  ;;  %s74_s20 = int_to_ptr.vmem [resolvable:$true] %s73_s20 }
   0x4   :  { %s2571_s21 = scalar_lea.vmem %s50_s18, 256  ;;  %p2576_p1 = scmp.lt.s32.totalorder %s50_s18, %s50_s18 }
   0x5   :  { %p2572_p0 = scmp.ne.s32.totalorder %s50_s18, %s2571_s21  ;;  %p2577_p2 = scmp.lt.s32.totalorder %s2571_s21, %s2571_s21 }
   0x7   :  { %p2578_p3 = por %p2577_p2, %p2576_p1 }
   0x9   :  { %p2579_p4 = pnand %p2578_p3, %p2572_p0 }
   0xb   :  { %2582 = shalt.err (!%p2579_p4)
}
   0xc   :  { %s2671_s22 = smov 128   ;;  %s2672_s23 = smov 8  }
   0xd   :  { %55 = dma.hbm_to_vmem [thread:$0]  %s3213_s3, 256, %s50_s18, [#allocation11], %s2671_s22, %s2671_s22, %s2672_s23  }
   0xe   :  { %s2591_s26 = scalar_lea.vmem %s74_s20, 512  ;;  %p2596_p6 = scmp.lt.s32.totalorder %s74_s20, %s74_s20 }
   0xf   :  { %p2592_p5 = scmp.ne.s32.totalorder %s74_s20, %s2591_s26  ;;  %p2597_p7 = scmp.lt.s32.totalorder %s2591_s26, %s2591_s26 }
  0x11   :  { %p2598_p8 = por %p2597_p7, %p2596_p6 }
  0x13   :  { %p2599_p9 = pnand %p2598_p8, %p2592_p5 }
  0x15   :  { %2602 = shalt.err (!%p2599_p9)
}
  0x16   :  { %79 = dma.hbm_to_vmem [thread:$0]  %s3216_s6, 512, %s74_s20, [#allocation14], %s2671_s22, %s2671_s22, %s2672_s23  }
  0x17   :  { %s2673_s29 = smov [#allocation8]   ;;  %s2674_s12 = smov [#allocation12]  }
  0x18   :  { %s37_s30 = sshll.u32 %s2673_s29, 4  ;;  %s64_s13 = sshll.u32 %s2674_s12, 4  ;;  %s38_s30 = int_to_ptr.vmem [resolvable:$true] %s37_s30  ;;  %s65_s13 = int_to_ptr.vmem [resolvable:$true] %s64_s13 }
  0x19   :  { %s2611_s3 = scalar_lea.vmem %s38_s30, 256  ;;  %p2616_p11 = scmp.lt.s32.totalorder %s38_s30, %s38_s30 }
  0x1a   :  { %p2612_p10 = scmp.ne.s32.totalorder %s38_s30, %s2611_s3  ;;  %p2617_p12 = scmp.lt.s32.totalorder %s2611_s3, %s2611_s3 }
  0x1c   :  { %p2618_p13 = por %p2617_p12, %p2616_p11 }
  0x1e   :  { %p2619_p0 = pnand %p2618_p13, %p2612_p10 }
  0x20   :  { %2622 = shalt.err (!%p2619_p0)
}
  0x21   :  { %43 = dma.hbm_to_vmem [thread:$0]  %s3212_s2, 256, %s38_s30, [#allocation9], %s2671_s22, %s2671_s22, %s2672_s23  }
  0x22   :  { %s2631_s6 = scalar_lea.vmem %s65_s13, 16  ;;  %s2635_s16 = scalar_lea.vmem %s65_s13, 32 }
  0x23   :  { %p2632_p1 = scmp.ne.s32.totalorder %s65_s13, %s2631_s6  ;;  %p2636_p2 = scmp.lt.s32.totalorder %s65_s13, %s65_s13 }
  0x24   :  { %p2637_p3 = scmp.lt.s32.totalorder %s2635_s16, %s2631_s6 }
  0x26   :  { %p2638_p4 = por %p2637_p3, %p2636_p2 }
  0x28   :  { %p2639_p5 = pnand %p2638_p4, %p2632_p1 }
  0x2a   :  { %2642 = shalt.err (!%p2639_p5)
}
  0x2b   :  { %67 = dma.hbm_to_vmem [thread:$0]  %s3215_s5, 16, %s65_s13, [#allocation11]  }
  0x2c   :  { %s2675_s19 = smov [#allocation15]  }
  0x2d   :  { %s85_s20 = sshll.u32 %s2675_s19, 4  ;;  %s86_s20 = int_to_ptr.vmem [resolvable:$true] %s85_s20 }
  0x2e   :  { %s2651_s21 = scalar_lea.vmem %s86_s20, 512  ;;  %p2656_p7 = scmp.lt.s32.totalorder %s86_s20, %s86_s20 }
  0x2f   :  { %p2652_p6 = scmp.ne.s32.totalorder %s86_s20, %s2651_s21  ;;  %p2657_p8 = scmp.lt.s32.totalorder %s2651_s21, %s2651_s21 }
  0x31   :  { %p2658_p9 = por %p2657_p8, %p2656_p7 }
  0x33   :  { %p2659_p10 = pnand %p2658_p9, %p2652_p6 }
  0x35   :  { %2662 = shalt.err (!%p2659_p10)
}
  0x36   :  { %91 = dma.hbm_to_vmem [thread:$0]  %s3217_s7, 512, %s86_s20, [#allocation14], %s2671_s22, %s2671_s22, %s2672_s23  }
  0x37   :  { %2663 = dma.done.wait [#allocation9], 256  }
  0x38   :  { %2664 = vsyncadd [#allocation9], 4294967040 }
  0x39   :  { %2665 = dma.done.wait [#allocation11], 272  }
  0x3a   :  { %2666 = vsyncadd [#allocation11], 4294967024 }
  0x3b   :  { %2667 = dma.done.wait [#allocation14], 1024  }
  0x3c   :  { %2668 = vsyncadd [#allocation14], 4294966272  ;;  %vm139_vm0 = vcmask 254976   ;;  %v2676_v0 = vmov 0.0   ;;  %v148_v1 = vld [vmem:[#allocation8 + $0x8] sm:$0xff]  ;;  %v245_v2 = vld [vmem:[#allocation10 + $0x8] sm:$0xff]  ;;  %v345_v45 = vlaneseq }
  0x3d   :  { %140 = vst.msk [vmem:[#allocation4] sm:$0x3] %vm139_vm0, %v2676_v0  ;;  %141 = vst.msk [vmem:[#allocation5] sm:$0x3] %vm139_vm0, %v2676_v0  ;;  %v147_v3 = vld [vmem:[#allocation8] sm:$0xff]  ;;  %2226 = vmatprep.subr.mxu0 %v148_v1  ;;  %2233 = vmatprep.subr.mxu1 %v245_v2  ;;  %v244_v4 = vld [vmem:[#allocation10] sm:$0xff] }
  0x3e   :  { %142 = vst.msk [vmem:[#allocation6] sm:$0x3] %vm139_vm0, %v2676_v0  ;;  %143 = vst.msk [vmem:[#allocation7] sm:$0x3] %vm139_vm0, %v2676_v0  ;;  %v145_v5 = vld [vmem:[%s3210_s0] sm:$0xff]  ;;  %vm149_vm1 = vcmask 130048   ;;  %2227 = vmatpush3.msra.mxu0 %v148_v1  ;;  %2234 = vmatpush3.msra.mxu1 %v245_v2 }
  0x3f   :  { %v242_v6 = vld [vmem:[%s3211_s1] sm:$0xff]  ;;  %2228 = vmatprep.subr.mxu0 %v147_v3  ;;  %2235 = vmatprep.subr.mxu1 %v244_v4  ;;  %v146_v7 = vld [vmem:[%s3210_s0 + $0x8] sm:$0xff]  ;;  %v2802_v13 = vld [vmem:[#allocation13 + $0x8] sm:$0xff]  ;;  %vm355_vm2 = vcmask 261120   ;;  %vm2677_vm3 = vmmov 0   ;;  %s2678_s0 = smov 32  }
  0x40   :  { %v243_v8 = vld [vmem:[%s3211_s1 + $0x8] sm:$0xff]  ;;  %2229 = vmatpush3.msra.mxu0 %v147_v3  ;;  %2230 = vmatprep.mubr.msk.f32.mxu0 %vm149_vm1, %v145_v5  ;;  %v2794_v11 = vld [vmem:[#allocation13 + $0x10] sm:$0xff]  ;;  %v2804_v14 = vld [vmem:[#allocation15 + $0x8] sm:$0xff]  ;;  %v346_v46 = vand.u32 127, %v345_v45  ;;  %s2680_s3 = smov 96  }
  0x41   :  { %2236 = vmatpush3.msra.mxu1 %v244_v4  ;;  %2237 = vmatprep.mubr.msk.f32.mxu1 %vm149_vm1, %v242_v6  ;;  %v2788_v9 = vld [vmem:[#allocation13 + $0x18] sm:$0xff]  ;;  %v2796_v12 = vld [vmem:[#allocation15 + $0x10] sm:$0xff]  ;;  %v2810_v15 = vld [vmem:[#allocation13] sm:$0xff] }
  0x42   :  { %v2790_v10 = vld [vmem:[#allocation15 + $0x18] sm:$0xff]  ;;  %2231 = vmatmul.mubr.msk.f32.vlgmr.msra.gmra.mxu0 %vm149_vm1, %v146_v7  ;;  %2238 = vmatmul.mubr.msk.f32.vlgmr.msra.gmra.mxu1 %vm149_vm1, %v243_v8  ;;  %v2814_v16 = vld [vmem:[#allocation15] sm:$0xff]  ;;  %v2100_v21 = vld [vmem:[%s3214_s4] ss:$0 sm:$0xff]  ;;  %vm347_vm4 = vcmp.ge.s32.totalorder %v346_v46, 64  ;;  %vm348_vm5 = vcmp.lt.s32.totalorder %v346_v46, 96 }
  0x43   :  { %2240 = vmatprep.subr.mxu0 %v2676_v0  ;;  %2251 = vmatprep.subr.mxu1 %v2676_v0  ;;  %v2103_v22 = vld [vmem:[#allocation12] ss:$0 sm:$0xff]  ;;  %vm2853_vm6 = vmand %vm347_vm4, %vm348_vm5  ;;  %s2679_s4 = smov 64  }
  0x44   :  { %2241 = vmatpush3.msra.mxu0 %v2788_v9  ;;  %2252 = vmatpush3.msra.mxu1 %v2790_v10  ;;  %v350_v17 = vld [vmem:[#allocation4] sm:$0x3]  ;;  %v351_v19 = vld [vmem:[#allocation5] sm:$0x3] }
  0x45   :  { %2242 = vmatprep.subr.mxu0 %v2676_v0  ;;  %2253 = vmatprep.subr.mxu1 %v2676_v0  ;;  %v352_v18 = vld [vmem:[#allocation6] sm:$0x3]  ;;  %v353_v20 = vld [vmem:[#allocation7] sm:$0x3] }
  0x46   :  { %2243 = vmatpush3.msra.mxu0 %v2794_v11  ;;  %2254 = vmatpush3.msra.mxu1 %v2796_v12 }
  0x47   :  { %2244 = vmatprep.subr.mxu0 %v2676_v0  ;;  %2255 = vmatprep.subr.mxu1 %v2676_v0 }
  0x48   :  { %2245 = vmatpush3.msra.mxu0 %v2802_v13  ;;  %2256 = vmatpush3.msra.mxu1 %v2804_v14 }
  0x49   :  { %2246 = vmatprep.subr.mxu0 %v2676_v0  ;;  %2257 = vmatprep.subr.mxu1 %v2676_v0 }
  0x4a   :  { %2247 = vmatpush3.msra.mxu0 %v2810_v15  ;;  %2248 = vmatprep.mubr.msk.f32.mxu0 %vm2677_vm3, %v2676_v0 }
  0x4b   :  { %2258 = vmatpush3.msra.mxu1 %v2814_v16  ;;  %2259 = vmatprep.mubr.msk.f32.mxu1 %vm2677_vm3, %v2676_v0 }
  0x4c   :  { %2249 = vmatmul.mubr.msk.f32.vlgmr.msra.gmra.mxu0 %vm355_vm2, %v350_v17  ;;  %2260 = vmatmul.mubr.msk.f32.vlgmr.msra.gmra.mxu1 %vm355_vm2, %v352_v18 }
  0x4d   :  { %514 = vrot.lane.b32.xlu1 %v351_v19, %s2678_s0  ;;  %2262 = vmatprep.subr.mxu0 %v2676_v0 }
  0x4e   :  { %2263 = vmatpush3.msra.mxu0 %v2788_v9  ;;  %2273 = vmatprep.subr.mxu1 %v2676_v0 }
  0x4f   :  { %2264 = vmatprep.subr.mxu0 %v2676_v0  ;;  %2274 = vmatpush3.msra.mxu1 %v2790_v10 }
  0x50   :  { %2265 = vmatpush3.msra.mxu0 %v2794_v11  ;;  %2275 = vmatprep.subr.mxu1 %v2676_v0 }
  0x51   :  { %543 = vrot.lane.b32.xlu1 %v353_v20, %s2678_s0  ;;  %2266 = vmatprep.subr.mxu0 %v2676_v0 }
  0x52   :  { %2267 = vmatpush3.msra.mxu0 %v2802_v13  ;;  %2270 = vmatprep.mubr.msk.f32.mxu0 %vm2677_vm3, %v2676_v0 }
  0x53   :  { %2268 = vmatprep.subr.mxu0 %v2676_v0  ;;  %2276 = vmatpush3.msra.mxu1 %v2796_v12 }
  0x54   :  { %2269 = vmatpush3.msra.mxu0 %v2810_v15  ;;  %2277 = vmatprep.subr.mxu1 %v2676_v0 }
  0x55   :  { %2278 = vmatpush3.msra.mxu1 %v2804_v14  ;;  %2281 = vmatprep.mubr.msk.f32.mxu1 %vm2677_vm3, %v2676_v0 }
  0x56   :  { %2279 = vmatprep.subr.mxu1 %v2676_v0  ;;  %2284 = vmatprep.subr.mxu0 %v2676_v0 }
  0x57   :  { %2280 = vmatpush3.msra.mxu1 %v2814_v16 }
  0x58   :  { %2295 = vmatprep.subr.mxu1 %v2676_v0 }
  0xbf   :  { %v515_v58 = vpop.permute.xlu1 %514 }
  0xc3   :  { %v544_v60 = vpop.permute.xlu1 %543 }
 0x102   :  { %v2232_v23 = vpop.f32.mrf.mxu0  ;;  %v2239_v24 = vpop.f32.mrf.mxu1 }
 0x103   :  { %v238_v25 = vadd.f32 %v2232_v23, %v2100_v21  ;;  %v334_v26 = vadd.f32 %v2239_v24, %v2103_v22 }
 0x104   :  { %v222_v27 = vpop.f32.mrf.mxu0  ;;  %v318_v28 = vpop.f32.mrf.mxu1 }
 0x105   :  { %240 = vst [vmem:[#allocation2 + $0x8] sm:$0xff] %v238_v25  ;;  %336 = vst [vmem:[#allocation3 + $0x8] sm:$0xff] %v334_v26  ;;  %v237_v29 = vadd.f32 %v2100_v21, %v222_v27  ;;  %v333_v30 = vadd.f32 %v2103_v22, %v318_v28 }
 0x107   :  { %239 = vst [vmem:[#allocation2] sm:$0xff] %v237_v29  ;;  %335 = vst [vmem:[#allocation3] sm:$0xff] %v333_v30 }
 0x10c   :  { %v425_v31 = vpop.f32.mrf.mxu0  ;;  %v430_v32 = vld [vmem:[#allocation3 + $0xe] sm:$0x3]  ;;  %v500_v33 = vpop.f32.mrf.mxu1  ;;  %v648_v24 = vld [vmem:[#allocation3 + $0xc] sm:$0x3] }
 0x10d   :  { %v504_v34 = vadd.f32 %v500_v33, %v430_v32 }
 0x10e   :  { %v354_v35 = vld [vmem:[#allocation2] sm:$0x3]  ;;  %v2250_v36 = vpop.f32.mrf.mxu0  ;;  %v2261_v37 = vpop.f32.mrf.mxu1  ;;  %v574_v19 = vld [vmem:[#allocation2 + $0x2] sm:$0x3] }
 0x10f   :  { %v429_v38 = vadd.f32 %v425_v31, %v354_v35  ;;  %v2107_v39 = vmul.f32 -1.442695, %v504_v34 }
 0x111   :  { %v2106_v40 = vmul.f32 -1.442695, %v429_v38  ;;  %2428 = vpow2.f32 %v2107_v39 }
 0x113   :  { %2430 = vpow2.f32 %v2106_v40 }
 0x114   :  { %2432 = vtanh.f32 %v429_v38 }
 0x11e   :  { %v2429_v41 = vpop.eup %2428 }
 0x11f   :  { %v538_v44 = vadd.f32 1.0, %v2429_v41 }
 0x120   :  { %v2431_v42 = vpop.eup %2430 }
 0x121   :  { %v509_v43 = vadd.f32 1.0, %v2431_v42  ;;  %v2433_v47 = vpop.eup %2432 }
 0x123   :  { %2434 = vrcp.f32 %v509_v43 }
 0x124   :  { %2436 = vrcp.f32 %v538_v44 }
 0x125   :  { %2438 = vtanh.f32 %v504_v34 }
 0x130   :  { %v2435_v48 = vpop.eup %2434 }
 0x131   :  { %v512_v50 = vsel %vm2853_vm6, %v2433_v47, %v2435_v48  ;;  %v2437_v51 = vpop.eup %2436 }
 0x132   :  { %519 = vrot.lane.b32.xlu0 %v512_v50, %s2679_s4  ;;  %v2439_v52 = vpop.eup %2438  ;;  %v517_v59 = vmul.f32 %v515_v58, %v512_v50  ;;  %v782_v58 = vld [vmem:[#allocation2 + $0x4] sm:$0x3] }
 0x133   :  { %v541_v53 = vsel %vm2853_vm6, %v2439_v52, %v2437_v51 }
 0x134   :  { %v546_v63 = vmul.f32 %v544_v60, %v541_v53 }
 0x136   :  { %548 = vrot.lane.b32.xlu0 %v541_v53, %s2679_s4 }
 0x1a4   :  { %v520_v54 = vpop.permute.xlu0 %519 }
 0x1a5   :  { %v522_v55 = vmul.f32 %v520_v54, %v512_v50 }
 0x1a7   :  { %524 = vrot.lane.b32.xlu0 %v522_v55, %s2678_s0 }
 0x1a8   :  { %v549_v56 = vpop.permute.xlu0 %548 }
 0x1a9   :  { %v551_v57 = vmul.f32 %v549_v56, %v541_v53 }
 0x1ab   :  { %553 = vrot.lane.b32.xlu1 %v551_v57, %s2678_s0 }
 0x219   :  { %v525_v61 = vpop.permute.xlu0 %524 }
 0x21a   :  { %v2865_v62 = vadd.f32 %v525_v61, %v517_v59 }
 0x21c   :  { %2440 = vtanh.f32 %v2865_v62 }
 0x21d   :  { %v554_v1 = vpop.permute.xlu1 %553 }
 0x21e   :  { %v2868_v2 = vadd.f32 %v554_v1, %v546_v63  ;;  %v856_v63 = vld [vmem:[#allocation3 + $0xa] sm:$0x3] }
 0x220   :  { %2442 = vtanh.f32 %v2868_v2 }
 0x229   :  { %v2441_v3 = vpop.eup %2440 }
 0x22a   :  { %530 = vrot.lane.b32.xlu0 %v2441_v3, %s2679_s4 }
 0x22d   :  { %v2443_v4 = vpop.eup %2442 }
 0x22e   :  { %559 = vrot.lane.b32.xlu1 %v2443_v4, %s2679_s4 }
 0x29c   :  { %v531_v5 = vpop.permute.xlu0 %530 }
 0x29d   :  { %v533_v6 = vmul.f32 %v531_v5, %v512_v50 }
 0x29f   :  { %564 = vrot.lane.b32.xlu0 %v533_v6, %s2678_s0 }
 0x2a0   :  { %v560_v7 = vpop.permute.xlu1 %559 }
 0x2a1   :  { %v562_v8 = vmul.f32 %v560_v7, %v541_v53 }
 0x2a3   :  { %570 = vrot.lane.b32.xlu1 %v562_v8, %s2678_s0 }
 0x311   :  { %v565_v17 = vpop.permute.xlu0 %564 }
 0x312   :  { %568 = vst.msk [vmem:[%s3218_s8] sm:$0x3] %vm139_vm0, %v565_v17  ;;  %2271 = vmatmul.mubr.msk.f32.vlgmr.msra.gmra.mxu0 %vm355_vm2, %v565_v17 }
 0x313   :  { %2285 = vmatpush3.msra.mxu0 %v2788_v9  ;;  %2292 = vmatprep.mubr.msk.f32.mxu0 %vm2677_vm3, %v2676_v0 }
 0x314   :  { %2286 = vmatprep.subr.mxu0 %v2676_v0 }
 0x315   :  { %v571_v18 = vpop.permute.xlu1 %570  ;;  %2287 = vmatpush3.msra.mxu0 %v2794_v11 }
 0x316   :  { %573 = vst.msk [vmem:[%s3219_s9 + $0xe] sm:$0x3] %vm139_vm0, %v571_v18  ;;  %2282 = vmatmul.mubr.msk.f32.vlgmr.msra.gmra.mxu1 %vm355_vm2, %v571_v18  ;;  %2288 = vmatprep.subr.mxu0 %v2676_v0 }
 0x317   :  { %2289 = vmatpush3.msra.mxu0 %v2802_v13  ;;  %2296 = vmatpush3.msra.mxu1 %v2790_v10 }
 0x318   :  { %2290 = vmatprep.subr.mxu0 %v2676_v0  ;;  %2297 = vmatprep.subr.mxu1 %v2676_v0 }
 0x319   :  { %2291 = vmatpush3.msra.mxu0 %v2810_v15  ;;  %2298 = vmatpush3.msra.mxu1 %v2796_v12 }
 0x31a   :  { %2299 = vmatprep.subr.mxu1 %v2676_v0  ;;  %2303 = vmatprep.mubr.msk.f32.mxu1 %vm2677_vm3, %v2676_v0 }
 0x31b   :  { %2300 = vmatpush3.msra.mxu1 %v2804_v14  ;;  %2306 = vmatprep.subr.mxu0 %v2676_v0 }
 0x31c   :  { %2301 = vmatprep.subr.mxu1 %v2676_v0 }
 0x31d   :  { %2302 = vmatpush3.msra.mxu1 %v2814_v16 }
 0x31e   :  { %2317 = vmatprep.subr.mxu1 %v2676_v0 }
 0x3d2   :  { %v643_v20 = vpop.f32.mrf.mxu0 }
 0x3d3   :  { %v647_v21 = vadd.f32 %v643_v20, %v574_v19 }
 0x3d4   :  { %v2272_v22 = vpop.f32.mrf.mxu0 }
 0x3d5   :  { %v2110_v23 = vmul.f32 -1.442695, %v647_v21 }
 0x3d6   :  { %v717_v25 = vpop.f32.mrf.mxu1 }
 0x3d7   :  { %2444 = vpow2.f32 %v2110_v23  ;;  %v721_v26 = vadd.f32 %v717_v25, %v648_v24 }
 0x3d8   :  { %v2283_v27 = vpop.f32.mrf.mxu1 }
 0x3d9   :  { %v2111_v28 = vmul.f32 -1.442695, %v721_v26 }
 0x3db   :  { %2446 = vpow2.f32 %v2111_v28 }
 0x3dc   :  { %2448 = vtanh.f32 %v647_v21 }
 0x3e4   :  { %v2445_v29 = vpop.eup %2444 }
 0x3e5   :  { %v726_v30 = vadd.f32 1.0, %v2445_v29 }
 0x3e7   :  { %2450 = vrcp.f32 %v726_v30 }
 0x3e8   :  { %v2447_v31 = vpop.eup %2446  ;;  %2452 = vtanh.f32 %v721_v26 }
 0x3e9   :  { %v751_v32 = vadd.f32 1.0, %v2447_v31  ;;  %v2449_v33 = vpop.eup %2448 }
 0x3eb   :  { %2454 = vrcp.f32 %v751_v32 }
 0x3f4   :  { %v2451_v34 = vpop.eup %2450 }
 0x3f5   :  { %v729_v35 = vsel %vm2853_vm6, %v2449_v33, %v2451_v34  ;;  %v2453_v36 = vpop.eup %2452 }
 0x3f6   :  { %732 = vrot.lane.b32.xlu0 %v729_v35, %s2679_s4  ;;  %v730_v43 = vmul.f32 %v729_v35, %v2865_v62 }
 0x3f8   :  { %v2455_v37 = vpop.eup %2454 }
 0x3f9   :  { %v754_v38 = vsel %vm2853_vm6, %v2453_v36, %v2455_v37 }
 0x3fa   :  { %757 = vrot.lane.b32.xlu1 %v754_v38, %s2679_s4  ;;  %v755_v46 = vmul.f32 %v754_v38, %v2868_v2 }
 0x468   :  { %v733_v39 = vpop.permute.xlu0 %732 }
 0x469   :  { %v735_v40 = vmul.f32 %v733_v39, %v729_v35 }
 0x46b   :  { %737 = vrot.lane.b32.xlu0 %v735_v40, %s2678_s0 }
 0x46c   :  { %v758_v41 = vpop.permute.xlu1 %757 }
 0x46d   :  { %v760_v42 = vmul.f32 %v758_v41, %v754_v38  ;;  %v990_v41 = vld [vmem:[#allocation2 + $0x6] sm:$0x3] }
 0x46f   :  { %762 = vrot.lane.b32.xlu1 %v760_v42, %s2678_s0 }
 0x4dd   :  { %v738_v44 = vpop.permute.xlu0 %737 }
 0x4de   :  { %v2914_v45 = vadd.f32 %v738_v44, %v730_v43 }
 0x4e0   :  { %2456 = vtanh.f32 %v2914_v45 }
 0x4e1   :  { %v763_v47 = vpop.permute.xlu1 %762 }
 0x4e2   :  { %v2918_v48 = vadd.f32 %v763_v47, %v755_v46  ;;  %v1064_v46 = vld [vmem:[#allocation3 + $0x8] sm:$0x3] }
 0x4e4   :  { %2458 = vtanh.f32 %v2918_v48 }
 0x4ed   :  { %v2457_v50 = vpop.eup %2456 }
 0x4ee   :  { %743 = vrot.lane.b32.xlu0 %v2457_v50, %s2679_s4 }
 0x4f1   :  { %v2459_v51 = vpop.eup %2458 }
 0x4f2   :  { %768 = vrot.lane.b32.xlu1 %v2459_v51, %s2679_s4 }
 0x560   :  { %v744_v52 = vpop.permute.xlu0 %743 }
 0x561   :  { %v746_v53 = vmul.f32 %v744_v52, %v729_v35 }
 0x563   :  { %773 = vrot.lane.b32.xlu0 %v746_v53, %s2678_s0 }
 0x564   :  { %v769_v54 = vpop.permute.xlu1 %768 }
 0x565   :  { %v771_v55 = vmul.f32 %v769_v54, %v754_v38 }
 0x567   :  { %778 = vrot.lane.b32.xlu1 %v771_v55, %s2678_s0 }
 0x5d5   :  { %v774_v56 = vpop.permute.xlu0 %773 }
 0x5d6   :  { %776 = vst.msk [vmem:[%s3218_s8 + $0x2] sm:$0x3] %vm139_vm0, %v774_v56  ;;  %2293 = vmatmul.mubr.msk.f32.vlgmr.msra.gmra.mxu0 %vm355_vm2, %v774_v56 }
 0x5d7   :  { %2307 = vmatpush3.msra.mxu0 %v2788_v9  ;;  %2314 = vmatprep.mubr.msk.f32.mxu0 %vm2677_vm3, %v2676_v0 }
 0x5d8   :  { %2308 = vmatprep.subr.mxu0 %v2676_v0 }
 0x5d9   :  { %v779_v57 = vpop.permute.xlu1 %778  ;;  %2309 = vmatpush3.msra.mxu0 %v2794_v11 }
 0x5da   :  { %781 = vst.msk [vmem:[%s3219_s9 + $0xc] sm:$0x3] %vm139_vm0, %v779_v57  ;;  %2304 = vmatmul.mubr.msk.f32.vlgmr.msra.gmra.mxu1 %vm355_vm2, %v779_v57  ;;  %2310 = vmatprep.subr.mxu0 %v2676_v0 }
 0x5db   :  { %2311 = vmatpush3.msra.mxu0 %v2802_v13  ;;  %2318 = vmatpush3.msra.mxu1 %v2790_v10 }
 0x5dc   :  { %2312 = vmatprep.subr.mxu0 %v2676_v0  ;;  %2319 = vmatprep.subr.mxu1 %v2676_v0 }
 0x5dd   :  { %2313 = vmatpush3.msra.mxu0 %v2810_v15  ;;  %2320 = vmatpush3.msra.mxu1 %v2796_v12 }
 0x5de   :  { %2321 = vmatprep.subr.mxu1 %v2676_v0  ;;  %2325 = vmatprep.mubr.msk.f32.mxu1 %vm2677_vm3, %v2676_v0 }
 0x5df   :  { %2322 = vmatpush3.msra.mxu1 %v2804_v14  ;;  %2328 = vmatprep.subr.mxu0 %v2676_v0 }
 0x5e0   :  { %2323 = vmatprep.subr.mxu1 %v2676_v0 }
 0x5e1   :  { %2324 = vmatpush3.msra.mxu1 %v2814_v16 }
 0x5e2   :  { %2339 = vmatprep.subr.mxu1 %v2676_v0 }
 0x696   :  { %v851_v59 = vpop.f32.mrf.mxu0 }
 0x697   :  { %v855_v60 = vadd.f32 %v851_v59, %v782_v58 }
 0x698   :  { %v2294_v61 = vpop.f32.mrf.mxu0 }
 0x699   :  { %v2114_v62 = vmul.f32 -1.442695, %v855_v60 }
 0x69a   :  { %v925_v1 = vpop.f32.mrf.mxu1 }
 0x69b   :  { %2460 = vpow2.f32 %v2114_v62  ;;  %v929_v2 = vadd.f32 %v925_v1, %v856_v63 }
 0x69c   :  { %v2305_v3 = vpop.f32.mrf.mxu1 }
 0x69d   :  { %v2115_v4 = vmul.f32 -1.442695, %v929_v2 }
 0x69f   :  { %2462 = vpow2.f32 %v2115_v4 }
 0x6a0   :  { %2464 = vtanh.f32 %v855_v60 }
 0x6a8   :  { %v2461_v5 = vpop.eup %2460 }
 0x6a9   :  { %v934_v6 = vadd.f32 1.0, %v2461_v5 }
 0x6ab   :  { %2466 = vrcp.f32 %v934_v6 }
 0x6ac   :  { %v2463_v7 = vpop.eup %2462  ;;  %2468 = vtanh.f32 %v929_v2 }
 0x6ad   :  { %v959_v8 = vadd.f32 1.0, %v2463_v7  ;;  %v2465_v17 = vpop.eup %2464 }
 0x6af   :  { %2470 = vrcp.f32 %v959_v8 }
 0x6b8   :  { %v2467_v18 = vpop.eup %2466 }
 0x6b9   :  { %v937_v19 = vsel %vm2853_vm6, %v2465_v17, %v2467_v18  ;;  %v2469_v20 = vpop.eup %2468 }
 0x6ba   :  { %940 = vrot.lane.b32.xlu0 %v937_v19, %s2679_s4  ;;  %v938_v27 = vmul.f32 %v937_v19, %v2914_v45 }
 0x6bc   :  { %v2471_v21 = vpop.eup %2470 }
 0x6bd   :  { %v962_v22 = vsel %vm2853_vm6, %v2469_v20, %v2471_v21 }
 0x6be   :  { %965 = vrot.lane.b32.xlu1 %v962_v22, %s2679_s4  ;;  %v963_v30 = vmul.f32 %v962_v22, %v2918_v48 }
 0x72c   :  { %v941_v23 = vpop.permute.xlu0 %940 }
 0x72d   :  { %v943_v24 = vmul.f32 %v941_v23, %v937_v19 }
 0x72f   :  { %945 = vrot.lane.b32.xlu0 %v943_v24, %s2678_s0 }
 0x730   :  { %v966_v25 = vpop.permute.xlu1 %965 }
 0x731   :  { %v968_v26 = vmul.f32 %v966_v25, %v962_v22  ;;  %v1198_v25 = vld [vmem:[#allocation2 + $0x8] sm:$0x3] }
 0x733   :  { %970 = vrot.lane.b32.xlu1 %v968_v26, %s2678_s0 }
 0x7a1   :  { %v946_v28 = vpop.permute.xlu0 %945 }
 0x7a2   :  { %v2964_v29 = vadd.f32 %v946_v28, %v938_v27 }
 0x7a4   :  { %2472 = vtanh.f32 %v2964_v29 }
 0x7a5   :  { %v971_v31 = vpop.permute.xlu1 %970 }
 0x7a6   :  { %v2968_v32 = vadd.f32 %v971_v31, %v963_v30  ;;  %v1272_v30 = vld [vmem:[#allocation3 + $0x6] sm:$0x3] }
 0x7a8   :  { %2474 = vtanh.f32 %v2968_v32 }
 0x7b1   :  { %v2473_v33 = vpop.eup %2472 }
 0x7b2   :  { %951 = vrot.lane.b32.xlu0 %v2473_v33, %s2679_s4 }
 0x7b5   :  { %v2475_v34 = vpop.eup %2474 }
 0x7b6   :  { %976 = vrot.lane.b32.xlu1 %v2475_v34, %s2679_s4 }
 0x824   :  { %v952_v35 = vpop.permute.xlu0 %951 }
 0x825   :  { %v954_v36 = vmul.f32 %v952_v35, %v937_v19 }
 0x827   :  { %981 = vrot.lane.b32.xlu0 %v954_v36, %s2678_s0 }
 0x828   :  { %v977_v37 = vpop.permute.xlu1 %976 }
 0x829   :  { %v979_v38 = vmul.f32 %v977_v37, %v962_v22 }
 0x82b   :  { %986 = vrot.lane.b32.xlu1 %v979_v38, %s2678_s0 }
 0x899   :  { %v982_v39 = vpop.permute.xlu0 %981 }
 0x89a   :  { %984 = vst.msk [vmem:[%s3218_s8 + $0x4] sm:$0x3] %vm139_vm0, %v982_v39  ;;  %2315 = vmatmul.mubr.msk.f32.vlgmr.msra.gmra.mxu0 %vm355_vm2, %v982_v39 }
 0x89b   :  { %2329 = vmatpush3.msra.mxu0 %v2788_v9  ;;  %2336 = vmatprep.mubr.msk.f32.mxu0 %vm2677_vm3, %v2676_v0 }
 0x89c   :  { %2330 = vmatprep.subr.mxu0 %v2676_v0 }
 0x89d   :  { %v987_v40 = vpop.permute.xlu1 %986  ;;  %2331 = vmatpush3.msra.mxu0 %v2794_v11 }
 0x89e   :  { %989 = vst.msk [vmem:[%s3219_s9 + $0xa] sm:$0x3] %vm139_vm0, %v987_v40  ;;  %2326 = vmatmul.mubr.msk.f32.vlgmr.msra.gmra.mxu1 %vm355_vm2, %v987_v40  ;;  %2332 = vmatprep.subr.mxu0 %v2676_v0 }
 0x89f   :  { %2333 = vmatpush3.msra.mxu0 %v2802_v13  ;;  %2340 = vmatpush3.msra.mxu1 %v2790_v10 }
 0x8a0   :  { %2334 = vmatprep.subr.mxu0 %v2676_v0  ;;  %2341 = vmatprep.subr.mxu1 %v2676_v0 }
 0x8a1   :  { %2335 = vmatpush3.msra.mxu0 %v2810_v15  ;;  %2342 = vmatpush3.msra.mxu1 %v2796_v12 }
 0x8a2   :  { %2343 = vmatprep.subr.mxu1 %v2676_v0  ;;  %2347 = vmatprep.mubr.msk.f32.mxu1 %vm2677_vm3, %v2676_v0 }
 0x8a3   :  { %2344 = vmatpush3.msra.mxu1 %v2804_v14  ;;  %2350 = vmatprep.subr.mxu0 %v2676_v0 }
 0x8a4   :  { %2345 = vmatprep.subr.mxu1 %v2676_v0 }
 0x8a5   :  { %2346 = vmatpush3.msra.mxu1 %v2814_v16 }
 0x8a6   :  { %2361 = vmatprep.subr.mxu1 %v2676_v0 }
 0x95a   :  { %v1059_v42 = vpop.f32.mrf.mxu0 }
 0x95b   :  { %v1063_v43 = vadd.f32 %v1059_v42, %v990_v41 }
 0x95c   :  { %v2316_v44 = vpop.f32.mrf.mxu0 }
 0x95d   :  { %v2118_v45 = vmul.f32 -1.442695, %v1063_v43 }
 0x95e   :  { %v1133_v47 = vpop.f32.mrf.mxu1 }
 0x95f   :  { %2476 = vpow2.f32 %v2118_v45  ;;  %v1137_v48 = vadd.f32 %v1133_v47, %v1064_v46 }
 0x960   :  { %v2327_v50 = vpop.f32.mrf.mxu1 }
 0x961   :  { %v2119_v51 = vmul.f32 -1.442695, %v1137_v48 }
 0x963   :  { %2478 = vpow2.f32 %v2119_v51 }
 0x964   :  { %2480 = vtanh.f32 %v1063_v43 }
 0x96c   :  { %v2477_v52 = vpop.eup %2476 }
 0x96d   :  { %v1142_v53 = vadd.f32 1.0, %v2477_v52 }
 0x96f   :  { %2482 = vrcp.f32 %v1142_v53 }
 0x970   :  { %v2479_v54 = vpop.eup %2478  ;;  %2484 = vtanh.f32 %v1137_v48 }
 0x971   :  { %v1167_v55 = vadd.f32 1.0, %v2479_v54  ;;  %v2481_v56 = vpop.eup %2480 }
 0x973   :  { %2486 = vrcp.f32 %v1167_v55 }
 0x97c   :  { %v2483_v57 = vpop.eup %2482 }
 0x97d   :  { %v1145_v58 = vsel %vm2853_vm6, %v2481_v56, %v2483_v57  ;;  %v2485_v59 = vpop.eup %2484 }
 0x97e   :  { %1148 = vrot.lane.b32.xlu0 %v1145_v58, %s2679_s4  ;;  %v1146_v3 = vmul.f32 %v1145_v58, %v2964_v29 }
 0x980   :  { %v2487_v60 = vpop.eup %2486 }
 0x981   :  { %v1170_v61 = vsel %vm2853_vm6, %v2485_v59, %v2487_v60 }
 0x982   :  { %1173 = vrot.lane.b32.xlu1 %v1170_v61, %s2679_s4  ;;  %v1171_v6 = vmul.f32 %v1170_v61, %v2968_v32 }
 0x9f0   :  { %v1149_v62 = vpop.permute.xlu0 %1148 }
 0x9f1   :  { %v1151_v63 = vmul.f32 %v1149_v62, %v1145_v58 }
 0x9f3   :  { %1153 = vrot.lane.b32.xlu0 %v1151_v63, %s2678_s0 }
 0x9f4   :  { %v1174_v1 = vpop.permute.xlu1 %1173 }
 0x9f5   :  { %v1176_v2 = vmul.f32 %v1174_v1, %v1170_v61  ;;  %v1480_v1 = vld [vmem:[#allocation3 + $0x4] sm:$0x3] }
 0x9f7   :  { %1178 = vrot.lane.b32.xlu1 %v1176_v2, %s2678_s0 }
 0xa65   :  { %v1154_v4 = vpop.permute.xlu0 %1153 }
 0xa66   :  { %v3014_v5 = vadd.f32 %v1154_v4, %v1146_v3 }
 0xa68   :  { %2488 = vtanh.f32 %v3014_v5 }
 0xa69   :  { %v1179_v7 = vpop.permute.xlu1 %1178 }
 0xa6a   :  { %v3018_v8 = vadd.f32 %v1179_v7, %v1171_v6 }
 0xa6c   :  { %2490 = vtanh.f32 %v3018_v8 }
 0xa75   :  { %v2489_v17 = vpop.eup %2488 }
 0xa76   :  { %1159 = vrot.lane.b32.xlu0 %v2489_v17, %s2679_s4 }
 0xa79   :  { %v2491_v18 = vpop.eup %2490 }
 0xa7a   :  { %1184 = vrot.lane.b32.xlu1 %v2491_v18, %s2679_s4 }
 0xae8   :  { %v1160_v19 = vpop.permute.xlu0 %1159 }
 0xae9   :  { %v1162_v20 = vmul.f32 %v1160_v19, %v1145_v58 }
 0xaeb   :  { %1189 = vrot.lane.b32.xlu0 %v1162_v20, %s2678_s0 }
 0xaec   :  { %v1185_v21 = vpop.permute.xlu1 %1184 }
 0xaed   :  { %v1187_v22 = vmul.f32 %v1185_v21, %v1170_v61 }
 0xaef   :  { %1194 = vrot.lane.b32.xlu1 %v1187_v22, %s2678_s0 }
 0xb5d   :  { %v1190_v23 = vpop.permute.xlu0 %1189 }
 0xb5e   :  { %1192 = vst.msk [vmem:[%s3218_s8 + $0x6] sm:$0x3] %vm139_vm0, %v1190_v23  ;;  %2337 = vmatmul.mubr.msk.f32.vlgmr.msra.gmra.mxu0 %vm355_vm2, %v1190_v23 }
 0xb5f   :  { %2351 = vmatpush3.msra.mxu0 %v2788_v9  ;;  %2358 = vmatprep.mubr.msk.f32.mxu0 %vm2677_vm3, %v2676_v0 }
 0xb60   :  { %2352 = vmatprep.subr.mxu0 %v2676_v0 }
 0xb61   :  { %v1195_v24 = vpop.permute.xlu1 %1194  ;;  %2353 = vmatpush3.msra.mxu0 %v2794_v11 }
 0xb62   :  { %1197 = vst.msk [vmem:[%s3219_s9 + $0x8] sm:$0x3] %vm139_vm0, %v1195_v24  ;;  %2348 = vmatmul.mubr.msk.f32.vlgmr.msra.gmra.mxu1 %vm355_vm2, %v1195_v24  ;;  %2354 = vmatprep.subr.mxu0 %v2676_v0 }
 0xb63   :  { %2355 = vmatpush3.msra.mxu0 %v2802_v13  ;;  %2362 = vmatpush3.msra.mxu1 %v2790_v10 }
 0xb64   :  { %2356 = vmatprep.subr.mxu0 %v2676_v0  ;;  %2363 = vmatprep.subr.mxu1 %v2676_v0 }
 0xb65   :  { %2357 = vmatpush3.msra.mxu0 %v2810_v15  ;;  %2364 = vmatpush3.msra.mxu1 %v2796_v12 }
 0xb66   :  { %2365 = vmatprep.subr.mxu1 %v2676_v0  ;;  %2369 = vmatprep.mubr.msk.f32.mxu1 %vm2677_vm3, %v2676_v0 }
 0xb67   :  { %2366 = vmatpush3.msra.mxu1 %v2804_v14  ;;  %2372 = vmatprep.subr.mxu0 %v2676_v0 }
 0xb68   :  { %2367 = vmatprep.subr.mxu1 %v2676_v0 }
 0xb69   :  { %2368 = vmatpush3.msra.mxu1 %v2814_v16 }
 0xb6a   :  { %2383 = vmatprep.subr.mxu1 %v2676_v0 }
 0xc1e   :  { %v1267_v26 = vpop.f32.mrf.mxu0 }
 0xc1f   :  { %v1271_v27 = vadd.f32 %v1267_v26, %v1198_v25 }
 0xc20   :  { %v2338_v28 = vpop.f32.mrf.mxu0 }
 0xc21   :  { %v2122_v29 = vmul.f32 -1.442695, %v1271_v27 }
 0xc22   :  { %v1341_v31 = vpop.f32.mrf.mxu1 }
 0xc23   :  { %2492 = vpow2.f32 %v2122_v29  ;;  %v1345_v32 = vadd.f32 %v1341_v31, %v1272_v30 }
 0xc24   :  { %v2349_v33 = vpop.f32.mrf.mxu1 }
 0xc25   :  { %v2123_v34 = vmul.f32 -1.442695, %v1345_v32 }
 0xc27   :  { %2494 = vpow2.f32 %v2123_v34 }
 0xc28   :  { %2496 = vtanh.f32 %v1271_v27 }
 0xc30   :  { %v2493_v35 = vpop.eup %2492 }
 0xc31   :  { %v1350_v36 = vadd.f32 1.0, %v2493_v35 }
 0xc33   :  { %2498 = vrcp.f32 %v1350_v36 }
 0xc34   :  { %v2495_v37 = vpop.eup %2494  ;;  %2500 = vtanh.f32 %v1345_v32 }
 0xc35   :  { %v1375_v38 = vadd.f32 1.0, %v2495_v37  ;;  %v2497_v39 = vpop.eup %2496 }
 0xc37   :  { %2502 = vrcp.f32 %v1375_v38 }
 0xc40   :  { %v2499_v40 = vpop.eup %2498 }
 0xc41   :  { %v1353_v41 = vsel %vm2853_vm6, %v2497_v39, %v2499_v40  ;;  %v2501_v42 = vpop.eup %2500  ;;  %v2556_v39 = vld [vmem:[#allocation13 + $0x18] sm:$0xff] }
 0xc42   :  { %1356 = vrot.lane.b32.xlu0 %v1353_v41, %s2679_s4  ;;  %v1354_v50 = vmul.f32 %v1353_v41, %v3014_v5 }
 0xc44   :  { %v2503_v43 = vpop.eup %2502 }
 0xc45   :  { %v1378_v44 = vsel %vm2853_vm6, %v2501_v42, %v2503_v43  ;;  %v2558_v42 = vld [vmem:[#allocation13 + $0x8] sm:$0xff]  ;;  %v2559_v43 = vld [vmem:[#allocation15 + $0x18] sm:$0xff] }
 0xc46   :  { %1381 = vrot.lane.b32.xlu1 %v1378_v44, %s2679_s4  ;;  %v1379_v53 = vmul.f32 %v1378_v44, %v3018_v8 }
 0xcb4   :  { %v1357_v45 = vpop.permute.xlu0 %1356 }
 0xcb5   :  { %v1359_v46 = vmul.f32 %v1357_v45, %v1353_v41  ;;  %v2561_v45 = vld [vmem:[#allocation15 + $0x8] sm:$0xff] }
 0xcb7   :  { %1361 = vrot.lane.b32.xlu0 %v1359_v46, %s2678_s0  ;;  %v2562_v46 = vld [vmem:[#allocation15] sm:$0xff] }
 0xcb8   :  { %v1382_v47 = vpop.permute.xlu1 %1381 }
 0xcb9   :  { %v1384_v48 = vmul.f32 %v1382_v47, %v1378_v44  ;;  %v1614_v47 = vld [vmem:[#allocation2 + $0xc] sm:$0x3] }
 0xcbb   :  { %1386 = vrot.lane.b32.xlu1 %v1384_v48, %s2678_s0 }
 0xd29   :  { %v1362_v51 = vpop.permute.xlu0 %1361 }
 0xd2a   :  { %v3064_v52 = vadd.f32 %v1362_v51, %v1354_v50 }
 0xd2c   :  { %2504 = vtanh.f32 %v3064_v52 }
 0xd2d   :  { %v1387_v54 = vpop.permute.xlu1 %1386 }
 0xd2e   :  { %v3068_v55 = vadd.f32 %v1387_v54, %v1379_v53  ;;  %v1688_v53 = vld [vmem:[#allocation3 + $0x2] sm:$0x3] }
 0xd30   :  { %2506 = vtanh.f32 %v3068_v55 }
 0xd39   :  { %v2505_v56 = vpop.eup %2504 }
 0xd3a   :  { %1367 = vrot.lane.b32.xlu0 %v2505_v56, %s2679_s4 }
 0xd3d   :  { %v2507_v57 = vpop.eup %2506 }
 0xd3e   :  { %1392 = vrot.lane.b32.xlu1 %v2507_v57, %s2679_s4 }
 0xdac   :  { %v1368_v58 = vpop.permute.xlu0 %1367 }
 0xdad   :  { %v1370_v59 = vmul.f32 %v1368_v58, %v1353_v41  ;;  %v2557_v41 = vld [vmem:[#allocation13 + $0x10] sm:$0xff] }
 0xdaf   :  { %1397 = vrot.lane.b32.xlu0 %v1370_v59, %s2678_s0 }
 0xdb0   :  { %v1393_v60 = vpop.permute.xlu1 %1392 }
 0xdb1   :  { %v1395_v61 = vmul.f32 %v1393_v60, %v1378_v44  ;;  %v2560_v44 = vld [vmem:[#allocation15 + $0x10] sm:$0xff] }
 0xdb3   :  { %1402 = vrot.lane.b32.xlu1 %v1395_v61, %s2678_s0 }
 0xe21   :  { %v1398_v62 = vpop.permute.xlu0 %1397 }
 0xe22   :  { %1400 = vst.msk [vmem:[%s3218_s8 + $0x8] sm:$0x3] %vm139_vm0, %v1398_v62  ;;  %2359 = vmatmul.mubr.msk.f32.vlgmr.msra.gmra.mxu0 %vm355_vm2, %v1398_v62 }
 0xe23   :  { %2373 = vmatpush3.msra.mxu0 %v2788_v9  ;;  %2380 = vmatprep.mubr.msk.f32.mxu0 %vm2677_vm3, %v2676_v0  ;;  %v1406_v9 = vld [vmem:[#allocation2 + $0xa] sm:$0x3] }
 0xe24   :  { %2374 = vmatprep.subr.mxu0 %v2676_v0 }
 0xe25   :  { %v1403_v63 = vpop.permute.xlu1 %1402  ;;  %2375 = vmatpush3.msra.mxu0 %v2794_v11 }
 0xe26   :  { %1405 = vst.msk [vmem:[%s3219_s9 + $0x6] sm:$0x3] %vm139_vm0, %v1403_v63  ;;  %2370 = vmatmul.mubr.msk.f32.vlgmr.msra.gmra.mxu1 %vm355_vm2, %v1403_v63  ;;  %2376 = vmatprep.subr.mxu0 %v2676_v0 }
 0xe27   :  { %2377 = vmatpush3.msra.mxu0 %v2802_v13  ;;  %2384 = vmatpush3.msra.mxu1 %v2790_v10 }
 0xe28   :  { %2378 = vmatprep.subr.mxu0 %v2676_v0  ;;  %2385 = vmatprep.subr.mxu1 %v2676_v0 }
 0xe29   :  { %2379 = vmatpush3.msra.mxu0 %v2810_v15  ;;  %2386 = vmatpush3.msra.mxu1 %v2796_v12 }
 0xe2a   :  { %2387 = vmatprep.subr.mxu1 %v2676_v0  ;;  %2391 = vmatprep.mubr.msk.f32.mxu1 %vm2677_vm3, %v2676_v0 }
 0xe2b   :  { %2388 = vmatpush3.msra.mxu1 %v2804_v14  ;;  %2394 = vmatprep.subr.mxu0 %v2676_v0 }
 0xe2c   :  { %2389 = vmatprep.subr.mxu1 %v2676_v0 }
 0xe2d   :  { %2390 = vmatpush3.msra.mxu1 %v2814_v16 }
 0xe2e   :  { %2405 = vmatprep.subr.mxu1 %v2676_v0 }
 0xee2   :  { %v1475_v10 = vpop.f32.mrf.mxu0 }
 0xee3   :  { %v1479_v11 = vadd.f32 %v1475_v10, %v1406_v9 }
 0xee4   :  { %v2360_v13 = vpop.f32.mrf.mxu0 }
 0xee5   :  { %v2126_v12 = vmul.f32 -1.442695, %v1479_v11 }
 0xee6   :  { %v1549_v2 = vpop.f32.mrf.mxu1 }
 0xee7   :  { %2508 = vpow2.f32 %v2126_v12  ;;  %v1553_v3 = vadd.f32 %v1549_v2, %v1480_v1 }
 0xee8   :  { %v2371_v4 = vpop.f32.mrf.mxu1 }
 0xee9   :  { %v2127_v5 = vmul.f32 -1.442695, %v1553_v3 }
 0xeeb   :  { %2510 = vpow2.f32 %v2127_v5 }
 0xeec   :  { %2512 = vtanh.f32 %v1479_v11 }
 0xef4   :  { %v2509_v14 = vpop.eup %2508 }
 0xef5   :  { %v1558_v6 = vadd.f32 1.0, %v2509_v14 }
 0xef7   :  { %2514 = vrcp.f32 %v1558_v6 }
 0xef8   :  { %v2511_v7 = vpop.eup %2510  ;;  %2516 = vtanh.f32 %v1553_v3 }
 0xef9   :  { %v1583_v16 = vadd.f32 1.0, %v2511_v7  ;;  %v2513_v8 = vpop.eup %2512 }
 0xefb   :  { %2518 = vrcp.f32 %v1583_v16 }
 0xf04   :  { %v2515_v17 = vpop.eup %2514 }
 0xf05   :  { %v1561_v18 = vsel %vm2853_vm6, %v2513_v8, %v2515_v17  ;;  %v2517_v19 = vpop.eup %2516 }
 0xf06   :  { %1564 = vrot.lane.b32.xlu0 %v1561_v18, %s2679_s4  ;;  %v1562_v26 = vmul.f32 %v1561_v18, %v3064_v52 }
 0xf08   :  { %v2519_v20 = vpop.eup %2518 }
 0xf09   :  { %v1586_v21 = vsel %vm2853_vm6, %v2517_v19, %v2519_v20 }
 0xf0a   :  { %1589 = vrot.lane.b32.xlu1 %v1586_v21, %s2679_s4  ;;  %v1587_v29 = vmul.f32 %v1586_v21, %v3068_v55 }
 0xf78   :  { %v1565_v22 = vpop.permute.xlu0 %1564 }
 0xf79   :  { %v1567_v23 = vmul.f32 %v1565_v22, %v1561_v18  ;;  %v1822_v22 = vld [vmem:[#allocation2 + $0xe] sm:$0x3] }
 0xf7b   :  { %1569 = vrot.lane.b32.xlu0 %v1567_v23, %s2678_s0 }
 0xf7c   :  { %v1590_v24 = vpop.permute.xlu1 %1589 }
 0xf7d   :  { %v1592_v25 = vmul.f32 %v1590_v24, %v1586_v21 }
 0xf7f   :  { %1594 = vrot.lane.b32.xlu1 %v1592_v25, %s2678_s0 }
 0xfed   :  { %v1570_v27 = vpop.permute.xlu0 %1569 }
 0xfee   :  { %v3114_v28 = vadd.f32 %v1570_v27, %v1562_v26  ;;  %v1896_v27 = vld [vmem:[#allocation3] sm:$0x3] }
 0xff0   :  { %2520 = vtanh.f32 %v3114_v28 }
 0xff1   :  { %v1595_v30 = vpop.permute.xlu1 %1594 }
 0xff2   :  { %v3118_v31 = vadd.f32 %v1595_v30, %v1587_v29 }
 0xff4   :  { %2522 = vtanh.f32 %v3118_v31 }
 0xffd   :  { %v2521_v32 = vpop.eup %2520 }
 0xffe   :  { %1575 = vrot.lane.b32.xlu0 %v2521_v32, %s2679_s4 }
0x1001   :  { %v2523_v33 = vpop.eup %2522 }
0x1002   :  { %1600 = vrot.lane.b32.xlu1 %v2523_v33, %s2679_s4 }
0x1070   :  { %v1576_v34 = vpop.permute.xlu0 %1575 }
0x1071   :  { %v1578_v35 = vmul.f32 %v1576_v34, %v1561_v18 }
0x1073   :  { %1605 = vrot.lane.b32.xlu0 %v1578_v35, %s2678_s0 }
0x1074   :  { %v1601_v36 = vpop.permute.xlu1 %1600 }
0x1075   :  { %v1603_v37 = vmul.f32 %v1601_v36, %v1586_v21 }
0x1077   :  { %1610 = vrot.lane.b32.xlu1 %v1603_v37, %s2678_s0 }
0x10e5   :  { %v1606_v38 = vpop.permute.xlu0 %1605 }
0x10e6   :  { %1608 = vst.msk [vmem:[%s3218_s8 + $0xa] sm:$0x3] %vm139_vm0, %v1606_v38  ;;  %2381 = vmatmul.mubr.msk.f32.vlgmr.msra.gmra.mxu0 %vm355_vm2, %v1606_v38 }
0x10e7   :  { %2395 = vmatpush3.msra.mxu0 %v2556_v39  ;;  %2402 = vmatprep.mubr.msk.f32.mxu0 %vm2677_vm3, %v2676_v0 }
0x10e8   :  { %2396 = vmatprep.subr.mxu0 %v2676_v0 }
0x10e9   :  { %v1611_v40 = vpop.permute.xlu1 %1610  ;;  %2397 = vmatpush3.msra.mxu0 %v2557_v41 }
0x10ea   :  { %1613 = vst.msk [vmem:[%s3219_s9 + $0x4] sm:$0x3] %vm139_vm0, %v1611_v40  ;;  %2392 = vmatmul.mubr.msk.f32.vlgmr.msra.gmra.mxu1 %vm355_vm2, %v1611_v40  ;;  %2398 = vmatprep.subr.mxu0 %v2676_v0 }
0x10eb   :  { %2399 = vmatpush3.msra.mxu0 %v2558_v42  ;;  %2406 = vmatpush3.msra.mxu1 %v2559_v43 }
0x10ec   :  { %2400 = vmatprep.subr.mxu0 %v2676_v0  ;;  %2407 = vmatprep.subr.mxu1 %v2676_v0 }
0x10ed   :  { %2401 = vmatpush3.msra.mxu0 %v2810_v15  ;;  %2408 = vmatpush3.msra.mxu1 %v2560_v44 }
0x10ee   :  { %2409 = vmatprep.subr.mxu1 %v2676_v0  ;;  %2413 = vmatprep.mubr.msk.f32.mxu1 %vm2677_vm3, %v2676_v0 }
0x10ef   :  { %2410 = vmatpush3.msra.mxu1 %v2561_v45 }
0x10f0   :  { %2411 = vmatprep.subr.mxu1 %v2676_v0 }
0x10f1   :  { %2412 = vmatpush3.msra.mxu1 %v2562_v46 }
0x11a6   :  { %v1683_v48 = vpop.f32.mrf.mxu0 }
0x11a7   :  { %v1687_v50 = vadd.f32 %v1683_v48, %v1614_v47 }
0x11a8   :  { %v2382_v51 = vpop.f32.mrf.mxu0 }
0x11a9   :  { %v2130_v52 = vmul.f32 -1.442695, %v1687_v50 }
0x11aa   :  { %v1757_v15 = vpop.f32.mrf.mxu1 }
0x11ab   :  { %2524 = vpow2.f32 %v2130_v52  ;;  %v1761_v54 = vadd.f32 %v1757_v15, %v1688_v53 }
0x11ac   :  { %v2393_v55 = vpop.f32.mrf.mxu1 }
0x11ad   :  { %v2131_v56 = vmul.f32 -1.442695, %v1761_v54 }
0x11af   :  { %2526 = vpow2.f32 %v2131_v56 }
0x11b0   :  { %2528 = vtanh.f32 %v1687_v50 }
0x11b8   :  { %v2525_v57 = vpop.eup %2524 }
0x11b9   :  { %v1766_v58 = vadd.f32 1.0, %v2525_v57 }
0x11bb   :  { %2530 = vrcp.f32 %v1766_v58 }
0x11bc   :  { %v2527_v59 = vpop.eup %2526  ;;  %2532 = vtanh.f32 %v1761_v54 }
0x11bd   :  { %v1791_v0 = vadd.f32 1.0, %v2527_v59  ;;  %v2529_v60 = vpop.eup %2528 }
0x11bf   :  { %2534 = vrcp.f32 %v1791_v0 }
0x11c8   :  { %v2531_v61 = vpop.eup %2530 }
0x11c9   :  { %v1769_v62 = vsel %vm2853_vm6, %v2529_v60, %v2531_v61  ;;  %v2533_v63 = vpop.eup %2532 }
0x11ca   :  { %1772 = vrot.lane.b32.xlu0 %v1769_v62, %s2679_s4  ;;  %v1770_v2 = vmul.f32 %v1769_v62, %v3114_v28 }
0x11cc   :  { %v2535_v9 = vpop.eup %2534 }
0x11cd   :  { %v1794_v10 = vsel %vm2853_vm6, %v2533_v63, %v2535_v9 }
0x11ce   :  { %1797 = vrot.lane.b32.xlu1 %v1794_v10, %s2679_s4  ;;  %v1795_v5 = vmul.f32 %v1794_v10, %v3118_v31 }
0x123c   :  { %v1773_v11 = vpop.permute.xlu0 %1772 }
0x123d   :  { %v1775_v13 = vmul.f32 %v1773_v11, %v1769_v62 }
0x123f   :  { %1777 = vrot.lane.b32.xlu0 %v1775_v13, %s2678_s0 }
0x1240   :  { %v1798_v12 = vpop.permute.xlu1 %1797 }
0x1241   :  { %v1800_v1 = vmul.f32 %v1798_v12, %v1794_v10 }
0x1243   :  { %1802 = vrot.lane.b32.xlu1 %v1800_v1, %s2678_s0 }
0x12b1   :  { %v1778_v3 = vpop.permute.xlu0 %1777 }
0x12b2   :  { %v1780_v4 = vadd.f32 %v1778_v3, %v1770_v2 }
0x12b4   :  { %2536 = vtanh.f32 %v1780_v4 }
0x12b5   :  { %v1803_v14 = vpop.permute.xlu1 %1802 }
0x12b6   :  { %v1805_v6 = vadd.f32 %v1803_v14, %v1795_v5 }
0x12b8   :  { %2538 = vtanh.f32 %v1805_v6 }
0x12c1   :  { %v2537_v7 = vpop.eup %2536 }
0x12c2   :  { %1783 = vrot.lane.b32.xlu0 %v2537_v7, %s2679_s4 }
0x12c5   :  { %v2539_v16 = vpop.eup %2538 }
0x12c6   :  { %1808 = vrot.lane.b32.xlu1 %v2539_v16, %s2679_s4 }
0x1334   :  { %v1784_v8 = vpop.permute.xlu0 %1783 }
0x1335   :  { %v1786_v17 = vmul.f32 %v1784_v8, %v1769_v62 }
0x1337   :  { %1813 = vrot.lane.b32.xlu0 %v1786_v17, %s2678_s0 }
0x1338   :  { %v1809_v18 = vpop.permute.xlu1 %1808 }
0x1339   :  { %v1811_v19 = vmul.f32 %v1809_v18, %v1794_v10 }
0x133b   :  { %1818 = vrot.lane.b32.xlu1 %v1811_v19, %s2678_s0 }
0x13a9   :  { %v1814_v20 = vpop.permute.xlu0 %1813 }
0x13aa   :  { %1816 = vst.msk [vmem:[%s3218_s8 + $0xc] sm:$0x3] %vm139_vm0, %v1814_v20  ;;  %2403 = vmatmul.mubr.msk.f32.vlgmr.msra.gmra.mxu0 %vm355_vm2, %v1814_v20 }
0x13ad   :  { %v1819_v21 = vpop.permute.xlu1 %1818 }
0x13ae   :  { %1821 = vst.msk [vmem:[%s3219_s9 + $0x2] sm:$0x3] %vm139_vm0, %v1819_v21  ;;  %2414 = vmatmul.mubr.msk.f32.vlgmr.msra.gmra.mxu1 %vm355_vm2, %v1819_v21 }
0x146a   :  { %v1891_v23 = vpop.f32.mrf.mxu0 }
0x146b   :  { %v1895_v24 = vadd.f32 %v1891_v23, %v1822_v22 }
0x146c   :  { %v2404_v25 = vpop.f32.mrf.mxu0 }
0x146d   :  { %v2134_v26 = vmul.f32 -1.442695, %v1895_v24 }
0x146e   :  { %v1965_v28 = vpop.f32.mrf.mxu1 }
0x146f   :  { %2540 = vpow2.f32 %v2134_v26  ;;  %v1969_v29 = vadd.f32 %v1965_v28, %v1896_v27 }
0x1470   :  { %v2415_v30 = vpop.f32.mrf.mxu1 }
0x1471   :  { %v2135_v31 = vmul.f32 -1.442695, %v1969_v29 }
0x1473   :  { %2542 = vpow2.f32 %v2135_v31 }
0x1474   :  { %2544 = vtanh.f32 %v1895_v24 }
0x147c   :  { %v2541_v32 = vpop.eup %2540 }
0x147d   :  { %v1974_v33 = vadd.f32 1.0, %v2541_v32 }
0x147f   :  { %2546 = vrcp.f32 %v1974_v33 }
0x1480   :  { %v2543_v34 = vpop.eup %2542  ;;  %2548 = vtanh.f32 %v1969_v29 }
0x1481   :  { %v1999_v35 = vadd.f32 1.0, %v2543_v34  ;;  %v2545_v36 = vpop.eup %2544 }
0x1483   :  { %2550 = vrcp.f32 %v1999_v35 }
0x148c   :  { %v2547_v37 = vpop.eup %2546 }
0x148d   :  { %v1977_v38 = vsel %vm2853_vm6, %v2545_v36, %v2547_v37  ;;  %v2549_v39 = vpop.eup %2548 }
0x148e   :  { %1980 = vrot.lane.b32.xlu0 %v1977_v38, %s2679_s4  ;;  %v1978_v46 = vmul.f32 %v1977_v38, %v1780_v4 }
0x1490   :  { %v2551_v40 = vpop.eup %2550 }
0x1491   :  { %v2002_v41 = vsel %vm2853_vm6, %v2549_v39, %v2551_v40 }
0x1492   :  { %2005 = vrot.lane.b32.xlu1 %v2002_v41, %s2679_s4  ;;  %v2003_v50 = vmul.f32 %v2002_v41, %v1805_v6 }
0x1500   :  { %v1981_v42 = vpop.permute.xlu0 %1980 }
0x1501   :  { %v1983_v43 = vmul.f32 %v1981_v42, %v1977_v38 }
0x1503   :  { %1985 = vrot.lane.b32.xlu0 %v1983_v43, %s2678_s0 }
0x1504   :  { %v2006_v44 = vpop.permute.xlu1 %2005 }
0x1505   :  { %v2008_v45 = vmul.f32 %v2006_v44, %v2002_v41 }
0x1507   :  { %2010 = vrot.lane.b32.xlu1 %v2008_v45, %s2678_s0 }
0x1575   :  { %v1986_v47 = vpop.permute.xlu0 %1985 }
0x1576   :  { %v1988_v48 = vadd.f32 %v1986_v47, %v1978_v46 }
0x1578   :  { %2552 = vtanh.f32 %v1988_v48 }
0x1579   :  { %v2011_v51 = vpop.permute.xlu1 %2010 }
0x157a   :  { %v2013_v52 = vadd.f32 %v2011_v51, %v2003_v50 }
0x157c   :  { %2554 = vtanh.f32 %v2013_v52 }
0x1585   :  { %v2553_v49 = vpop.eup %2552 }
0x1586   :  { %1991 = vrot.lane.b32.xlu0 %v2553_v49, %s2679_s4 }
0x1589   :  { %v2555_v53 = vpop.eup %2554 }
0x158a   :  { %2016 = vrot.lane.b32.xlu1 %v2555_v53, %s2679_s4 }
0x15f8   :  { %v1992_v15 = vpop.permute.xlu0 %1991 }
0x15f9   :  { %v1994_v54 = vmul.f32 %v1992_v15, %v1977_v38 }
0x15fb   :  { %2021 = vrot.lane.b32.xlu0 %v1994_v54, %s2678_s0 }
0x15fc   :  { %v2017_v55 = vpop.permute.xlu1 %2016 }
0x15fd   :  { %v2019_v56 = vmul.f32 %v2017_v55, %v2002_v41 }
0x15ff   :  { %2026 = vrot.lane.b32.xlu1 %v2019_v56, %s2678_s0  ;;  %2032 = vrot.lane.b32.xlu0 %v1988_v48, %s2680_s3 }
0x1603   :  { %2038 = vrot.lane.b32.xlu1 %v2013_v52, %s2680_s3 }
0x166d   :  { %v2022_v57 = vpop.permute.xlu0 %2021 }
0x166e   :  { %2024 = vst.msk [vmem:[%s3218_s8 + $0xe] sm:$0x3] %vm139_vm0, %v2022_v57  ;;  %2030 = vst.msk [vmem:[#allocation4] sm:$0x3] %vm139_vm0, %v2022_v57 }
0x166f   :  { %2045 = vst.msk [vmem:[%s3220_s10] sm:$0x3] %vm139_vm0, %v2022_v57 }
0x1671   :  { %v2027_v58 = vpop.permute.xlu1 %2026  ;;  %v2033_v59 = vpop.permute.xlu0 %2032 }
0x1672   :  { %2029 = vst.msk [vmem:[%s3219_s9] sm:$0x3] %vm139_vm0, %v2027_v58  ;;  %2036 = vst.msk [vmem:[#allocation6] sm:$0x3] %vm139_vm0, %v2027_v58 }
0x1673   :  { %2136 = vst.msk [vmem:[%s3220_s10 + $0x2] sm:$0x3] %vm139_vm0, %v2027_v58  ;;  %2035 = vst.msk [vmem:[#allocation5] sm:$0x3] %vm139_vm0, %v2033_v59 }
0x1674   :  { %2048 = vst.msk [vmem:[%s3221_s11] sm:$0x3] %vm139_vm0, %v2033_v59 }
0x1675   :  { %v2039_v0 = vpop.permute.xlu1 %2038 }
0x1676   :  { %2041 = vst.msk [vmem:[#allocation7] sm:$0x3] %vm139_vm0, %v2039_v0  ;;  %2137 = vst.msk [vmem:[%s3221_s11 + $0x2] sm:$0x3] %vm139_vm0, %v2039_v0 }
0x1677   :  { %2081 = vsyncpa [#allocation9], 1 }
0x1678   :  { %2082 = vsyncpa [#allocation11], 1 }
0x1679   :  { %2083 = vsyncpa [#allocation14], 1 }

// kernel: lstm_layer_forward.5
= control target key start
LH: loop header
LB: loop body
LE: loop exit
PB: predicated region body
PF: predicated region fallthrough
CT: control target
= control target key end

     0   :  { %21 = vsyncpa [#allocation9], 0  ;;  %s2795_s18 = smov [#allocation8]   ;;  %s3441_s0 = inlined_call_operand.vmem [shape: f32[16,32], index: 0, kind: input, shape index: {}, may-alias: {0,2}]   ;;  %s3442_s1 = inlined_call_operand.vmem [shape: f32[16,32], index: 1, kind: input, shape index: {}, may-alias: {1,3}]   ;;  %s3443_s2 = inlined_call_operand.vmem [shape: f32[16,32], index: 2, kind: input, shape index: {}, may-alias: {0,2}]   ;;  %s3444_s3 = inlined_call_operand.vmem [shape: f32[16,32], index: 3, kind: input, shape index: {}, may-alias: {1,3}]   ;;  %s3445_s4 = inlined_call_operand.vmem [shape: f32[32,128], index: 4, kind: input, shape index: {}]   ;;  %s3446_s5 = inlined_call_operand.vmem [shape: f32[32,128], index: 5, kind: input, shape index: {}]   ;;  %s3447_s6 = inlined_call_operand.vmem [shape: f32[32,128], index: 6, kind: input, shape index: {}]   ;;  %s3448_s7 = inlined_call_operand.vmem [shape: f32[32,128], index: 7, kind: input, shape index: {}]   ;;  %s3449_s8 = inlined_call_operand.hbm [shape: f32[1,128], index: 8, kind: input, shape index: {}]   ;;  %s3450_s9 = inlined_call_operand.vmem [shape: f32[1,128], index: 9, kind: input, shape index: {}]   ;;  %s3451_s10 = inlined_call_operand.vmem [shape: f32[32,128], index: 10, kind: input, shape index: {}]   ;;  %s3452_s11 = inlined_call_operand.vmem [shape: f32[32,128], index: 11, kind: input, shape index: {}]   ;;  %s3453_s12 = inlined_call_operand.vmem [shape: f32[16,32], index: 12, kind: output, shape index: {0}]   ;;  %s3454_s13 = inlined_call_operand.vmem [shape: f32[16,32], index: 13, kind: output, shape index: {1}]   ;;  %s3455_s14 = inlined_call_operand.vmem [shape: f32[2,2,32], index: 14, kind: output, shape index: {2}]   ;;  %s3456_s15 = inlined_call_operand.vmem [shape: f32[2,2,32], index: 15, kind: output, shape index: {3}]  }
   0x1   :  { %s60_s19 = sshll.u32 %s2795_s18, 4  ;;  %s61_s19 = int_to_ptr.vmem [resolvable:$true] %s60_s19 }
   0x2   :  { %s2781_s20 = scalar_lea.vmem %s61_s19, 16  ;;  %s2785_s21 = scalar_lea.vmem %s61_s19, 32 }
   0x3   :  { %p2782_p0 = scmp.ne.s32.totalorder %s61_s19, %s2781_s20  ;;  %p2786_p1 = scmp.lt.s32.totalorder %s61_s19, %s61_s19 }
   0x4   :  { %p2787_p2 = scmp.lt.s32.totalorder %s2785_s21, %s2781_s20 }
   0x6   :  { %p2788_p3 = por %p2787_p2, %p2786_p1 }
   0x8   :  { %p2789_p4 = pnand %p2788_p3, %p2782_p0 }
   0xa   :  { %2792 = shalt.err (!%p2789_p4)
}
   0xb   :  { %63 = dma.hbm_to_vmem [thread:$0]  %s3449_s8, 16, %s61_s19, [#allocation9]  }
   0xc   :  { %2793 = dma.done.wait [#allocation9], 16  }
   0xd   :  { %2794 = vsyncadd [#allocation9], 4294967280  ;;  %vm119_vm0 = vcmask 254976   ;;  %v2796_v0 = vmov 0.0   ;;  %v130_v1 = vld [vmem:[%s3445_s4 + $0x18] sm:$0xff]  ;;  %v129_v3 = vld [vmem:[%s3445_s4 + $0x10] sm:$0xff] }
   0xe   :  { %120 = vst.msk [vmem:[#allocation4] sm:$0x3] %vm119_vm0, %v2796_v0  ;;  %121 = vst.msk [vmem:[#allocation5] sm:$0x3] %vm119_vm0, %v2796_v0  ;;  %v226_v2 = vld [vmem:[%s3446_s5 + $0x18] sm:$0xff]  ;;  %2411 = vmatprep.subr.mxu0 %v130_v1  ;;  %v225_v4 = vld [vmem:[%s3446_s5 + $0x10] sm:$0xff] }
   0xf   :  { %122 = vst.msk [vmem:[#allocation6] sm:$0x3] %vm119_vm0, %v2796_v0  ;;  %123 = vst.msk [vmem:[#allocation7] sm:$0x3] %vm119_vm0, %v2796_v0  ;;  %2422 = vmatprep.subr.mxu1 %v226_v2  ;;  %2412 = vmatpush3.msra.mxu0 %v130_v1  ;;  %v128_v5 = vld [vmem:[%s3445_s4 + $0x8] sm:$0xff]  ;;  %v127_v7 = vld [vmem:[%s3445_s4] sm:$0xff] }
  0x10   :  { %2423 = vmatpush3.msra.mxu1 %v226_v2  ;;  %v224_v6 = vld [vmem:[%s3446_s5 + $0x8] sm:$0xff]  ;;  %2413 = vmatprep.subr.mxu0 %v129_v3  ;;  %v223_v8 = vld [vmem:[%s3446_s5] sm:$0xff]  ;;  %vm131_vm1 = vcmask 261120   ;;  %v318_v12 = vld [vmem:[%s3447_s6 + $0x18] sm:$0xff]  ;;  %vm2797_vm2 = vmmov 0   ;;  %s2798_s4 = smov 32  }
  0x11   :  { %2424 = vmatprep.subr.mxu1 %v225_v4  ;;  %2414 = vmatpush3.msra.mxu0 %v129_v3  ;;  %v125_v9 = vld [vmem:[%s3441_s0] sm:$0xff]  ;;  %v126_v10 = vld [vmem:[%s3441_s0 + $0x8] sm:$0xff]  ;;  %v413_v13 = vld [vmem:[%s3448_s7 + $0x18] sm:$0xff]  ;;  %s2800_s8 = smov 96  }
  0x12   :  { %2425 = vmatpush3.msra.mxu1 %v225_v4  ;;  %2415 = vmatprep.subr.mxu0 %v128_v5  ;;  %v221_v11 = vld [vmem:[%s3442_s1] sm:$0xff]  ;;  %v222_v14 = vld [vmem:[%s3442_s1 + $0x8] sm:$0xff]  ;;  %v317_v15 = vld [vmem:[%s3447_s6 + $0x10] sm:$0xff] }
  0x13   :  { %2426 = vmatprep.subr.mxu1 %v224_v6  ;;  %2416 = vmatpush3.msra.mxu0 %v128_v5  ;;  %v412_v16 = vld [vmem:[%s3448_s7 + $0x10] sm:$0xff]  ;;  %v316_v17 = vld [vmem:[%s3447_s6 + $0x8] sm:$0xff]  ;;  %v315_v19 = vld [vmem:[%s3447_s6] sm:$0xff]  ;;  %v507_v5 = vlaneseq }
  0x14   :  { %2427 = vmatpush3.msra.mxu1 %v224_v6  ;;  %2417 = vmatprep.subr.mxu0 %v127_v7  ;;  %v411_v18 = vld [vmem:[%s3448_s7 + $0x8] sm:$0xff]  ;;  %v410_v20 = vld [vmem:[%s3448_s7] sm:$0xff]  ;;  %v2973_v25 = vld [vmem:[%s3451_s10 + $0x18] sm:$0xff] }
  0x15   :  { %2428 = vmatprep.subr.mxu1 %v223_v8  ;;  %2418 = vmatpush3.msra.mxu0 %v127_v7  ;;  %v313_v21 = vld [vmem:[%s3443_s2] sm:$0xff]  ;;  %v314_v23 = vld [vmem:[%s3443_s2 + $0x8] sm:$0xff]  ;;  %v2978_v26 = vld [vmem:[%s3452_s11 + $0x18] sm:$0xff]  ;;  %v508_v7 = vand.u32 127, %v507_v5 }
  0x16   :  { %2419 = vmatprep.mubr.msk.f32.mxu0 %vm131_vm1, %v125_v9  ;;  %2429 = vmatpush3.msra.mxu1 %v223_v8  ;;  %v408_v22 = vld [vmem:[%s3444_s3] sm:$0xff]  ;;  %v409_v24 = vld [vmem:[%s3444_s3 + $0x8] sm:$0xff]  ;;  %v2987_v27 = vld [vmem:[%s3451_s10 + $0x10] sm:$0xff] }
  0x17   :  { %2420 = vmatmul.mubr.msk.f32.vlgmr.msra.gmra.mxu0 %vm131_vm1, %v126_v10  ;;  %2430 = vmatprep.mubr.msk.f32.mxu1 %vm131_vm1, %v221_v11  ;;  %v2992_v28 = vld [vmem:[%s3452_s11 + $0x10] sm:$0xff]  ;;  %v3001_v29 = vld [vmem:[%s3451_s10 + $0x8] sm:$0xff]  ;;  %v3015_v31 = vld [vmem:[%s3451_s10] sm:$0xff]  ;;  %vm509_vm3 = vcmp.ge.s32.totalorder %v508_v7, 64  ;;  %vm510_vm4 = vcmp.lt.s32.totalorder %v508_v7, 96 }
  0x18   :  { %2433 = vmatprep.subr.mxu0 %v318_v12  ;;  %2444 = vmatprep.subr.mxu1 %v413_v13  ;;  %v3008_v30 = vld [vmem:[%s3452_s11 + $0x8] sm:$0xff]  ;;  %v512_v32 = vld [vmem:[#allocation4] sm:$0x3]  ;;  %v513_v34 = vld [vmem:[#allocation5] sm:$0x3] }
  0x19   :  { %2431 = vmatmul.mubr.msk.f32.vlgmr.msra.gmra.mxu1 %vm131_vm1, %v222_v14  ;;  %2434 = vmatpush3.msra.mxu0 %v318_v12  ;;  %v3023_v33 = vld [vmem:[%s3452_s11] sm:$0xff]  ;;  %v2265_v37 = vld [vmem:[#allocation8] ss:$0 sm:$0xff]  ;;  %vm3061_vm5 = vmand %vm509_vm3, %vm510_vm4 }
  0x1a   :  { %2445 = vmatpush3.msra.mxu1 %v413_v13  ;;  %2435 = vmatprep.subr.mxu0 %v317_v15  ;;  %v514_v35 = vld [vmem:[#allocation6] sm:$0x3]  ;;  %v515_v36 = vld [vmem:[#allocation7] sm:$0x3]  ;;  %v2270_v46 = vld [vmem:[%s3450_s9] ss:$0 sm:$0xff] }
  0x1b   :  { %2446 = vmatprep.subr.mxu1 %v412_v16  ;;  %2436 = vmatpush3.msra.mxu0 %v317_v15  ;;  %s2799_s9 = smov 64  }
  0x1c   :  { %2447 = vmatpush3.msra.mxu1 %v412_v16  ;;  %2437 = vmatprep.subr.mxu0 %v316_v17 }
  0x1d   :  { %2448 = vmatprep.subr.mxu1 %v411_v18  ;;  %2438 = vmatpush3.msra.mxu0 %v316_v17 }
  0x1e   :  { %2449 = vmatpush3.msra.mxu1 %v411_v18  ;;  %2439 = vmatprep.subr.mxu0 %v315_v19 }
  0x1f   :  { %2450 = vmatprep.subr.mxu1 %v410_v20  ;;  %2440 = vmatpush3.msra.mxu0 %v315_v19 }
  0x20   :  { %2441 = vmatprep.mubr.msk.f32.mxu0 %vm131_vm1, %v313_v21  ;;  %2451 = vmatpush3.msra.mxu1 %v410_v20 }
  0x21   :  { %2452 = vmatprep.mubr.msk.f32.mxu1 %vm131_vm1, %v408_v22  ;;  %2442 = vmatmul.mubr.msk.f32.vlgmr.msra.gmra.mxu0 %vm131_vm1, %v314_v23 }
  0x22   :  { %2453 = vmatmul.mubr.msk.f32.vlgmr.msra.gmra.mxu1 %vm131_vm1, %v409_v24  ;;  %2455 = vmatprep.subr.mxu0 %v2796_v0 }
  0x23   :  { %2466 = vmatprep.subr.mxu1 %v2796_v0  ;;  %2456 = vmatpush3.msra.mxu0 %v2973_v25 }
  0x24   :  { %2467 = vmatpush3.msra.mxu1 %v2978_v26  ;;  %2457 = vmatprep.subr.mxu0 %v2796_v0 }
  0x25   :  { %2468 = vmatprep.subr.mxu1 %v2796_v0  ;;  %2458 = vmatpush3.msra.mxu0 %v2987_v27 }
  0x26   :  { %2469 = vmatpush3.msra.mxu1 %v2992_v28  ;;  %2459 = vmatprep.subr.mxu0 %v2796_v0 }
  0x27   :  { %2470 = vmatprep.subr.mxu1 %v2796_v0  ;;  %2460 = vmatpush3.msra.mxu0 %v3001_v29 }
  0x28   :  { %2463 = vmatprep.mubr.msk.f32.mxu0 %vm2797_vm2, %v2796_v0  ;;  %2461 = vmatprep.subr.mxu0 %v2796_v0 }
  0x29   :  { %2471 = vmatpush3.msra.mxu1 %v3008_v30  ;;  %2462 = vmatpush3.msra.mxu0 %v3015_v31 }
  0x2a   :  { %2472 = vmatprep.subr.mxu1 %v2796_v0  ;;  %2464 = vmatmul.mubr.msk.f32.vlgmr.msra.gmra.mxu0 %vm131_vm1, %v512_v32 }
  0x2b   :  { %2473 = vmatpush3.msra.mxu1 %v3023_v33  ;;  %2474 = vmatprep.mubr.msk.f32.mxu1 %vm2797_vm2, %v2796_v0 }
  0x2c   :  { %675 = vrot.lane.b32.xlu1 %v513_v34, %s2798_s4  ;;  %2475 = vmatmul.mubr.msk.f32.vlgmr.msra.gmra.mxu1 %vm131_vm1, %v514_v35 }
  0x2d   :  { %2477 = vmatprep.subr.mxu0 %v2796_v0  ;;  %2488 = vmatprep.subr.mxu1 %v2796_v0 }
  0x2e   :  { %2478 = vmatpush3.msra.mxu0 %v2973_v25  ;;  %2489 = vmatpush3.msra.mxu1 %v2978_v26 }
  0x2f   :  { %2479 = vmatprep.subr.mxu0 %v2796_v0  ;;  %2490 = vmatprep.subr.mxu1 %v2796_v0 }
  0x30   :  { %704 = vrot.lane.b32.xlu1 %v515_v36, %s2798_s4  ;;  %2480 = vmatpush3.msra.mxu0 %v2987_v27 }
  0x31   :  { %2481 = vmatprep.subr.mxu0 %v2796_v0  ;;  %2485 = vmatprep.mubr.msk.f32.mxu0 %vm2797_vm2, %v2796_v0 }
  0x32   :  { %2482 = vmatpush3.msra.mxu0 %v3001_v29  ;;  %2491 = vmatpush3.msra.mxu1 %v2992_v28 }
  0x33   :  { %2483 = vmatprep.subr.mxu0 %v2796_v0  ;;  %2492 = vmatprep.subr.mxu1 %v2796_v0 }
  0x34   :  { %2484 = vmatpush3.msra.mxu0 %v3015_v31  ;;  %2493 = vmatpush3.msra.mxu1 %v3008_v30 }
  0x35   :  { %2496 = vmatprep.mubr.msk.f32.mxu1 %vm2797_vm2, %v2796_v0  ;;  %2494 = vmatprep.subr.mxu1 %v2796_v0 }
  0x36   :  { %2499 = vmatprep.subr.mxu0 %v2796_v0  ;;  %2495 = vmatpush3.msra.mxu1 %v3023_v33 }
  0x37   :  { %2510 = vmatprep.subr.mxu1 %v2796_v0 }
  0x9e   :  { %v676_v19 = vpop.permute.xlu1 %675 }
  0xa2   :  { %v705_v21 = vpop.permute.xlu1 %704 }
  0xd7   :  { %v2421_v38 = vpop.f32.mrf.mxu0 }
  0xd8   :  { %v220_v39 = vadd.f32 %v2421_v38, %v2265_v37 }
  0xd9   :  { %v2432_v40 = vpop.f32.mrf.mxu1  ;;  %v204_v41 = vpop.f32.mrf.mxu0 }
  0xda   :  { %v309_v42 = vadd.f32 %v2432_v40, %v220_v39  ;;  %v219_v43 = vadd.f32 %v2265_v37, %v204_v41 }
  0xdb   :  { %v299_v44 = vpop.f32.mrf.mxu1 }
  0xdc   :  { %311 = vst [vmem:[#allocation2 + $0x8] sm:$0xff] %v309_v42  ;;  %v308_v45 = vadd.f32 %v299_v44, %v219_v43 }
  0xde   :  { %310 = vst [vmem:[#allocation2] sm:$0xff] %v308_v45 }
  0xe1   :  { %v2443_v47 = vpop.f32.mrf.mxu0 }
  0xe2   :  { %v2454_v48 = vpop.f32.mrf.mxu1  ;;  %v407_v49 = vadd.f32 %v2443_v47, %v2270_v46 }
  0xe3   :  { %v391_v50 = vpop.f32.mrf.mxu0 }
  0xe4   :  { %v496_v51 = vadd.f32 %v2454_v48, %v407_v49  ;;  %v406_v52 = vadd.f32 %v2270_v46, %v391_v50  ;;  %v486_v53 = vpop.f32.mrf.mxu1 }
  0xe5   :  { %v516_v55 = vld [vmem:[#allocation2] sm:$0x3]  ;;  %v735_v43 = vld [vmem:[#allocation2 + $0x2] sm:$0x3] }
  0xe6   :  { %498 = vst [vmem:[#allocation3 + $0x8] sm:$0xff] %v496_v51  ;;  %v495_v54 = vadd.f32 %v486_v53, %v406_v52 }
  0xe8   :  { %497 = vst [vmem:[#allocation3] sm:$0xff] %v495_v54 }
  0xea   :  { %v586_v56 = vpop.f32.mrf.mxu0 }
  0xeb   :  { %v590_v57 = vadd.f32 %v586_v56, %v516_v55 }
  0xec   :  { %v2465_v58 = vpop.f32.mrf.mxu0  ;;  %v661_v59 = vpop.f32.mrf.mxu1 }
  0xed   :  { %v2275_v60 = vmul.f32 -1.442695, %v590_v57  ;;  %v591_v61 = vld [vmem:[#allocation3 + $0xe] sm:$0x3]  ;;  %v809_v48 = vld [vmem:[#allocation3 + $0xc] sm:$0x3] }
  0xee   :  { %v665_v62 = vadd.f32 %v661_v59, %v591_v61  ;;  %v2476_v63 = vpop.f32.mrf.mxu1 }
  0xef   :  { %2637 = vpow2.f32 %v2275_v60 }
  0xf0   :  { %v2276_v1 = vmul.f32 -1.442695, %v665_v62 }
  0xf2   :  { %2639 = vpow2.f32 %v2276_v1 }
  0xf3   :  { %2641 = vtanh.f32 %v590_v57 }
  0xfc   :  { %v2638_v2 = vpop.eup %2637 }
  0xfd   :  { %v670_v3 = vadd.f32 1.0, %v2638_v2 }
  0xff   :  { %v2640_v4 = vpop.eup %2639  ;;  %2643 = vrcp.f32 %v670_v3 }
 0x100   :  { %v699_v6 = vadd.f32 1.0, %v2640_v4  ;;  %2645 = vtanh.f32 %v665_v62  ;;  %v2642_v9 = vpop.eup %2641 }
 0x102   :  { %2647 = vrcp.f32 %v699_v6 }
 0x10c   :  { %v2644_v10 = vpop.eup %2643 }
 0x10d   :  { %v673_v11 = vsel %vm3061_vm5, %v2642_v9, %v2644_v10  ;;  %v2646_v12 = vpop.eup %2645 }
 0x10e   :  { %680 = vrot.lane.b32.xlu0 %v673_v11, %s2799_s9  ;;  %v678_v20 = vmul.f32 %v676_v19, %v673_v11  ;;  %v943_v19 = vld [vmem:[#allocation2 + $0x4] sm:$0x3] }
 0x10f   :  { %v2648_v13 = vpop.eup %2647 }
 0x110   :  { %v702_v14 = vsel %vm3061_vm5, %v2646_v12, %v2648_v13 }
 0x111   :  { %v707_v24 = vmul.f32 %v705_v21, %v702_v14 }
 0x112   :  { %709 = vrot.lane.b32.xlu0 %v702_v14, %s2799_s9 }
 0x180   :  { %v681_v15 = vpop.permute.xlu0 %680 }
 0x181   :  { %v683_v16 = vmul.f32 %v681_v15, %v673_v11 }
 0x183   :  { %685 = vrot.lane.b32.xlu0 %v683_v16, %s2798_s4 }
 0x184   :  { %v710_v17 = vpop.permute.xlu0 %709 }
 0x185   :  { %v712_v18 = vmul.f32 %v710_v17, %v702_v14 }
 0x187   :  { %714 = vrot.lane.b32.xlu1 %v712_v18, %s2798_s4 }
 0x1f5   :  { %v686_v22 = vpop.permute.xlu0 %685 }
 0x1f6   :  { %v3073_v23 = vadd.f32 %v686_v22, %v678_v20 }
 0x1f8   :  { %2649 = vtanh.f32 %v3073_v23 }
 0x1f9   :  { %v715_v32 = vpop.permute.xlu1 %714 }
 0x1fa   :  { %v3076_v34 = vadd.f32 %v715_v32, %v707_v24  ;;  %v1017_v24 = vld [vmem:[#allocation3 + $0xa] sm:$0x3] }
 0x1fc   :  { %2651 = vtanh.f32 %v3076_v34 }
 0x205   :  { %v2650_v35 = vpop.eup %2649 }
 0x206   :  { %691 = vrot.lane.b32.xlu0 %v2650_v35, %s2799_s9 }
 0x209   :  { %v2652_v36 = vpop.eup %2651 }
 0x20a   :  { %720 = vrot.lane.b32.xlu1 %v2652_v36, %s2799_s9 }
 0x278   :  { %v692_v37 = vpop.permute.xlu0 %691 }
 0x279   :  { %v694_v38 = vmul.f32 %v692_v37, %v673_v11 }
 0x27b   :  { %725 = vrot.lane.b32.xlu0 %v694_v38, %s2798_s4 }
 0x27c   :  { %v721_v39 = vpop.permute.xlu1 %720 }
 0x27d   :  { %v723_v40 = vmul.f32 %v721_v39, %v702_v14 }
 0x27f   :  { %731 = vrot.lane.b32.xlu1 %v723_v40, %s2798_s4 }
 0x2ed   :  { %v726_v41 = vpop.permute.xlu0 %725 }
 0x2ee   :  { %729 = vst.msk [vmem:[%s3453_s12] sm:$0x3] %vm119_vm0, %v726_v41  ;;  %2486 = vmatmul.mubr.msk.f32.vlgmr.msra.gmra.mxu0 %vm131_vm1, %v726_v41 }
 0x2ef   :  { %2500 = vmatpush3.msra.mxu0 %v2973_v25  ;;  %2507 = vmatprep.mubr.msk.f32.mxu0 %vm2797_vm2, %v2796_v0 }
 0x2f0   :  { %2501 = vmatprep.subr.mxu0 %v2796_v0 }
 0x2f1   :  { %v732_v42 = vpop.permute.xlu1 %731  ;;  %2502 = vmatpush3.msra.mxu0 %v2987_v27 }
 0x2f2   :  { %734 = vst.msk [vmem:[%s3454_s13 + $0xe] sm:$0x3] %vm119_vm0, %v732_v42  ;;  %2497 = vmatmul.mubr.msk.f32.vlgmr.msra.gmra.mxu1 %vm131_vm1, %v732_v42  ;;  %2503 = vmatprep.subr.mxu0 %v2796_v0 }
 0x2f3   :  { %2504 = vmatpush3.msra.mxu0 %v3001_v29  ;;  %2511 = vmatpush3.msra.mxu1 %v2978_v26 }
 0x2f4   :  { %2505 = vmatprep.subr.mxu0 %v2796_v0  ;;  %2512 = vmatprep.subr.mxu1 %v2796_v0 }
 0x2f5   :  { %2506 = vmatpush3.msra.mxu0 %v3015_v31  ;;  %2513 = vmatpush3.msra.mxu1 %v2992_v28 }
 0x2f6   :  { %2514 = vmatprep.subr.mxu1 %v2796_v0  ;;  %2518 = vmatprep.mubr.msk.f32.mxu1 %vm2797_vm2, %v2796_v0 }
 0x2f7   :  { %2515 = vmatpush3.msra.mxu1 %v3008_v30  ;;  %2521 = vmatprep.subr.mxu0 %v2796_v0 }
 0x2f8   :  { %2516 = vmatprep.subr.mxu1 %v2796_v0 }
 0x2f9   :  { %2517 = vmatpush3.msra.mxu1 %v3023_v33 }
 0x2fa   :  { %2532 = vmatprep.subr.mxu1 %v2796_v0 }
 0x3ae   :  { %v804_v44 = vpop.f32.mrf.mxu0 }
 0x3af   :  { %v808_v45 = vadd.f32 %v804_v44, %v735_v43 }
 0x3b0   :  { %v2487_v46 = vpop.f32.mrf.mxu0 }
 0x3b1   :  { %v2279_v47 = vmul.f32 -1.442695, %v808_v45 }
 0x3b2   :  { %v878_v49 = vpop.f32.mrf.mxu1 }
 0x3b3   :  { %2653 = vpow2.f32 %v2279_v47  ;;  %v882_v50 = vadd.f32 %v878_v49, %v809_v48 }
 0x3b4   :  { %v2498_v51 = vpop.f32.mrf.mxu1 }
 0x3b5   :  { %v2280_v52 = vmul.f32 -1.442695, %v882_v50 }
 0x3b7   :  { %2655 = vpow2.f32 %v2280_v52 }
 0x3b8   :  { %2657 = vtanh.f32 %v808_v45 }
 0x3c0   :  { %v2654_v53 = vpop.eup %2653 }
 0x3c1   :  { %v887_v54 = vadd.f32 1.0, %v2654_v53 }
 0x3c3   :  { %2659 = vrcp.f32 %v887_v54 }
 0x3c4   :  { %v2656_v55 = vpop.eup %2655  ;;  %2661 = vtanh.f32 %v882_v50 }
 0x3c5   :  { %v912_v56 = vadd.f32 1.0, %v2656_v55  ;;  %v2658_v57 = vpop.eup %2657 }
 0x3c7   :  { %2663 = vrcp.f32 %v912_v56 }
 0x3d0   :  { %v2660_v58 = vpop.eup %2659 }
 0x3d1   :  { %v890_v59 = vsel %vm3061_vm5, %v2658_v57, %v2660_v58  ;;  %v2662_v60 = vpop.eup %2661 }
 0x3d2   :  { %893 = vrot.lane.b32.xlu0 %v890_v59, %s2799_s9  ;;  %v891_v4 = vmul.f32 %v890_v59, %v3073_v23 }
 0x3d4   :  { %v2664_v61 = vpop.eup %2663 }
 0x3d5   :  { %v915_v62 = vsel %vm3061_vm5, %v2662_v60, %v2664_v61 }
 0x3d6   :  { %918 = vrot.lane.b32.xlu1 %v915_v62, %s2799_s9  ;;  %v916_v7 = vmul.f32 %v915_v62, %v3076_v34 }
 0x444   :  { %v894_v63 = vpop.permute.xlu0 %893 }
 0x445   :  { %v896_v1 = vmul.f32 %v894_v63, %v890_v59 }
 0x447   :  { %898 = vrot.lane.b32.xlu0 %v896_v1, %s2798_s4 }
 0x448   :  { %v919_v2 = vpop.permute.xlu1 %918 }
 0x449   :  { %v921_v3 = vmul.f32 %v919_v2, %v915_v62  ;;  %v1151_v2 = vld [vmem:[#allocation2 + $0x6] sm:$0x3] }
 0x44b   :  { %923 = vrot.lane.b32.xlu1 %v921_v3, %s2798_s4 }
 0x4b9   :  { %v899_v5 = vpop.permute.xlu0 %898 }
 0x4ba   :  { %v3122_v6 = vadd.f32 %v899_v5, %v891_v4 }
 0x4bc   :  { %2665 = vtanh.f32 %v3122_v6 }
 0x4bd   :  { %v924_v9 = vpop.permute.xlu1 %923 }
 0x4be   :  { %v3126_v10 = vadd.f32 %v924_v9, %v916_v7  ;;  %v1225_v7 = vld [vmem:[#allocation3 + $0x8] sm:$0x3] }
 0x4c0   :  { %2667 = vtanh.f32 %v3126_v10 }
 0x4c9   :  { %v2666_v11 = vpop.eup %2665 }
 0x4ca   :  { %904 = vrot.lane.b32.xlu0 %v2666_v11, %s2799_s9 }
 0x4cd   :  { %v2668_v12 = vpop.eup %2667 }
 0x4ce   :  { %929 = vrot.lane.b32.xlu1 %v2668_v12, %s2799_s9 }
 0x53c   :  { %v905_v13 = vpop.permute.xlu0 %904 }
 0x53d   :  { %v907_v14 = vmul.f32 %v905_v13, %v890_v59 }
 0x53f   :  { %934 = vrot.lane.b32.xlu0 %v907_v14, %s2798_s4 }
 0x540   :  { %v930_v15 = vpop.permute.xlu1 %929 }
 0x541   :  { %v932_v16 = vmul.f32 %v930_v15, %v915_v62 }
 0x543   :  { %939 = vrot.lane.b32.xlu1 %v932_v16, %s2798_s4 }
 0x5b1   :  { %v935_v17 = vpop.permute.xlu0 %934 }
 0x5b2   :  { %937 = vst.msk [vmem:[%s3453_s12 + $0x2] sm:$0x3] %vm119_vm0, %v935_v17  ;;  %2508 = vmatmul.mubr.msk.f32.vlgmr.msra.gmra.mxu0 %vm131_vm1, %v935_v17 }
 0x5b3   :  { %2522 = vmatpush3.msra.mxu0 %v2973_v25  ;;  %2529 = vmatprep.mubr.msk.f32.mxu0 %vm2797_vm2, %v2796_v0 }
 0x5b4   :  { %2523 = vmatprep.subr.mxu0 %v2796_v0 }
 0x5b5   :  { %v940_v18 = vpop.permute.xlu1 %939  ;;  %2524 = vmatpush3.msra.mxu0 %v2987_v27 }
 0x5b6   :  { %942 = vst.msk [vmem:[%s3454_s13 + $0xc] sm:$0x3] %vm119_vm0, %v940_v18  ;;  %2519 = vmatmul.mubr.msk.f32.vlgmr.msra.gmra.mxu1 %vm131_vm1, %v940_v18  ;;  %2525 = vmatprep.subr.mxu0 %v2796_v0 }
 0x5b7   :  { %2526 = vmatpush3.msra.mxu0 %v3001_v29  ;;  %2533 = vmatpush3.msra.mxu1 %v2978_v26 }
 0x5b8   :  { %2527 = vmatprep.subr.mxu0 %v2796_v0  ;;  %2534 = vmatprep.subr.mxu1 %v2796_v0 }
 0x5b9   :  { %2528 = vmatpush3.msra.mxu0 %v3015_v31  ;;  %2535 = vmatpush3.msra.mxu1 %v2992_v28 }
 0x5ba   :  { %2536 = vmatprep.subr.mxu1 %v2796_v0  ;;  %2540 = vmatprep.mubr.msk.f32.mxu1 %vm2797_vm2, %v2796_v0 }
 0x5bb   :  { %2537 = vmatpush3.msra.mxu1 %v3008_v30  ;;  %2543 = vmatprep.subr.mxu0 %v2796_v0 }
 0x5bc   :  { %2538 = vmatprep.subr.mxu1 %v2796_v0 }
 0x5bd   :  { %2539 = vmatpush3.msra.mxu1 %v3023_v33 }
 0x5be   :  { %2554 = vmatprep.subr.mxu1 %v2796_v0 }
 0x672   :  { %v1012_v20 = vpop.f32.mrf.mxu0 }
 0x673   :  { %v1016_v21 = vadd.f32 %v1012_v20, %v943_v19 }
 0x674   :  { %v2509_v22 = vpop.f32.mrf.mxu0 }
 0x675   :  { %v2283_v23 = vmul.f32 -1.442695, %v1016_v21 }
 0x676   :  { %v1086_v32 = vpop.f32.mrf.mxu1 }
 0x677   :  { %2669 = vpow2.f32 %v2283_v23  ;;  %v1090_v34 = vadd.f32 %v1086_v32, %v1017_v24 }
 0x678   :  { %v2520_v35 = vpop.f32.mrf.mxu1 }
 0x679   :  { %v2284_v36 = vmul.f32 -1.442695, %v1090_v34 }
 0x67b   :  { %2671 = vpow2.f32 %v2284_v36 }
 0x67c   :  { %2673 = vtanh.f32 %v1016_v21 }
 0x684   :  { %v2670_v37 = vpop.eup %2669 }
 0x685   :  { %v1095_v38 = vadd.f32 1.0, %v2670_v37 }
 0x687   :  { %2675 = vrcp.f32 %v1095_v38 }
 0x688   :  { %v2672_v39 = vpop.eup %2671  ;;  %2677 = vtanh.f32 %v1090_v34 }
 0x689   :  { %v1120_v40 = vadd.f32 1.0, %v2672_v39  ;;  %v2674_v41 = vpop.eup %2673 }
 0x68b   :  { %2679 = vrcp.f32 %v1120_v40 }
 0x694   :  { %v2676_v42 = vpop.eup %2675 }
 0x695   :  { %v1098_v43 = vsel %vm3061_vm5, %v2674_v41, %v2676_v42  ;;  %v2678_v44 = vpop.eup %2677 }
 0x696   :  { %1101 = vrot.lane.b32.xlu0 %v1098_v43, %s2799_s9  ;;  %v1099_v51 = vmul.f32 %v1098_v43, %v3122_v6 }
 0x698   :  { %v2680_v45 = vpop.eup %2679 }
 0x699   :  { %v1123_v46 = vsel %vm3061_vm5, %v2678_v44, %v2680_v45 }
 0x69a   :  { %1126 = vrot.lane.b32.xlu1 %v1123_v46, %s2799_s9  ;;  %v1124_v54 = vmul.f32 %v1123_v46, %v3126_v10 }
 0x708   :  { %v1102_v47 = vpop.permute.xlu0 %1101 }
 0x709   :  { %v1104_v48 = vmul.f32 %v1102_v47, %v1098_v43 }
 0x70b   :  { %1106 = vrot.lane.b32.xlu0 %v1104_v48, %s2798_s4 }
 0x70c   :  { %v1127_v49 = vpop.permute.xlu1 %1126 }
 0x70d   :  { %v1129_v50 = vmul.f32 %v1127_v49, %v1123_v46  ;;  %v1359_v49 = vld [vmem:[#allocation2 + $0x8] sm:$0x3] }
 0x70f   :  { %1131 = vrot.lane.b32.xlu1 %v1129_v50, %s2798_s4 }
 0x77d   :  { %v1107_v52 = vpop.permute.xlu0 %1106 }
 0x77e   :  { %v3172_v53 = vadd.f32 %v1107_v52, %v1099_v51 }
 0x780   :  { %2681 = vtanh.f32 %v3172_v53 }
 0x781   :  { %v1132_v55 = vpop.permute.xlu1 %1131 }
 0x782   :  { %v3176_v56 = vadd.f32 %v1132_v55, %v1124_v54  ;;  %v1433_v54 = vld [vmem:[#allocation3 + $0x6] sm:$0x3] }
 0x784   :  { %2683 = vtanh.f32 %v3176_v56 }
 0x78d   :  { %v2682_v57 = vpop.eup %2681 }
 0x78e   :  { %1112 = vrot.lane.b32.xlu0 %v2682_v57, %s2799_s9 }
 0x791   :  { %v2684_v58 = vpop.eup %2683 }
 0x792   :  { %1137 = vrot.lane.b32.xlu1 %v2684_v58, %s2799_s9 }
 0x800   :  { %v1113_v59 = vpop.permute.xlu0 %1112 }
 0x801   :  { %v1115_v60 = vmul.f32 %v1113_v59, %v1098_v43 }
 0x803   :  { %1142 = vrot.lane.b32.xlu0 %v1115_v60, %s2798_s4 }
 0x804   :  { %v1138_v61 = vpop.permute.xlu1 %1137 }
 0x805   :  { %v1140_v62 = vmul.f32 %v1138_v61, %v1123_v46 }
 0x807   :  { %1147 = vrot.lane.b32.xlu1 %v1140_v62, %s2798_s4 }
 0x875   :  { %v1143_v63 = vpop.permute.xlu0 %1142 }
 0x876   :  { %1145 = vst.msk [vmem:[%s3453_s12 + $0x4] sm:$0x3] %vm119_vm0, %v1143_v63  ;;  %2530 = vmatmul.mubr.msk.f32.vlgmr.msra.gmra.mxu0 %vm131_vm1, %v1143_v63 }
 0x877   :  { %2544 = vmatpush3.msra.mxu0 %v2973_v25  ;;  %2551 = vmatprep.mubr.msk.f32.mxu0 %vm2797_vm2, %v2796_v0 }
 0x878   :  { %2545 = vmatprep.subr.mxu0 %v2796_v0 }
 0x879   :  { %v1148_v1 = vpop.permute.xlu1 %1147  ;;  %2546 = vmatpush3.msra.mxu0 %v2987_v27 }
 0x87a   :  { %1150 = vst.msk [vmem:[%s3454_s13 + $0xa] sm:$0x3] %vm119_vm0, %v1148_v1  ;;  %2541 = vmatmul.mubr.msk.f32.vlgmr.msra.gmra.mxu1 %vm131_vm1, %v1148_v1  ;;  %2547 = vmatprep.subr.mxu0 %v2796_v0 }
 0x87b   :  { %2548 = vmatpush3.msra.mxu0 %v3001_v29  ;;  %2555 = vmatpush3.msra.mxu1 %v2978_v26 }
 0x87c   :  { %2549 = vmatprep.subr.mxu0 %v2796_v0  ;;  %2556 = vmatprep.subr.mxu1 %v2796_v0 }
 0x87d   :  { %2550 = vmatpush3.msra.mxu0 %v3015_v31  ;;  %2557 = vmatpush3.msra.mxu1 %v2992_v28 }
 0x87e   :  { %2558 = vmatprep.subr.mxu1 %v2796_v0  ;;  %2562 = vmatprep.mubr.msk.f32.mxu1 %vm2797_vm2, %v2796_v0 }
 0x87f   :  { %2559 = vmatpush3.msra.mxu1 %v3008_v30  ;;  %2565 = vmatprep.subr.mxu0 %v2796_v0 }
 0x880   :  { %2560 = vmatprep.subr.mxu1 %v2796_v0 }
 0x881   :  { %2561 = vmatpush3.msra.mxu1 %v3023_v33 }
 0x882   :  { %2576 = vmatprep.subr.mxu1 %v2796_v0 }
 0x936   :  { %v1220_v3 = vpop.f32.mrf.mxu0 }
 0x937   :  { %v1224_v4 = vadd.f32 %v1220_v3, %v1151_v2 }
 0x938   :  { %v2531_v5 = vpop.f32.mrf.mxu0 }
 0x939   :  { %v2287_v6 = vmul.f32 -1.442695, %v1224_v4 }
 0x93a   :  { %v1294_v9 = vpop.f32.mrf.mxu1 }
 0x93b   :  { %2685 = vpow2.f32 %v2287_v6  ;;  %v1298_v10 = vadd.f32 %v1294_v9, %v1225_v7 }
 0x93c   :  { %v2542_v11 = vpop.f32.mrf.mxu1 }
 0x93d   :  { %v2288_v12 = vmul.f32 -1.442695, %v1298_v10 }
 0x93f   :  { %2687 = vpow2.f32 %v2288_v12 }
 0x940   :  { %2689 = vtanh.f32 %v1224_v4 }
 0x948   :  { %v2686_v13 = vpop.eup %2685 }
 0x949   :  { %v1303_v14 = vadd.f32 1.0, %v2686_v13 }
 0x94b   :  { %2691 = vrcp.f32 %v1303_v14 }
 0x94c   :  { %v2688_v15 = vpop.eup %2687  ;;  %2693 = vtanh.f32 %v1298_v10 }
 0x94d   :  { %v1328_v16 = vadd.f32 1.0, %v2688_v15  ;;  %v2690_v17 = vpop.eup %2689 }
 0x94f   :  { %2695 = vrcp.f32 %v1328_v16 }
 0x958   :  { %v2692_v18 = vpop.eup %2691 }
 0x959   :  { %v1306_v19 = vsel %vm3061_vm5, %v2690_v17, %v2692_v18  ;;  %v2694_v20 = vpop.eup %2693 }
 0x95a   :  { %1309 = vrot.lane.b32.xlu0 %v1306_v19, %s2799_s9  ;;  %v1307_v35 = vmul.f32 %v1306_v19, %v3172_v53 }
 0x95c   :  { %v2696_v21 = vpop.eup %2695 }
 0x95d   :  { %v1331_v22 = vsel %vm3061_vm5, %v2694_v20, %v2696_v21 }
 0x95e   :  { %1334 = vrot.lane.b32.xlu1 %v1331_v22, %s2799_s9  ;;  %v1332_v38 = vmul.f32 %v1331_v22, %v3176_v56 }
 0x9cc   :  { %v1310_v23 = vpop.permute.xlu0 %1309 }
 0x9cd   :  { %v1312_v24 = vmul.f32 %v1310_v23, %v1306_v19 }
 0x9cf   :  { %1314 = vrot.lane.b32.xlu0 %v1312_v24, %s2798_s4 }
 0x9d0   :  { %v1335_v32 = vpop.permute.xlu1 %1334 }
 0x9d1   :  { %v1337_v34 = vmul.f32 %v1335_v32, %v1331_v22 }
 0x9d3   :  { %1339 = vrot.lane.b32.xlu1 %v1337_v34, %s2798_s4 }
 0xa41   :  { %v1315_v36 = vpop.permute.xlu0 %1314 }
 0xa42   :  { %v3222_v37 = vadd.f32 %v1315_v36, %v1307_v35 }
 0xa44   :  { %2697 = vtanh.f32 %v3222_v37 }
 0xa45   :  { %v1340_v39 = vpop.permute.xlu1 %1339 }
 0xa46   :  { %v3226_v40 = vadd.f32 %v1340_v39, %v1332_v38 }
 0xa48   :  { %2699 = vtanh.f32 %v3226_v40 }
 0xa51   :  { %v2698_v41 = vpop.eup %2697 }
 0xa52   :  { %1320 = vrot.lane.b32.xlu0 %v2698_v41, %s2799_s9 }
 0xa55   :  { %v2700_v42 = vpop.eup %2699 }
 0xa56   :  { %1345 = vrot.lane.b32.xlu1 %v2700_v42, %s2799_s9 }
 0xac4   :  { %v1321_v43 = vpop.permute.xlu0 %1320 }
 0xac5   :  { %v1323_v44 = vmul.f32 %v1321_v43, %v1306_v19 }
 0xac7   :  { %1350 = vrot.lane.b32.xlu0 %v1323_v44, %s2798_s4 }
 0xac8   :  { %v1346_v45 = vpop.permute.xlu1 %1345 }
 0xac9   :  { %v1348_v46 = vmul.f32 %v1346_v45, %v1331_v22 }
 0xacb   :  { %1355 = vrot.lane.b32.xlu1 %v1348_v46, %s2798_s4 }
 0xb39   :  { %v1351_v47 = vpop.permute.xlu0 %1350 }
 0xb3a   :  { %1353 = vst.msk [vmem:[%s3453_s12 + $0x6] sm:$0x3] %vm119_vm0, %v1351_v47  ;;  %2552 = vmatmul.mubr.msk.f32.vlgmr.msra.gmra.mxu0 %vm131_vm1, %v1351_v47 }
 0xb3b   :  { %2566 = vmatpush3.msra.mxu0 %v2973_v25  ;;  %2573 = vmatprep.mubr.msk.f32.mxu0 %vm2797_vm2, %v2796_v0 }
 0xb3c   :  { %2567 = vmatprep.subr.mxu0 %v2796_v0 }
 0xb3d   :  { %v1356_v48 = vpop.permute.xlu1 %1355  ;;  %2568 = vmatpush3.msra.mxu0 %v2987_v27 }
 0xb3e   :  { %1358 = vst.msk [vmem:[%s3454_s13 + $0x8] sm:$0x3] %vm119_vm0, %v1356_v48  ;;  %2563 = vmatmul.mubr.msk.f32.vlgmr.msra.gmra.mxu1 %vm131_vm1, %v1356_v48  ;;  %2569 = vmatprep.subr.mxu0 %v2796_v0 }
 0xb3f   :  { %2570 = vmatpush3.msra.mxu0 %v3001_v29  ;;  %2577 = vmatpush3.msra.mxu1 %v2978_v26 }
 0xb40   :  { %2571 = vmatprep.subr.mxu0 %v2796_v0  ;;  %2578 = vmatprep.subr.mxu1 %v2796_v0 }
 0xb41   :  { %2572 = vmatpush3.msra.mxu0 %v3015_v31  ;;  %2579 = vmatpush3.msra.mxu1 %v2992_v28 }
 0xb42   :  { %2580 = vmatprep.subr.mxu1 %v2796_v0  ;;  %2584 = vmatprep.mubr.msk.f32.mxu1 %vm2797_vm2, %v2796_v0 }
 0xb43   :  { %2581 = vmatpush3.msra.mxu1 %v3008_v30  ;;  %2587 = vmatprep.subr.mxu0 %v2796_v0 }
 0xb44   :  { %2582 = vmatprep.subr.mxu1 %v2796_v0 }
 0xb45   :  { %2583 = vmatpush3.msra.mxu1 %v3023_v33 }
 0xb46   :  { %2598 = vmatprep.subr.mxu1 %v2796_v0 }
 0xbfa   :  { %v1428_v50 = vpop.f32.mrf.mxu0 }
 0xbfb   :  { %v1432_v51 = vadd.f32 %v1428_v50, %v1359_v49 }
 0xbfc   :  { %v2553_v52 = vpop.f32.mrf.mxu0 }
 0xbfd   :  { %v2291_v53 = vmul.f32 -1.442695, %v1432_v51 }
 0xbfe   :  { %v1502_v55 = vpop.f32.mrf.mxu1 }
 0xbff   :  { %2701 = vpow2.f32 %v2291_v53  ;;  %v1506_v56 = vadd.f32 %v1502_v55, %v1433_v54 }
 0xc00   :  { %v2564_v57 = vpop.f32.mrf.mxu1 }
 0xc01   :  { %v2292_v58 = vmul.f32 -1.442695, %v1506_v56 }
 0xc03   :  { %2703 = vpow2.f32 %v2292_v58 }
 0xc04   :  { %2705 = vtanh.f32 %v1432_v51 }
 0xc0c   :  { %v2702_v59 = vpop.eup %2701 }
 0xc0d   :  { %v1511_v60 = vadd.f32 1.0, %v2702_v59 }
 0xc0f   :  { %2707 = vrcp.f32 %v1511_v60 }
 0xc10   :  { %v2704_v61 = vpop.eup %2703  ;;  %2709 = vtanh.f32 %v1506_v56 }
 0xc11   :  { %v1536_v62 = vadd.f32 1.0, %v2704_v61  ;;  %v2706_v63 = vpop.eup %2705 }
 0xc13   :  { %2711 = vrcp.f32 %v1536_v62  ;;  %v2765_v62 = vld [vmem:[%s3451_s10 + $0x18] sm:$0xff] }
 0xc1c   :  { %v2708_v1 = vpop.eup %2707 }
 0xc1d   :  { %v1514_v2 = vsel %vm3061_vm5, %v2706_v63, %v2708_v1  ;;  %v2710_v3 = vpop.eup %2709  ;;  %v2766_v1 = vld [vmem:[%s3451_s10 + $0x10] sm:$0xff] }
 0xc1e   :  { %1517 = vrot.lane.b32.xlu0 %v1514_v2, %s2799_s9  ;;  %v1515_v11 = vmul.f32 %v1514_v2, %v3222_v37 }
 0xc20   :  { %v2712_v4 = vpop.eup %2711 }
 0xc21   :  { %v1539_v5 = vsel %vm3061_vm5, %v2710_v3, %v2712_v4  ;;  %v2768_v3 = vld [vmem:[%s3452_s11 + $0x18] sm:$0xff]  ;;  %v2769_v4 = vld [vmem:[%s3451_s10] sm:$0xff] }
 0xc22   :  { %1542 = vrot.lane.b32.xlu1 %v1539_v5, %s2799_s9  ;;  %v1540_v14 = vmul.f32 %v1539_v5, %v3226_v40 }
 0xc90   :  { %v1518_v6 = vpop.permute.xlu0 %1517 }
 0xc91   :  { %v1520_v7 = vmul.f32 %v1518_v6, %v1514_v2  ;;  %v2771_v6 = vld [vmem:[%s3452_s11 + $0x8] sm:$0xff] }
 0xc93   :  { %1522 = vrot.lane.b32.xlu0 %v1520_v7, %s2798_s4  ;;  %v2772_v7 = vld [vmem:[%s3452_s11] sm:$0xff] }
 0xc94   :  { %v1543_v9 = vpop.permute.xlu1 %1542 }
 0xc95   :  { %v1545_v10 = vmul.f32 %v1543_v9, %v1539_v5  ;;  %v1775_v9 = vld [vmem:[#allocation2 + $0xc] sm:$0x3] }
 0xc97   :  { %1547 = vrot.lane.b32.xlu1 %v1545_v10, %s2798_s4 }
 0xd05   :  { %v1523_v12 = vpop.permute.xlu0 %1522 }
 0xd06   :  { %v3272_v13 = vadd.f32 %v1523_v12, %v1515_v11 }
 0xd08   :  { %2713 = vtanh.f32 %v3272_v13 }
 0xd09   :  { %v1548_v15 = vpop.permute.xlu1 %1547 }
 0xd0a   :  { %v3276_v16 = vadd.f32 %v1548_v15, %v1540_v14  ;;  %v1849_v14 = vld [vmem:[#allocation3 + $0x2] sm:$0x3] }
 0xd0c   :  { %2715 = vtanh.f32 %v3276_v16 }
 0xd15   :  { %v2714_v17 = vpop.eup %2713 }
 0xd16   :  { %1528 = vrot.lane.b32.xlu0 %v2714_v17, %s2799_s9 }
 0xd19   :  { %v2716_v18 = vpop.eup %2715 }
 0xd1a   :  { %1553 = vrot.lane.b32.xlu1 %v2716_v18, %s2799_s9 }
 0xd88   :  { %v1529_v19 = vpop.permute.xlu0 %1528 }
 0xd89   :  { %v1531_v20 = vmul.f32 %v1529_v19, %v1514_v2  ;;  %v2767_v2 = vld [vmem:[%s3451_s10 + $0x8] sm:$0xff] }
 0xd8b   :  { %1558 = vrot.lane.b32.xlu0 %v1531_v20, %s2798_s4 }
 0xd8c   :  { %v1554_v21 = vpop.permute.xlu1 %1553 }
 0xd8d   :  { %v1556_v22 = vmul.f32 %v1554_v21, %v1539_v5  ;;  %v2770_v5 = vld [vmem:[%s3452_s11 + $0x10] sm:$0xff] }
 0xd8f   :  { %1563 = vrot.lane.b32.xlu1 %v1556_v22, %s2798_s4 }
 0xdfd   :  { %v1559_v23 = vpop.permute.xlu0 %1558 }
 0xdfe   :  { %1561 = vst.msk [vmem:[%s3453_s12 + $0x8] sm:$0x3] %vm119_vm0, %v1559_v23  ;;  %2574 = vmatmul.mubr.msk.f32.vlgmr.msra.gmra.mxu0 %vm131_vm1, %v1559_v23 }
 0xdff   :  { %2588 = vmatpush3.msra.mxu0 %v2973_v25  ;;  %2595 = vmatprep.mubr.msk.f32.mxu0 %vm2797_vm2, %v2796_v0  ;;  %v1567_v25 = vld [vmem:[#allocation2 + $0xa] sm:$0x3] }
 0xe00   :  { %2589 = vmatprep.subr.mxu0 %v2796_v0 }
 0xe01   :  { %v1564_v24 = vpop.permute.xlu1 %1563  ;;  %2590 = vmatpush3.msra.mxu0 %v2987_v27 }
 0xe02   :  { %1566 = vst.msk [vmem:[%s3454_s13 + $0x6] sm:$0x3] %vm119_vm0, %v1564_v24  ;;  %2585 = vmatmul.mubr.msk.f32.vlgmr.msra.gmra.mxu1 %vm131_vm1, %v1564_v24  ;;  %2591 = vmatprep.subr.mxu0 %v2796_v0 }
 0xe03   :  { %2592 = vmatpush3.msra.mxu0 %v3001_v29  ;;  %2599 = vmatpush3.msra.mxu1 %v2978_v26 }
 0xe04   :  { %2593 = vmatprep.subr.mxu0 %v2796_v0  ;;  %2600 = vmatprep.subr.mxu1 %v2796_v0 }
 0xe05   :  { %2594 = vmatpush3.msra.mxu0 %v3015_v31  ;;  %2601 = vmatpush3.msra.mxu1 %v2992_v28  ;;  %v1641_v31 = vld [vmem:[#allocation3 + $0x4] sm:$0x3] }
 0xe06   :  { %2602 = vmatprep.subr.mxu1 %v2796_v0  ;;  %2606 = vmatprep.mubr.msk.f32.mxu1 %vm2797_vm2, %v2796_v0 }
 0xe07   :  { %2603 = vmatpush3.msra.mxu1 %v3008_v30  ;;  %2609 = vmatprep.subr.mxu0 %v2796_v0 }
 0xe08   :  { %2604 = vmatprep.subr.mxu1 %v2796_v0 }
 0xe09   :  { %2605 = vmatpush3.msra.mxu1 %v3023_v33 }
 0xe0a   :  { %2620 = vmatprep.subr.mxu1 %v2796_v0 }
 0xebe   :  { %v1636_v26 = vpop.f32.mrf.mxu0 }
 0xebf   :  { %v1640_v27 = vadd.f32 %v1636_v26, %v1567_v25 }
 0xec0   :  { %v2575_v29 = vpop.f32.mrf.mxu0 }
 0xec1   :  { %v2295_v28 = vmul.f32 -1.442695, %v1640_v27 }
 0xec2   :  { %v1710_v32 = vpop.f32.mrf.mxu1 }
 0xec3   :  { %2717 = vpow2.f32 %v2295_v28  ;;  %v1714_v34 = vadd.f32 %v1710_v32, %v1641_v31 }
 0xec4   :  { %v2586_v35 = vpop.f32.mrf.mxu1 }
 0xec5   :  { %v2296_v36 = vmul.f32 -1.442695, %v1714_v34 }
 0xec7   :  { %2719 = vpow2.f32 %v2296_v36 }
 0xec8   :  { %2721 = vtanh.f32 %v1640_v27 }
 0xed0   :  { %v2718_v30 = vpop.eup %2717 }
 0xed1   :  { %v1719_v37 = vadd.f32 1.0, %v2718_v30 }
 0xed3   :  { %2723 = vrcp.f32 %v1719_v37 }
 0xed4   :  { %v2720_v38 = vpop.eup %2719  ;;  %2725 = vtanh.f32 %v1714_v34 }
 0xed5   :  { %v1744_v33 = vadd.f32 1.0, %v2720_v38  ;;  %v2722_v39 = vpop.eup %2721 }
 0xed7   :  { %2727 = vrcp.f32 %v1744_v33 }
 0xee0   :  { %v2724_v40 = vpop.eup %2723 }
 0xee1   :  { %v1722_v41 = vsel %vm3061_vm5, %v2722_v39, %v2724_v40  ;;  %v2726_v42 = vpop.eup %2725 }
 0xee2   :  { %1725 = vrot.lane.b32.xlu0 %v1722_v41, %s2799_s9  ;;  %v1723_v49 = vmul.f32 %v1722_v41, %v3272_v13 }
 0xee4   :  { %v2728_v43 = vpop.eup %2727 }
 0xee5   :  { %v1747_v44 = vsel %vm3061_vm5, %v2726_v42, %v2728_v43 }
 0xee6   :  { %1750 = vrot.lane.b32.xlu1 %v1747_v44, %s2799_s9  ;;  %v1748_v52 = vmul.f32 %v1747_v44, %v3276_v16 }
 0xf54   :  { %v1726_v45 = vpop.permute.xlu0 %1725 }
 0xf55   :  { %v1728_v46 = vmul.f32 %v1726_v45, %v1722_v41 }
 0xf57   :  { %1730 = vrot.lane.b32.xlu0 %v1728_v46, %s2798_s4  ;;  %v1983_v46 = vld [vmem:[#allocation2 + $0xe] sm:$0x3] }
 0xf58   :  { %v1751_v47 = vpop.permute.xlu1 %1750 }
 0xf59   :  { %v1753_v48 = vmul.f32 %v1751_v47, %v1747_v44 }
 0xf5b   :  { %1755 = vrot.lane.b32.xlu1 %v1753_v48, %s2798_s4 }
 0xfc9   :  { %v1731_v50 = vpop.permute.xlu0 %1730 }
 0xfca   :  { %v3322_v51 = vadd.f32 %v1731_v50, %v1723_v49 }
 0xfcc   :  { %2729 = vtanh.f32 %v3322_v51 }
 0xfcd   :  { %v1756_v53 = vpop.permute.xlu1 %1755 }
 0xfce   :  { %v3326_v54 = vadd.f32 %v1756_v53, %v1748_v52 }
 0xfd0   :  { %2731 = vtanh.f32 %v3326_v54 }
 0xfd9   :  { %v2730_v55 = vpop.eup %2729 }
 0xfda   :  { %1736 = vrot.lane.b32.xlu0 %v2730_v55, %s2799_s9 }
 0xfdd   :  { %v2732_v56 = vpop.eup %2731 }
 0xfde   :  { %1761 = vrot.lane.b32.xlu1 %v2732_v56, %s2799_s9 }
0x104c   :  { %v1737_v57 = vpop.permute.xlu0 %1736 }
0x104d   :  { %v1739_v58 = vmul.f32 %v1737_v57, %v1722_v41 }
0x104f   :  { %1766 = vrot.lane.b32.xlu0 %v1739_v58, %s2798_s4 }
0x1050   :  { %v1762_v59 = vpop.permute.xlu1 %1761 }
0x1051   :  { %v1764_v60 = vmul.f32 %v1762_v59, %v1747_v44 }
0x1053   :  { %1771 = vrot.lane.b32.xlu1 %v1764_v60, %s2798_s4 }
0x10c1   :  { %v1767_v61 = vpop.permute.xlu0 %1766 }
0x10c2   :  { %1769 = vst.msk [vmem:[%s3453_s12 + $0xa] sm:$0x3] %vm119_vm0, %v1767_v61  ;;  %2596 = vmatmul.mubr.msk.f32.vlgmr.msra.gmra.mxu0 %vm131_vm1, %v1767_v61 }
0x10c3   :  { %2610 = vmatpush3.msra.mxu0 %v2765_v62  ;;  %2617 = vmatprep.mubr.msk.f32.mxu0 %vm2797_vm2, %v2796_v0 }
0x10c4   :  { %2611 = vmatprep.subr.mxu0 %v2796_v0 }
0x10c5   :  { %v1772_v63 = vpop.permute.xlu1 %1771  ;;  %2612 = vmatpush3.msra.mxu0 %v2766_v1 }
0x10c6   :  { %1774 = vst.msk [vmem:[%s3454_s13 + $0x4] sm:$0x3] %vm119_vm0, %v1772_v63  ;;  %2607 = vmatmul.mubr.msk.f32.vlgmr.msra.gmra.mxu1 %vm131_vm1, %v1772_v63  ;;  %2613 = vmatprep.subr.mxu0 %v2796_v0 }
0x10c7   :  { %2614 = vmatpush3.msra.mxu0 %v2767_v2  ;;  %2621 = vmatpush3.msra.mxu1 %v2768_v3 }
0x10c8   :  { %2615 = vmatprep.subr.mxu0 %v2796_v0  ;;  %2622 = vmatprep.subr.mxu1 %v2796_v0 }
0x10c9   :  { %2616 = vmatpush3.msra.mxu0 %v2769_v4  ;;  %2623 = vmatpush3.msra.mxu1 %v2770_v5 }
0x10ca   :  { %2624 = vmatprep.subr.mxu1 %v2796_v0  ;;  %2628 = vmatprep.mubr.msk.f32.mxu1 %vm2797_vm2, %v2796_v0 }
0x10cb   :  { %2625 = vmatpush3.msra.mxu1 %v2771_v6 }
0x10cc   :  { %2626 = vmatprep.subr.mxu1 %v2796_v0 }
0x10cd   :  { %2627 = vmatpush3.msra.mxu1 %v2772_v7 }
0x1182   :  { %v1844_v10 = vpop.f32.mrf.mxu0 }
0x1183   :  { %v1848_v11 = vadd.f32 %v1844_v10, %v1775_v9 }
0x1184   :  { %v2597_v12 = vpop.f32.mrf.mxu0 }
0x1185   :  { %v2299_v13 = vmul.f32 -1.442695, %v1848_v11 }
0x1186   :  { %v1918_v15 = vpop.f32.mrf.mxu1 }
0x1187   :  { %2733 = vpow2.f32 %v2299_v13  ;;  %v1922_v16 = vadd.f32 %v1918_v15, %v1849_v14 }
0x1188   :  { %v2608_v17 = vpop.f32.mrf.mxu1 }
0x1189   :  { %v2300_v18 = vmul.f32 -1.442695, %v1922_v16 }
0x118b   :  { %2735 = vpow2.f32 %v2300_v18 }
0x118c   :  { %2737 = vtanh.f32 %v1848_v11 }
0x1194   :  { %v2734_v19 = vpop.eup %2733 }
0x1195   :  { %v1927_v20 = vadd.f32 1.0, %v2734_v19 }
0x1197   :  { %2739 = vrcp.f32 %v1927_v20 }
0x1198   :  { %v2736_v0 = vpop.eup %2735  ;;  %2741 = vtanh.f32 %v1922_v16 }
0x1199   :  { %v1952_v21 = vadd.f32 1.0, %v2736_v0  ;;  %v2738_v22 = vpop.eup %2737 }
0x119b   :  { %2743 = vrcp.f32 %v1952_v21 }
0x11a4   :  { %v2740_v23 = vpop.eup %2739 }
0x11a5   :  { %v1930_v24 = vsel %vm3061_vm5, %v2738_v22, %v2740_v23  ;;  %v2742_v25 = vpop.eup %2741 }
0x11a6   :  { %1933 = vrot.lane.b32.xlu0 %v1930_v24, %s2799_s9  ;;  %v1931_v34 = vmul.f32 %v1930_v24, %v3322_v51  ;;  %v2057_v51 = vld [vmem:[#allocation3] sm:$0x3] }
0x11a8   :  { %v2744_v26 = vpop.eup %2743 }
0x11a9   :  { %v1955_v27 = vsel %vm3061_vm5, %v2742_v25, %v2744_v26 }
0x11aa   :  { %1958 = vrot.lane.b32.xlu1 %v1955_v27, %s2799_s9  ;;  %v1956_v30 = vmul.f32 %v1955_v27, %v3326_v54 }
0x1218   :  { %v1934_v29 = vpop.permute.xlu0 %1933 }
0x1219   :  { %v1936_v28 = vmul.f32 %v1934_v29, %v1930_v24 }
0x121b   :  { %1938 = vrot.lane.b32.xlu0 %v1936_v28, %s2798_s4 }
0x121c   :  { %v1959_v31 = vpop.permute.xlu1 %1958 }
0x121d   :  { %v1961_v32 = vmul.f32 %v1959_v31, %v1955_v27 }
0x121f   :  { %1963 = vrot.lane.b32.xlu1 %v1961_v32, %s2798_s4 }
0x128d   :  { %v1939_v35 = vpop.permute.xlu0 %1938 }
0x128e   :  { %v1941_v36 = vadd.f32 %v1939_v35, %v1931_v34 }
0x1290   :  { %2745 = vtanh.f32 %v1941_v36 }
0x1291   :  { %v1964_v37 = vpop.permute.xlu1 %1963 }
0x1292   :  { %v1966_v38 = vadd.f32 %v1964_v37, %v1956_v30 }
0x1294   :  { %2747 = vtanh.f32 %v1966_v38 }
0x129d   :  { %v2746_v33 = vpop.eup %2745 }
0x129e   :  { %1944 = vrot.lane.b32.xlu0 %v2746_v33, %s2799_s9 }
0x12a1   :  { %v2748_v39 = vpop.eup %2747 }
0x12a2   :  { %1969 = vrot.lane.b32.xlu1 %v2748_v39, %s2799_s9 }
0x1310   :  { %v1945_v40 = vpop.permute.xlu0 %1944 }
0x1311   :  { %v1947_v41 = vmul.f32 %v1945_v40, %v1930_v24 }
0x1313   :  { %1974 = vrot.lane.b32.xlu0 %v1947_v41, %s2798_s4 }
0x1314   :  { %v1970_v42 = vpop.permute.xlu1 %1969 }
0x1315   :  { %v1972_v43 = vmul.f32 %v1970_v42, %v1955_v27 }
0x1317   :  { %1979 = vrot.lane.b32.xlu1 %v1972_v43, %s2798_s4 }
0x1385   :  { %v1975_v44 = vpop.permute.xlu0 %1974 }
0x1386   :  { %1977 = vst.msk [vmem:[%s3453_s12 + $0xc] sm:$0x3] %vm119_vm0, %v1975_v44  ;;  %2618 = vmatmul.mubr.msk.f32.vlgmr.msra.gmra.mxu0 %vm131_vm1, %v1975_v44 }
0x1389   :  { %v1980_v45 = vpop.permute.xlu1 %1979 }
0x138a   :  { %1982 = vst.msk [vmem:[%s3454_s13 + $0x2] sm:$0x3] %vm119_vm0, %v1980_v45  ;;  %2629 = vmatmul.mubr.msk.f32.vlgmr.msra.gmra.mxu1 %vm131_vm1, %v1980_v45 }
0x1446   :  { %v2052_v47 = vpop.f32.mrf.mxu0 }
0x1447   :  { %v2056_v48 = vadd.f32 %v2052_v47, %v1983_v46 }
0x1448   :  { %v2619_v49 = vpop.f32.mrf.mxu0 }
0x1449   :  { %v2303_v50 = vmul.f32 -1.442695, %v2056_v48 }
0x144a   :  { %v2126_v52 = vpop.f32.mrf.mxu1 }
0x144b   :  { %2749 = vpow2.f32 %v2303_v50  ;;  %v2130_v53 = vadd.f32 %v2126_v52, %v2057_v51 }
0x144c   :  { %v2630_v54 = vpop.f32.mrf.mxu1 }
0x144d   :  { %v2304_v55 = vmul.f32 -1.442695, %v2130_v53 }
0x144f   :  { %2751 = vpow2.f32 %v2304_v55 }
0x1450   :  { %2753 = vtanh.f32 %v2056_v48 }
0x1458   :  { %v2750_v56 = vpop.eup %2749 }
0x1459   :  { %v2135_v57 = vadd.f32 1.0, %v2750_v56 }
0x145b   :  { %2755 = vrcp.f32 %v2135_v57 }
0x145c   :  { %v2752_v58 = vpop.eup %2751  ;;  %2757 = vtanh.f32 %v2130_v53 }
0x145d   :  { %v2160_v59 = vadd.f32 1.0, %v2752_v58  ;;  %v2754_v60 = vpop.eup %2753 }
0x145f   :  { %2759 = vrcp.f32 %v2160_v59 }
0x1468   :  { %v2756_v61 = vpop.eup %2755 }
0x1469   :  { %v2138_v62 = vsel %vm3061_vm5, %v2754_v60, %v2756_v61  ;;  %v2758_v63 = vpop.eup %2757 }
0x146a   :  { %2141 = vrot.lane.b32.xlu0 %v2138_v62, %s2799_s9  ;;  %v2139_v7 = vmul.f32 %v2138_v62, %v1941_v36 }
0x146c   :  { %v2760_v1 = vpop.eup %2759 }
0x146d   :  { %v2163_v2 = vsel %vm3061_vm5, %v2758_v63, %v2760_v1 }
0x146e   :  { %2166 = vrot.lane.b32.xlu1 %v2163_v2, %s2799_s9  ;;  %v2164_v11 = vmul.f32 %v2163_v2, %v1966_v38 }
0x14dc   :  { %v2142_v3 = vpop.permute.xlu0 %2141 }
0x14dd   :  { %v2144_v4 = vmul.f32 %v2142_v3, %v2138_v62 }
0x14df   :  { %2146 = vrot.lane.b32.xlu0 %v2144_v4, %s2798_s4 }
0x14e0   :  { %v2167_v5 = vpop.permute.xlu1 %2166 }
0x14e1   :  { %v2169_v6 = vmul.f32 %v2167_v5, %v2163_v2 }
0x14e3   :  { %2171 = vrot.lane.b32.xlu1 %v2169_v6, %s2798_s4 }
0x1551   :  { %v2147_v9 = vpop.permute.xlu0 %2146 }
0x1552   :  { %v2149_v10 = vadd.f32 %v2147_v9, %v2139_v7 }
0x1554   :  { %2761 = vtanh.f32 %v2149_v10 }
0x1555   :  { %v2172_v12 = vpop.permute.xlu1 %2171 }
0x1556   :  { %v2174_v13 = vadd.f32 %v2172_v12, %v2164_v11 }
0x1558   :  { %2763 = vtanh.f32 %v2174_v13 }
0x1561   :  { %v2762_v8 = vpop.eup %2761 }
0x1562   :  { %2152 = vrot.lane.b32.xlu0 %v2762_v8, %s2799_s9 }
0x1565   :  { %v2764_v14 = vpop.eup %2763 }
0x1566   :  { %2177 = vrot.lane.b32.xlu1 %v2764_v14, %s2799_s9 }
0x15d4   :  { %v2153_v15 = vpop.permute.xlu0 %2152 }
0x15d5   :  { %v2155_v16 = vmul.f32 %v2153_v15, %v2138_v62 }
0x15d7   :  { %2182 = vrot.lane.b32.xlu0 %v2155_v16, %s2798_s4 }
0x15d8   :  { %v2178_v17 = vpop.permute.xlu1 %2177 }
0x15d9   :  { %v2180_v18 = vmul.f32 %v2178_v17, %v2163_v2 }
0x15db   :  { %2187 = vrot.lane.b32.xlu1 %v2180_v18, %s2798_s4  ;;  %2193 = vrot.lane.b32.xlu0 %v2149_v10, %s2800_s8 }
0x15df   :  { %2199 = vrot.lane.b32.xlu1 %v2174_v13, %s2800_s8 }
0x1649   :  { %v2183_v19 = vpop.permute.xlu0 %2182 }
0x164a   :  { %2185 = vst.msk [vmem:[%s3453_s12 + $0xe] sm:$0x3] %vm119_vm0, %v2183_v19  ;;  %2191 = vst.msk [vmem:[#allocation4] sm:$0x3] %vm119_vm0, %v2183_v19 }
0x164b   :  { %2206 = vst.msk [vmem:[%s3455_s14] sm:$0x3] %vm119_vm0, %v2183_v19 }
0x164d   :  { %v2188_v20 = vpop.permute.xlu1 %2187  ;;  %v2194_v0 = vpop.permute.xlu0 %2193 }
0x164e   :  { %2190 = vst.msk [vmem:[%s3454_s13] sm:$0x3] %vm119_vm0, %v2188_v20  ;;  %2197 = vst.msk [vmem:[#allocation6] sm:$0x3] %vm119_vm0, %v2188_v20 }
0x164f   :  { %2305 = vst.msk [vmem:[%s3455_s14 + $0x2] sm:$0x3] %vm119_vm0, %v2188_v20  ;;  %2196 = vst.msk [vmem:[#allocation5] sm:$0x3] %vm119_vm0, %v2194_v0 }
0x1650   :  { %2209 = vst.msk [vmem:[%s3456_s15] sm:$0x3] %vm119_vm0, %v2194_v0 }
0x1651   :  { %v2200_v21 = vpop.permute.xlu1 %2199 }
0x1652   :  { %2202 = vst.msk [vmem:[#allocation7] sm:$0x3] %vm119_vm0, %v2200_v21  ;;  %2306 = vst.msk [vmem:[%s3456_s15 + $0x2] sm:$0x3] %vm119_vm0, %v2200_v21 }
0x1653   :  { %2242 = vsyncpa [#allocation9], 1 }

// kernel: lstm_layer_forward.6
= control target key start
LH: loop header
LB: loop body
LE: loop exit
PB: predicated region body
PF: predicated region fallthrough
CT: control target
= control target key end

     0   :  { %vm107_vm0 = vcmask 254976   ;;  %v2759_v3 = vmov 0.0   ;;  %vm119_vm1 = vcmask 261120   ;;  %vm2760_vm2 = vmmov 0   ;;  %s2763_s24 = smov 96   ;;  %s3404_s4 = inlined_call_operand.vmem [shape: f32[32,128], index: 4, kind: input, shape index: {}]   ;;  %s3405_s5 = inlined_call_operand.vmem [shape: f32[32,128], index: 5, kind: input, shape index: {}]   ;;  %s3406_s0 = inlined_call_operand.vmem [shape: f32[16,32], index: 0, kind: input, shape index: {}, may-alias: {0,2}]   ;;  %s3407_s1 = inlined_call_operand.vmem [shape: f32[16,32], index: 1, kind: input, shape index: {}, may-alias: {1,3}]   ;;  %s3408_s6 = inlined_call_operand.vmem [shape: f32[32,128], index: 6, kind: input, shape index: {}]   ;;  %s3409_s7 = inlined_call_operand.vmem [shape: f32[32,128], index: 7, kind: input, shape index: {}]   ;;  %s3410_s2 = inlined_call_operand.vmem [shape: f32[16,32], index: 2, kind: input, shape index: {}, may-alias: {0,2}]   ;;  %s3411_s3 = inlined_call_operand.vmem [shape: f32[16,32], index: 3, kind: input, shape index: {}, may-alias: {1,3}]   ;;  %s3412_s10 = inlined_call_operand.vmem [shape: f32[32,128], index: 10, kind: input, shape index: {}]   ;;  %s3413_s11 = inlined_call_operand.vmem [shape: f32[32,128], index: 11, kind: input, shape index: {}]   ;;  %s3414_s8 = inlined_call_operand.vmem [shape: f32[1,128], index: 8, kind: input, shape index: {}]   ;;  %s3415_s9 = inlined_call_operand.vmem [shape: f32[1,128], index: 9, kind: input, shape index: {}]   ;;  %s3416_s12 = inlined_call_operand.vmem [shape: f32[16,32], index: 12, kind: output, shape index: {0}]   ;;  %s3417_s13 = inlined_call_operand.vmem [shape: f32[16,32], index: 13, kind: output, shape index: {1}]   ;;  %s3418_s14 = inlined_call_operand.vmem [shape: f32[2,2,32], index: 14, kind: output, shape index: {2}]   ;;  %s3419_s15 = inlined_call_operand.vmem [shape: f32[2,2,32], index: 15, kind: output, shape index: {3}]  }
   0x1   :  { %v118_v0 = vld [vmem:[%s3404_s4 + $0x18] sm:$0xff]  ;;  %v117_v2 = vld [vmem:[%s3404_s4 + $0x10] sm:$0xff]  ;;  %108 = vst.msk [vmem:[#allocation4] sm:$0x3] %vm107_vm0, %v2759_v3  ;;  %109 = vst.msk [vmem:[#allocation5] sm:$0x3] %vm107_vm0, %v2759_v3 }
   0x2   :  { %v214_v1 = vld [vmem:[%s3405_s5 + $0x18] sm:$0xff]  ;;  %110 = vst.msk [vmem:[#allocation6] sm:$0x3] %vm107_vm0, %v2759_v3  ;;  %111 = vst.msk [vmem:[#allocation7] sm:$0x3] %vm107_vm0, %v2759_v3  ;;  %2398 = vmatprep.subr.mxu0 %v118_v0  ;;  %v213_v4 = vld [vmem:[%s3405_s5 + $0x10] sm:$0xff] }
   0x3   :  { %2409 = vmatprep.subr.mxu1 %v214_v1  ;;  %2399 = vmatpush3.msra.mxu0 %v118_v0  ;;  %v116_v5 = vld [vmem:[%s3404_s4 + $0x8] sm:$0xff]  ;;  %v115_v7 = vld [vmem:[%s3404_s4] sm:$0xff]  ;;  %v306_v12 = vld [vmem:[%s3408_s6 + $0x18] sm:$0xff] }
   0x4   :  { %2410 = vmatpush3.msra.mxu1 %v214_v1  ;;  %v212_v6 = vld [vmem:[%s3405_s5 + $0x8] sm:$0xff]  ;;  %2400 = vmatprep.subr.mxu0 %v117_v2  ;;  %v211_v8 = vld [vmem:[%s3405_s5] sm:$0xff]  ;;  %v401_v14 = vld [vmem:[%s3409_s7 + $0x18] sm:$0xff]  ;;  %s2761_s5 = smov 32  }
   0x5   :  { %2411 = vmatprep.subr.mxu1 %v213_v4  ;;  %2401 = vmatpush3.msra.mxu0 %v117_v2  ;;  %v113_v9 = vld [vmem:[%s3406_s0] sm:$0xff]  ;;  %v114_v10 = vld [vmem:[%s3406_s0 + $0x8] sm:$0xff]  ;;  %v305_v15 = vld [vmem:[%s3408_s6 + $0x10] sm:$0xff] }
   0x6   :  { %2412 = vmatpush3.msra.mxu1 %v213_v4  ;;  %2402 = vmatprep.subr.mxu0 %v116_v5  ;;  %v209_v11 = vld [vmem:[%s3407_s1] sm:$0xff]  ;;  %v210_v13 = vld [vmem:[%s3407_s1 + $0x8] sm:$0xff]  ;;  %v400_v16 = vld [vmem:[%s3409_s7 + $0x10] sm:$0xff] }
   0x7   :  { %2413 = vmatprep.subr.mxu1 %v212_v6  ;;  %2403 = vmatpush3.msra.mxu0 %v116_v5  ;;  %v304_v17 = vld [vmem:[%s3408_s6 + $0x8] sm:$0xff]  ;;  %v303_v19 = vld [vmem:[%s3408_s6] sm:$0xff]  ;;  %v2933_v25 = vld [vmem:[%s3412_s10 + $0x18] sm:$0xff]  ;;  %v495_v5 = vlaneseq }
   0x8   :  { %2414 = vmatpush3.msra.mxu1 %v212_v6  ;;  %2404 = vmatprep.subr.mxu0 %v115_v7  ;;  %v399_v18 = vld [vmem:[%s3409_s7 + $0x8] sm:$0xff]  ;;  %v398_v20 = vld [vmem:[%s3409_s7] sm:$0xff]  ;;  %v2938_v26 = vld [vmem:[%s3413_s11 + $0x18] sm:$0xff] }
   0x9   :  { %2415 = vmatprep.subr.mxu1 %v211_v8  ;;  %2405 = vmatpush3.msra.mxu0 %v115_v7  ;;  %v301_v21 = vld [vmem:[%s3410_s2] sm:$0xff]  ;;  %v302_v23 = vld [vmem:[%s3410_s2 + $0x8] sm:$0xff]  ;;  %v2947_v27 = vld [vmem:[%s3412_s10 + $0x10] sm:$0xff]  ;;  %v496_v7 = vand.u32 127, %v495_v5 }
   0xa   :  { %2406 = vmatprep.mubr.msk.f32.mxu0 %vm119_vm1, %v113_v9  ;;  %2416 = vmatpush3.msra.mxu1 %v211_v8  ;;  %v396_v22 = vld [vmem:[%s3411_s3] sm:$0xff]  ;;  %v397_v24 = vld [vmem:[%s3411_s3 + $0x8] sm:$0xff]  ;;  %v2952_v28 = vld [vmem:[%s3413_s11 + $0x10] sm:$0xff] }
   0xb   :  { %2407 = vmatmul.mubr.msk.f32.vlgmr.msra.gmra.mxu0 %vm119_vm1, %v114_v10  ;;  %2417 = vmatprep.mubr.msk.f32.mxu1 %vm119_vm1, %v209_v11  ;;  %v2961_v29 = vld [vmem:[%s3412_s10 + $0x8] sm:$0xff]  ;;  %v2975_v31 = vld [vmem:[%s3412_s10] sm:$0xff]  ;;  %vm497_vm3 = vcmp.ge.s32.totalorder %v496_v7, 64  ;;  %vm498_vm4 = vcmp.lt.s32.totalorder %v496_v7, 96 }
   0xc   :  { %2420 = vmatprep.subr.mxu0 %v306_v12  ;;  %2431 = vmatprep.subr.mxu1 %v401_v14  ;;  %v2968_v30 = vld [vmem:[%s3413_s11 + $0x8] sm:$0xff]  ;;  %v500_v32 = vld [vmem:[#allocation4] sm:$0x3]  ;;  %v501_v34 = vld [vmem:[#allocation5] sm:$0x3] }
   0xd   :  { %2418 = vmatmul.mubr.msk.f32.vlgmr.msra.gmra.mxu1 %vm119_vm1, %v210_v13  ;;  %2421 = vmatpush3.msra.mxu0 %v306_v12  ;;  %v2983_v33 = vld [vmem:[%s3413_s11] sm:$0xff]  ;;  %vm3024_vm5 = vmand %vm497_vm3, %vm498_vm4 }
   0xe   :  { %2432 = vmatpush3.msra.mxu1 %v401_v14  ;;  %2422 = vmatprep.subr.mxu0 %v305_v15  ;;  %v502_v35 = vld [vmem:[#allocation6] sm:$0x3]  ;;  %v503_v36 = vld [vmem:[#allocation7] sm:$0x3]  ;;  %v2252_v37 = vld [vmem:[%s3414_s8] ss:$0 sm:$0xff] }
   0xf   :  { %2433 = vmatprep.subr.mxu1 %v400_v16  ;;  %2423 = vmatpush3.msra.mxu0 %v305_v15  ;;  %v2257_v46 = vld [vmem:[%s3415_s9] ss:$0 sm:$0xff]  ;;  %s2762_s8 = smov 64  }
  0x10   :  { %2434 = vmatpush3.msra.mxu1 %v400_v16  ;;  %2424 = vmatprep.subr.mxu0 %v304_v17 }
  0x11   :  { %2435 = vmatprep.subr.mxu1 %v399_v18  ;;  %2425 = vmatpush3.msra.mxu0 %v304_v17 }
  0x12   :  { %2436 = vmatpush3.msra.mxu1 %v399_v18  ;;  %2426 = vmatprep.subr.mxu0 %v303_v19 }
  0x13   :  { %2437 = vmatprep.subr.mxu1 %v398_v20  ;;  %2427 = vmatpush3.msra.mxu0 %v303_v19 }
  0x14   :  { %2428 = vmatprep.mubr.msk.f32.mxu0 %vm119_vm1, %v301_v21  ;;  %2438 = vmatpush3.msra.mxu1 %v398_v20 }
  0x15   :  { %2439 = vmatprep.mubr.msk.f32.mxu1 %vm119_vm1, %v396_v22  ;;  %2429 = vmatmul.mubr.msk.f32.vlgmr.msra.gmra.mxu0 %vm119_vm1, %v302_v23 }
  0x16   :  { %2440 = vmatmul.mubr.msk.f32.vlgmr.msra.gmra.mxu1 %vm119_vm1, %v397_v24  ;;  %2442 = vmatprep.subr.mxu0 %v2759_v3 }
  0x17   :  { %2453 = vmatprep.subr.mxu1 %v2759_v3  ;;  %2443 = vmatpush3.msra.mxu0 %v2933_v25 }
  0x18   :  { %2454 = vmatpush3.msra.mxu1 %v2938_v26  ;;  %2444 = vmatprep.subr.mxu0 %v2759_v3 }
  0x19   :  { %2455 = vmatprep.subr.mxu1 %v2759_v3  ;;  %2445 = vmatpush3.msra.mxu0 %v2947_v27 }
  0x1a   :  { %2456 = vmatpush3.msra.mxu1 %v2952_v28  ;;  %2446 = vmatprep.subr.mxu0 %v2759_v3 }
  0x1b   :  { %2457 = vmatprep.subr.mxu1 %v2759_v3  ;;  %2447 = vmatpush3.msra.mxu0 %v2961_v29 }
  0x1c   :  { %2450 = vmatprep.mubr.msk.f32.mxu0 %vm2760_vm2, %v2759_v3  ;;  %2448 = vmatprep.subr.mxu0 %v2759_v3 }
  0x1d   :  { %2458 = vmatpush3.msra.mxu1 %v2968_v30  ;;  %2449 = vmatpush3.msra.mxu0 %v2975_v31 }
  0x1e   :  { %2459 = vmatprep.subr.mxu1 %v2759_v3  ;;  %2451 = vmatmul.mubr.msk.f32.vlgmr.msra.gmra.mxu0 %vm119_vm1, %v500_v32 }
  0x1f   :  { %2460 = vmatpush3.msra.mxu1 %v2983_v33  ;;  %2461 = vmatprep.mubr.msk.f32.mxu1 %vm2760_vm2, %v2759_v3 }
  0x20   :  { %663 = vrot.lane.b32.xlu1 %v501_v34, %s2761_s5  ;;  %2462 = vmatmul.mubr.msk.f32.vlgmr.msra.gmra.mxu1 %vm119_vm1, %v502_v35 }
  0x21   :  { %2464 = vmatprep.subr.mxu0 %v2759_v3  ;;  %2475 = vmatprep.subr.mxu1 %v2759_v3 }
  0x22   :  { %2465 = vmatpush3.msra.mxu0 %v2933_v25  ;;  %2476 = vmatpush3.msra.mxu1 %v2938_v26 }
  0x23   :  { %2466 = vmatprep.subr.mxu0 %v2759_v3  ;;  %2477 = vmatprep.subr.mxu1 %v2759_v3 }
  0x24   :  { %692 = vrot.lane.b32.xlu1 %v503_v36, %s2761_s5  ;;  %2467 = vmatpush3.msra.mxu0 %v2947_v27 }
  0x25   :  { %2468 = vmatprep.subr.mxu0 %v2759_v3  ;;  %2472 = vmatprep.mubr.msk.f32.mxu0 %vm2760_vm2, %v2759_v3 }
  0x26   :  { %2469 = vmatpush3.msra.mxu0 %v2961_v29  ;;  %2478 = vmatpush3.msra.mxu1 %v2952_v28 }
  0x27   :  { %2470 = vmatprep.subr.mxu0 %v2759_v3  ;;  %2479 = vmatprep.subr.mxu1 %v2759_v3 }
  0x28   :  { %2471 = vmatpush3.msra.mxu0 %v2975_v31  ;;  %2480 = vmatpush3.msra.mxu1 %v2968_v30 }
  0x29   :  { %2483 = vmatprep.mubr.msk.f32.mxu1 %vm2760_vm2, %v2759_v3  ;;  %2481 = vmatprep.subr.mxu1 %v2759_v3 }
  0x2a   :  { %2486 = vmatprep.subr.mxu0 %v2759_v3  ;;  %2482 = vmatpush3.msra.mxu1 %v2983_v33 }
  0x2b   :  { %2497 = vmatprep.subr.mxu1 %v2759_v3 }
  0x92   :  { %v664_v19 = vpop.permute.xlu1 %663 }
  0x96   :  { %v693_v21 = vpop.permute.xlu1 %692 }
  0xcb   :  { %v2408_v38 = vpop.f32.mrf.mxu0 }
  0xcc   :  { %v208_v39 = vadd.f32 %v2408_v38, %v2252_v37 }
  0xcd   :  { %v2419_v40 = vpop.f32.mrf.mxu1  ;;  %v192_v41 = vpop.f32.mrf.mxu0 }
  0xce   :  { %v297_v42 = vadd.f32 %v2419_v40, %v208_v39  ;;  %v207_v43 = vadd.f32 %v2252_v37, %v192_v41 }
  0xcf   :  { %v287_v44 = vpop.f32.mrf.mxu1 }
  0xd0   :  { %299 = vst [vmem:[#allocation2 + $0x8] sm:$0xff] %v297_v42  ;;  %v296_v45 = vadd.f32 %v287_v44, %v207_v43 }
  0xd2   :  { %298 = vst [vmem:[#allocation2] sm:$0xff] %v296_v45 }
  0xd5   :  { %v2430_v47 = vpop.f32.mrf.mxu0 }
  0xd6   :  { %v2441_v48 = vpop.f32.mrf.mxu1  ;;  %v395_v49 = vadd.f32 %v2430_v47, %v2257_v46 }
  0xd7   :  { %v379_v50 = vpop.f32.mrf.mxu0 }
  0xd8   :  { %v484_v51 = vadd.f32 %v2441_v48, %v395_v49  ;;  %v394_v52 = vadd.f32 %v2257_v46, %v379_v50  ;;  %v474_v53 = vpop.f32.mrf.mxu1 }
  0xd9   :  { %v504_v55 = vld [vmem:[#allocation2] sm:$0x3]  ;;  %v723_v43 = vld [vmem:[#allocation2 + $0x2] sm:$0x3] }
  0xda   :  { %486 = vst [vmem:[#allocation3 + $0x8] sm:$0xff] %v484_v51  ;;  %v483_v54 = vadd.f32 %v474_v53, %v394_v52 }
  0xdc   :  { %485 = vst [vmem:[#allocation3] sm:$0xff] %v483_v54 }
  0xde   :  { %v574_v56 = vpop.f32.mrf.mxu0 }
  0xdf   :  { %v578_v57 = vadd.f32 %v574_v56, %v504_v55 }
  0xe0   :  { %v2452_v58 = vpop.f32.mrf.mxu0  ;;  %v649_v59 = vpop.f32.mrf.mxu1 }
  0xe1   :  { %v2262_v60 = vmul.f32 -1.442695, %v578_v57  ;;  %v579_v61 = vld [vmem:[#allocation3 + $0xe] sm:$0x3]  ;;  %v797_v48 = vld [vmem:[#allocation3 + $0xc] sm:$0x3] }
  0xe2   :  { %v653_v62 = vadd.f32 %v649_v59, %v579_v61  ;;  %v2463_v63 = vpop.f32.mrf.mxu1 }
  0xe3   :  { %2623 = vpow2.f32 %v2262_v60 }
  0xe4   :  { %v2263_v0 = vmul.f32 -1.442695, %v653_v62 }
  0xe6   :  { %2625 = vpow2.f32 %v2263_v0 }
  0xe7   :  { %2627 = vtanh.f32 %v578_v57 }
  0xf0   :  { %v2624_v1 = vpop.eup %2623 }
  0xf1   :  { %v658_v2 = vadd.f32 1.0, %v2624_v1 }
  0xf3   :  { %v2626_v4 = vpop.eup %2625  ;;  %2629 = vrcp.f32 %v658_v2 }
  0xf4   :  { %v687_v6 = vadd.f32 1.0, %v2626_v4  ;;  %2631 = vtanh.f32 %v653_v62  ;;  %v2628_v9 = vpop.eup %2627 }
  0xf6   :  { %2633 = vrcp.f32 %v687_v6 }
 0x100   :  { %v2630_v10 = vpop.eup %2629 }
 0x101   :  { %v661_v11 = vsel %vm3024_vm5, %v2628_v9, %v2630_v10  ;;  %v2632_v12 = vpop.eup %2631 }
 0x102   :  { %668 = vrot.lane.b32.xlu0 %v661_v11, %s2762_s8  ;;  %v666_v20 = vmul.f32 %v664_v19, %v661_v11  ;;  %v931_v19 = vld [vmem:[#allocation2 + $0x4] sm:$0x3] }
 0x103   :  { %v2634_v13 = vpop.eup %2633 }
 0x104   :  { %v690_v14 = vsel %vm3024_vm5, %v2632_v12, %v2634_v13 }
 0x105   :  { %v695_v24 = vmul.f32 %v693_v21, %v690_v14 }
 0x106   :  { %697 = vrot.lane.b32.xlu0 %v690_v14, %s2762_s8 }
 0x174   :  { %v669_v15 = vpop.permute.xlu0 %668 }
 0x175   :  { %v671_v16 = vmul.f32 %v669_v15, %v661_v11 }
 0x177   :  { %673 = vrot.lane.b32.xlu0 %v671_v16, %s2761_s5 }
 0x178   :  { %v698_v17 = vpop.permute.xlu0 %697 }
 0x179   :  { %v700_v18 = vmul.f32 %v698_v17, %v690_v14 }
 0x17b   :  { %702 = vrot.lane.b32.xlu1 %v700_v18, %s2761_s5 }
 0x1e9   :  { %v674_v22 = vpop.permute.xlu0 %673 }
 0x1ea   :  { %v3036_v23 = vadd.f32 %v674_v22, %v666_v20 }
 0x1ec   :  { %2635 = vtanh.f32 %v3036_v23 }
 0x1ed   :  { %v703_v32 = vpop.permute.xlu1 %702 }
 0x1ee   :  { %v3039_v34 = vadd.f32 %v703_v32, %v695_v24  ;;  %v1005_v24 = vld [vmem:[#allocation3 + $0xa] sm:$0x3] }
 0x1f0   :  { %2637 = vtanh.f32 %v3039_v34 }
 0x1f9   :  { %v2636_v35 = vpop.eup %2635 }
 0x1fa   :  { %679 = vrot.lane.b32.xlu0 %v2636_v35, %s2762_s8 }
 0x1fd   :  { %v2638_v36 = vpop.eup %2637 }
 0x1fe   :  { %708 = vrot.lane.b32.xlu1 %v2638_v36, %s2762_s8 }
 0x26c   :  { %v680_v37 = vpop.permute.xlu0 %679 }
 0x26d   :  { %v682_v38 = vmul.f32 %v680_v37, %v661_v11 }
 0x26f   :  { %713 = vrot.lane.b32.xlu0 %v682_v38, %s2761_s5 }
 0x270   :  { %v709_v39 = vpop.permute.xlu1 %708 }
 0x271   :  { %v711_v40 = vmul.f32 %v709_v39, %v690_v14 }
 0x273   :  { %719 = vrot.lane.b32.xlu1 %v711_v40, %s2761_s5 }
 0x2e1   :  { %v714_v41 = vpop.permute.xlu0 %713 }
 0x2e2   :  { %717 = vst.msk [vmem:[%s3416_s12] sm:$0x3] %vm107_vm0, %v714_v41  ;;  %2473 = vmatmul.mubr.msk.f32.vlgmr.msra.gmra.mxu0 %vm119_vm1, %v714_v41 }
 0x2e3   :  { %2487 = vmatpush3.msra.mxu0 %v2933_v25  ;;  %2494 = vmatprep.mubr.msk.f32.mxu0 %vm2760_vm2, %v2759_v3 }
 0x2e4   :  { %2488 = vmatprep.subr.mxu0 %v2759_v3 }
 0x2e5   :  { %v720_v42 = vpop.permute.xlu1 %719  ;;  %2489 = vmatpush3.msra.mxu0 %v2947_v27 }
 0x2e6   :  { %722 = vst.msk [vmem:[%s3417_s13 + $0xe] sm:$0x3] %vm107_vm0, %v720_v42  ;;  %2484 = vmatmul.mubr.msk.f32.vlgmr.msra.gmra.mxu1 %vm119_vm1, %v720_v42  ;;  %2490 = vmatprep.subr.mxu0 %v2759_v3 }
 0x2e7   :  { %2491 = vmatpush3.msra.mxu0 %v2961_v29  ;;  %2498 = vmatpush3.msra.mxu1 %v2938_v26 }
 0x2e8   :  { %2492 = vmatprep.subr.mxu0 %v2759_v3  ;;  %2499 = vmatprep.subr.mxu1 %v2759_v3 }
 0x2e9   :  { %2493 = vmatpush3.msra.mxu0 %v2975_v31  ;;  %2500 = vmatpush3.msra.mxu1 %v2952_v28 }
 0x2ea   :  { %2501 = vmatprep.subr.mxu1 %v2759_v3  ;;  %2505 = vmatprep.mubr.msk.f32.mxu1 %vm2760_vm2, %v2759_v3 }
 0x2eb   :  { %2502 = vmatpush3.msra.mxu1 %v2968_v30  ;;  %2508 = vmatprep.subr.mxu0 %v2759_v3 }
 0x2ec   :  { %2503 = vmatprep.subr.mxu1 %v2759_v3 }
 0x2ed   :  { %2504 = vmatpush3.msra.mxu1 %v2983_v33 }
 0x2ee   :  { %2519 = vmatprep.subr.mxu1 %v2759_v3 }
 0x3a2   :  { %v792_v44 = vpop.f32.mrf.mxu0 }
 0x3a3   :  { %v796_v45 = vadd.f32 %v792_v44, %v723_v43 }
 0x3a4   :  { %v2474_v46 = vpop.f32.mrf.mxu0 }
 0x3a5   :  { %v2266_v47 = vmul.f32 -1.442695, %v796_v45 }
 0x3a6   :  { %v866_v49 = vpop.f32.mrf.mxu1 }
 0x3a7   :  { %2639 = vpow2.f32 %v2266_v47  ;;  %v870_v50 = vadd.f32 %v866_v49, %v797_v48 }
 0x3a8   :  { %v2485_v51 = vpop.f32.mrf.mxu1 }
 0x3a9   :  { %v2267_v52 = vmul.f32 -1.442695, %v870_v50 }
 0x3ab   :  { %2641 = vpow2.f32 %v2267_v52 }
 0x3ac   :  { %2643 = vtanh.f32 %v796_v45 }
 0x3b4   :  { %v2640_v53 = vpop.eup %2639 }
 0x3b5   :  { %v875_v54 = vadd.f32 1.0, %v2640_v53 }
 0x3b7   :  { %2645 = vrcp.f32 %v875_v54 }
 0x3b8   :  { %v2642_v55 = vpop.eup %2641  ;;  %2647 = vtanh.f32 %v870_v50 }
 0x3b9   :  { %v900_v56 = vadd.f32 1.0, %v2642_v55  ;;  %v2644_v57 = vpop.eup %2643 }
 0x3bb   :  { %2649 = vrcp.f32 %v900_v56 }
 0x3c4   :  { %v2646_v58 = vpop.eup %2645 }
 0x3c5   :  { %v878_v59 = vsel %vm3024_vm5, %v2644_v57, %v2646_v58  ;;  %v2648_v60 = vpop.eup %2647 }
 0x3c6   :  { %881 = vrot.lane.b32.xlu0 %v878_v59, %s2762_s8  ;;  %v879_v4 = vmul.f32 %v878_v59, %v3036_v23 }
 0x3c8   :  { %v2650_v61 = vpop.eup %2649 }
 0x3c9   :  { %v903_v62 = vsel %vm3024_vm5, %v2648_v60, %v2650_v61 }
 0x3ca   :  { %906 = vrot.lane.b32.xlu1 %v903_v62, %s2762_s8  ;;  %v904_v7 = vmul.f32 %v903_v62, %v3039_v34 }
 0x438   :  { %v882_v63 = vpop.permute.xlu0 %881 }
 0x439   :  { %v884_v0 = vmul.f32 %v882_v63, %v878_v59 }
 0x43b   :  { %886 = vrot.lane.b32.xlu0 %v884_v0, %s2761_s5 }
 0x43c   :  { %v907_v1 = vpop.permute.xlu1 %906 }
 0x43d   :  { %v909_v2 = vmul.f32 %v907_v1, %v903_v62  ;;  %v1139_v1 = vld [vmem:[#allocation2 + $0x6] sm:$0x3] }
 0x43f   :  { %911 = vrot.lane.b32.xlu1 %v909_v2, %s2761_s5 }
 0x4ad   :  { %v887_v5 = vpop.permute.xlu0 %886 }
 0x4ae   :  { %v3085_v6 = vadd.f32 %v887_v5, %v879_v4 }
 0x4b0   :  { %2651 = vtanh.f32 %v3085_v6 }
 0x4b1   :  { %v912_v9 = vpop.permute.xlu1 %911 }
 0x4b2   :  { %v3089_v10 = vadd.f32 %v912_v9, %v904_v7  ;;  %v1213_v7 = vld [vmem:[#allocation3 + $0x8] sm:$0x3] }
 0x4b4   :  { %2653 = vtanh.f32 %v3089_v10 }
 0x4bd   :  { %v2652_v11 = vpop.eup %2651 }
 0x4be   :  { %892 = vrot.lane.b32.xlu0 %v2652_v11, %s2762_s8 }
 0x4c1   :  { %v2654_v12 = vpop.eup %2653 }
 0x4c2   :  { %917 = vrot.lane.b32.xlu1 %v2654_v12, %s2762_s8 }
 0x530   :  { %v893_v13 = vpop.permute.xlu0 %892 }
 0x531   :  { %v895_v14 = vmul.f32 %v893_v13, %v878_v59 }
 0x533   :  { %922 = vrot.lane.b32.xlu0 %v895_v14, %s2761_s5 }
 0x534   :  { %v918_v15 = vpop.permute.xlu1 %917 }
 0x535   :  { %v920_v16 = vmul.f32 %v918_v15, %v903_v62 }
 0x537   :  { %927 = vrot.lane.b32.xlu1 %v920_v16, %s2761_s5 }
 0x5a5   :  { %v923_v17 = vpop.permute.xlu0 %922 }
 0x5a6   :  { %925 = vst.msk [vmem:[%s3416_s12 + $0x2] sm:$0x3] %vm107_vm0, %v923_v17  ;;  %2495 = vmatmul.mubr.msk.f32.vlgmr.msra.gmra.mxu0 %vm119_vm1, %v923_v17 }
 0x5a7   :  { %2509 = vmatpush3.msra.mxu0 %v2933_v25  ;;  %2516 = vmatprep.mubr.msk.f32.mxu0 %vm2760_vm2, %v2759_v3 }
 0x5a8   :  { %2510 = vmatprep.subr.mxu0 %v2759_v3 }
 0x5a9   :  { %v928_v18 = vpop.permute.xlu1 %927  ;;  %2511 = vmatpush3.msra.mxu0 %v2947_v27 }
 0x5aa   :  { %930 = vst.msk [vmem:[%s3417_s13 + $0xc] sm:$0x3] %vm107_vm0, %v928_v18  ;;  %2506 = vmatmul.mubr.msk.f32.vlgmr.msra.gmra.mxu1 %vm119_vm1, %v928_v18  ;;  %2512 = vmatprep.subr.mxu0 %v2759_v3 }
 0x5ab   :  { %2513 = vmatpush3.msra.mxu0 %v2961_v29  ;;  %2520 = vmatpush3.msra.mxu1 %v2938_v26 }
 0x5ac   :  { %2514 = vmatprep.subr.mxu0 %v2759_v3  ;;  %2521 = vmatprep.subr.mxu1 %v2759_v3 }
 0x5ad   :  { %2515 = vmatpush3.msra.mxu0 %v2975_v31  ;;  %2522 = vmatpush3.msra.mxu1 %v2952_v28 }
 0x5ae   :  { %2523 = vmatprep.subr.mxu1 %v2759_v3  ;;  %2527 = vmatprep.mubr.msk.f32.mxu1 %vm2760_vm2, %v2759_v3 }
 0x5af   :  { %2524 = vmatpush3.msra.mxu1 %v2968_v30  ;;  %2530 = vmatprep.subr.mxu0 %v2759_v3 }
 0x5b0   :  { %2525 = vmatprep.subr.mxu1 %v2759_v3 }
 0x5b1   :  { %2526 = vmatpush3.msra.mxu1 %v2983_v33 }
 0x5b2   :  { %2541 = vmatprep.subr.mxu1 %v2759_v3 }
 0x666   :  { %v1000_v20 = vpop.f32.mrf.mxu0 }
 0x667   :  { %v1004_v21 = vadd.f32 %v1000_v20, %v931_v19 }
 0x668   :  { %v2496_v22 = vpop.f32.mrf.mxu0 }
 0x669   :  { %v2270_v23 = vmul.f32 -1.442695, %v1004_v21 }
 0x66a   :  { %v1074_v32 = vpop.f32.mrf.mxu1 }
 0x66b   :  { %2655 = vpow2.f32 %v2270_v23  ;;  %v1078_v34 = vadd.f32 %v1074_v32, %v1005_v24 }
 0x66c   :  { %v2507_v35 = vpop.f32.mrf.mxu1 }
 0x66d   :  { %v2271_v36 = vmul.f32 -1.442695, %v1078_v34 }
 0x66f   :  { %2657 = vpow2.f32 %v2271_v36 }
 0x670   :  { %2659 = vtanh.f32 %v1004_v21 }
 0x678   :  { %v2656_v37 = vpop.eup %2655 }
 0x679   :  { %v1083_v38 = vadd.f32 1.0, %v2656_v37 }
 0x67b   :  { %2661 = vrcp.f32 %v1083_v38 }
 0x67c   :  { %v2658_v39 = vpop.eup %2657  ;;  %2663 = vtanh.f32 %v1078_v34 }
 0x67d   :  { %v1108_v40 = vadd.f32 1.0, %v2658_v39  ;;  %v2660_v41 = vpop.eup %2659 }
 0x67f   :  { %2665 = vrcp.f32 %v1108_v40 }
 0x688   :  { %v2662_v42 = vpop.eup %2661 }
 0x689   :  { %v1086_v43 = vsel %vm3024_vm5, %v2660_v41, %v2662_v42  ;;  %v2664_v44 = vpop.eup %2663 }
 0x68a   :  { %1089 = vrot.lane.b32.xlu0 %v1086_v43, %s2762_s8  ;;  %v1087_v51 = vmul.f32 %v1086_v43, %v3085_v6 }
 0x68c   :  { %v2666_v45 = vpop.eup %2665 }
 0x68d   :  { %v1111_v46 = vsel %vm3024_vm5, %v2664_v44, %v2666_v45 }
 0x68e   :  { %1114 = vrot.lane.b32.xlu1 %v1111_v46, %s2762_s8  ;;  %v1112_v54 = vmul.f32 %v1111_v46, %v3089_v10 }
 0x6fc   :  { %v1090_v47 = vpop.permute.xlu0 %1089 }
 0x6fd   :  { %v1092_v48 = vmul.f32 %v1090_v47, %v1086_v43 }
 0x6ff   :  { %1094 = vrot.lane.b32.xlu0 %v1092_v48, %s2761_s5 }
 0x700   :  { %v1115_v49 = vpop.permute.xlu1 %1114 }
 0x701   :  { %v1117_v50 = vmul.f32 %v1115_v49, %v1111_v46  ;;  %v1347_v49 = vld [vmem:[#allocation2 + $0x8] sm:$0x3] }
 0x703   :  { %1119 = vrot.lane.b32.xlu1 %v1117_v50, %s2761_s5 }
 0x771   :  { %v1095_v52 = vpop.permute.xlu0 %1094 }
 0x772   :  { %v3135_v53 = vadd.f32 %v1095_v52, %v1087_v51 }
 0x774   :  { %2667 = vtanh.f32 %v3135_v53 }
 0x775   :  { %v1120_v55 = vpop.permute.xlu1 %1119 }
 0x776   :  { %v3139_v56 = vadd.f32 %v1120_v55, %v1112_v54  ;;  %v1421_v54 = vld [vmem:[#allocation3 + $0x6] sm:$0x3] }
 0x778   :  { %2669 = vtanh.f32 %v3139_v56 }
 0x781   :  { %v2668_v57 = vpop.eup %2667 }
 0x782   :  { %1100 = vrot.lane.b32.xlu0 %v2668_v57, %s2762_s8 }
 0x785   :  { %v2670_v58 = vpop.eup %2669 }
 0x786   :  { %1125 = vrot.lane.b32.xlu1 %v2670_v58, %s2762_s8 }
 0x7f4   :  { %v1101_v59 = vpop.permute.xlu0 %1100 }
 0x7f5   :  { %v1103_v60 = vmul.f32 %v1101_v59, %v1086_v43 }
 0x7f7   :  { %1130 = vrot.lane.b32.xlu0 %v1103_v60, %s2761_s5 }
 0x7f8   :  { %v1126_v61 = vpop.permute.xlu1 %1125 }
 0x7f9   :  { %v1128_v62 = vmul.f32 %v1126_v61, %v1111_v46 }
 0x7fb   :  { %1135 = vrot.lane.b32.xlu1 %v1128_v62, %s2761_s5 }
 0x869   :  { %v1131_v63 = vpop.permute.xlu0 %1130 }
 0x86a   :  { %1133 = vst.msk [vmem:[%s3416_s12 + $0x4] sm:$0x3] %vm107_vm0, %v1131_v63  ;;  %2517 = vmatmul.mubr.msk.f32.vlgmr.msra.gmra.mxu0 %vm119_vm1, %v1131_v63 }
 0x86b   :  { %2531 = vmatpush3.msra.mxu0 %v2933_v25  ;;  %2538 = vmatprep.mubr.msk.f32.mxu0 %vm2760_vm2, %v2759_v3 }
 0x86c   :  { %2532 = vmatprep.subr.mxu0 %v2759_v3 }
 0x86d   :  { %v1136_v0 = vpop.permute.xlu1 %1135  ;;  %2533 = vmatpush3.msra.mxu0 %v2947_v27 }
 0x86e   :  { %1138 = vst.msk [vmem:[%s3417_s13 + $0xa] sm:$0x3] %vm107_vm0, %v1136_v0  ;;  %2528 = vmatmul.mubr.msk.f32.vlgmr.msra.gmra.mxu1 %vm119_vm1, %v1136_v0  ;;  %2534 = vmatprep.subr.mxu0 %v2759_v3 }
 0x86f   :  { %2535 = vmatpush3.msra.mxu0 %v2961_v29  ;;  %2542 = vmatpush3.msra.mxu1 %v2938_v26 }
 0x870   :  { %2536 = vmatprep.subr.mxu0 %v2759_v3  ;;  %2543 = vmatprep.subr.mxu1 %v2759_v3 }
 0x871   :  { %2537 = vmatpush3.msra.mxu0 %v2975_v31  ;;  %2544 = vmatpush3.msra.mxu1 %v2952_v28 }
 0x872   :  { %2545 = vmatprep.subr.mxu1 %v2759_v3  ;;  %2549 = vmatprep.mubr.msk.f32.mxu1 %vm2760_vm2, %v2759_v3 }
 0x873   :  { %2546 = vmatpush3.msra.mxu1 %v2968_v30  ;;  %2552 = vmatprep.subr.mxu0 %v2759_v3 }
 0x874   :  { %2547 = vmatprep.subr.mxu1 %v2759_v3 }
 0x875   :  { %2548 = vmatpush3.msra.mxu1 %v2983_v33 }
 0x876   :  { %2563 = vmatprep.subr.mxu1 %v2759_v3 }
 0x92a   :  { %v1208_v2 = vpop.f32.mrf.mxu0 }
 0x92b   :  { %v1212_v4 = vadd.f32 %v1208_v2, %v1139_v1 }
 0x92c   :  { %v2518_v5 = vpop.f32.mrf.mxu0 }
 0x92d   :  { %v2274_v6 = vmul.f32 -1.442695, %v1212_v4 }
 0x92e   :  { %v1282_v9 = vpop.f32.mrf.mxu1 }
 0x92f   :  { %2671 = vpow2.f32 %v2274_v6  ;;  %v1286_v10 = vadd.f32 %v1282_v9, %v1213_v7 }
 0x930   :  { %v2529_v11 = vpop.f32.mrf.mxu1 }
 0x931   :  { %v2275_v12 = vmul.f32 -1.442695, %v1286_v10 }
 0x933   :  { %2673 = vpow2.f32 %v2275_v12 }
 0x934   :  { %2675 = vtanh.f32 %v1212_v4 }
 0x93c   :  { %v2672_v13 = vpop.eup %2671 }
 0x93d   :  { %v1291_v14 = vadd.f32 1.0, %v2672_v13 }
 0x93f   :  { %2677 = vrcp.f32 %v1291_v14 }
 0x940   :  { %v2674_v15 = vpop.eup %2673  ;;  %2679 = vtanh.f32 %v1286_v10 }
 0x941   :  { %v1316_v16 = vadd.f32 1.0, %v2674_v15  ;;  %v2676_v17 = vpop.eup %2675 }
 0x943   :  { %2681 = vrcp.f32 %v1316_v16 }
 0x94c   :  { %v2678_v18 = vpop.eup %2677 }
 0x94d   :  { %v1294_v19 = vsel %vm3024_vm5, %v2676_v17, %v2678_v18  ;;  %v2680_v20 = vpop.eup %2679 }
 0x94e   :  { %1297 = vrot.lane.b32.xlu0 %v1294_v19, %s2762_s8  ;;  %v1295_v35 = vmul.f32 %v1294_v19, %v3135_v53 }
 0x950   :  { %v2682_v21 = vpop.eup %2681 }
 0x951   :  { %v1319_v22 = vsel %vm3024_vm5, %v2680_v20, %v2682_v21 }
 0x952   :  { %1322 = vrot.lane.b32.xlu1 %v1319_v22, %s2762_s8  ;;  %v1320_v38 = vmul.f32 %v1319_v22, %v3139_v56 }
 0x9c0   :  { %v1298_v23 = vpop.permute.xlu0 %1297 }
 0x9c1   :  { %v1300_v24 = vmul.f32 %v1298_v23, %v1294_v19 }
 0x9c3   :  { %1302 = vrot.lane.b32.xlu0 %v1300_v24, %s2761_s5 }
 0x9c4   :  { %v1323_v32 = vpop.permute.xlu1 %1322 }
 0x9c5   :  { %v1325_v34 = vmul.f32 %v1323_v32, %v1319_v22 }
 0x9c7   :  { %1327 = vrot.lane.b32.xlu1 %v1325_v34, %s2761_s5 }
 0xa35   :  { %v1303_v36 = vpop.permute.xlu0 %1302 }
 0xa36   :  { %v3185_v37 = vadd.f32 %v1303_v36, %v1295_v35 }
 0xa38   :  { %2683 = vtanh.f32 %v3185_v37 }
 0xa39   :  { %v1328_v39 = vpop.permute.xlu1 %1327 }
 0xa3a   :  { %v3189_v40 = vadd.f32 %v1328_v39, %v1320_v38 }
 0xa3c   :  { %2685 = vtanh.f32 %v3189_v40 }
 0xa45   :  { %v2684_v41 = vpop.eup %2683 }
 0xa46   :  { %1308 = vrot.lane.b32.xlu0 %v2684_v41, %s2762_s8 }
 0xa49   :  { %v2686_v42 = vpop.eup %2685 }
 0xa4a   :  { %1333 = vrot.lane.b32.xlu1 %v2686_v42, %s2762_s8 }
 0xab8   :  { %v1309_v43 = vpop.permute.xlu0 %1308 }
 0xab9   :  { %v1311_v44 = vmul.f32 %v1309_v43, %v1294_v19 }
 0xabb   :  { %1338 = vrot.lane.b32.xlu0 %v1311_v44, %s2761_s5 }
 0xabc   :  { %v1334_v45 = vpop.permute.xlu1 %1333 }
 0xabd   :  { %v1336_v46 = vmul.f32 %v1334_v45, %v1319_v22 }
 0xabf   :  { %1343 = vrot.lane.b32.xlu1 %v1336_v46, %s2761_s5 }
 0xb2d   :  { %v1339_v47 = vpop.permute.xlu0 %1338 }
 0xb2e   :  { %1341 = vst.msk [vmem:[%s3416_s12 + $0x6] sm:$0x3] %vm107_vm0, %v1339_v47  ;;  %2539 = vmatmul.mubr.msk.f32.vlgmr.msra.gmra.mxu0 %vm119_vm1, %v1339_v47 }
 0xb2f   :  { %2553 = vmatpush3.msra.mxu0 %v2933_v25  ;;  %2560 = vmatprep.mubr.msk.f32.mxu0 %vm2760_vm2, %v2759_v3 }
 0xb30   :  { %2554 = vmatprep.subr.mxu0 %v2759_v3 }
 0xb31   :  { %v1344_v48 = vpop.permute.xlu1 %1343  ;;  %2555 = vmatpush3.msra.mxu0 %v2947_v27 }
 0xb32   :  { %1346 = vst.msk [vmem:[%s3417_s13 + $0x8] sm:$0x3] %vm107_vm0, %v1344_v48  ;;  %2550 = vmatmul.mubr.msk.f32.vlgmr.msra.gmra.mxu1 %vm119_vm1, %v1344_v48  ;;  %2556 = vmatprep.subr.mxu0 %v2759_v3 }
 0xb33   :  { %2557 = vmatpush3.msra.mxu0 %v2961_v29  ;;  %2564 = vmatpush3.msra.mxu1 %v2938_v26 }
 0xb34   :  { %2558 = vmatprep.subr.mxu0 %v2759_v3  ;;  %2565 = vmatprep.subr.mxu1 %v2759_v3 }
 0xb35   :  { %2559 = vmatpush3.msra.mxu0 %v2975_v31  ;;  %2566 = vmatpush3.msra.mxu1 %v2952_v28 }
 0xb36   :  { %2567 = vmatprep.subr.mxu1 %v2759_v3  ;;  %2571 = vmatprep.mubr.msk.f32.mxu1 %vm2760_vm2, %v2759_v3 }
 0xb37   :  { %2568 = vmatpush3.msra.mxu1 %v2968_v30  ;;  %2574 = vmatprep.subr.mxu0 %v2759_v3 }
 0xb38   :  { %2569 = vmatprep.subr.mxu1 %v2759_v3 }
 0xb39   :  { %2570 = vmatpush3.msra.mxu1 %v2983_v33 }
 0xb3a   :  { %2585 = vmatprep.subr.mxu1 %v2759_v3 }
 0xbee   :  { %v1416_v50 = vpop.f32.mrf.mxu0 }
 0xbef   :  { %v1420_v51 = vadd.f32 %v1416_v50, %v1347_v49 }
 0xbf0   :  { %v2540_v52 = vpop.f32.mrf.mxu0 }
 0xbf1   :  { %v2278_v53 = vmul.f32 -1.442695, %v1420_v51 }
 0xbf2   :  { %v1490_v55 = vpop.f32.mrf.mxu1 }
 0xbf3   :  { %2687 = vpow2.f32 %v2278_v53  ;;  %v1494_v56 = vadd.f32 %v1490_v55, %v1421_v54 }
 0xbf4   :  { %v2551_v57 = vpop.f32.mrf.mxu1 }
 0xbf5   :  { %v2279_v58 = vmul.f32 -1.442695, %v1494_v56 }
 0xbf7   :  { %2689 = vpow2.f32 %v2279_v58 }
 0xbf8   :  { %2691 = vtanh.f32 %v1420_v51 }
 0xc00   :  { %v2688_v59 = vpop.eup %2687 }
 0xc01   :  { %v1499_v60 = vadd.f32 1.0, %v2688_v59 }
 0xc03   :  { %2693 = vrcp.f32 %v1499_v60 }
 0xc04   :  { %v2690_v61 = vpop.eup %2689  ;;  %2695 = vtanh.f32 %v1494_v56 }
 0xc05   :  { %v1524_v62 = vadd.f32 1.0, %v2690_v61  ;;  %v2692_v63 = vpop.eup %2691 }
 0xc07   :  { %2697 = vrcp.f32 %v1524_v62  ;;  %v2751_v62 = vld [vmem:[%s3412_s10 + $0x18] sm:$0xff] }
 0xc10   :  { %v2694_v0 = vpop.eup %2693 }
 0xc11   :  { %v1502_v1 = vsel %vm3024_vm5, %v2692_v63, %v2694_v0  ;;  %v2696_v2 = vpop.eup %2695  ;;  %v2752_v0 = vld [vmem:[%s3412_s10 + $0x10] sm:$0xff] }
 0xc12   :  { %1505 = vrot.lane.b32.xlu0 %v1502_v1, %s2762_s8  ;;  %v1503_v11 = vmul.f32 %v1502_v1, %v3185_v37 }
 0xc14   :  { %v2698_v4 = vpop.eup %2697 }
 0xc15   :  { %v1527_v5 = vsel %vm3024_vm5, %v2696_v2, %v2698_v4  ;;  %v2754_v2 = vld [vmem:[%s3413_s11 + $0x18] sm:$0xff]  ;;  %v2755_v4 = vld [vmem:[%s3412_s10] sm:$0xff] }
 0xc16   :  { %1530 = vrot.lane.b32.xlu1 %v1527_v5, %s2762_s8  ;;  %v1528_v14 = vmul.f32 %v1527_v5, %v3189_v40 }
 0xc84   :  { %v1506_v6 = vpop.permute.xlu0 %1505 }
 0xc85   :  { %v1508_v7 = vmul.f32 %v1506_v6, %v1502_v1  ;;  %v2757_v6 = vld [vmem:[%s3413_s11 + $0x8] sm:$0xff] }
 0xc87   :  { %1510 = vrot.lane.b32.xlu0 %v1508_v7, %s2761_s5  ;;  %v2758_v7 = vld [vmem:[%s3413_s11] sm:$0xff] }
 0xc88   :  { %v1531_v9 = vpop.permute.xlu1 %1530 }
 0xc89   :  { %v1533_v10 = vmul.f32 %v1531_v9, %v1527_v5  ;;  %v1763_v9 = vld [vmem:[#allocation2 + $0xc] sm:$0x3] }
 0xc8b   :  { %1535 = vrot.lane.b32.xlu1 %v1533_v10, %s2761_s5 }
 0xcf9   :  { %v1511_v12 = vpop.permute.xlu0 %1510 }
 0xcfa   :  { %v3235_v13 = vadd.f32 %v1511_v12, %v1503_v11 }
 0xcfc   :  { %2699 = vtanh.f32 %v3235_v13 }
 0xcfd   :  { %v1536_v15 = vpop.permute.xlu1 %1535 }
 0xcfe   :  { %v3239_v16 = vadd.f32 %v1536_v15, %v1528_v14  ;;  %v1837_v14 = vld [vmem:[#allocation3 + $0x2] sm:$0x3] }
 0xd00   :  { %2701 = vtanh.f32 %v3239_v16 }
 0xd09   :  { %v2700_v17 = vpop.eup %2699 }
 0xd0a   :  { %1516 = vrot.lane.b32.xlu0 %v2700_v17, %s2762_s8 }
 0xd0d   :  { %v2702_v18 = vpop.eup %2701 }
 0xd0e   :  { %1541 = vrot.lane.b32.xlu1 %v2702_v18, %s2762_s8 }
 0xd7c   :  { %v1517_v19 = vpop.permute.xlu0 %1516 }
 0xd7d   :  { %v1519_v20 = vmul.f32 %v1517_v19, %v1502_v1  ;;  %v2753_v1 = vld [vmem:[%s3412_s10 + $0x8] sm:$0xff] }
 0xd7f   :  { %1546 = vrot.lane.b32.xlu0 %v1519_v20, %s2761_s5 }
 0xd80   :  { %v1542_v21 = vpop.permute.xlu1 %1541 }
 0xd81   :  { %v1544_v22 = vmul.f32 %v1542_v21, %v1527_v5  ;;  %v2756_v5 = vld [vmem:[%s3413_s11 + $0x10] sm:$0xff] }
 0xd83   :  { %1551 = vrot.lane.b32.xlu1 %v1544_v22, %s2761_s5 }
 0xdf1   :  { %v1547_v23 = vpop.permute.xlu0 %1546 }
 0xdf2   :  { %1549 = vst.msk [vmem:[%s3416_s12 + $0x8] sm:$0x3] %vm107_vm0, %v1547_v23  ;;  %2561 = vmatmul.mubr.msk.f32.vlgmr.msra.gmra.mxu0 %vm119_vm1, %v1547_v23 }
 0xdf3   :  { %2575 = vmatpush3.msra.mxu0 %v2933_v25  ;;  %2582 = vmatprep.mubr.msk.f32.mxu0 %vm2760_vm2, %v2759_v3  ;;  %v1555_v25 = vld [vmem:[#allocation2 + $0xa] sm:$0x3] }
 0xdf4   :  { %2576 = vmatprep.subr.mxu0 %v2759_v3 }
 0xdf5   :  { %v1552_v24 = vpop.permute.xlu1 %1551  ;;  %2577 = vmatpush3.msra.mxu0 %v2947_v27 }
 0xdf6   :  { %1554 = vst.msk [vmem:[%s3417_s13 + $0x6] sm:$0x3] %vm107_vm0, %v1552_v24  ;;  %2572 = vmatmul.mubr.msk.f32.vlgmr.msra.gmra.mxu1 %vm119_vm1, %v1552_v24  ;;  %2578 = vmatprep.subr.mxu0 %v2759_v3 }
 0xdf7   :  { %2579 = vmatpush3.msra.mxu0 %v2961_v29  ;;  %2586 = vmatpush3.msra.mxu1 %v2938_v26 }
 0xdf8   :  { %2580 = vmatprep.subr.mxu0 %v2759_v3  ;;  %2587 = vmatprep.subr.mxu1 %v2759_v3 }
 0xdf9   :  { %2581 = vmatpush3.msra.mxu0 %v2975_v31  ;;  %2588 = vmatpush3.msra.mxu1 %v2952_v28  ;;  %v1629_v31 = vld [vmem:[#allocation3 + $0x4] sm:$0x3] }
 0xdfa   :  { %2589 = vmatprep.subr.mxu1 %v2759_v3  ;;  %2593 = vmatprep.mubr.msk.f32.mxu1 %vm2760_vm2, %v2759_v3 }
 0xdfb   :  { %2590 = vmatpush3.msra.mxu1 %v2968_v30  ;;  %2596 = vmatprep.subr.mxu0 %v2759_v3 }
 0xdfc   :  { %2591 = vmatprep.subr.mxu1 %v2759_v3 }
 0xdfd   :  { %2592 = vmatpush3.msra.mxu1 %v2983_v33 }
 0xdfe   :  { %2607 = vmatprep.subr.mxu1 %v2759_v3 }
 0xeb2   :  { %v1624_v26 = vpop.f32.mrf.mxu0 }
 0xeb3   :  { %v1628_v27 = vadd.f32 %v1624_v26, %v1555_v25 }
 0xeb4   :  { %v2562_v29 = vpop.f32.mrf.mxu0 }
 0xeb5   :  { %v2282_v28 = vmul.f32 -1.442695, %v1628_v27 }
 0xeb6   :  { %v1698_v32 = vpop.f32.mrf.mxu1 }
 0xeb7   :  { %2703 = vpow2.f32 %v2282_v28  ;;  %v1702_v34 = vadd.f32 %v1698_v32, %v1629_v31 }
 0xeb8   :  { %v2573_v35 = vpop.f32.mrf.mxu1 }
 0xeb9   :  { %v2283_v36 = vmul.f32 -1.442695, %v1702_v34 }
 0xebb   :  { %2705 = vpow2.f32 %v2283_v36 }
 0xebc   :  { %2707 = vtanh.f32 %v1628_v27 }
 0xec4   :  { %v2704_v30 = vpop.eup %2703 }
 0xec5   :  { %v1707_v37 = vadd.f32 1.0, %v2704_v30 }
 0xec7   :  { %2709 = vrcp.f32 %v1707_v37 }
 0xec8   :  { %v2706_v38 = vpop.eup %2705  ;;  %2711 = vtanh.f32 %v1702_v34 }
 0xec9   :  { %v1732_v33 = vadd.f32 1.0, %v2706_v38  ;;  %v2708_v39 = vpop.eup %2707 }
 0xecb   :  { %2713 = vrcp.f32 %v1732_v33 }
 0xed4   :  { %v2710_v40 = vpop.eup %2709 }
 0xed5   :  { %v1710_v41 = vsel %vm3024_vm5, %v2708_v39, %v2710_v40  ;;  %v2712_v42 = vpop.eup %2711 }
 0xed6   :  { %1713 = vrot.lane.b32.xlu0 %v1710_v41, %s2762_s8  ;;  %v1711_v49 = vmul.f32 %v1710_v41, %v3235_v13 }
 0xed8   :  { %v2714_v43 = vpop.eup %2713 }
 0xed9   :  { %v1735_v44 = vsel %vm3024_vm5, %v2712_v42, %v2714_v43 }
 0xeda   :  { %1738 = vrot.lane.b32.xlu1 %v1735_v44, %s2762_s8  ;;  %v1736_v52 = vmul.f32 %v1735_v44, %v3239_v16 }
 0xf48   :  { %v1714_v45 = vpop.permute.xlu0 %1713 }
 0xf49   :  { %v1716_v46 = vmul.f32 %v1714_v45, %v1710_v41 }
 0xf4b   :  { %1718 = vrot.lane.b32.xlu0 %v1716_v46, %s2761_s5  ;;  %v1971_v46 = vld [vmem:[#allocation2 + $0xe] sm:$0x3] }
 0xf4c   :  { %v1739_v47 = vpop.permute.xlu1 %1738 }
 0xf4d   :  { %v1741_v48 = vmul.f32 %v1739_v47, %v1735_v44 }
 0xf4f   :  { %1743 = vrot.lane.b32.xlu1 %v1741_v48, %s2761_s5 }
 0xfbd   :  { %v1719_v50 = vpop.permute.xlu0 %1718 }
 0xfbe   :  { %v3285_v51 = vadd.f32 %v1719_v50, %v1711_v49 }
 0xfc0   :  { %2715 = vtanh.f32 %v3285_v51 }
 0xfc1   :  { %v1744_v53 = vpop.permute.xlu1 %1743 }
 0xfc2   :  { %v3289_v54 = vadd.f32 %v1744_v53, %v1736_v52 }
 0xfc4   :  { %2717 = vtanh.f32 %v3289_v54 }
 0xfcd   :  { %v2716_v55 = vpop.eup %2715 }
 0xfce   :  { %1724 = vrot.lane.b32.xlu0 %v2716_v55, %s2762_s8 }
 0xfd1   :  { %v2718_v56 = vpop.eup %2717 }
 0xfd2   :  { %1749 = vrot.lane.b32.xlu1 %v2718_v56, %s2762_s8 }
0x1040   :  { %v1725_v57 = vpop.permute.xlu0 %1724 }
0x1041   :  { %v1727_v58 = vmul.f32 %v1725_v57, %v1710_v41 }
0x1043   :  { %1754 = vrot.lane.b32.xlu0 %v1727_v58, %s2761_s5 }
0x1044   :  { %v1750_v59 = vpop.permute.xlu1 %1749 }
0x1045   :  { %v1752_v60 = vmul.f32 %v1750_v59, %v1735_v44 }
0x1047   :  { %1759 = vrot.lane.b32.xlu1 %v1752_v60, %s2761_s5 }
0x10b5   :  { %v1755_v61 = vpop.permute.xlu0 %1754 }
0x10b6   :  { %1757 = vst.msk [vmem:[%s3416_s12 + $0xa] sm:$0x3] %vm107_vm0, %v1755_v61  ;;  %2583 = vmatmul.mubr.msk.f32.vlgmr.msra.gmra.mxu0 %vm119_vm1, %v1755_v61 }
0x10b7   :  { %2597 = vmatpush3.msra.mxu0 %v2751_v62  ;;  %2604 = vmatprep.mubr.msk.f32.mxu0 %vm2760_vm2, %v2759_v3 }
0x10b8   :  { %2598 = vmatprep.subr.mxu0 %v2759_v3 }
0x10b9   :  { %v1760_v63 = vpop.permute.xlu1 %1759  ;;  %2599 = vmatpush3.msra.mxu0 %v2752_v0 }
0x10ba   :  { %1762 = vst.msk [vmem:[%s3417_s13 + $0x4] sm:$0x3] %vm107_vm0, %v1760_v63  ;;  %2594 = vmatmul.mubr.msk.f32.vlgmr.msra.gmra.mxu1 %vm119_vm1, %v1760_v63  ;;  %2600 = vmatprep.subr.mxu0 %v2759_v3 }
0x10bb   :  { %2601 = vmatpush3.msra.mxu0 %v2753_v1  ;;  %2608 = vmatpush3.msra.mxu1 %v2754_v2 }
0x10bc   :  { %2602 = vmatprep.subr.mxu0 %v2759_v3  ;;  %2609 = vmatprep.subr.mxu1 %v2759_v3 }
0x10bd   :  { %2603 = vmatpush3.msra.mxu0 %v2755_v4  ;;  %2610 = vmatpush3.msra.mxu1 %v2756_v5 }
0x10be   :  { %2611 = vmatprep.subr.mxu1 %v2759_v3  ;;  %2615 = vmatprep.mubr.msk.f32.mxu1 %vm2760_vm2, %v2759_v3 }
0x10bf   :  { %2612 = vmatpush3.msra.mxu1 %v2757_v6 }
0x10c0   :  { %2613 = vmatprep.subr.mxu1 %v2759_v3 }
0x10c1   :  { %2614 = vmatpush3.msra.mxu1 %v2758_v7 }
0x1176   :  { %v1832_v10 = vpop.f32.mrf.mxu0 }
0x1177   :  { %v1836_v11 = vadd.f32 %v1832_v10, %v1763_v9 }
0x1178   :  { %v2584_v12 = vpop.f32.mrf.mxu0 }
0x1179   :  { %v2286_v13 = vmul.f32 -1.442695, %v1836_v11 }
0x117a   :  { %v1906_v15 = vpop.f32.mrf.mxu1 }
0x117b   :  { %2719 = vpow2.f32 %v2286_v13  ;;  %v1910_v16 = vadd.f32 %v1906_v15, %v1837_v14 }
0x117c   :  { %v2595_v17 = vpop.f32.mrf.mxu1 }
0x117d   :  { %v2287_v18 = vmul.f32 -1.442695, %v1910_v16 }
0x117f   :  { %2721 = vpow2.f32 %v2287_v18 }
0x1180   :  { %2723 = vtanh.f32 %v1836_v11 }
0x1188   :  { %v2720_v19 = vpop.eup %2719 }
0x1189   :  { %v1915_v20 = vadd.f32 1.0, %v2720_v19 }
0x118b   :  { %2725 = vrcp.f32 %v1915_v20 }
0x118c   :  { %v2722_v3 = vpop.eup %2721  ;;  %2727 = vtanh.f32 %v1910_v16 }
0x118d   :  { %v1940_v21 = vadd.f32 1.0, %v2722_v3  ;;  %v2724_v22 = vpop.eup %2723 }
0x118f   :  { %2729 = vrcp.f32 %v1940_v21 }
0x1198   :  { %v2726_v23 = vpop.eup %2725 }
0x1199   :  { %v1918_v24 = vsel %vm3024_vm5, %v2724_v22, %v2726_v23  ;;  %v2728_v25 = vpop.eup %2727 }
0x119a   :  { %1921 = vrot.lane.b32.xlu0 %v1918_v24, %s2762_s8  ;;  %v1919_v34 = vmul.f32 %v1918_v24, %v3285_v51  ;;  %v2045_v51 = vld [vmem:[#allocation3] sm:$0x3] }
0x119c   :  { %v2730_v26 = vpop.eup %2729 }
0x119d   :  { %v1943_v27 = vsel %vm3024_vm5, %v2728_v25, %v2730_v26 }
0x119e   :  { %1946 = vrot.lane.b32.xlu1 %v1943_v27, %s2762_s8  ;;  %v1944_v30 = vmul.f32 %v1943_v27, %v3289_v54 }
0x120c   :  { %v1922_v29 = vpop.permute.xlu0 %1921 }
0x120d   :  { %v1924_v28 = vmul.f32 %v1922_v29, %v1918_v24 }
0x120f   :  { %1926 = vrot.lane.b32.xlu0 %v1924_v28, %s2761_s5 }
0x1210   :  { %v1947_v31 = vpop.permute.xlu1 %1946 }
0x1211   :  { %v1949_v32 = vmul.f32 %v1947_v31, %v1943_v27 }
0x1213   :  { %1951 = vrot.lane.b32.xlu1 %v1949_v32, %s2761_s5 }
0x1281   :  { %v1927_v35 = vpop.permute.xlu0 %1926 }
0x1282   :  { %v1929_v36 = vadd.f32 %v1927_v35, %v1919_v34 }
0x1284   :  { %2731 = vtanh.f32 %v1929_v36 }
0x1285   :  { %v1952_v37 = vpop.permute.xlu1 %1951 }
0x1286   :  { %v1954_v38 = vadd.f32 %v1952_v37, %v1944_v30 }
0x1288   :  { %2733 = vtanh.f32 %v1954_v38 }
0x1291   :  { %v2732_v33 = vpop.eup %2731 }
0x1292   :  { %1932 = vrot.lane.b32.xlu0 %v2732_v33, %s2762_s8 }
0x1295   :  { %v2734_v39 = vpop.eup %2733 }
0x1296   :  { %1957 = vrot.lane.b32.xlu1 %v2734_v39, %s2762_s8 }
0x1304   :  { %v1933_v40 = vpop.permute.xlu0 %1932 }
0x1305   :  { %v1935_v41 = vmul.f32 %v1933_v40, %v1918_v24 }
0x1307   :  { %1962 = vrot.lane.b32.xlu0 %v1935_v41, %s2761_s5 }
0x1308   :  { %v1958_v42 = vpop.permute.xlu1 %1957 }
0x1309   :  { %v1960_v43 = vmul.f32 %v1958_v42, %v1943_v27 }
0x130b   :  { %1967 = vrot.lane.b32.xlu1 %v1960_v43, %s2761_s5 }
0x1379   :  { %v1963_v44 = vpop.permute.xlu0 %1962 }
0x137a   :  { %1965 = vst.msk [vmem:[%s3416_s12 + $0xc] sm:$0x3] %vm107_vm0, %v1963_v44  ;;  %2605 = vmatmul.mubr.msk.f32.vlgmr.msra.gmra.mxu0 %vm119_vm1, %v1963_v44 }
0x137d   :  { %v1968_v45 = vpop.permute.xlu1 %1967 }
0x137e   :  { %1970 = vst.msk [vmem:[%s3417_s13 + $0x2] sm:$0x3] %vm107_vm0, %v1968_v45  ;;  %2616 = vmatmul.mubr.msk.f32.vlgmr.msra.gmra.mxu1 %vm119_vm1, %v1968_v45 }
0x143a   :  { %v2040_v47 = vpop.f32.mrf.mxu0 }
0x143b   :  { %v2044_v48 = vadd.f32 %v2040_v47, %v1971_v46 }
0x143c   :  { %v2606_v49 = vpop.f32.mrf.mxu0 }
0x143d   :  { %v2290_v50 = vmul.f32 -1.442695, %v2044_v48 }
0x143e   :  { %v2114_v52 = vpop.f32.mrf.mxu1 }
0x143f   :  { %2735 = vpow2.f32 %v2290_v50  ;;  %v2118_v53 = vadd.f32 %v2114_v52, %v2045_v51 }
0x1440   :  { %v2617_v54 = vpop.f32.mrf.mxu1 }
0x1441   :  { %v2291_v55 = vmul.f32 -1.442695, %v2118_v53 }
0x1443   :  { %2737 = vpow2.f32 %v2291_v55 }
0x1444   :  { %2739 = vtanh.f32 %v2044_v48 }
0x144c   :  { %v2736_v56 = vpop.eup %2735 }
0x144d   :  { %v2123_v57 = vadd.f32 1.0, %v2736_v56 }
0x144f   :  { %2741 = vrcp.f32 %v2123_v57 }
0x1450   :  { %v2738_v58 = vpop.eup %2737  ;;  %2743 = vtanh.f32 %v2118_v53 }
0x1451   :  { %v2148_v59 = vadd.f32 1.0, %v2738_v58  ;;  %v2740_v60 = vpop.eup %2739 }
0x1453   :  { %2745 = vrcp.f32 %v2148_v59 }
0x145c   :  { %v2742_v61 = vpop.eup %2741 }
0x145d   :  { %v2126_v62 = vsel %vm3024_vm5, %v2740_v60, %v2742_v61  ;;  %v2744_v63 = vpop.eup %2743 }
0x145e   :  { %2129 = vrot.lane.b32.xlu0 %v2126_v62, %s2762_s8  ;;  %v2127_v7 = vmul.f32 %v2126_v62, %v1929_v36 }
0x1460   :  { %v2746_v0 = vpop.eup %2745 }
0x1461   :  { %v2151_v1 = vsel %vm3024_vm5, %v2744_v63, %v2746_v0 }
0x1462   :  { %2154 = vrot.lane.b32.xlu1 %v2151_v1, %s2762_s8  ;;  %v2152_v11 = vmul.f32 %v2151_v1, %v1954_v38 }
0x14d0   :  { %v2130_v2 = vpop.permute.xlu0 %2129 }
0x14d1   :  { %v2132_v4 = vmul.f32 %v2130_v2, %v2126_v62 }
0x14d3   :  { %2134 = vrot.lane.b32.xlu0 %v2132_v4, %s2761_s5 }
0x14d4   :  { %v2155_v5 = vpop.permute.xlu1 %2154 }
0x14d5   :  { %v2157_v6 = vmul.f32 %v2155_v5, %v2151_v1 }
0x14d7   :  { %2159 = vrot.lane.b32.xlu1 %v2157_v6, %s2761_s5 }
0x1545   :  { %v2135_v9 = vpop.permute.xlu0 %2134 }
0x1546   :  { %v2137_v10 = vadd.f32 %v2135_v9, %v2127_v7 }
0x1548   :  { %2747 = vtanh.f32 %v2137_v10 }
0x1549   :  { %v2160_v12 = vpop.permute.xlu1 %2159 }
0x154a   :  { %v2162_v13 = vadd.f32 %v2160_v12, %v2152_v11 }
0x154c   :  { %2749 = vtanh.f32 %v2162_v13 }
0x1555   :  { %v2748_v8 = vpop.eup %2747 }
0x1556   :  { %2140 = vrot.lane.b32.xlu0 %v2748_v8, %s2762_s8 }
0x1559   :  { %v2750_v14 = vpop.eup %2749 }
0x155a   :  { %2165 = vrot.lane.b32.xlu1 %v2750_v14, %s2762_s8 }
0x15c8   :  { %v2141_v15 = vpop.permute.xlu0 %2140 }
0x15c9   :  { %v2143_v16 = vmul.f32 %v2141_v15, %v2126_v62 }
0x15cb   :  { %2170 = vrot.lane.b32.xlu0 %v2143_v16, %s2761_s5 }
0x15cc   :  { %v2166_v17 = vpop.permute.xlu1 %2165 }
0x15cd   :  { %v2168_v18 = vmul.f32 %v2166_v17, %v2151_v1 }
0x15cf   :  { %2175 = vrot.lane.b32.xlu1 %v2168_v18, %s2761_s5  ;;  %2181 = vrot.lane.b32.xlu0 %v2137_v10, %s2763_s24 }
0x15d3   :  { %2187 = vrot.lane.b32.xlu1 %v2162_v13, %s2763_s24 }
0x163d   :  { %v2171_v19 = vpop.permute.xlu0 %2170 }
0x163e   :  { %2173 = vst.msk [vmem:[%s3416_s12 + $0xe] sm:$0x3] %vm107_vm0, %v2171_v19  ;;  %2179 = vst.msk [vmem:[#allocation4] sm:$0x3] %vm107_vm0, %v2171_v19 }
0x163f   :  { %2194 = vst.msk [vmem:[%s3418_s14] sm:$0x3] %vm107_vm0, %v2171_v19 }
0x1641   :  { %v2176_v20 = vpop.permute.xlu1 %2175  ;;  %v2182_v3 = vpop.permute.xlu0 %2181 }
0x1642   :  { %2178 = vst.msk [vmem:[%s3417_s13] sm:$0x3] %vm107_vm0, %v2176_v20  ;;  %2185 = vst.msk [vmem:[#allocation6] sm:$0x3] %vm107_vm0, %v2176_v20 }
0x1643   :  { %2292 = vst.msk [vmem:[%s3418_s14 + $0x2] sm:$0x3] %vm107_vm0, %v2176_v20  ;;  %2184 = vst.msk [vmem:[#allocation5] sm:$0x3] %vm107_vm0, %v2182_v3 }
0x1644   :  { %2197 = vst.msk [vmem:[%s3419_s15] sm:$0x3] %vm107_vm0, %v2182_v3 }
0x1645   :  { %v2188_v21 = vpop.permute.xlu1 %2187 }
0x1646   :  { %2190 = vst.msk [vmem:[#allocation7] sm:$0x3] %vm107_vm0, %v2188_v21  ;;  %2293 = vst.msk [vmem:[%s3419_s15 + $0x2] sm:$0x3] %vm107_vm0, %v2188_v21 }

</bundles_post_ra>
